<compile_context>
chip_gen: v7x
topology: tpu7x:2x2x1
jax: 0.10.0
libtpu: 0.0.40
codegen_flags: <defaults>
</compile_context>

<pallas_src>
import jax
import jax.numpy as jnp
from jax.experimental import pallas as pl
from jax.experimental.pallas import tpu as pltpu


def eucb_kernel(x_ref, wcomb_ref, shift_ref, wpw_ref, bpw_ref, o_ref):
    """Fused (upsample x2 + depthwise 3x3 + BN + ReLU + 1x1 conv) row tile.

    x_ref     : (1, H+2, W+2, C)    1-px zero-padded ORIGINAL-resolution input
    wcomb_ref : (16, C)             parity-combined 2x2 depthwise weights with
                                    BN scale folded in; row = ((a*2+b)*2+r)*2+s
    shift_ref : (1, C)              BN shift = beta - mean * scale
    wpw_ref   : (C, Cout)           pointwise conv weights
    bpw_ref   : (1, Cout)           pointwise conv bias
    o_ref     : (1, 2*TR, 2*W, Cout) one row tile of the upsampled output
    """
    TR = o_ref.shape[1] // 2          # original-resolution rows in this tile
    W2 = o_ref.shape[2]
    W = W2 // 2
    C = wpw_ref.shape[0]
    Cout = wpw_ref.shape[1]

    # rows [row0, row0 + TR + 2) of the padded input cover this tile + halo
    row0 = pl.multiple_of(pl.program_id(1) * TR, TR)
    xt = x_ref[0, pl.ds(row0, TR + 2), :, :].astype(jnp.float32)  # (TR+2, W+2, C)

    shift = shift_ref[0, :].astype(jnp.float32)
    bias = bpw_ref[0, :].astype(jnp.float32)

    row_parities = []
    for a in range(2):                        # output-row parity
        col_parities = []
        for b in range(2):                    # output-column parity
            # parity-combined 2x2 depthwise conv (the 2x upsample is implicit)
            acc = jnp.zeros((TR, W, C), jnp.float32)
            for r in range(2):
                for s in range(2):
                    widx = ((a * 2 + b) * 2 + r) * 2 + s
                    patch = xt[a + r:a + r + TR, b + s:b + s + W, :]
                    acc = acc + patch * wcomb_ref[widx, :].astype(jnp.float32)
            # BN (scale already folded into the weights) + ReLU
            y = jnp.maximum(acc + shift, 0.0)
            # channel_shuffle(groups=C_in) is the identity permutation.
            # pointwise 1x1 conv as C VPU multiply-accumulates (no MXU/reshape;
            # for C >= 128 one would switch back to a K-tiled jnp.dot).
            out = jnp.broadcast_to(bias, (TR, W, Cout))
            for c in range(C):
                yc = jnp.broadcast_to(y[:, :, c:c + 1], (TR, W, Cout))
                out = out + yc * wpw_ref[c, :].astype(jnp.float32)
            col_parities.append(out)
        # interleave column parities: (TR, W, Cout) x2 -> (TR, 2W, Cout)
        row_parities.append(
            jnp.stack(col_parities, axis=2).reshape(TR, W2, Cout))
    # interleave row parities: (TR, 2W, Cout) x2 -> (2TR, 2W, Cout)
    full = jnp.stack(row_parities, axis=1).reshape(2 * TR, W2, Cout)
    o_ref[...] = full[None].astype(o_ref.dtype)


def eucb_forward(x_nchw, w_dw, bn_gamma, bn_beta, bn_mean, bn_var,
                 w_pw, b_pw, eps=1e-5, row_tile=None):
    """EUCB forward. x_nchw: (N, C, H, W). Returns (N, Cout, 2H, 2W)."""
    N, C, H, W = x_nchw.shape
    Cout = w_pw.shape[0]
    H2, W2 = 2 * H, 2 * W
    itemsize = jnp.dtype(x_nchw.dtype).itemsize

    # --- choose a row tile: bound the per-step VMEM block and give the
    #     pipeline / megacore several steps per image ---
    if row_tile is None:
        row_tile = H
        while (row_tile % 2 == 0 and
               ((2 * row_tile) * W2 * max(C, Cout) * 4 > (2 << 20)
                or row_tile > max(1, H // 2))):
            row_tile //= 2
    assert H % row_tile == 0, (H, row_tile)
    num_row_tiles = H // row_tile

    # --- host-side parameter prep ---
    scale = bn_gamma / jnp.sqrt(bn_var + eps)                 # (C,)
    shift = (bn_beta - bn_mean * scale).reshape(1, C)
    w_sc = w_dw[:, 0, :, :] * scale[:, None, None]            # (C,3,3) BN folded

    # Parity-combined 2x2 depthwise weights.  Output row 2i+a reads x rows:
    #   a=0: {i-1} with w[0,:]      and {i}   with w[1,:]+w[2,:]
    #   a=1: {i}   with w[0,:]+w[1,:] and {i+1} with w[2,:]
    # and symmetrically for columns.
    groups = (((0,), (1, 2)), ((0, 1), (2,)))
    rows = []
    for a in range(2):
        for b in range(2):
            for r in range(2):
                for s in range(2):
                    wsum = jnp.zeros((C,), w_sc.dtype)
                    for dh in groups[a][r]:
                        for dw_ in groups[b][s]:
                            wsum = wsum + w_sc[:, dh, dw_]
                    rows.append(wsum)
    wcomb = jnp.stack(rows, axis=0)                           # (16, C)

    wpw = jnp.transpose(w_pw[:, :, 0, 0], (1, 0))             # (C, Cout)
    bpw = b_pw.reshape(1, Cout)

    # --- cheap original-resolution glue: NCHW -> NHWC + 1-px zero pad.
    #     (The 2x upsample itself is fused into the kernel.) ---
    x = jnp.transpose(x_nchw, (0, 2, 3, 1))                   # (N, H, W, C)
    xpad = jnp.pad(x, ((0, 0), (1, 1), (1, 1), (0, 0)))       # (N, H+2, W+2, C)

    flops = 2 * N * H2 * W2 * C * (4 + Cout)      # 2x2 dw taps + 1x1 conv MACs
    bytes_accessed = itemsize * (
        N * (H + 2) * (W + 2) * C + N * H2 * W2 * Cout
        + 16 * C + C + C * Cout + Cout)
    cost = pl.CostEstimate(flops=flops, transcendentals=0,
                           bytes_accessed=bytes_accessed)

    out_nhwc = pl.pallas_call(
        eucb_kernel,
        out_shape=jax.ShapeDtypeStruct((N, H2, W2, Cout), x_nchw.dtype),
        grid_spec=pltpu.PrefetchScalarGridSpec(
            num_scalar_prefetch=0,
            grid=(N, num_row_tiles),
            in_specs=[
                # whole padded original-res image stays resident per batch elem
                pl.BlockSpec((1, H + 2, W + 2, C), lambda n, r: (n, 0, 0, 0)),
                pl.BlockSpec((16, C), lambda n, r: (0, 0)),
                pl.BlockSpec((1, C), lambda n, r: (0, 0)),
                pl.BlockSpec((C, Cout), lambda n, r: (0, 0)),
                pl.BlockSpec((1, Cout), lambda n, r: (0, 0)),
            ],
            out_specs=pl.BlockSpec((1, 2 * row_tile, W2, Cout),
                                   lambda n, r: (n, r, 0, 0)),
        ),
        compiler_params=pltpu.CompilerParams(
            dimension_semantics=("parallel", "parallel"),
            vmem_limit_bytes=32 * 1024 * 1024),
        cost_estimate=cost,
    )(xpad, wcomb, shift, wpw, bpw)

    # TODO(synk): the final NHWC->NCHW transpose stays in XLA; emitting a
    # lane-dense (N, Cout, H2*W2) output directly would need an in-kernel
    # minor-dim transpose (channel counts here are far below 128 lanes).
    return jnp.transpose(out_nhwc, (0, 3, 1, 2))


def eucb_reference(x_nchw, w_dw, bn_gamma, bn_beta, bn_mean, bn_var,
                   w_pw, b_pw, eps=1e-5):
    """Plain-JAX reference (same math, no Pallas) for a sanity check."""
    N, C, H, W = x_nchw.shape
    x = jnp.repeat(jnp.repeat(x_nchw, 2, axis=2), 2, axis=3)   # nearest upsample
    xp = jnp.pad(x, ((0, 0), (0, 0), (1, 1), (1, 1)))
    H2, W2 = 2 * H, 2 * W
    acc = jnp.zeros((N, C, H2, W2), jnp.float32)
    for dh in range(3):
        for dw in range(3):
            acc = acc + xp[:, :, dh:dh + H2, dw:dw + W2] * \
                w_dw[:, 0, dh, dw][None, :, None, None]
    scale = bn_gamma / jnp.sqrt(bn_var + eps)
    shift = bn_beta - bn_mean * scale
    y = acc * scale[None, :, None, None] + shift[None, :, None, None]
    y = jnp.maximum(y, 0.0)
    # channel_shuffle(groups=C) is identity
    out = jnp.einsum('nchw,oc->nohw', y, w_pw[:, :, 0, 0]) + \
        b_pw[None, :, None, None]
    return out


if __name__ == "__main__":
    # small shapes consistent with the module
    N, C_in, C_out, H, W = 2, 4, 8, 16, 16

    key = jax.random.PRNGKey(0)
    k_x, k_dw, k_pw = jax.random.split(key, 3)

    x = jax.random.normal(k_x, (N, C_in, H, W), jnp.float32)

    # _init_weights(scheme='normal'): conv weights ~ N(0, 0.02), bias = 0
    w_dw = 0.02 * jax.random.normal(k_dw, (C_in, 1, 3, 3), jnp.float32)      # depthwise
    w_pw = 0.02 * jax.random.normal(k_pw, (C_out, C_in, 1, 1), jnp.float32)  # pointwise
    b_pw = jnp.zeros((C_out,), jnp.float32)

    # BatchNorm2d init: gamma=1, beta=0; eval-mode running stats mean=0, var=1
    bn_gamma = jnp.ones((C_in,), jnp.float32)
    bn_beta = jnp.zeros((C_in,), jnp.float32)
    bn_mean = jnp.zeros((C_in,), jnp.float32)
    bn_var = jnp.ones((C_in,), jnp.float32)

    out = eucb_forward(x, w_dw, bn_gamma, bn_beta, bn_mean, bn_var, w_pw, b_pw)
    out = jax.block_until_ready(out)

    ref = eucb_reference(x, w_dw, bn_gamma, bn_beta, bn_mean, bn_var, w_pw, b_pw)
    assert out.shape == (N, C_out, 2 * H, 2 * W), out.shape
    err = float(jnp.max(jnp.abs(out - ref)))
    assert err < 1e-4, err

    print("KERNEL_OK")
</pallas_src>

<mosaic_0001>
module attributes {stable_mosaic.version = 11 : i64} {
  func.func @eucb_kernel(%arg0: i32, %arg1: i32, %arg2: memref<1x18x18x4xf32, #tpu.memory_space<vmem>>, %arg3: memref<16x4xf32, #tpu.memory_space<vmem>>, %arg4: memref<1x4xf32, #tpu.memory_space<vmem>>, %arg5: memref<4x8xf32, #tpu.memory_space<vmem>>, %arg6: memref<1x8xf32, #tpu.memory_space<vmem>>, %arg7: memref<1x16x32x8xf32, #tpu.memory_space<vmem>>) attributes {dimension_semantics = [#tpu.dimension_semantics<parallel>, #tpu.dimension_semantics<parallel>], iteration_bounds = array<i64: 2, 2>, scalar_prefetch = 0 : i64, scratch_operands = 0 : i64, tpu.core_type = #tpu.core_type<tc>, window_params = [{transform_indices = @transform_0, window_bounds = array<i64: 1, 18, 18, 4>}, {pipeline_mode = #tpu.pipeline_mode<synchronous>, transform_indices = @transform_1, window_bounds = array<i64: 16, 4>}, {pipeline_mode = #tpu.pipeline_mode<synchronous>, transform_indices = @transform_2, window_bounds = array<i64: 1, 4>}, {pipeline_mode = #tpu.pipeline_mode<synchronous>, transform_indices = @transform_3, window_bounds = array<i64: 4, 8>}, {pipeline_mode = #tpu.pipeline_mode<synchronous>, transform_indices = @transform_4, window_bounds = array<i64: 1, 8>}, {transform_indices = @transform_5, window_bounds = array<i64: 1, 16, 32, 8>}]} {
    %c8_i32 = arith.constant 8 : i32
    %0 = arith.muli %arg1, %c8_i32 : i32
    %1 = tpu.assume_multiple %0, 8 : i32
    %c0 = arith.constant 0 : index
    %2 = arith.index_cast %1 : i32 to index
    %c0_0 = arith.constant 0 : index
    %c0_1 = arith.constant 0 : index
    %3 = vector.load %arg2[%c0, %2, %c0_0, %c0_1] : memref<1x18x18x4xf32, #tpu.memory_space<vmem>>, vector<1x10x18x4xf32>
    %4 = vector.shape_cast %3 : vector<1x10x18x4xf32> to vector<10x18x4xf32>
    %c0_2 = arith.constant 0 : index
    %c0_3 = arith.constant 0 : index
    %5 = vector.load %arg4[%c0_2, %c0_3] : memref<1x4xf32, #tpu.memory_space<vmem>>, vector<1x4xf32>
    %6 = vector.shape_cast %5 : vector<1x4xf32> to vector<4xf32>
    %c0_4 = arith.constant 0 : index
    %c0_5 = arith.constant 0 : index
    %7 = vector.load %arg6[%c0_4, %c0_5] : memref<1x8xf32, #tpu.memory_space<vmem>>, vector<1x8xf32>
    %8 = vector.shape_cast %7 : vector<1x8xf32> to vector<8xf32>
    %cst = arith.constant 0.000000e+00 : f32
    %9 = vector.broadcast %cst : f32 to vector<8x16x4xf32>
    %10 = vector.extract_strided_slice %4 {offsets = [0, 0, 0], sizes = [8, 16, 4], strides = [1, 1, 1]} : vector<10x18x4xf32> to vector<8x16x4xf32>
    %c0_6 = arith.constant 0 : index
    %c0_7 = arith.constant 0 : index
    %11 = vector.load %arg3[%c0_6, %c0_7] : memref<16x4xf32, #tpu.memory_space<vmem>>, vector<1x4xf32>
    %12 = vector.shape_cast %11 : vector<1x4xf32> to vector<4xf32>
    %13 = vector.shape_cast %12 : vector<4xf32> to vector<1x1x4xf32>
    %14 = vector.broadcast %13 : vector<1x1x4xf32> to vector<8x16x4xf32>
    %15 = arith.mulf %10, %14 : vector<8x16x4xf32>
    %16 = arith.addf %9, %15 : vector<8x16x4xf32>
    %17 = vector.extract_strided_slice %4 {offsets = [0, 1, 0], sizes = [8, 16, 4], strides = [1, 1, 1]} : vector<10x18x4xf32> to vector<8x16x4xf32>
    %c1 = arith.constant 1 : index
    %c0_8 = arith.constant 0 : index
    %18 = vector.load %arg3[%c1, %c0_8] : memref<16x4xf32, #tpu.memory_space<vmem>>, vector<1x4xf32>
    %19 = vector.shape_cast %18 : vector<1x4xf32> to vector<4xf32>
    %20 = vector.shape_cast %19 : vector<4xf32> to vector<1x1x4xf32>
    %21 = vector.broadcast %20 : vector<1x1x4xf32> to vector<8x16x4xf32>
    %22 = arith.mulf %17, %21 : vector<8x16x4xf32>
    %23 = arith.addf %16, %22 : vector<8x16x4xf32>
    %24 = vector.extract_strided_slice %4 {offsets = [1, 0, 0], sizes = [8, 16, 4], strides = [1, 1, 1]} : vector<10x18x4xf32> to vector<8x16x4xf32>
    %c2 = arith.constant 2 : index
    %c0_9 = arith.constant 0 : index
    %25 = vector.load %arg3[%c2, %c0_9] : memref<16x4xf32, #tpu.memory_space<vmem>>, vector<1x4xf32>
    %26 = vector.shape_cast %25 : vector<1x4xf32> to vector<4xf32>
    %27 = vector.shape_cast %26 : vector<4xf32> to vector<1x1x4xf32>
    %28 = vector.broadcast %27 : vector<1x1x4xf32> to vector<8x16x4xf32>
    %29 = arith.mulf %24, %28 : vector<8x16x4xf32>
    %30 = arith.addf %23, %29 : vector<8x16x4xf32>
    %31 = vector.extract_strided_slice %4 {offsets = [1, 1, 0], sizes = [8, 16, 4], strides = [1, 1, 1]} : vector<10x18x4xf32> to vector<8x16x4xf32>
    %c3 = arith.constant 3 : index
    %c0_10 = arith.constant 0 : index
    %32 = vector.load %arg3[%c3, %c0_10] : memref<16x4xf32, #tpu.memory_space<vmem>>, vector<1x4xf32>
    %33 = vector.shape_cast %32 : vector<1x4xf32> to vector<4xf32>
    %34 = vector.shape_cast %33 : vector<4xf32> to vector<1x1x4xf32>
    %35 = vector.broadcast %34 : vector<1x1x4xf32> to vector<8x16x4xf32>
    %36 = arith.mulf %31, %35 : vector<8x16x4xf32>
    %37 = arith.addf %30, %36 : vector<8x16x4xf32>
    %38 = vector.shape_cast %6 : vector<4xf32> to vector<1x1x4xf32>
    %39 = vector.broadcast %38 : vector<1x1x4xf32> to vector<8x16x4xf32>
    %40 = arith.addf %37, %39 : vector<8x16x4xf32>
    %cst_11 = arith.constant 0.000000e+00 : f32
    %41 = vector.broadcast %cst_11 : f32 to vector<8x16x4xf32>
    %42 = arith.maximumf %40, %41 : vector<8x16x4xf32>
    %43 = vector.shape_cast %8 : vector<8xf32> to vector<1x1x8xf32>
    %44 = vector.broadcast %43 : vector<1x1x8xf32> to vector<8x16x8xf32>
    %45 = vector.extract_strided_slice %42 {offsets = [0, 0, 0], sizes = [8, 16, 1], strides = [1, 1, 1]} : vector<8x16x4xf32> to vector<8x16x1xf32>
    %46 = vector.shape_cast %45 : vector<8x16x1xf32> to vector<8x16x1xf32>
    %47 = vector.broadcast %46 : vector<8x16x1xf32> to vector<8x16x8xf32>
    %c0_12 = arith.constant 0 : index
    %c0_13 = arith.constant 0 : index
    %48 = vector.load %arg5[%c0_12, %c0_13] : memref<4x8xf32, #tpu.memory_space<vmem>>, vector<1x8xf32>
    %49 = vector.shape_cast %48 : vector<1x8xf32> to vector<8xf32>
    %50 = vector.shape_cast %49 : vector<8xf32> to vector<1x1x8xf32>
    %51 = vector.broadcast %50 : vector<1x1x8xf32> to vector<8x16x8xf32>
    %52 = arith.mulf %47, %51 : vector<8x16x8xf32>
    %53 = arith.addf %44, %52 : vector<8x16x8xf32>
    %54 = vector.extract_strided_slice %42 {offsets = [0, 0, 1], sizes = [8, 16, 1], strides = [1, 1, 1]} : vector<8x16x4xf32> to vector<8x16x1xf32>
    %55 = vector.shape_cast %54 : vector<8x16x1xf32> to vector<8x16x1xf32>
    %56 = vector.broadcast %55 : vector<8x16x1xf32> to vector<8x16x8xf32>
    %c1_14 = arith.constant 1 : index
    %c0_15 = arith.constant 0 : index
    %57 = vector.load %arg5[%c1_14, %c0_15] : memref<4x8xf32, #tpu.memory_space<vmem>>, vector<1x8xf32>
    %58 = vector.shape_cast %57 : vector<1x8xf32> to vector<8xf32>
    %59 = vector.shape_cast %58 : vector<8xf32> to vector<1x1x8xf32>
    %60 = vector.broadcast %59 : vector<1x1x8xf32> to vector<8x16x8xf32>
    %61 = arith.mulf %56, %60 : vector<8x16x8xf32>
    %62 = arith.addf %53, %61 : vector<8x16x8xf32>
    %63 = vector.extract_strided_slice %42 {offsets = [0, 0, 2], sizes = [8, 16, 1], strides = [1, 1, 1]} : vector<8x16x4xf32> to vector<8x16x1xf32>
    %64 = vector.shape_cast %63 : vector<8x16x1xf32> to vector<8x16x1xf32>
    %65 = vector.broadcast %64 : vector<8x16x1xf32> to vector<8x16x8xf32>
    %c2_16 = arith.constant 2 : index
    %c0_17 = arith.constant 0 : index
    %66 = vector.load %arg5[%c2_16, %c0_17] : memref<4x8xf32, #tpu.memory_space<vmem>>, vector<1x8xf32>
    %67 = vector.shape_cast %66 : vector<1x8xf32> to vector<8xf32>
    %68 = vector.shape_cast %67 : vector<8xf32> to vector<1x1x8xf32>
    %69 = vector.broadcast %68 : vector<1x1x8xf32> to vector<8x16x8xf32>
    %70 = arith.mulf %65, %69 : vector<8x16x8xf32>
    %71 = arith.addf %62, %70 : vector<8x16x8xf32>
    %72 = vector.extract_strided_slice %42 {offsets = [0, 0, 3], sizes = [8, 16, 1], strides = [1, 1, 1]} : vector<8x16x4xf32> to vector<8x16x1xf32>
    %73 = vector.shape_cast %72 : vector<8x16x1xf32> to vector<8x16x1xf32>
    %74 = vector.broadcast %73 : vector<8x16x1xf32> to vector<8x16x8xf32>
    %c3_18 = arith.constant 3 : index
    %c0_19 = arith.constant 0 : index
    %75 = vector.load %arg5[%c3_18, %c0_19] : memref<4x8xf32, #tpu.memory_space<vmem>>, vector<1x8xf32>
    %76 = vector.shape_cast %75 : vector<1x8xf32> to vector<8xf32>
    %77 = vector.shape_cast %76 : vector<8xf32> to vector<1x1x8xf32>
    %78 = vector.broadcast %77 : vector<1x1x8xf32> to vector<8x16x8xf32>
    %79 = arith.mulf %74, %78 : vector<8x16x8xf32>
    %80 = arith.addf %71, %79 : vector<8x16x8xf32>
    %cst_20 = arith.constant 0.000000e+00 : f32
    %81 = vector.broadcast %cst_20 : f32 to vector<8x16x4xf32>
    %82 = vector.extract_strided_slice %4 {offsets = [0, 1, 0], sizes = [8, 16, 4], strides = [1, 1, 1]} : vector<10x18x4xf32> to vector<8x16x4xf32>
    %c4 = arith.constant 4 : index
    %c0_21 = arith.constant 0 : index
    %83 = vector.load %arg3[%c4, %c0_21] : memref<16x4xf32, #tpu.memory_space<vmem>>, vector<1x4xf32>
    %84 = vector.shape_cast %83 : vector<1x4xf32> to vector<4xf32>
    %85 = vector.shape_cast %84 : vector<4xf32> to vector<1x1x4xf32>
    %86 = vector.broadcast %85 : vector<1x1x4xf32> to vector<8x16x4xf32>
    %87 = arith.mulf %82, %86 : vector<8x16x4xf32>
    %88 = arith.addf %81, %87 : vector<8x16x4xf32>
    %89 = vector.extract_strided_slice %4 {offsets = [0, 2, 0], sizes = [8, 16, 4], strides = [1, 1, 1]} : vector<10x18x4xf32> to vector<8x16x4xf32>
    %c5 = arith.constant 5 : index
    %c0_22 = arith.constant 0 : index
    %90 = vector.load %arg3[%c5, %c0_22] : memref<16x4xf32, #tpu.memory_space<vmem>>, vector<1x4xf32>
    %91 = vector.shape_cast %90 : vector<1x4xf32> to vector<4xf32>
    %92 = vector.shape_cast %91 : vector<4xf32> to vector<1x1x4xf32>
    %93 = vector.broadcast %92 : vector<1x1x4xf32> to vector<8x16x4xf32>
    %94 = arith.mulf %89, %93 : vector<8x16x4xf32>
    %95 = arith.addf %88, %94 : vector<8x16x4xf32>
    %96 = vector.extract_strided_slice %4 {offsets = [1, 1, 0], sizes = [8, 16, 4], strides = [1, 1, 1]} : vector<10x18x4xf32> to vector<8x16x4xf32>
    %c6 = arith.constant 6 : index
    %c0_23 = arith.constant 0 : index
    %97 = vector.load %arg3[%c6, %c0_23] : memref<16x4xf32, #tpu.memory_space<vmem>>, vector<1x4xf32>
    %98 = vector.shape_cast %97 : vector<1x4xf32> to vector<4xf32>
    %99 = vector.shape_cast %98 : vector<4xf32> to vector<1x1x4xf32>
    %100 = vector.broadcast %99 : vector<1x1x4xf32> to vector<8x16x4xf32>
    %101 = arith.mulf %96, %100 : vector<8x16x4xf32>
    %102 = arith.addf %95, %101 : vector<8x16x4xf32>
    %103 = vector.extract_strided_slice %4 {offsets = [1, 2, 0], sizes = [8, 16, 4], strides = [1, 1, 1]} : vector<10x18x4xf32> to vector<8x16x4xf32>
    %c7 = arith.constant 7 : index
    %c0_24 = arith.constant 0 : index
    %104 = vector.load %arg3[%c7, %c0_24] : memref<16x4xf32, #tpu.memory_space<vmem>>, vector<1x4xf32>
    %105 = vector.shape_cast %104 : vector<1x4xf32> to vector<4xf32>
    %106 = vector.shape_cast %105 : vector<4xf32> to vector<1x1x4xf32>
    %107 = vector.broadcast %106 : vector<1x1x4xf32> to vector<8x16x4xf32>
    %108 = arith.mulf %103, %107 : vector<8x16x4xf32>
    %109 = arith.addf %102, %108 : vector<8x16x4xf32>
    %110 = vector.shape_cast %6 : vector<4xf32> to vector<1x1x4xf32>
    %111 = vector.broadcast %110 : vector<1x1x4xf32> to vector<8x16x4xf32>
    %112 = arith.addf %109, %111 : vector<8x16x4xf32>
    %cst_25 = arith.constant 0.000000e+00 : f32
    %113 = vector.broadcast %cst_25 : f32 to vector<8x16x4xf32>
    %114 = arith.maximumf %112, %113 : vector<8x16x4xf32>
    %115 = vector.shape_cast %8 : vector<8xf32> to vector<1x1x8xf32>
    %116 = vector.broadcast %115 : vector<1x1x8xf32> to vector<8x16x8xf32>
    %117 = vector.extract_strided_slice %114 {offsets = [0, 0, 0], sizes = [8, 16, 1], strides = [1, 1, 1]} : vector<8x16x4xf32> to vector<8x16x1xf32>
    %118 = vector.shape_cast %117 : vector<8x16x1xf32> to vector<8x16x1xf32>
    %119 = vector.broadcast %118 : vector<8x16x1xf32> to vector<8x16x8xf32>
    %c0_26 = arith.constant 0 : index
    %c0_27 = arith.constant 0 : index
    %120 = vector.load %arg5[%c0_26, %c0_27] : memref<4x8xf32, #tpu.memory_space<vmem>>, vector<1x8xf32>
    %121 = vector.shape_cast %120 : vector<1x8xf32> to vector<8xf32>
    %122 = vector.shape_cast %121 : vector<8xf32> to vector<1x1x8xf32>
    %123 = vector.broadcast %122 : vector<1x1x8xf32> to vector<8x16x8xf32>
    %124 = arith.mulf %119, %123 : vector<8x16x8xf32>
    %125 = arith.addf %116, %124 : vector<8x16x8xf32>
    %126 = vector.extract_strided_slice %114 {offsets = [0, 0, 1], sizes = [8, 16, 1], strides = [1, 1, 1]} : vector<8x16x4xf32> to vector<8x16x1xf32>
    %127 = vector.shape_cast %126 : vector<8x16x1xf32> to vector<8x16x1xf32>
    %128 = vector.broadcast %127 : vector<8x16x1xf32> to vector<8x16x8xf32>
    %c1_28 = arith.constant 1 : index
    %c0_29 = arith.constant 0 : index
    %129 = vector.load %arg5[%c1_28, %c0_29] : memref<4x8xf32, #tpu.memory_space<vmem>>, vector<1x8xf32>
    %130 = vector.shape_cast %129 : vector<1x8xf32> to vector<8xf32>
    %131 = vector.shape_cast %130 : vector<8xf32> to vector<1x1x8xf32>
    %132 = vector.broadcast %131 : vector<1x1x8xf32> to vector<8x16x8xf32>
    %133 = arith.mulf %128, %132 : vector<8x16x8xf32>
    %134 = arith.addf %125, %133 : vector<8x16x8xf32>
    %135 = vector.extract_strided_slice %114 {offsets = [0, 0, 2], sizes = [8, 16, 1], strides = [1, 1, 1]} : vector<8x16x4xf32> to vector<8x16x1xf32>
    %136 = vector.shape_cast %135 : vector<8x16x1xf32> to vector<8x16x1xf32>
    %137 = vector.broadcast %136 : vector<8x16x1xf32> to vector<8x16x8xf32>
    %c2_30 = arith.constant 2 : index
    %c0_31 = arith.constant 0 : index
    %138 = vector.load %arg5[%c2_30, %c0_31] : memref<4x8xf32, #tpu.memory_space<vmem>>, vector<1x8xf32>
    %139 = vector.shape_cast %138 : vector<1x8xf32> to vector<8xf32>
    %140 = vector.shape_cast %139 : vector<8xf32> to vector<1x1x8xf32>
    %141 = vector.broadcast %140 : vector<1x1x8xf32> to vector<8x16x8xf32>
    %142 = arith.mulf %137, %141 : vector<8x16x8xf32>
    %143 = arith.addf %134, %142 : vector<8x16x8xf32>
    %144 = vector.extract_strided_slice %114 {offsets = [0, 0, 3], sizes = [8, 16, 1], strides = [1, 1, 1]} : vector<8x16x4xf32> to vector<8x16x1xf32>
    %145 = vector.shape_cast %144 : vector<8x16x1xf32> to vector<8x16x1xf32>
    %146 = vector.broadcast %145 : vector<8x16x1xf32> to vector<8x16x8xf32>
    %c3_32 = arith.constant 3 : index
    %c0_33 = arith.constant 0 : index
    %147 = vector.load %arg5[%c3_32, %c0_33] : memref<4x8xf32, #tpu.memory_space<vmem>>, vector<1x8xf32>
    %148 = vector.shape_cast %147 : vector<1x8xf32> to vector<8xf32>
    %149 = vector.shape_cast %148 : vector<8xf32> to vector<1x1x8xf32>
    %150 = vector.broadcast %149 : vector<1x1x8xf32> to vector<8x16x8xf32>
    %151 = arith.mulf %146, %150 : vector<8x16x8xf32>
    %152 = arith.addf %143, %151 : vector<8x16x8xf32>
    %153 = vector.shape_cast %80 : vector<8x16x8xf32> to vector<8x16x1x8xf32>
    %154 = vector.shape_cast %152 : vector<8x16x8xf32> to vector<8x16x1x8xf32>
    %155 = tpu.concatenate %153, %154 in 2 : vector<8x16x1x8xf32>, vector<8x16x1x8xf32> -> vector<8x16x2x8xf32>
    %156 = vector.shape_cast %155 : vector<8x16x2x8xf32> to vector<8x32x8xf32>
    %cst_34 = arith.constant 0.000000e+00 : f32
    %157 = vector.broadcast %cst_34 : f32 to vector<8x16x4xf32>
    %158 = vector.extract_strided_slice %4 {offsets = [1, 0, 0], sizes = [8, 16, 4], strides = [1, 1, 1]} : vector<10x18x4xf32> to vector<8x16x4xf32>
    %c8 = arith.constant 8 : index
    %c0_35 = arith.constant 0 : index
    %159 = vector.load %arg3[%c8, %c0_35] : memref<16x4xf32, #tpu.memory_space<vmem>>, vector<1x4xf32>
    %160 = vector.shape_cast %159 : vector<1x4xf32> to vector<4xf32>
    %161 = vector.shape_cast %160 : vector<4xf32> to vector<1x1x4xf32>
    %162 = vector.broadcast %161 : vector<1x1x4xf32> to vector<8x16x4xf32>
    %163 = arith.mulf %158, %162 : vector<8x16x4xf32>
    %164 = arith.addf %157, %163 : vector<8x16x4xf32>
    %165 = vector.extract_strided_slice %4 {offsets = [1, 1, 0], sizes = [8, 16, 4], strides = [1, 1, 1]} : vector<10x18x4xf32> to vector<8x16x4xf32>
    %c9 = arith.constant 9 : index
    %c0_36 = arith.constant 0 : index
    %166 = vector.load %arg3[%c9, %c0_36] : memref<16x4xf32, #tpu.memory_space<vmem>>, vector<1x4xf32>
    %167 = vector.shape_cast %166 : vector<1x4xf32> to vector<4xf32>
    %168 = vector.shape_cast %167 : vector<4xf32> to vector<1x1x4xf32>
    %169 = vector.broadcast %168 : vector<1x1x4xf32> to vector<8x16x4xf32>
    %170 = arith.mulf %165, %169 : vector<8x16x4xf32>
    %171 = arith.addf %164, %170 : vector<8x16x4xf32>
    %172 = vector.extract_strided_slice %4 {offsets = [2, 0, 0], sizes = [8, 16, 4], strides = [1, 1, 1]} : vector<10x18x4xf32> to vector<8x16x4xf32>
    %c10 = arith.constant 10 : index
    %c0_37 = arith.constant 0 : index
    %173 = vector.load %arg3[%c10, %c0_37] : memref<16x4xf32, #tpu.memory_space<vmem>>, vector<1x4xf32>
    %174 = vector.shape_cast %173 : vector<1x4xf32> to vector<4xf32>
    %175 = vector.shape_cast %174 : vector<4xf32> to vector<1x1x4xf32>
    %176 = vector.broadcast %175 : vector<1x1x4xf32> to vector<8x16x4xf32>
    %177 = arith.mulf %172, %176 : vector<8x16x4xf32>
    %178 = arith.addf %171, %177 : vector<8x16x4xf32>
    %179 = vector.extract_strided_slice %4 {offsets = [2, 1, 0], sizes = [8, 16, 4], strides = [1, 1, 1]} : vector<10x18x4xf32> to vector<8x16x4xf32>
    %c11 = arith.constant 11 : index
    %c0_38 = arith.constant 0 : index
    %180 = vector.load %arg3[%c11, %c0_38] : memref<16x4xf32, #tpu.memory_space<vmem>>, vector<1x4xf32>
    %181 = vector.shape_cast %180 : vector<1x4xf32> to vector<4xf32>
    %182 = vector.shape_cast %181 : vector<4xf32> to vector<1x1x4xf32>
    %183 = vector.broadcast %182 : vector<1x1x4xf32> to vector<8x16x4xf32>
    %184 = arith.mulf %179, %183 : vector<8x16x4xf32>
    %185 = arith.addf %178, %184 : vector<8x16x4xf32>
    %186 = vector.shape_cast %6 : vector<4xf32> to vector<1x1x4xf32>
    %187 = vector.broadcast %186 : vector<1x1x4xf32> to vector<8x16x4xf32>
    %188 = arith.addf %185, %187 : vector<8x16x4xf32>
    %cst_39 = arith.constant 0.000000e+00 : f32
    %189 = vector.broadcast %cst_39 : f32 to vector<8x16x4xf32>
    %190 = arith.maximumf %188, %189 : vector<8x16x4xf32>
    %191 = vector.shape_cast %8 : vector<8xf32> to vector<1x1x8xf32>
    %192 = vector.broadcast %191 : vector<1x1x8xf32> to vector<8x16x8xf32>
    %193 = vector.extract_strided_slice %190 {offsets = [0, 0, 0], sizes = [8, 16, 1], strides = [1, 1, 1]} : vector<8x16x4xf32> to vector<8x16x1xf32>
    %194 = vector.shape_cast %193 : vector<8x16x1xf32> to vector<8x16x1xf32>
    %195 = vector.broadcast %194 : vector<8x16x1xf32> to vector<8x16x8xf32>
    %c0_40 = arith.constant 0 : index
    %c0_41 = arith.constant 0 : index
    %196 = vector.load %arg5[%c0_40, %c0_41] : memref<4x8xf32, #tpu.memory_space<vmem>>, vector<1x8xf32>
    %197 = vector.shape_cast %196 : vector<1x8xf32> to vector<8xf32>
    %198 = vector.shape_cast %197 : vector<8xf32> to vector<1x1x8xf32>
    %199 = vector.broadcast %198 : vector<1x1x8xf32> to vector<8x16x8xf32>
    %200 = arith.mulf %195, %199 : vector<8x16x8xf32>
    %201 = arith.addf %192, %200 : vector<8x16x8xf32>
    %202 = vector.extract_strided_slice %190 {offsets = [0, 0, 1], sizes = [8, 16, 1], strides = [1, 1, 1]} : vector<8x16x4xf32> to vector<8x16x1xf32>
    %203 = vector.shape_cast %202 : vector<8x16x1xf32> to vector<8x16x1xf32>
    %204 = vector.broadcast %203 : vector<8x16x1xf32> to vector<8x16x8xf32>
    %c1_42 = arith.constant 1 : index
    %c0_43 = arith.constant 0 : index
    %205 = vector.load %arg5[%c1_42, %c0_43] : memref<4x8xf32, #tpu.memory_space<vmem>>, vector<1x8xf32>
    %206 = vector.shape_cast %205 : vector<1x8xf32> to vector<8xf32>
    %207 = vector.shape_cast %206 : vector<8xf32> to vector<1x1x8xf32>
    %208 = vector.broadcast %207 : vector<1x1x8xf32> to vector<8x16x8xf32>
    %209 = arith.mulf %204, %208 : vector<8x16x8xf32>
    %210 = arith.addf %201, %209 : vector<8x16x8xf32>
    %211 = vector.extract_strided_slice %190 {offsets = [0, 0, 2], sizes = [8, 16, 1], strides = [1, 1, 1]} : vector<8x16x4xf32> to vector<8x16x1xf32>
    %212 = vector.shape_cast %211 : vector<8x16x1xf32> to vector<8x16x1xf32>
    %213 = vector.broadcast %212 : vector<8x16x1xf32> to vector<8x16x8xf32>
    %c2_44 = arith.constant 2 : index
    %c0_45 = arith.constant 0 : index
    %214 = vector.load %arg5[%c2_44, %c0_45] : memref<4x8xf32, #tpu.memory_space<vmem>>, vector<1x8xf32>
    %215 = vector.shape_cast %214 : vector<1x8xf32> to vector<8xf32>
    %216 = vector.shape_cast %215 : vector<8xf32> to vector<1x1x8xf32>
    %217 = vector.broadcast %216 : vector<1x1x8xf32> to vector<8x16x8xf32>
    %218 = arith.mulf %213, %217 : vector<8x16x8xf32>
    %219 = arith.addf %210, %218 : vector<8x16x8xf32>
    %220 = vector.extract_strided_slice %190 {offsets = [0, 0, 3], sizes = [8, 16, 1], strides = [1, 1, 1]} : vector<8x16x4xf32> to vector<8x16x1xf32>
    %221 = vector.shape_cast %220 : vector<8x16x1xf32> to vector<8x16x1xf32>
    %222 = vector.broadcast %221 : vector<8x16x1xf32> to vector<8x16x8xf32>
    %c3_46 = arith.constant 3 : index
    %c0_47 = arith.constant 0 : index
    %223 = vector.load %arg5[%c3_46, %c0_47] : memref<4x8xf32, #tpu.memory_space<vmem>>, vector<1x8xf32>
    %224 = vector.shape_cast %223 : vector<1x8xf32> to vector<8xf32>
    %225 = vector.shape_cast %224 : vector<8xf32> to vector<1x1x8xf32>
    %226 = vector.broadcast %225 : vector<1x1x8xf32> to vector<8x16x8xf32>
    %227 = arith.mulf %222, %226 : vector<8x16x8xf32>
    %228 = arith.addf %219, %227 : vector<8x16x8xf32>
    %cst_48 = arith.constant 0.000000e+00 : f32
    %229 = vector.broadcast %cst_48 : f32 to vector<8x16x4xf32>
    %230 = vector.extract_strided_slice %4 {offsets = [1, 1, 0], sizes = [8, 16, 4], strides = [1, 1, 1]} : vector<10x18x4xf32> to vector<8x16x4xf32>
    %c12 = arith.constant 12 : index
    %c0_49 = arith.constant 0 : index
    %231 = vector.load %arg3[%c12, %c0_49] : memref<16x4xf32, #tpu.memory_space<vmem>>, vector<1x4xf32>
    %232 = vector.shape_cast %231 : vector<1x4xf32> to vector<4xf32>
    %233 = vector.shape_cast %232 : vector<4xf32> to vector<1x1x4xf32>
    %234 = vector.broadcast %233 : vector<1x1x4xf32> to vector<8x16x4xf32>
    %235 = arith.mulf %230, %234 : vector<8x16x4xf32>
    %236 = arith.addf %229, %235 : vector<8x16x4xf32>
    %237 = vector.extract_strided_slice %4 {offsets = [1, 2, 0], sizes = [8, 16, 4], strides = [1, 1, 1]} : vector<10x18x4xf32> to vector<8x16x4xf32>
    %c13 = arith.constant 13 : index
    %c0_50 = arith.constant 0 : index
    %238 = vector.load %arg3[%c13, %c0_50] : memref<16x4xf32, #tpu.memory_space<vmem>>, vector<1x4xf32>
    %239 = vector.shape_cast %238 : vector<1x4xf32> to vector<4xf32>
    %240 = vector.shape_cast %239 : vector<4xf32> to vector<1x1x4xf32>
    %241 = vector.broadcast %240 : vector<1x1x4xf32> to vector<8x16x4xf32>
    %242 = arith.mulf %237, %241 : vector<8x16x4xf32>
    %243 = arith.addf %236, %242 : vector<8x16x4xf32>
    %244 = vector.extract_strided_slice %4 {offsets = [2, 1, 0], sizes = [8, 16, 4], strides = [1, 1, 1]} : vector<10x18x4xf32> to vector<8x16x4xf32>
    %c14 = arith.constant 14 : index
    %c0_51 = arith.constant 0 : index
    %245 = vector.load %arg3[%c14, %c0_51] : memref<16x4xf32, #tpu.memory_space<vmem>>, vector<1x4xf32>
    %246 = vector.shape_cast %245 : vector<1x4xf32> to vector<4xf32>
    %247 = vector.shape_cast %246 : vector<4xf32> to vector<1x1x4xf32>
    %248 = vector.broadcast %247 : vector<1x1x4xf32> to vector<8x16x4xf32>
    %249 = arith.mulf %244, %248 : vector<8x16x4xf32>
    %250 = arith.addf %243, %249 : vector<8x16x4xf32>
    %251 = vector.extract_strided_slice %4 {offsets = [2, 2, 0], sizes = [8, 16, 4], strides = [1, 1, 1]} : vector<10x18x4xf32> to vector<8x16x4xf32>
    %c15 = arith.constant 15 : index
    %c0_52 = arith.constant 0 : index
    %252 = vector.load %arg3[%c15, %c0_52] : memref<16x4xf32, #tpu.memory_space<vmem>>, vector<1x4xf32>
    %253 = vector.shape_cast %252 : vector<1x4xf32> to vector<4xf32>
    %254 = vector.shape_cast %253 : vector<4xf32> to vector<1x1x4xf32>
    %255 = vector.broadcast %254 : vector<1x1x4xf32> to vector<8x16x4xf32>
    %256 = arith.mulf %251, %255 : vector<8x16x4xf32>
    %257 = arith.addf %250, %256 : vector<8x16x4xf32>
    %258 = vector.shape_cast %6 : vector<4xf32> to vector<1x1x4xf32>
    %259 = vector.broadcast %258 : vector<1x1x4xf32> to vector<8x16x4xf32>
    %260 = arith.addf %257, %259 : vector<8x16x4xf32>
    %cst_53 = arith.constant 0.000000e+00 : f32
    %261 = vector.broadcast %cst_53 : f32 to vector<8x16x4xf32>
    %262 = arith.maximumf %260, %261 : vector<8x16x4xf32>
    %263 = vector.shape_cast %8 : vector<8xf32> to vector<1x1x8xf32>
    %264 = vector.broadcast %263 : vector<1x1x8xf32> to vector<8x16x8xf32>
    %265 = vector.extract_strided_slice %262 {offsets = [0, 0, 0], sizes = [8, 16, 1], strides = [1, 1, 1]} : vector<8x16x4xf32> to vector<8x16x1xf32>
    %266 = vector.shape_cast %265 : vector<8x16x1xf32> to vector<8x16x1xf32>
    %267 = vector.broadcast %266 : vector<8x16x1xf32> to vector<8x16x8xf32>
    %c0_54 = arith.constant 0 : index
    %c0_55 = arith.constant 0 : index
    %268 = vector.load %arg5[%c0_54, %c0_55] : memref<4x8xf32, #tpu.memory_space<vmem>>, vector<1x8xf32>
    %269 = vector.shape_cast %268 : vector<1x8xf32> to vector<8xf32>
    %270 = vector.shape_cast %269 : vector<8xf32> to vector<1x1x8xf32>
    %271 = vector.broadcast %270 : vector<1x1x8xf32> to vector<8x16x8xf32>
    %272 = arith.mulf %267, %271 : vector<8x16x8xf32>
    %273 = arith.addf %264, %272 : vector<8x16x8xf32>
    %274 = vector.extract_strided_slice %262 {offsets = [0, 0, 1], sizes = [8, 16, 1], strides = [1, 1, 1]} : vector<8x16x4xf32> to vector<8x16x1xf32>
    %275 = vector.shape_cast %274 : vector<8x16x1xf32> to vector<8x16x1xf32>
    %276 = vector.broadcast %275 : vector<8x16x1xf32> to vector<8x16x8xf32>
    %c1_56 = arith.constant 1 : index
    %c0_57 = arith.constant 0 : index
    %277 = vector.load %arg5[%c1_56, %c0_57] : memref<4x8xf32, #tpu.memory_space<vmem>>, vector<1x8xf32>
    %278 = vector.shape_cast %277 : vector<1x8xf32> to vector<8xf32>
    %279 = vector.shape_cast %278 : vector<8xf32> to vector<1x1x8xf32>
    %280 = vector.broadcast %279 : vector<1x1x8xf32> to vector<8x16x8xf32>
    %281 = arith.mulf %276, %280 : vector<8x16x8xf32>
    %282 = arith.addf %273, %281 : vector<8x16x8xf32>
    %283 = vector.extract_strided_slice %262 {offsets = [0, 0, 2], sizes = [8, 16, 1], strides = [1, 1, 1]} : vector<8x16x4xf32> to vector<8x16x1xf32>
    %284 = vector.shape_cast %283 : vector<8x16x1xf32> to vector<8x16x1xf32>
    %285 = vector.broadcast %284 : vector<8x16x1xf32> to vector<8x16x8xf32>
    %c2_58 = arith.constant 2 : index
    %c0_59 = arith.constant 0 : index
    %286 = vector.load %arg5[%c2_58, %c0_59] : memref<4x8xf32, #tpu.memory_space<vmem>>, vector<1x8xf32>
    %287 = vector.shape_cast %286 : vector<1x8xf32> to vector<8xf32>
    %288 = vector.shape_cast %287 : vector<8xf32> to vector<1x1x8xf32>
    %289 = vector.broadcast %288 : vector<1x1x8xf32> to vector<8x16x8xf32>
    %290 = arith.mulf %285, %289 : vector<8x16x8xf32>
    %291 = arith.addf %282, %290 : vector<8x16x8xf32>
    %292 = vector.extract_strided_slice %262 {offsets = [0, 0, 3], sizes = [8, 16, 1], strides = [1, 1, 1]} : vector<8x16x4xf32> to vector<8x16x1xf32>
    %293 = vector.shape_cast %292 : vector<8x16x1xf32> to vector<8x16x1xf32>
    %294 = vector.broadcast %293 : vector<8x16x1xf32> to vector<8x16x8xf32>
    %c3_60 = arith.constant 3 : index
    %c0_61 = arith.constant 0 : index
    %295 = vector.load %arg5[%c3_60, %c0_61] : memref<4x8xf32, #tpu.memory_space<vmem>>, vector<1x8xf32>
    %296 = vector.shape_cast %295 : vector<1x8xf32> to vector<8xf32>
    %297 = vector.shape_cast %296 : vector<8xf32> to vector<1x1x8xf32>
    %298 = vector.broadcast %297 : vector<1x1x8xf32> to vector<8x16x8xf32>
    %299 = arith.mulf %294, %298 : vector<8x16x8xf32>
    %300 = arith.addf %291, %299 : vector<8x16x8xf32>
    %301 = vector.shape_cast %228 : vector<8x16x8xf32> to vector<8x16x1x8xf32>
    %302 = vector.shape_cast %300 : vector<8x16x8xf32> to vector<8x16x1x8xf32>
    %303 = tpu.concatenate %301, %302 in 2 : vector<8x16x1x8xf32>, vector<8x16x1x8xf32> -> vector<8x16x2x8xf32>
    %304 = vector.shape_cast %303 : vector<8x16x2x8xf32> to vector<8x32x8xf32>
    %305 = vector.shape_cast %156 : vector<8x32x8xf32> to vector<8x1x32x8xf32>
    %306 = vector.shape_cast %304 : vector<8x32x8xf32> to vector<8x1x32x8xf32>
    %307 = tpu.concatenate %305, %306 in 1 : vector<8x1x32x8xf32>, vector<8x1x32x8xf32> -> vector<8x2x32x8xf32>
    %308 = vector.shape_cast %307 : vector<8x2x32x8xf32> to vector<16x32x8xf32>
    %309 = vector.shape_cast %308 : vector<16x32x8xf32> to vector<1x16x32x8xf32>
    %c0_62 = arith.constant 0 : index
    %c0_63 = arith.constant 0 : index
    %c0_64 = arith.constant 0 : index
    %c0_65 = arith.constant 0 : index
    %310 = vector.load %arg7[%c0_62, %c0_63, %c0_64, %c0_65] : memref<1x16x32x8xf32, #tpu.memory_space<vmem>>, vector<1x16x32x8xf32>
    tpu.vector_store %arg7[%c0_62, %c0_63, %c0_64, %c0_65], %309 {strides = array<i32>} : memref<1x16x32x8xf32, #tpu.memory_space<vmem>>, vector<1x16x32x8xf32>,
    return
  }
  func.func @transform_0(%arg0: i32, %arg1: i32) -> (i32, i32, i32, i32) {
    %c0_i32 = arith.constant 0 : i32
    %c0_i32_0 = arith.constant 0 : i32
    %c0_i32_1 = arith.constant 0 : i32
    %c0_i32_2 = arith.constant 0 : i32
    return %arg0, %c0_i32, %c0_i32_0, %c0_i32_1 : i32, i32, i32, i32
  }
  func.func @transform_1(%arg0: i32, %arg1: i32) -> (i32, i32) {
    %c0_i32 = arith.constant 0 : i32
    %c0_i32_0 = arith.constant 0 : i32
    %c0_i32_1 = arith.constant 0 : i32
    return %c0_i32, %c0_i32_0 : i32, i32
  }
  func.func @transform_2(%arg0: i32, %arg1: i32) -> (i32, i32) {
    %c0_i32 = arith.constant 0 : i32
    %c0_i32_0 = arith.constant 0 : i32
    %c0_i32_1 = arith.constant 0 : i32
    return %c0_i32, %c0_i32_0 : i32, i32
  }
  func.func @transform_3(%arg0: i32, %arg1: i32) -> (i32, i32) {
    %c0_i32 = arith.constant 0 : i32
    %c0_i32_0 = arith.constant 0 : i32
    %c0_i32_1 = arith.constant 0 : i32
    return %c0_i32, %c0_i32_0 : i32, i32
  }
  func.func @transform_4(%arg0: i32, %arg1: i32) -> (i32, i32) {
    %c0_i32 = arith.constant 0 : i32
    %c0_i32_0 = arith.constant 0 : i32
    %c0_i32_1 = arith.constant 0 : i32
    return %c0_i32, %c0_i32_0 : i32, i32
  }
  func.func @transform_5(%arg0: i32, %arg1: i32) -> (i32, i32, i32, i32) {
    %c0_i32 = arith.constant 0 : i32
    %c0_i32_0 = arith.constant 0 : i32
    %c0_i32_1 = arith.constant 0 : i32
    return %arg0, %arg1, %c0_i32, %c0_i32_0 : i32, i32, i32, i32
  }
}

</mosaic_0001>

<bundles_post_ra>
// kernel: tpu_custom_call.1
= control target key start
LH: loop header
LB: loop body
LE: loop exit
PB: predicated region body
PF: predicated region fallthrough
CT: control target
= control target key end

     0   :  { %s10954_s18 = smov 0   ;;  %s10956_s19 = smov 0   ;;  %s17854_s0 = inlined_call_operand.vmem [shape: f32[2,18,18,4], index: 0, kind: input, shape index: {}]   ;;  %s17855_s1 = inlined_call_operand.vmem [shape: f32[16,4], index: 1, kind: input, shape index: {}]   ;;  %s17856_s2 = inlined_call_operand.vmem [shape: f32[1,4], index: 2, kind: input, shape index: {}]   ;;  %s17857_s3 = inlined_call_operand.vmem [shape: f32[4,8], index: 3, kind: input, shape index: {}]   ;;  %s17858_s4 = inlined_call_operand.vmem [shape: f32[1,8], index: 4, kind: input, shape index: {}]   ;;  %s17859_s5 = inlined_call_operand.vmem [shape: f32[2,32,32,8], index: 5, kind: output, shape index: {}]  }
   0x1   :  { %s10958_s20 = smov 0   ;;  %s10960_s21 = smov 0  }
   0x2   :  { %s10962_s22 = smov 0  }
   0x3 LB: > { %s24_s23 = sadd.s32 1, %s10908_s20  ;;  %s27_s24 = sadd.s32 1, %s10912_s21  ;;  %s10916_s22 = sphi %s10962_s22, %s15_s22   ;;  %s10912_s21 = sphi %s10960_s21, %s19631_s21   ;;  %s10908_s20 = sphi %s10958_s20, %s19630_s20   ;;  %s10904_s19 = sphi %s10956_s19, %s19629_s19   ;;  %s10900_s18 = sphi %s10954_s18, %s19628_s18  }
   0x4   : > { %p25_p0 = scmp.ge.s32.totalorder %s24_s23, 2  ;;  %p10704_p1 = scmp.ge.s32.totalorder %s10916_s22, 1 }
   0x5   : > { %p201_p2 = scmp.lt.s32.totalorder %s10916_s22, 5 }
   0x6   : > { %s19633_s23 = smov (%p25_p0, %s24_s23), 0  ;;  %s19635_s24 = smov (!%p25_p0, %s27_s24), %s10912_s21 }
   0x7   : > { %p202_p3 = pnand %p10704_p1, %p201_p2  ;;  %p29_p4 = scmp.ge.s32.totalorder %s19635_s24, 2 }
   0x9   : > { %s19637_s24 = smov (%p29_p4, %s19635_s24), 0  ;;  %205 = sbr.rel (%p202_p3) target bundleno = 1103 (0x44f), region = 40 }
  0x10   : > { %p234_p5 = scmp.lt.s32.totalorder %s10904_s19, 1  ;;  %v17860_v0 = vmov 0   ;;  %s10711_s25 = smul.u32 192, %s10900_s18  ;;  %v10998_v1 = vld [vmem:[%s17855_s1] ss:$0 sm:$0xff]  ;;  %vm375_vm0 = vcmask 1046528  }
  0x11   : > { %10784 = vset.pattern.permute.xlu1 %v17860_v0  ;;  %10783 = vset.pattern.permute.xlu0 %v17860_v0  ;;  %v11003_v2 = vld [vmem:[%s17855_s1 + $0x1] ss:$0 sm:$0xff]  ;;  %v11008_v3 = vld [vmem:[%s17855_s1 + $0x2] ss:$0 sm:$0xff]  ;;  %v11015_v4 = vld [vmem:[%s17855_s1 + $0x3] ss:$0 sm:$0xff] }
  0x12   : > { %s19639_s19 = smov (!%p234_p5, %s10904_s19), 1  ;;  %v11074_v46 = vld [vmem:[%s17856_s2] ss:$0 sm:$0xff]  ;;  %vm4598_vm1 = vcmask 1040384   ;;  %s10706_s15 = sshll.u32 %s10900_s18, 4  ;;  %vm10543_vm2 = vcmask 64512  }
  0x13   : > { %s10736_s26 = smul.u32 432, %s19639_s19  ;;  %p14320_p6 = scmp.lt.s32.totalorder %s10706_s15, 31 }
  0x14   : > { %s10708_s17 = sshll.u32 %s19639_s19, 7 }
  0x15   : > { %s238_s29 = scalar_lea.vmem %s17854_s0, %s10736_s26  ;;  %s19641_s15 = smov (!%p14320_p6, %s10706_s15), 31 }
  0x16   : > { %s11010_s11 = scalar_lea.vmem %s238_s29, %s10711_s25  ;;  %s10707_s18 = sshll.u32 %s19641_s15, 2 }
  0x17   : > { %v256_v5 = vld [vmem:[%s11010_s11 + $0x18] sm:$0xff]  ;;  %v11019_v6 = vld [vmem:[%s11010_s11 + $0x20] sm:$0xff]  ;;  %v11022_v7 = vld [vmem:[%s11010_s11 + $0x30] sm:$0xff]  ;;  %s14419_s19 = sadd.s32 %s10708_s17, %s10707_s18 }
  0x18   : > { %v11025_v8 = vld [vmem:[%s11010_s11 + $0x38] sm:$0xff]  ;;  %v292_v9 = vmul.f32 %v10998_v1, %v256_v5  ;;  %v330_v10 = vmul.f32 %v11003_v2, %v256_v5  ;;  %v331_v11 = vmul.f32 %v11003_v2, %v11019_v6  ;;  %v455_v12 = vmul.f32 %v11008_v3, %v11022_v7  ;;  %v253_v13 = vld [vmem:[%s11010_s11] sm:$0xff]  ;;  %v11035_v14 = vld [vmem:[%s11010_s11 + $0x8] sm:$0xff]  ;;  %s10709_s25 = sshll.u32 %s14419_s19, 3 }
  0x19   : > { %v493_v15 = vmul.f32 %v11015_v4, %v11022_v7  ;;  %v494_v16 = vmul.f32 %v11015_v4, %v11025_v8  ;;  %v290_v17 = vmul.f32 %v10998_v1, %v253_v13  ;;  %v327_v18 = vmul.f32 %v11003_v2, %v253_v13  ;;  %v11047_v23 = vld [vmem:[%s11010_s11 + $0x28] sm:$0x3]  ;;  %v11051_v28 = vld [vmem:[%s11010_s11 + $0x40] sm:$0x3]  ;;  %v11062_v37 = vld [vmem:[%s11010_s11 + $0x10] sm:$0x3]  ;;  %s14466_s28 = scalar_lea.vmem %s17859_s5, %s10709_s25 }
  0x1a   : > { %v381_v19 = vrot.slane %v330_v10, 1  ;;  %v382_v20 = vrot.slane %v331_v11, 1  ;;  %v328_v21 = vmul.f32 %v11003_v2, %v11035_v14  ;;  %v453_v22 = vmul.f32 %v11008_v3, %v256_v5  ;;  %v11085_v55 = vld [vmem:[%s11010_s11 + $0x50] sm:$0xff]  ;;  %v11095_v10 = vld [vmem:[%s11010_s11 + $0x58] sm:$0x3] }
  0x1b   : > { %v543_v24 = vrot.slane %v493_v15, 1  ;;  %v544_v25 = vrot.slane %v494_v16, 1  ;;  %v376_v26 = vrot.slane %v327_v18, 1  ;;  %v490_v27 = vmul.f32 %v11015_v4, %v256_v5 }
  0x1c   : > { %v383_v29 = vsel %vm375_vm0, %v381_v19, %v382_v20  ;;  %v377_v30 = vrot.slane %v328_v21, 1  ;;  %v491_v31 = vmul.f32 %v11015_v4, %v11019_v6  ;;  %v293_v32 = vmul.f32 %v10998_v1, %v11019_v6 }
  0x1d   : > { %v434_v33 = vadd.f32 %v383_v29, %v292_v9  ;;  %v545_v34 = vsel %vm375_vm0, %v543_v24, %v544_v25  ;;  %v538_v35 = vrot.slane %v490_v27, 1  ;;  %v332_v36 = vmul.f32 %v11003_v2, %v11047_v23 }
  0x1e   : > { %v378_v38 = vsel %vm375_vm0, %v376_v26, %v377_v30  ;;  %v539_v39 = vrot.slane %v491_v31, 1  ;;  %v456_v40 = vmul.f32 %v11008_v3, %v11025_v8  ;;  %v495_v41 = vmul.f32 %v11015_v4, %v11051_v28 }
  0x1f   : > { %v471_v42 = vadd.f32 %v455_v12, %v434_v33  ;;  %v432_v43 = vadd.f32 %v378_v38, %v290_v17  ;;  %v384_v44 = vrot.slane %v332_v36, 1  ;;  %v291_v45 = vmul.f32 %v10998_v1, %v11035_v14  ;;  %v11125_v38 = vld [vmem:[%s11010_s11 + $0x68] sm:$0xff] }
  0x20   : > { %v540_v47 = vsel %vm375_vm0, %v538_v35, %v539_v39  ;;  %v546_v48 = vrot.slane %v495_v41, 1  ;;  %v329_v49 = vmul.f32 %v11003_v2, %v11062_v37  ;;  %v454_v50 = vmul.f32 %v11008_v3, %v11019_v6 }
  0x21   : > { %v596_v51 = vadd.f32 %v545_v34, %v471_v42  ;;  %v469_v52 = vadd.f32 %v453_v22, %v432_v43  ;;  %v385_v53 = vsel %vm375_vm0, %v382_v20, %v384_v44  ;;  %v492_v54 = vmul.f32 %v11015_v4, %v11047_v23  ;;  %v11108_v22 = vld [vmem:[%s11010_s11 + $0x48] sm:$0xff] }
  0x22   : > { %v435_v56 = vadd.f32 %v385_v53, %v293_v32  ;;  %v547_v57 = vsel %vm375_vm0, %v544_v25, %v546_v48  ;;  %v379_v58 = vrot.slane %v329_v49, 1  ;;  %v295_v59 = vmul.f32 %v10998_v1, %v11025_v8 }
  0x23   : > { %v618_v60 = vadd.f32 %v11074_v46, %v596_v51  ;;  %v594_v61 = vadd.f32 %v540_v47, %v469_v52  ;;  %v541_v62 = vrot.slane %v492_v54, 1  ;;  %v334_v63 = vmul.f32 %v11003_v2, %v11025_v8  ;;  %v11136_v47 = vld [vmem:[%s11010_s11 + $0x70] sm:$0x3] }
  0x24   : > { %v472_v5 = vadd.f32 %v456_v40, %v435_v56  ;;  %v380_v9 = vsel %vm375_vm0, %v377_v30, %v379_v58  ;;  %v335_v11 = vmul.f32 %v11003_v2, %v11051_v28  ;;  %v458_v12 = vmul.f32 %v11008_v3, %v11085_v55  ;;  %v11149_v58 = vld [vmem:[%s11010_s11 + $0x60] sm:$0xff] }
  0x25   : > { %v11101_v13 = vmax.f32 %v618_v60, 0.0  ;;  %v616_v15 = vadd.f32 %v11074_v46, %v594_v61  ;;  %v433_v16 = vadd.f32 %v380_v9, %v291_v45  ;;  %v542_v17 = vsel %vm375_vm0, %v539_v39, %v541_v62 }
  0x26   : > { %v597_v18 = vadd.f32 %v547_v57, %v472_v5  ;;  %v387_v19 = vrot.slane %v334_v63, 1  ;;  %v389_v20 = vrot.slane %v335_v11, 1  ;;  %v497_v21 = vmul.f32 %v11015_v4, %v11085_v55 }
  0x27   : > { %666 = vperm.xlu1 %10784, %v11101_v13   ;;  %v11111_v24 = vmax.f32 %v616_v15, 0.0  ;;  %v470_v25 = vadd.f32 %v454_v50, %v433_v16  ;;  %v498_v26 = vmul.f32 %v11015_v4, %v11095_v10  ;;  %v294_v27 = vmul.f32 %v10998_v1, %v11022_v7 }
  0x28   : > { %v619_v29 = vadd.f32 %v11074_v46, %v597_v18  ;;  %v390_v30 = vsel %vm375_vm0, %v387_v19, %v389_v20  ;;  %v549_v31 = vrot.slane %v497_v21, 1  ;;  %v333_v32 = vmul.f32 %v11003_v2, %v11022_v7 }
  0x29   : > { %18293 = vst [vmem:[#allocation2_spill] sm:$0xff] %v11111_v24  ;;  %656 = vperm.xlu0 %10783, %v11111_v24   ;;  %v595_v33 = vadd.f32 %v542_v17, %v470_v25  ;;  %v437_v34 = vadd.f32 %v390_v30, %v295_v59  ;;  %v551_v35 = vrot.slane %v498_v26, 1  ;;  %v457_v36 = vmul.f32 %v11008_v3, %v11108_v22  ;;  %v11168_v25 = vld [vmem:[%s11010_s11 + $0x80] sm:$0xff] }
  0x2a   : > { %v11127_v39 = vmax.f32 %v619_v29, 0.0  ;;  %v386_v40 = vrot.slane %v333_v32, 1  ;;  %v496_v41 = vmul.f32 %v11015_v4, %v11108_v22  ;;  %v297_v42 = vmul.f32 %v10998_v1, %v11085_v55 }
  0x2b   : > { %v617_v43 = vadd.f32 %v11074_v46, %v595_v33  ;;  %v474_v44 = vadd.f32 %v458_v12, %v437_v34  ;;  %v552_v45 = vsel %vm375_vm0, %v549_v31, %v551_v35  ;;  %v337_v48 = vmul.f32 %v11003_v2, %v11085_v55  ;;  %v11181_v34 = vld [vmem:[%s11010_s11 + $0x88] sm:$0x3] }
  0x2c   : > { %18294 = vst [vmem:[#allocation3_spill] sm:$0xff] %v11127_v39  ;;  %671 = vperm.xlu1 %10784, %v11127_v39   ;;  %v388_v49 = vsel %vm375_vm0, %v386_v40, %v387_v19  ;;  %v548_v50 = vrot.slane %v496_v41, 1  ;;  %v338_v51 = vmul.f32 %v11003_v2, %v11095_v10  ;;  %v460_v52 = vmul.f32 %v11008_v3, %v11125_v38 }
  0x2d   : > { %v11146_v53 = vmax.f32 %v617_v43, 0.0  ;;  %v599_v54 = vadd.f32 %v552_v45, %v474_v44  ;;  %v436_v56 = vadd.f32 %v388_v49, %v294_v27  ;;  %v392_v57 = vrot.slane %v337_v48, 1  ;;  %v11192_v49 = vld [vmem:[%s11010_s11 + $0x78] sm:$0xff] }
  0x2e   : > { %v550_v59 = vsel %vm375_vm0, %v548_v50, %v549_v31  ;;  %v394_v60 = vrot.slane %v338_v51, 1  ;;  %v500_v61 = vmul.f32 %v11015_v4, %v11125_v38  ;;  %v501_v62 = vmul.f32 %v11015_v4, %v11136_v47 }
  0x2f   : > { %18295 = vst [vmem:[#allocation4_spill] sm:$0xff] %v11146_v53  ;;  %661 = vperm.xlu0 %10783, %v11146_v53   ;;  %v621_v63 = vadd.f32 %v11074_v46, %v599_v54  ;;  %v473_v5 = vadd.f32 %v457_v36, %v436_v56  ;;  %v296_v9 = vmul.f32 %v10998_v1, %v11108_v22 }
  0x30   : > { %v336_v11 = vmul.f32 %v11003_v2, %v11108_v22  ;;  %v395_v12 = vsel %vm375_vm0, %v392_v57, %v394_v60  ;;  %v554_v15 = vrot.slane %v500_v61, 1  ;;  %v556_v16 = vrot.slane %v501_v62, 1 }
  0x31   : > { %v459_v17 = vmul.f32 %v11008_v3, %v11149_v58  ;;  %v11165_v18 = vmax.f32 %v621_v63, 0.0  ;;  %v598_v19 = vadd.f32 %v550_v59, %v473_v5  ;;  %v439_v20 = vadd.f32 %v395_v12, %v297_v42 }
  0x32   : > { %v391_v21 = vrot.slane %v336_v11, 1  ;;  %v557_v26 = vsel %vm375_vm0, %v554_v15, %v556_v16  ;;  %v499_v27 = vmul.f32 %v11015_v4, %v11149_v58  ;;  %v299_v29 = vmul.f32 %v10998_v1, %v11125_v38 }
  0x33   : > { %18296 = vst [vmem:[#allocation5_spill] sm:$0xff] %v11165_v18  ;;  %v340_v30 = vmul.f32 %v11003_v2, %v11125_v38  ;;  %681 = vperm.xlu1 %10784, %v11165_v18   ;;  %v620_v31 = vadd.f32 %v11074_v46, %v598_v19  ;;  %v476_v32 = vadd.f32 %v460_v52, %v439_v20 }
  0x34   : > { %v393_v33 = vsel %vm375_vm0, %v391_v21, %v392_v57  ;;  %v341_v35 = vmul.f32 %v11003_v2, %v11136_v47  ;;  %v553_v40 = vrot.slane %v499_v27, 1  ;;  %v462_v42 = vmul.f32 %v11008_v3, %v11168_v25  ;;  %v11218_v21 = vld [vmem:[%s11010_s11 + $0xa0] sm:$0x3] }
  0x35   : > { %v438_v36 = vadd.f32 %v393_v33, %v296_v9  ;;  %v397_v41 = vrot.slane %v340_v30, 1  ;;  %v11187_v43 = vmax.f32 %v620_v31, 0.0  ;;  %v601_v44 = vadd.f32 %v557_v26, %v476_v32  ;;  %v11207_v9 = vld [vmem:[%s11010_s11 + $0x98] sm:$0xff] }
  0x36   : > { %v399_v45 = vrot.slane %v341_v35, 1  ;;  %v503_v48 = vmul.f32 %v11015_v4, %v11168_v25  ;;  %v555_v51 = vsel %vm375_vm0, %v553_v40, %v554_v15  ;;  %v504_v52 = vmul.f32 %v11015_v4, %v11181_v34  ;;  %v11231_v40 = vld [vmem:[%s11010_s11 + $0x90] sm:$0xff] }
  0x37   : > { %18297 = vst [vmem:[#allocation6_spill] sm:$0xff] %v11187_v43  ;;  %v475_v50 = vadd.f32 %v459_v17, %v438_v36  ;;  %v298_v54 = vmul.f32 %v10998_v1, %v11149_v58  ;;  %676 = vperm.xlu0 %10783, %v11187_v43   ;;  %v623_v56 = vadd.f32 %v11074_v46, %v601_v44 }
  0x38   : > { %v400_v57 = vsel %vm375_vm0, %v397_v41, %v399_v45  ;;  %v559_v59 = vrot.slane %v503_v48, 1  ;;  %v339_v60 = vmul.f32 %v11003_v2, %v11149_v58  ;;  %v561_v63 = vrot.slane %v504_v52, 1 }
  0x39   : > { %v600_v61 = vadd.f32 %v555_v51, %v475_v50  ;;  %v441_v62 = vadd.f32 %v400_v57, %v299_v29  ;;  %v461_v5 = vmul.f32 %v11008_v3, %v11192_v49  ;;  %v11209_v11 = vmax.f32 %v623_v56, 0.0 }
  0x3a   : > { %v396_v12 = vrot.slane %v339_v60, 1  ;;  %v502_v15 = vmul.f32 %v11015_v4, %v11192_v49  ;;  %v301_v16 = vmul.f32 %v10998_v1, %v11168_v25  ;;  %v562_v20 = vsel %vm375_vm0, %v559_v59, %v561_v63 }
  0x3b   : > { %18298 = vst [vmem:[#allocation7_spill] sm:$0xff] %v11209_v11  ;;  %v622_v17 = vadd.f32 %v11074_v46, %v600_v61  ;;  %v478_v19 = vadd.f32 %v462_v42, %v441_v62  ;;  %v343_v26 = vmul.f32 %v11003_v2, %v11168_v25  ;;  %691 = vperm.xlu1 %10784, %v11209_v11  }
  0x3c   : > { %v398_v27 = vsel %vm375_vm0, %v396_v12, %v397_v41  ;;  %v558_v29 = vrot.slane %v502_v15, 1  ;;  %v344_v30 = vmul.f32 %v11003_v2, %v11181_v34  ;;  %v464_v31 = vmul.f32 %v11008_v3, %v11207_v9 }
  0x3d   : > { %v11228_v32 = vmax.f32 %v622_v17, 0.0  ;;  %v603_v33 = vadd.f32 %v562_v20, %v478_v19  ;;  %v440_v35 = vadd.f32 %v398_v27, %v298_v54  ;;  %v402_v36 = vrot.slane %v343_v26, 1  ;;  %v11263_v27 = vld [vmem:[%s11010_s11 + $0xb8] sm:$0x3] }
  0x3e   : > { %v560_v42 = vsel %vm375_vm0, %v558_v29, %v559_v59  ;;  %v404_v44 = vrot.slane %v344_v30, 1  ;;  %v506_v41 = vmul.f32 %v11015_v4, %v11207_v9  ;;  %v507_v45 = vmul.f32 %v11015_v4, %v11218_v21 }
  0x3f   : > { %18299 = vst [vmem:[#allocation8_spill] sm:$0xff] %v11228_v32  ;;  %686 = vperm.xlu0 %10783, %v11228_v32   ;;  %v625_v48 = vadd.f32 %v11074_v46, %v603_v33  ;;  %v477_v50 = vadd.f32 %v461_v5, %v440_v35  ;;  %v300_v51 = vmul.f32 %v10998_v1, %v11192_v49  ;;  %v11250_v5 = vld [vmem:[%s11010_s11 + $0xb0] sm:$0xff] }
  0x40   : > { %v342_v52 = vmul.f32 %v11003_v2, %v11192_v49  ;;  %v405_v54 = vsel %vm375_vm0, %v402_v36, %v404_v44  ;;  %v564_v56 = vrot.slane %v506_v41, 1  ;;  %v566_v57 = vrot.slane %v507_v45, 1 }
  0x41   : > { %v463_v59 = vmul.f32 %v11008_v3, %v11231_v40  ;;  %v11247_v60 = vmax.f32 %v625_v48, 0.0  ;;  %v602_v61 = vadd.f32 %v560_v42, %v477_v50  ;;  %v443_v62 = vadd.f32 %v405_v54, %v301_v16 }
  0x42   : > { %v401_v63 = vrot.slane %v342_v52, 1  ;;  %v567_v12 = vsel %vm375_vm0, %v564_v56, %v566_v57  ;;  %v505_v15 = vmul.f32 %v11015_v4, %v11231_v40  ;;  %v303_v17 = vmul.f32 %v10998_v1, %v11207_v9 }
  0x43   : > { %18300 = vst [vmem:[#allocation9_spill] sm:$0xff] %v11247_v60  ;;  %v346_v19 = vmul.f32 %v11003_v2, %v11207_v9  ;;  %701 = vperm.xlu1 %10784, %v11247_v60   ;;  %v624_v20 = vadd.f32 %v11074_v46, %v602_v61  ;;  %v480_v16 = vadd.f32 %v464_v31, %v443_v62 }
  0x44   : > { %v403_v26 = vsel %vm375_vm0, %v401_v63, %v402_v36  ;;  %v347_v29 = vmul.f32 %v11003_v2, %v11218_v21  ;;  %v563_v33 = vrot.slane %v505_v15, 1  ;;  %v466_v42 = vmul.f32 %v11008_v3, %v11250_v5  ;;  %v11274_v36 = vld [vmem:[%s11010_s11 + $0xa8] sm:$0xff] }
  0x45   : > { %v442_v30 = vadd.f32 %v403_v26, %v300_v51  ;;  %v407_v35 = vrot.slane %v346_v19, 1  ;;  %v11269_v44 = vmax.f32 %v624_v20, 0.0  ;;  %v605_v41 = vadd.f32 %v567_v12, %v480_v16  ;;  %v11289_v15 = vld [vmem:[%s11010_s11 + $0xc8] sm:$0xff] }
  0x46   : > { %v409_v45 = vrot.slane %v347_v29, 1  ;;  %v509_v31 = vmul.f32 %v11015_v4, %v11250_v5  ;;  %v565_v50 = vsel %vm375_vm0, %v563_v33, %v564_v56  ;;  %v510_v51 = vmul.f32 %v11015_v4, %v11263_v27  ;;  %v11300_v33 = vld [vmem:[%s11010_s11 + $0xd0] sm:$0x3] }
  0x47   : > { %18301 = vst [vmem:[#allocation10_spill] sm:$0xff] %v11269_v44  ;;  %v479_v48 = vadd.f32 %v463_v59, %v442_v30  ;;  %v302_v52 = vmul.f32 %v10998_v1, %v11231_v40  ;;  %696 = vperm.xlu0 %10783, %v11269_v44   ;;  %v627_v54 = vadd.f32 %v11074_v46, %v605_v41 }
  0x48   : > { %v410_v57 = vsel %vm375_vm0, %v407_v35, %v409_v45  ;;  %v569_v61 = vrot.slane %v509_v31, 1  ;;  %v345_v62 = vmul.f32 %v11003_v2, %v11231_v40  ;;  %v571_v56 = vrot.slane %v510_v51, 1 }
  0x49   : > { %v604_v59 = vadd.f32 %v565_v50, %v479_v48  ;;  %v445_v63 = vadd.f32 %v410_v57, %v303_v17  ;;  %v465_v12 = vmul.f32 %v11008_v3, %v11274_v36  ;;  %v11291_v19 = vmax.f32 %v627_v54, 0.0 }
  0x4a   : > { %v406_v20 = vrot.slane %v345_v62, 1  ;;  %v508_v16 = vmul.f32 %v11015_v4, %v11274_v36  ;;  %v305_v26 = vmul.f32 %v10998_v1, %v11250_v5  ;;  %v572_v17 = vsel %vm375_vm0, %v569_v61, %v571_v56  ;;  %v11313_v62 = vld [vmem:[%s11010_s11 + $0xc0] sm:$0xff] }
  0x4b   : > { %18302 = vst [vmem:[#allocation11_spill] sm:$0xff] %v11291_v19  ;;  %v626_v29 = vadd.f32 %v11074_v46, %v604_v59  ;;  %v482_v30 = vadd.f32 %v466_v42, %v445_v63  ;;  %v349_v41 = vmul.f32 %v11003_v2, %v11250_v5  ;;  %711 = vperm.xlu1 %10784, %v11291_v19  }
  0x4c   : > { %v408_v45 = vsel %vm375_vm0, %v406_v20, %v407_v35  ;;  %v568_v31 = vrot.slane %v508_v16, 1  ;;  %v350_v48 = vmul.f32 %v11003_v2, %v11263_v27  ;;  %v468_v50 = vmul.f32 %v11008_v3, %v11289_v15 }
  0x4d   : > { %v11310_v51 = vmax.f32 %v626_v29, 0.0  ;;  %v607_v42 = vadd.f32 %v572_v17, %v482_v30  ;;  %v444_v54 = vadd.f32 %v408_v45, %v302_v52  ;;  %v412_v57 = vrot.slane %v349_v41, 1  ;;  %v11334_v30 = vld [vmem:[%s17855_s1 + $0x5] ss:$0 sm:$0xff] }
  0x4e   : > { %v570_v59 = vsel %vm375_vm0, %v568_v31, %v569_v61  ;;  %v414_v63 = vrot.slane %v350_v48, 1  ;;  %v512_v35 = vmul.f32 %v11015_v4, %v11289_v15  ;;  %v513_v56 = vmul.f32 %v11015_v4, %v11300_v33  ;;  %v11329_v61 = vld [vmem:[%s17855_s1 + $0x4] ss:$0 sm:$0xff] }
  0x4f   : > { %18303 = vst [vmem:[#allocation12_spill] sm:$0xff] %v11310_v51  ;;  %706 = vperm.xlu0 %10783, %v11310_v51   ;;  %v629_v20 = vadd.f32 %v11074_v46, %v607_v42  ;;  %v481_v16 = vadd.f32 %v465_v12, %v444_v54  ;;  %v304_v52 = vmul.f32 %v10998_v1, %v11274_v36  ;;  %v11344_v42 = vld [vmem:[%s17855_s1 + $0x6] ss:$0 sm:$0xff] }
  0x50   : > { %v348_v29 = vmul.f32 %v11003_v2, %v11274_v36  ;;  %v415_v17 = vsel %vm375_vm0, %v412_v57, %v414_v63  ;;  %v574_v41 = vrot.slane %v512_v35, 1  ;;  %v576_v12 = vrot.slane %v513_v56, 1 }
  0x51   : > { %v467_v1 = vmul.f32 %v11008_v3, %v11313_v62  ;;  %v11339_v45 = vmax.f32 %v629_v20, 0.0  ;;  %v606_v2 = vadd.f32 %v570_v59, %v481_v16  ;;  %v447_v31 = vadd.f32 %v415_v17, %v305_v26  ;;  %v11358_v26 = vld [vmem:[%s17855_s1 + $0x7] ss:$0 sm:$0xff] }
  0x52   : > { %v411_v48 = vrot.slane %v348_v29, 1  ;;  %v577_v54 = vsel %vm375_vm0, %v574_v41, %v576_v12  ;;  %v511_v63 = vmul.f32 %v11015_v4, %v11313_v62  ;;  %v1080_v35 = vmul.f32 %v11329_v61, %v11035_v14 }
  0x53   : > { %18304 = vst [vmem:[#allocation13_spill] sm:$0xff] %v11339_v45  ;;  %v11353_v3 = vmul.f32 %v11334_v30, %v11035_v14  ;;  %721 = vperm.xlu1 %10784, %v11339_v45   ;;  %v628_v59 = vadd.f32 %v11074_v46, %v606_v2  ;;  %v484_v56 = vadd.f32 %v468_v50, %v447_v31 }
  0x54   : > { %v413_v20 = vsel %vm375_vm0, %v411_v48, %v412_v57  ;;  %v11365_v4 = vmul.f32 %v11334_v30, %v11062_v37  ;;  %v573_v29 = vrot.slane %v511_v63, 1  ;;  %v1274_v17 = vmul.f32 %v11344_v42, %v11019_v6 }
  0x55   : > { %v446_v16 = vadd.f32 %v413_v20, %v304_v52  ;;  %v17865_v14 = vrot.slane %v11353_v3, 1  ;;  %v11370_v12 = vmax.f32 %v628_v59, 0.0  ;;  %v609_v0 = vadd.f32 %v577_v54, %v484_v56 }
  0x56   : > { %18305 = vst [vmem:[#allocation14_spill] sm:$0xff] %v11365_v4  ;;  %v17864_v45 = vrot.slane %v11365_v4, 1  ;;  %v11375_v50 = vmul.f32 %v11358_v26, %v11019_v6  ;;  %v575_v37 = vsel %vm375_vm0, %v573_v29, %v574_v41  ;;  %v11380_v52 = vmul.f32 %v11358_v26, %v11047_v23 }
  0x57   : > { %18306 = vst [vmem:[#allocation15_spill] sm:$0xff] %v11370_v12  ;;  %v483_v57 = vadd.f32 %v467_v1, %v446_v16  ;;  %v1083_v2 = vmul.f32 %v11329_v61, %v11019_v6  ;;  %716 = vperm.xlu0 %10783, %v11370_v12   ;;  %v631_v31 = vadd.f32 %v11074_v46, %v609_v0 }
  0x58   : > { %18307 = vst [vmem:[#allocation16_spill] sm:$0xff] %v11380_v52  ;;  %v1184_v48 = vsel %vm375_vm0, %v17865_v14, %v17864_v45  ;;  %v17867_v1 = vrot.slane %v11375_v50, 1  ;;  %v11394_v41 = vmul.f32 %v11334_v30, %v11019_v6  ;;  %v17866_v59 = vrot.slane %v11380_v52, 1 }
  0x59   : > { %v608_v54 = vadd.f32 %v575_v37, %v483_v57  ;;  %v1245_v63 = vadd.f32 %v1184_v48, %v1080_v35  ;;  %v11399_v56 = vmul.f32 %v11334_v30, %v11047_v23  ;;  %v11401_v0 = vmax.f32 %v631_v31, 0.0 }
  0x5a   : > { %18308 = vst [vmem:[#allocation17_spill] sm:$0xff] %v11394_v41  ;;  %v17871_v20 = vrot.slane %v11394_v41, 1  ;;  %v1277_v16 = vmul.f32 %v11344_v42, %v11025_v8  ;;  %v11408_v29 = vmul.f32 %v11358_v26, %v11025_v8  ;;  %v1378_v37 = vsel %vm375_vm0, %v17867_v1, %v17866_v59 }
  0x5b   : > { %18309 = vst [vmem:[#allocation18_spill] sm:$0xff] %v11399_v56  ;;  %18310 = vst [vmem:[#allocation19_spill] sm:$0xff] %v11401_v0  ;;  %v630_v57 = vadd.f32 %v11074_v46, %v608_v54  ;;  %v1298_v35 = vadd.f32 %v1274_v17, %v1245_v63  ;;  %v17870_v31 = vrot.slane %v11399_v56, 1  ;;  %731 = vperm.xlu1 %10784, %v11401_v0  }
  0x5c   : > { %18311 = vst [vmem:[#allocation20_spill] sm:$0xff] %v11408_v29  ;;  %v11420_v48 = vmul.f32 %v11358_v26, %v11051_v28  ;;  %v1085_v54 = vmul.f32 %v11329_v61, %v11022_v7  ;;  %v1138_v17 = vmul.f32 %v11334_v30, %v11022_v7  ;;  %v11436_v1 = vmul.f32 %v11334_v30, %v11025_v8 }
  0x5d   : > { %v11427_v63 = vmax.f32 %v630_v57, 0.0  ;;  %v1439_v14 = vadd.f32 %v1378_v37, %v1298_v35  ;;  %v1189_v59 = vsel %vm375_vm0, %v17871_v20, %v17870_v31  ;;  %v1279_v7 = vmul.f32 %v11344_v42, %v11108_v22 }
  0x5e   : > { %18312 = vst [vmem:[#allocation21_spill] sm:$0xff] %v11420_v48  ;;  %18314 = vst [vmem:[#allocation23_spill] sm:$0xff] %v11436_v1  ;;  %v1248_v45 = vadd.f32 %v1189_v59, %v1083_v2  ;;  %v17877_v52 = vrot.slane %v11420_v48, 1  ;;  %v1190_v4 = vrot.slane %v1138_v17, 1  ;;  %v1332_v37 = vmul.f32 %v11358_v26, %v11108_v22 }
  0x5f   : > { %18313 = vst [vmem:[#allocation22_spill] sm:$0xff] %v11427_v63  ;;  %726 = vperm.xlu0 %10783, %v11427_v63   ;;  %v1463_v57 = vadd.f32 %v11074_v46, %v1439_v14  ;;  %v11448_v31 = vmul.f32 %v11358_v26, %v11085_v55  ;;  %v17873_v2 = vmov 1   ;;  %v18316_v17 = vrot.slane %v11408_v29, 1 }
  0x60   : > { %10785 = vset.pattern.permute.xlu1 %v17873_v2  ;;  %v1301_v59 = vadd.f32 %v1277_v16, %v1248_v45  ;;  %v1087_v14 = vmul.f32 %v11329_v61, %v11051_v28  ;;  %v11460_v35 = vmul.f32 %v11334_v30, %v11051_v28  ;;  %v18319_v2 = vrot.slane %v11436_v1, 1 }
  0x61   : > { %18315 = vst [vmem:[#allocation24_spill] sm:$0xff] %v11448_v31  ;;  %v1383_v20 = vsel %vm375_vm0, %v18316_v17, %v17877_v52  ;;  %v11462_v56 = vmax.f32 %v1463_v57, 0.0  ;;  %776 = vperm.xlu1 %10785, %v11146_v53   ;;  %v1384_v16 = vrot.slane %v1332_v37, 1  ;;  %v17880_v48 = vrot.slane %v11448_v31, 1 }
  0x62   : > { %18317 = vst [vmem:[#allocation25_spill] sm:$0xff] %v11460_v35  ;;  %v1192_v45 = vsel %vm375_vm0, %v1190_v4, %v18319_v2  ;;  %v1442_v29 = vadd.f32 %v1383_v20, %v1301_v59  ;;  %v17881_v52 = vrot.slane %v11460_v35, 1  ;;  %v1281_v41 = vmul.f32 %v11344_v42, %v11095_v10 }
  0x63   : > { %18318 = vst [vmem:[#allocation26_spill] sm:$0xff] %v11462_v56  ;;  %v1250_v17 = vadd.f32 %v1192_v45, %v1085_v54  ;;  %1517 = vperm.xlu0 %10783, %v11462_v56   ;;  %v1386_v57 = vsel %vm375_vm0, %v1384_v16, %v17880_v48  ;;  %v11478_v1 = vmul.f32 %v11358_v26, %v11095_v10 }
  0x64   : > { %v1089_v4 = vmul.f32 %v11329_v61, %v11085_v55  ;;  %v11484_v20 = vmul.f32 %v11334_v30, %v11085_v55  ;;  %v1466_v54 = vadd.f32 %v11074_v46, %v1442_v29  ;;  %v1252_v2 = vadd.f32 %v17881_v52, %v1087_v14 }
  0x65   : > { %v1303_v37 = vadd.f32 %v1279_v7, %v1250_v17  ;;  %v11491_v59 = vmul.f32 %v11334_v30, %v11095_v10  ;;  %780 = vperm.xlu1 %10785, %v11101_v13   ;;  %v1283_v48 = vmul.f32 %v11344_v42, %v11125_v38  ;;  %v11500_v29 = vmul.f32 %v11358_v26, %v11125_v38 }
  0x66   : > { %18320 = vst [vmem:[#allocation27_spill] sm:$0xff] %v11484_v20  ;;  %v11502_v7 = vmax.f32 %v1466_v54, 0.0  ;;  %v1305_v17 = vadd.f32 %v1281_v41, %v1252_v2  ;;  %v11507_v52 = vmul.f32 %v11358_v26, %v11136_v47  ;;  %v1091_v16 = vmul.f32 %v11329_v61, %v11149_v58 }
  0x67   : > { %18321 = vst [vmem:[#allocation28_spill] sm:$0xff] %v11491_v59  ;;  %18322 = vst [vmem:[#allocation29_spill] sm:$0xff] %v11500_v29  ;;  %v1444_v14 = vadd.f32 %v1386_v57, %v1303_v37  ;;  %v17889_v10 = vrot.slane %v11491_v59, 1  ;;  %v1144_v56 = vmul.f32 %v11334_v30, %v11149_v58  ;;  %v18325_v41 = vrot.slane %v11478_v1, 1 }
  0x68   : > { %18323 = vst [vmem:[#allocation30_spill] sm:$0xff] %v11502_v7  ;;  %18324 = vst [vmem:[#allocation31_spill] sm:$0xff] %v11507_v52  ;;  %1532 = vperm.xlu0 %10783, %v11502_v7   ;;  %v18326_v37 = vrot.slane %v11484_v20, 1  ;;  %v11525_v45 = vmul.f32 %v11334_v30, %v11125_v38  ;;  %v17891_v7 = vrot.slane %v11507_v52, 1  ;;  %v11556_v52 = vmul.f32 %v11334_v30, %v11136_v47 }
  0x69   : > { %v1468_v54 = vadd.f32 %v11074_v46, %v1444_v14  ;;  %v1446_v57 = vadd.f32 %v18325_v41, %v1305_v17  ;;  %788 = vperm.xlu1 %10785, %v11187_v43   ;;  %v1200_v35 = vrot.slane %v1144_v56, 1  ;;  %v1285_v14 = vmul.f32 %v11344_v42, %v11192_v49 }
  0x6a   : > { %v1199_v2 = vsel %vm375_vm0, %v18326_v37, %v17889_v10  ;;  %18327 = vst [vmem:[#allocation32_spill] sm:$0xff] %v11525_v45  ;;  %v17896_v20 = vrot.slane %v11525_v45, 1  ;;  %v1338_v37 = vmul.f32 %v11358_v26, %v11192_v49  ;;  %v11544_v56 = vmul.f32 %v11358_v26, %v11168_v25  ;;  %18332 = vst [vmem:[#allocation36_spill] sm:$0xff] %v11556_v52 }
  0x6b   : > { %v1254_v31 = vadd.f32 %v1199_v2, %v1089_v4  ;;  %v11531_v17 = vmax.f32 %v1468_v54, 0.0  ;;  %v1470_v41 = vadd.f32 %v11074_v46, %v1446_v57  ;;  %v18329_v4 = vrot.slane %v11500_v29, 1 }
  0x6c   : > { %18330 = vst [vmem:[#allocation34_spill] sm:$0xff] %v11544_v56  ;;  %v1093_v54 = vmul.f32 %v11329_v61, %v11136_v47  ;;  %v17898_v29 = vrot.slane %v11544_v56, 1  ;;  %v11565_v45 = vmul.f32 %v11358_v26, %v11181_v34  ;;  %v11571_v47 = vmul.f32 %v11334_v30, %v11168_v25 }
  0x6d   : > { %18328 = vst [vmem:[#allocation33_spill] sm:$0xff] %v11531_v17  ;;  %v1307_v10 = vadd.f32 %v1283_v48, %v1254_v31  ;;  %v1393_v2 = vsel %vm375_vm0, %v18329_v4, %v17891_v7  ;;  %1542 = vperm.xlu0 %10783, %v11531_v17   ;;  %v11549_v57 = vmax.f32 %v1470_v41, 0.0  ;;  %v1202_v31 = vsel %vm375_vm0, %v1200_v35, %v17896_v20 }
  0x6e   : > { %v1394_v48 = vrot.slane %v1338_v37, 1  ;;  %796 = vperm.xlu1 %10785, %v11228_v32   ;;  %v1256_v7 = vadd.f32 %v1202_v31, %v1091_v16  ;;  %v1287_v17 = vmul.f32 %v11344_v42, %v11181_v34  ;;  %v17899_v41 = vrot.slane %v11556_v52, 1  ;;  %18333 = vst [vmem:[#allocation37_spill] sm:$0xff] %v11565_v45  ;;  %18334 = vst [vmem:[#allocation38_spill] sm:$0xff] %v11571_v47 }
  0x6f   : > { %18331 = vst [vmem:[#allocation35_spill] sm:$0xff] %v11549_v57  ;;  %v1448_v4 = vadd.f32 %v1393_v2, %v1307_v10  ;;  %v1095_v35 = vmul.f32 %v11329_v61, %v11168_v25  ;;  %v11579_v2 = vmul.f32 %v11334_v30, %v11181_v34  ;;  %v17906_v59 = vrot.slane %v11571_v47, 1 }
  0x70   : > { %v1309_v10 = vadd.f32 %v1285_v14, %v1256_v7  ;;  %v1396_v37 = vsel %vm375_vm0, %v1394_v48, %v17898_v29  ;;  %v1258_v31 = vadd.f32 %v17899_v41, %v1093_v54  ;;  %v1289_v7 = vmul.f32 %v11344_v42, %v11207_v9 }
  0x71   : > { %v1472_v16 = vadd.f32 %v11074_v46, %v1448_v4  ;;  %18335 = vst [vmem:[#allocation39_spill] sm:$0xff] %v11579_v2  ;;  %1552 = vperm.xlu0 %10783, %v11549_v57   ;;  %v17905_v34 = vrot.slane %v11579_v2, 1  ;;  %v11594_v4 = vmul.f32 %v11358_v26, %v11207_v9  ;;  %v11598_v54 = vmul.f32 %v11358_v26, %v11218_v21 }
  0x72   : > { %804 = vperm.xlu1 %10785, %v11269_v44   ;;  %v1450_v48 = vadd.f32 %v1396_v37, %v1309_v10  ;;  %v1311_v29 = vadd.f32 %v1287_v17, %v1258_v31  ;;  %v1097_v41 = vmul.f32 %v11329_v61, %v11231_v40  ;;  %v11613_v37 = vmul.f32 %v11334_v30, %v11207_v9 }
  0x73   : > { %v11588_v14 = vmax.f32 %v1472_v16, 0.0  ;;  %18337 = vst [vmem:[#allocation41_spill] sm:$0xff] %v11594_v4  ;;  %18338 = vst [vmem:[#allocation42_spill] sm:$0xff] %v11598_v54  ;;  %v1150_v16 = vmul.f32 %v11334_v30, %v11231_v40  ;;  %v1209_v10 = vsel %vm375_vm0, %v17906_v59, %v17905_v34  ;;  %v18340_v31 = vrot.slane %v11565_v45, 1 }
  0x74   : > { %v1474_v20 = vadd.f32 %v11074_v46, %v1450_v48  ;;  %18339 = vst [vmem:[#allocation43_spill] sm:$0xff] %v11613_v37  ;;  %v1260_v56 = vadd.f32 %v1209_v10, %v1095_v35  ;;  %v17910_v48 = vrot.slane %v11598_v54, 1  ;;  %v17911_v34 = vrot.slane %v11613_v37, 1 }
  0x75   : > { %18336 = vst [vmem:[#allocation40_spill] sm:$0xff] %v11588_v14  ;;  %1562 = vperm.xlu0 %10783, %v11588_v14   ;;  %v1452_v57 = vadd.f32 %v18340_v31, %v1311_v29  ;;  %v1210_v52 = vrot.slane %v1150_v16, 1  ;;  %v1291_v59 = vmul.f32 %v11344_v42, %v11274_v36  ;;  %v1344_v17 = vmul.f32 %v11358_v26, %v11274_v36 }
  0x76   : > { %v11619_v2 = vmax.f32 %v1474_v20, 0.0  ;;  %812 = vperm.xlu1 %10785, %v11310_v51   ;;  %v1313_v47 = vadd.f32 %v1289_v7, %v1260_v56  ;;  %v18342_v29 = vrot.slane %v11594_v4, 1  ;;  %v11635_v35 = vmul.f32 %v11358_v26, %v11250_v5 }
  0x77   : > { %v1476_v14 = vadd.f32 %v11074_v46, %v1452_v57  ;;  %v1212_v16 = vsel %vm375_vm0, %v1210_v52, %v17911_v34  ;;  %v1404_v10 = vrot.slane %v1344_v17, 1  ;;  %v1099_v31 = vmul.f32 %v11329_v61, %v11218_v21 }
  0x78   : > { %18341 = vst [vmem:[#allocation44_spill] sm:$0xff] %v11619_v2  ;;  %v1403_v20 = vsel %vm375_vm0, %v18342_v29, %v17910_v48  ;;  %18343 = vst [vmem:[#allocation45_spill] sm:$0xff] %v11635_v35  ;;  %v11644_v56 = vmul.f32 %v11334_v30, %v11218_v21  ;;  %v1262_v29 = vadd.f32 %v1212_v16, %v1097_v41  ;;  %v17915_v48 = vrot.slane %v11635_v35, 1  ;;  %v11671_v16 = vld [vmem:[%s17855_s1 + $0x8] ss:$0 sm:$0xff] }
  0x79   : > { %1572 = vperm.xlu0 %10783, %v11619_v2   ;;  %v11647_v57 = vmax.f32 %v1476_v14, 0.0  ;;  %v1454_v7 = vadd.f32 %v1403_v20, %v1313_v47  ;;  %v1293_v17 = vmul.f32 %v11344_v42, %v11263_v27  ;;  %v11656_v34 = vmul.f32 %v11358_v26, %v11263_v27 }
  0x7a   : > { %18344 = vst [vmem:[#allocation46_spill] sm:$0xff] %v11644_v56  ;;  %820 = vperm.xlu1 %10785, %v11370_v12   ;;  %v17916_v52 = vrot.slane %v11644_v56, 1  ;;  %v1101_v21 = vmul.f32 %v11329_v61, %v11250_v5  ;;  %v1315_v47 = vadd.f32 %v1291_v59, %v1262_v29  ;;  %v1406_v41 = vsel %vm375_vm0, %v1404_v10, %v17915_v48 }
  0x7b   : > { %18345 = vst [vmem:[#allocation47_spill] sm:$0xff] %v11647_v57  ;;  %18346 = vst [vmem:[#allocation48_spill] sm:$0xff] %v11656_v34  ;;  %v1478_v14 = vadd.f32 %v11074_v46, %v1454_v7  ;;  %v11666_v20 = vmul.f32 %v11334_v30, %v11250_v5  ;;  %v11678_v59 = vmul.f32 %v11334_v30, %v11263_v27  ;;  %v11685_v7 = vld [vmem:[%s17855_s1 + $0x9] ss:$0 sm:$0xff]  ;;  %v11698_v27 = vld [vmem:[%s17855_s1 + $0xa] ss:$0 sm:$0xff] }
  0x7c   : > { %v1264_v2 = vadd.f32 %v17916_v52, %v1099_v31  ;;  %v1295_v10 = vmul.f32 %v11344_v42, %v11289_v15  ;;  %v1456_v48 = vadd.f32 %v1406_v41, %v1315_v47  ;;  %v11693_v52 = vmul.f32 %v11358_v26, %v11289_v15 }
  0x7d   : > { %1582 = vperm.xlu0 %10783, %v11647_v57   ;;  %v11688_v29 = vmax.f32 %v1478_v14, 0.0  ;;  %v11704_v14 = vmul.f32 %v11358_v26, %v11300_v33  ;;  %v4733_v47 = vmul.f32 %v11671_v16, %v11019_v6  ;;  %v11712_v57 = vmul.f32 %v11685_v7, %v11019_v6 }
  0x7e   : > { %828 = vperm.xlu1 %10785, %v11427_v63   ;;  %v1317_v54 = vadd.f32 %v1293_v17, %v1264_v2  ;;  %v1480_v41 = vadd.f32 %v11074_v46, %v1456_v48  ;;  %v4771_v2 = vmul.f32 %v11685_v7, %v11047_v23  ;;  %v11719_v17 = vld [vmem:[%s17855_s1 + $0xb] ss:$0 sm:$0xff]  ;;  %v18349_v33 = vrot.slane %v11656_v34, 1 }
  0x7f   : > { %18347 = vst [vmem:[#allocation49_spill] sm:$0xff] %v11688_v29  ;;  %18348 = vst [vmem:[#allocation50_spill] sm:$0xff] %v11712_v57  ;;  %v18350_v4 = vrot.slane %v11678_v59, 1  ;;  %v18351_v48 = vrot.slane %v11666_v20, 1  ;;  %v17929_v6 = vrot.slane %v11704_v14, 1  ;;  %v4895_v37 = vmul.f32 %v11698_v27, %v11025_v8 }
  0x80   : > { %v1458_v35 = vadd.f32 %v18349_v33, %v1317_v54  ;;  %v11732_v23 = vmax.f32 %v1480_v41, 0.0  ;;  %v17930_v45 = vrot.slane %v11712_v57, 1  ;;  %v4820_v34 = vrot.slane %v4771_v2, 1 }
  0x81   : > { %v1219_v31 = vsel %vm375_vm0, %v18351_v48, %v18350_v4  ;;  %1592 = vperm.xlu0 %10783, %v11688_v29   ;;  %v17927_v54 = vmov 2   ;;  %v18353_v4 = vrot.slane %v11693_v52, 1  ;;  %v11744_v29 = vmul.f32 %v11719_v17, %v11025_v8 }
  0x82   : > { %18352 = vst [vmem:[#allocation51_spill] sm:$0xff] %v11732_v23  ;;  %v1266_v56 = vadd.f32 %v1219_v31, %v1101_v21  ;;  %10786 = vset.pattern.permute.xlu1 %v17927_v54  ;;  %v1482_v33 = vadd.f32 %v11074_v46, %v1458_v35  ;;  %v4933_v21 = vmul.f32 %v11719_v17, %v11051_v28 }
  0x83   : > { %v1413_v48 = vsel %vm375_vm0, %v18353_v4, %v17929_v6  ;;  %18354 = vst [vmem:[#allocation52_spill] sm:$0xff] %v11744_v29  ;;  %873 = vperm.xlu1 %10786, %v11111_v24   ;;  %v4821_v35 = vsel %vm375_vm0, %v17930_v45, %v4820_v34  ;;  %v4736_v41 = vmul.f32 %v11671_v16, %v11108_v22  ;;  %v17931_v54 = vrot.slane %v11744_v29, 1 }
  0x84   : > { %v1319_v31 = vadd.f32 %v1295_v10, %v1266_v56  ;;  %v4775_v2 = vmul.f32 %v11685_v7, %v11108_v22  ;;  %v11756_v4 = vmax.f32 %v1482_v33, 0.0  ;;  %v4874_v8 = vadd.f32 %v4821_v35, %v4733_v47 }
  0x85   : > { %v4982_v6 = vrot.slane %v4933_v21, 1  ;;  %1602 = vperm.xlu0 %10783, %v11732_v23   ;;  %v11762_v56 = vmul.f32 %v11685_v7, %v11085_v55  ;;  %v4898_v10 = vmul.f32 %v11698_v27, %v11149_v58  ;;  %v4937_v47 = vmul.f32 %v11719_v17, %v11149_v58 }
  0x86   : > { %18355 = vst [vmem:[#allocation53_spill] sm:$0xff] %v11756_v4  ;;  %v1460_v28 = vadd.f32 %v1413_v48, %v1319_v31  ;;  %v4827_v34 = vrot.slane %v4775_v2, 1  ;;  %v4911_v45 = vadd.f32 %v4895_v37, %v4874_v8  ;;  %v11773_v33 = vmul.f32 %v11719_v17, %v11125_v38 }
  0x87   : > { %18356 = vst [vmem:[#allocation54_spill] sm:$0xff] %v11762_v56  ;;  %v4983_v22 = vsel %vm375_vm0, %v17931_v54, %v4982_v6  ;;  %881 = vperm.xlu1 %10786, %v11101_v13   ;;  %v17933_v48 = vrot.slane %v11762_v56, 1  ;;  %v4738_v37 = vmul.f32 %v11671_v16, %v11149_v58  ;;  %v4778_v21 = vmul.f32 %v11685_v7, %v11149_v58 }
  0x88   : > { %18357 = vst [vmem:[#allocation55_spill] sm:$0xff] %v11773_v33  ;;  %v1484_v55 = vadd.f32 %v11074_v46, %v1460_v28  ;;  %v5036_v6 = vadd.f32 %v4983_v22, %v4911_v45  ;;  %v4989_v31 = vrot.slane %v4937_v47, 1  ;;  %v17932_v35 = vrot.slane %v11773_v33, 1 }
  0x89   : > { %v11785_v2 = vmul.f32 %v11685_v7, %v11125_v38  ;;  %1612 = vperm.xlu0 %10783, %v11756_v4   ;;  %v4829_v28 = vsel %vm375_vm0, %v4827_v34, %v17933_v48  ;;  %v4832_v54 = vrot.slane %v4778_v21, 1  ;;  %v4900_v58 = vmul.f32 %v11698_v27, %v11192_v49 }
  0x8a   : > { %v11788_v8 = vmax.f32 %v1484_v55, 0.0  ;;  %v5052_v45 = vadd.f32 %v11074_v46, %v5036_v6  ;;  %v4877_v22 = vadd.f32 %v4829_v28, %v4736_v41  ;;  %v4991_v38 = vsel %vm375_vm0, %v4989_v31, %v17932_v35 }
  0x8b   : > { %18358 = vst [vmem:[#allocation56_spill] sm:$0xff] %v11785_v2  ;;  %v17944_v47 = vrot.slane %v11785_v2, 1  ;;  %885 = vperm.xlu1 %10786, %v11127_v39   ;;  %v4940_v55 = vmul.f32 %v11719_v17, %v11192_v49  ;;  %v11805_v34 = vmul.f32 %v11719_v17, %v11168_v25  ;;  %v4740_v21 = vmul.f32 %v11671_v16, %v11192_v49 }
  0x8c   : > { %18359 = vst [vmem:[#allocation57_spill] sm:$0xff] %v11788_v8  ;;  %v4781_v41 = vmul.f32 %v11685_v7, %v11192_v49  ;;  %v11811_v6 = vmax.f32 %v5052_v45, 0.0  ;;  %v4914_v31 = vadd.f32 %v4898_v10, %v4877_v22  ;;  %v11818_v35 = vmul.f32 %v11685_v7, %v11168_v25 }
  0x8d   : > { %18360 = vst [vmem:[#allocation58_spill] sm:$0xff] %v11805_v34  ;;  %v4834_v28 = vsel %vm375_vm0, %v4832_v54, %v17944_v47  ;;  %1622 = vperm.xlu0 %10783, %v11788_v8   ;;  %v4994_v4 = vrot.slane %v4940_v55, 1  ;;  %v17940_v23 = vrot.slane %v11805_v34, 1  ;;  %v4902_v10 = vmul.f32 %v11698_v27, %v11231_v40 }
  0x8e   : > { %18361 = vst [vmem:[#allocation59_spill] sm:$0xff] %v11811_v6  ;;  %18362 = vst [vmem:[#allocation60_spill] sm:$0xff] %v11818_v35  ;;  %v4879_v48 = vadd.f32 %v4834_v28, %v4738_v37  ;;  %v4837_v33 = vrot.slane %v4781_v41, 1  ;;  %v5039_v56 = vadd.f32 %v4991_v38, %v4914_v31  ;;  %v17942_v49 = vrot.slane %v11818_v35, 1  ;;  %v12137_v35 = vld [vmem:[%s11010_s11 + $0x88] sm:$0x3] }
  0x8f   : > { %v4943_v54 = vmul.f32 %v11719_v17, %v11231_v40  ;;  %893 = vperm.xlu1 %10786, %v11165_v18   ;;  %v4996_v37 = vsel %vm375_vm0, %v4994_v4, %v17940_v23  ;;  %v11833_v45 = vmul.f32 %v11719_v17, %v11207_v9  ;;  %v4742_v22 = vmul.f32 %v11671_v16, %v11231_v40 }
  0x90   : > { %v4916_v25 = vadd.f32 %v4900_v58, %v4879_v48  ;;  %v5055_v38 = vadd.f32 %v11074_v46, %v5039_v56  ;;  %v4839_v55 = vsel %vm375_vm0, %v4837_v33, %v17942_v49  ;;  %v4784_v48 = vmul.f32 %v11685_v7, %v11231_v40  ;;  %v11859_v40 = vld [vmem:[%s17856_s2] ss:$0 sm:$0xff] }
  0x91   : > { %18363 = vst [vmem:[#allocation61_spill] sm:$0xff] %v11833_v45  ;;  %v4999_v41 = vrot.slane %v4943_v54, 1  ;;  %5090 = vperm.xlu0 %10783, %v11811_v6   ;;  %v4881_v58 = vadd.f32 %v4839_v55, %v4740_v21  ;;  %v17941_v31 = vrot.slane %v11833_v45, 1  ;;  %v11847_v28 = vmul.f32 %v11685_v7, %v11207_v9 }
  0x92   : > { %v5041_v4 = vadd.f32 %v4996_v37, %v4916_v25  ;;  %v11849_v23 = vmax.f32 %v5055_v38, 0.0  ;;  %v4842_v46 = vrot.slane %v4784_v48, 1  ;;  %v4904_v56 = vmul.f32 %v11698_v27, %v11274_v36 }
  0x93   : > { %18364 = vst [vmem:[#allocation62_spill] sm:$0xff] %v11847_v28  ;;  %v4946_v33 = vmul.f32 %v11719_v17, %v11274_v36  ;;  %901 = vperm.xlu1 %10786, %v11209_v11   ;;  %v4918_v9 = vadd.f32 %v4902_v10, %v4881_v58  ;;  %v5001_v54 = vsel %vm375_vm0, %v4999_v41, %v17941_v31  ;;  %v17943_v25 = vrot.slane %v11847_v28, 1 }
  0x94   : > { %18365 = vst [vmem:[#allocation63_spill] sm:$0xff] %v11849_v23  ;;  %v5057_v21 = vadd.f32 %v11859_v40, %v5041_v4  ;;  %v11868_v37 = vmul.f32 %v11719_v17, %v11250_v5  ;;  %v4744_v55 = vmul.f32 %v11671_v16, %v11274_v36  ;;  %v4787_v48 = vmul.f32 %v11685_v7, %v11274_v36 }
  0x95   : > { %v5004_v38 = vrot.slane %v4946_v33, 1  ;;  %5105 = vperm.xlu0 %10783, %v11849_v23   ;;  %v5043_v41 = vadd.f32 %v5001_v54, %v4918_v9  ;;  %v4844_v4 = vsel %vm375_vm0, %v4842_v46, %v17943_v25  ;;  %v11882_v58 = vmul.f32 %v11685_v7, %v11250_v5 }
  0x96   : > { %18366 = vst [vmem:[#allocation64_spill] sm:$0xff] %v11868_v37  ;;  %v11875_v10 = vmax.f32 %v5057_v21, 0.0  ;;  %v4883_v33 = vadd.f32 %v4844_v4, %v4742_v22  ;;  %v17945_v31 = vrot.slane %v11868_v37, 1  ;;  %v4847_v49 = vrot.slane %v4787_v48, 1  ;;  %v280_v48 = vld [vmem:[%s11010_s11 + $0xd8] sm:$0xff]  ;;  %v11901_v4 = vld [vmem:[%s11010_s11 + $0xe0] sm:$0xff] }
  0x97   : > { %18368 = vst [vmem:[#allocation66_spill] sm:$0xff] %v11882_v58  ;;  %v4906_v36 = vmul.f32 %v11698_v27, %v11313_v62  ;;  %909 = vperm.xlu1 %10786, %v11247_v60   ;;  %v5059_v21 = vadd.f32 %v11859_v40, %v5043_v41  ;;  %v17951_v9 = vrot.slane %v11882_v58, 1  ;;  %v4949_v46 = vmul.f32 %v11719_v17, %v11313_v62 }
  0x98   : > { %18367 = vst [vmem:[#allocation65_spill] sm:$0xff] %v11875_v10  ;;  %v11894_v5 = vmul.f32 %v11719_v17, %v11289_v15  ;;  %v4920_v22 = vadd.f32 %v4904_v56, %v4883_v33  ;;  %v5006_v54 = vsel %vm375_vm0, %v5004_v38, %v17945_v31  ;;  %v4746_v41 = vmul.f32 %v11671_v16, %v11313_v62 }
  0x99   : > { %v4790_v25 = vmul.f32 %v11685_v7, %v11313_v62  ;;  %5115 = vperm.xlu0 %10783, %v11875_v10   ;;  %v11908_v47 = vmax.f32 %v5059_v21, 0.0  ;;  %v4849_v56 = vsel %vm375_vm0, %v4847_v49, %v17951_v9  ;;  %v5009_v33 = vrot.slane %v4949_v46, 1  ;;  %v11921_v62 = vld [vmem:[%s17855_s1 + $0xc] ss:$0 sm:$0xff]  ;;  %v11926_v49 = vld [vmem:[%s17855_s1 + $0xd] ss:$0 sm:$0xff] }
  0x9a   : > { %18369 = vst [vmem:[#allocation67_spill] sm:$0xff] %v11894_v5  ;;  %v17950_v38 = vrot.slane %v11894_v5, 1  ;;  %v5045_v31 = vadd.f32 %v5006_v54, %v4920_v22  ;;  %v4885_v23 = vadd.f32 %v4849_v56, %v4744_v55  ;;  %v11916_v6 = vmul.f32 %v11685_v7, %v11289_v15  ;;  %v11943_v54 = vld [vmem:[%s17855_s1 + $0xe] ss:$0 sm:$0xff]  ;;  %v10804_v56 = vld [vmem:[%s11010_s11 + $0x20] sm:$0xff] }
  0x9b   : > { %18370 = vst [vmem:[#allocation68_spill] sm:$0xff] %v11908_v47  ;;  %v4852_v16 = vrot.slane %v4790_v25, 1  ;;  %917 = vperm.xlu1 %10786, %v11291_v19   ;;  %v4908_v15 = vmul.f32 %v11698_v27, %v280_v48  ;;  %v4952_v7 = vmul.f32 %v11719_v17, %v280_v48  ;;  %v11936_v25 = vmul.f32 %v11719_v17, %v11901_v4 }
  0x9c   : > { %18371 = vst [vmem:[#allocation69_spill] sm:$0xff] %v11916_v6  ;;  %v5011_v55 = vsel %vm375_vm0, %v5009_v33, %v17950_v38  ;;  %v5061_v21 = vadd.f32 %v11859_v40, %v5045_v31  ;;  %v4922_v46 = vadd.f32 %v4906_v36, %v4885_v23  ;;  %v17956_v22 = vrot.slane %v11916_v6, 1  ;;  %v11955_v23 = vld [vmem:[%s17855_s1 + $0xf] ss:$0 sm:$0xff]  ;;  %v11963_v38 = vld [vmem:[%s11010_s11 + $0x28] sm:$0x3] }
  0x9d   : > { %18372 = vst [vmem:[#allocation70_spill] sm:$0xff] %v11936_v25  ;;  %5125 = vperm.xlu0 %10783, %v11908_v47   ;;  %v5014_v27 = vrot.slane %v4952_v7, 1  ;;  %v5489_v17 = vmul.f32 %v10804_v56, %v11921_v62  ;;  %v11950_v33 = vmul.f32 %v10804_v56, %v11926_v49  ;;  %v11967_v9 = vmul.f32 %v11963_v38, %v11926_v49  ;;  %v18376_v56 = vld [vmem:[#allocation13_spill] sm:$0xff] }
  0x9e   : > { %v11957_v31 = vmax.f32 %v5061_v21, 0.0  ;;  %v5047_v36 = vadd.f32 %v5011_v55, %v4922_v46  ;;  %v4854_v7 = vsel %vm375_vm0, %v4852_v16, %v17956_v22  ;;  %v18377_v47 = vrot.slane %v11936_v25, 1  ;;  %v11975_v55 = vld [vmem:[%s11010_s11 + $0x38] sm:$0xff] }
  0x9f   : > { %18373 = vst [vmem:[#allocation71_spill] sm:$0xff] %v11950_v33  ;;  %18375 = vst [vmem:[#allocation73_spill] sm:$0xff] %v11967_v9  ;;  %925 = vperm.xlu1 %10786, %v18376_v56   ;;  %v4887_v48 = vadd.f32 %v4854_v7, %v4746_v41  ;;  %v5683_v16 = vmul.f32 %v11975_v55, %v11943_v54  ;;  %v11983_v5 = vmul.f32 %v11975_v55, %v11955_v23  ;;  %v11986_v41 = vld [vmem:[%s11010_s11 + $0x40] sm:$0x3] }
  0xa0   : > { %18374 = vst [vmem:[#allocation72_spill] sm:$0xff] %v11957_v31  ;;  %v5016_v10 = vsel %vm375_vm0, %v5014_v27, %v18377_v47  ;;  %v5063_v46 = vadd.f32 %v11859_v40, %v5047_v36  ;;  %v11990_v47 = vmul.f32 %v11986_v41, %v11955_v23  ;;  %v5492_v7 = vmul.f32 %v11975_v55, %v11921_v62 }
  0xa1   : > { %18378 = vst [vmem:[#allocation74_spill] sm:$0xff] %v11983_v5  ;;  %5135 = vperm.xlu0 %10783, %v11957_v31   ;;  %v4924_v27 = vadd.f32 %v4908_v15, %v4887_v48  ;;  %v11997_v36 = vmul.f32 %v11975_v55, %v11926_v49  ;;  %v12001_v21 = vmul.f32 %v11986_v41, %v11926_v49  ;;  %v18383_v25 = vrot.slane %v11967_v9, 1 }
  0xa2   : > { %18379 = vst [vmem:[#allocation75_spill] sm:$0xff] %v11990_v47  ;;  %v12003_v22 = vmax.f32 %v5063_v46, 0.0  ;;  %v18384_v6 = vrot.slane %v11950_v33, 1  ;;  %v17969_v48 = vrot.slane %v11983_v5, 1  ;;  %v17968_v31 = vrot.slane %v11990_v47, 1 }
  0xa3   : > { %18380 = vst [vmem:[#allocation76_spill] sm:$0xff] %v11997_v36  ;;  %18381 = vst [vmem:[#allocation77_spill] sm:$0xff] %v12001_v21  ;;  %933 = vperm.xlu1 %10786, %v11401_v0   ;;  %v5049_v37 = vadd.f32 %v5016_v10, %v4924_v27  ;;  %v17975_v45 = vrot.slane %v11997_v36, 1  ;;  %v17974_v46 = vrot.slane %v12001_v21, 1  ;;  %v12030_v10 = vld [vmem:[%s11010_s11 + $0x58] sm:$0x3] }
  0xa4   : > { %18382 = vst [vmem:[#allocation78_spill] sm:$0xff] %v12003_v22  ;;  %v5593_v15 = vsel %vm375_vm0, %v18384_v6, %v18383_v25  ;;  %v5787_v9 = vsel %vm375_vm0, %v17969_v48, %v17968_v31  ;;  %v12021_v6 = vld [vmem:[%s11010_s11 + $0x50] sm:$0xff]  ;;  %v12044_v48 = vld [vmem:[%s11010_s11 + $0x48] sm:$0xff] }
  0xa5   : > { %v5654_v8 = vadd.f32 %v5593_v15, %v5489_v17  ;;  %v5686_v25 = vmul.f32 %v12021_v6, %v11943_v54  ;;  %v12027_v33 = vmul.f32 %v12021_v6, %v11955_v23  ;;  %v12034_v17 = vmul.f32 %v12030_v10, %v11955_v23  ;;  %5145 = vperm.xlu0 %10783, %v12003_v22   ;;  %v12060_v22 = vld [vmem:[%s11010_s11 + $0x60] sm:$0xff]  ;;  %v12076_v36 = vld [vmem:[%s11010_s11 + $0x68] sm:$0xff] }
  0xa6   : > { %v5065_v27 = vadd.f32 %v11859_v40, %v5049_v37  ;;  %v5598_v31 = vsel %vm375_vm0, %v17975_v45, %v17974_v46  ;;  %v5494_v47 = vmul.f32 %v12044_v48, %v11921_v62  ;;  %v5547_v37 = vmul.f32 %v12044_v48, %v11926_v49  ;;  %v12166_v57 = vpop.permute.xlu1 %666 }
  0xa7   : > { %18385 = vst [vmem:[#allocation79_spill] sm:$0xff] %v12027_v33  ;;  %18386 = vst [vmem:[#allocation80_spill] sm:$0xff] %v12034_v17  ;;  %v5707_v15 = vadd.f32 %v5683_v16, %v5654_v8  ;;  %v5657_v5 = vadd.f32 %v5598_v31, %v5492_v7  ;;  %v17983_v58 = vrot.slane %v12027_v33, 1  ;;  %v17982_v34 = vrot.slane %v12034_v17, 1 }
  0xa8   : > { %v12052_v8 = vmax.f32 %v5065_v27, 0.0  ;;  %v17978_v16 = vmov 3   ;;  %v12057_v45 = vmul.f32 %v12021_v6, %v11926_v49  ;;  %v5688_v31 = vmul.f32 %v12060_v22, %v11943_v54  ;;  %18402 = vst [vmem:[#allocation93_spill] sm:$0xff] %v12166_v57 }
  0xa9   : > { %10787 = vset.pattern.permute.xlu1 %v17978_v16  ;;  %v5848_v46 = vadd.f32 %v5787_v9, %v5707_v15  ;;  %v5710_v7 = vadd.f32 %v5686_v25, %v5657_v5  ;;  %v5792_v27 = vsel %vm375_vm0, %v17983_v58, %v17982_v34  ;;  %v5599_v9 = vrot.slane %v5547_v37, 1 }
  0xaa   : > { %18387 = vst [vmem:[#allocation81_spill] sm:$0xff] %v12052_v8  ;;  %18388 = vst [vmem:[#allocation82_spill] sm:$0xff] %v12057_v45  ;;  %978 = vperm.xlu1 %10787, %v11146_v53   ;;  %v5741_v15 = vmul.f32 %v12060_v22, %v11955_v23  ;;  %5155 = vperm.xlu0 %10783, %v12052_v8   ;;  %v12080_v5 = vmul.f32 %v12076_v36, %v11955_v23  ;;  %v12089_v8 = vld [vmem:[%s11010_s11 + $0x70] sm:$0x3]  ;;  %v18392_v53 = vrot.slane %v12057_v45, 1 }
  0xab   : > { %v5872_v16 = vadd.f32 %v11859_v40, %v5848_v46  ;;  %v5496_v25 = vmul.f32 %v12030_v10, %v11921_v62  ;;  %v5851_v34 = vadd.f32 %v5792_v27, %v5710_v7  ;;  %v12086_v58 = vmul.f32 %v12030_v10, %v11926_v49 }
  0xac   : > { %18389 = vst [vmem:[#allocation83_spill] sm:$0xff] %v12080_v5  ;;  %v5793_v37 = vrot.slane %v5741_v15, 1  ;;  %v5690_v46 = vmul.f32 %v12089_v8, %v11943_v54  ;;  %v5601_v17 = vsel %vm375_vm0, %v5599_v9, %v18392_v53  ;;  %v17993_v33 = vrot.slane %v12080_v5, 1  ;;  %v12126_v5 = vld [vmem:[%s11010_s11 + $0x80] sm:$0xff] }
  0xad   : > { %18390 = vst [vmem:[#allocation84_spill] sm:$0xff] %v12086_v58  ;;  %v12093_v21 = vmax.f32 %v5872_v16, 0.0  ;;  %v12101_v7 = vmul.f32 %v12089_v8, %v11955_v23  ;;  %v5875_v27 = vadd.f32 %v11859_v40, %v5851_v34  ;;  %v5659_v15 = vadd.f32 %v5601_v17, %v5494_v47 }
  0xae   : > { %982 = vperm.xlu1 %10787, %v11101_v13   ;;  %v17996_v16 = vrot.slane %v12086_v58, 1  ;;  %v5498_v45 = vmul.f32 %v12076_v36, %v11921_v62  ;;  %v5795_v53 = vsel %vm375_vm0, %v5793_v37, %v17993_v33  ;;  %v12115_v13 = vmul.f32 %v12076_v36, %v11926_v49 }
  0xaf   : > { %18391 = vst [vmem:[#allocation85_spill] sm:$0xff] %v12093_v21  ;;  %18393 = vst [vmem:[#allocation86_spill] sm:$0xff] %v12101_v7  ;;  %5926 = vperm.xlu0 %10783, %v12093_v21   ;;  %v12119_v34 = vmul.f32 %v12089_v8, %v11926_v49  ;;  %v12121_v47 = vmax.f32 %v5875_v27, 0.0  ;;  %v5712_v17 = vadd.f32 %v5688_v31, %v5659_v15  ;;  %v12145_v15 = vld [vmem:[%s11010_s11 + $0x78] sm:$0xff] }
  0xb0   : > { %18394 = vst [vmem:[#allocation87_spill] sm:$0xff] %v12115_v13  ;;  %v5661_v21 = vadd.f32 %v17996_v16, %v5496_v25  ;;  %v5692_v37 = vmul.f32 %v12126_v5, %v11943_v54  ;;  %v12134_v28 = vmul.f32 %v12126_v5, %v11955_v23  ;;  %v12141_v31 = vmul.f32 %v12137_v35, %v11955_v23 }
  0xb1   : > { %18395 = vst [vmem:[#allocation88_spill] sm:$0xff] %v12119_v34  ;;  %18396 = vst [vmem:[#allocation89_spill] sm:$0xff] %v12121_v47  ;;  %v18005_v9 = vrot.slane %v12119_v34, 1  ;;  %v5853_v25 = vadd.f32 %v5795_v53, %v5712_v17  ;;  %v5500_v16 = vmul.f32 %v12145_v15, %v11921_v62  ;;  %v5553_v33 = vmul.f32 %v12145_v15, %v11926_v49 }
  0xb2   : > { %18397 = vst [vmem:[#allocation90_spill] sm:$0xff] %v12134_v28  ;;  %18398 = vst [vmem:[#allocation91_spill] sm:$0xff] %v12141_v31  ;;  %990 = vperm.xlu1 %10787, %v11187_v43   ;;  %v5714_v27 = vadd.f32 %v5690_v46, %v5661_v21  ;;  %v18399_v58 = vrot.slane %v12115_v13, 1  ;;  %v18008_v53 = vrot.slane %v12134_v28, 1  ;;  %v18007_v21 = vrot.slane %v12141_v31, 1  ;;  %v12175_v13 = vld [vmem:[%s11010_s11 + $0x90] sm:$0xff]  ;;  %v12195_v31 = vpop.permute.xlu0 %656 }
  0xb3   : > { %5941 = vperm.xlu0 %10783, %v12121_v47   ;;  %v12161_v46 = vmul.f32 %v12126_v5, %v11926_v49  ;;  %v5877_v17 = vadd.f32 %v11859_v40, %v5853_v25  ;;  %v18401_v43 = vrot.slane %v12101_v7, 1  ;;  %v5609_v34 = vrot.slane %v5553_v33, 1  ;;  %18405 = vst [vmem:[#allocation96_spill] sm:$0xff] %v12195_v31 }
  0xb4   : > { %v5608_v2 = vsel %vm375_vm0, %v18399_v58, %v18005_v9  ;;  %v5802_v58 = vsel %vm375_vm0, %v18008_v53, %v18007_v21  ;;  %v5694_v25 = vmul.f32 %v12175_v13, %v11943_v54  ;;  %v12205_v28 = vmul.f32 %v12137_v35, %v11926_v49 }
  0xb5   : > { %18400 = vst [vmem:[#allocation92_spill] sm:$0xff] %v12161_v46  ;;  %v5855_v47 = vadd.f32 %v18401_v43, %v5714_v27  ;;  %v5663_v29 = vadd.f32 %v5608_v2, %v5498_v45  ;;  %v18012_v9 = vrot.slane %v12161_v46, 1  ;;  %v5747_v43 = vmul.f32 %v12175_v13, %v11955_v23  ;;  %v12186_v27 = vld [vmem:[%s11010_s11 + $0x98] sm:$0xff] }
  0xb6   : > { %v12181_v2 = vmax.f32 %v5877_v17, 0.0  ;;  %998 = vperm.xlu1 %10787, %v11228_v32   ;;  %v12190_v21 = vmul.f32 %v12186_v27, %v11955_v23  ;;  %v5502_v32 = vmul.f32 %v12137_v35, %v11921_v62  ;;  %18407 = vst [vmem:[#allocation98_spill] sm:$0xff] %v12205_v28 }
  0xb7   : > { %v5879_v45 = vadd.f32 %v11859_v40, %v5855_v47  ;;  %v5716_v33 = vadd.f32 %v5692_v37, %v5663_v29  ;;  %v5611_v53 = vsel %vm375_vm0, %v5609_v34, %v18012_v9  ;;  %v5803_v57 = vrot.slane %v5747_v43, 1 }
  0xb8   : > { %18403 = vst [vmem:[#allocation94_spill] sm:$0xff] %v12181_v2  ;;  %18404 = vst [vmem:[#allocation95_spill] sm:$0xff] %v12190_v21  ;;  %5951 = vperm.xlu0 %10783, %v12181_v2   ;;  %v5665_v29 = vadd.f32 %v5611_v53, %v5500_v16  ;;  %v18013_v37 = vrot.slane %v12190_v21, 1  ;;  %v18018_v16 = vrot.slane %v12205_v28, 1  ;;  %v12216_v53 = vld [vmem:[%s11010_s11 + $0xa0] sm:$0x3]  ;;  %v12234_v2 = vpop.permute.xlu0 %661 }
  0xb9   : > { %v12198_v17 = vmax.f32 %v5879_v45, 0.0  ;;  %v5857_v47 = vadd.f32 %v5802_v58, %v5716_v33  ;;  %v12212_v58 = vpop.permute.xlu1 %671  ;;  %v5696_v33 = vmul.f32 %v12216_v53, %v11943_v54  ;;  %v12222_v9 = vmul.f32 %v12216_v53, %v11955_v23  ;;  %18412 = vst [vmem:[#allocation103_spill] sm:$0xff] %v12234_v2  ;;  %v12284_v28 = vld [vmem:[%s11010_s11 + $0x18] sm:$0xff] }
  0xba   : > { %1006 = vperm.xlu1 %10787, %v11269_v44   ;;  %v5718_v43 = vadd.f32 %v5694_v25, %v5665_v29  ;;  %v5805_v45 = vsel %vm375_vm0, %v5803_v57, %v18013_v37  ;;  %18408 = vst [vmem:[#allocation99_spill] sm:$0xff] %v12212_v58  ;;  %v5667_v29 = vadd.f32 %v18018_v16, %v5502_v32  ;;  %v12246_v32 = vld [vmem:[%s11010_s11 + $0xb0] sm:$0xff]  ;;  %v12253_v37 = vld [vmem:[%s11010_s11 + $0xb8] sm:$0x3]  ;;  %18421 = vst [vmem:[#allocation110_spill] sm:$0xff] %v12284_v28 }
  0xbb   : > { %18406 = vst [vmem:[#allocation97_spill] sm:$0xff] %v12198_v17  ;;  %v5881_v34 = vadd.f32 %v11859_v40, %v5857_v47  ;;  %18409 = vst [vmem:[#allocation100_spill] sm:$0xff] %v12222_v9  ;;  %v12229_v47 = vmul.f32 %v12186_v27, %v11926_v49  ;;  %v12250_v16 = vmul.f32 %v12246_v32, %v11955_v23  ;;  %v18418_v2 = vrot.slane %v12222_v9, 1 }
  0xbc   : > { %5961 = vperm.xlu0 %10783, %v12198_v17   ;;  %v5859_v57 = vadd.f32 %v5805_v45, %v5718_v43  ;;  %v5720_v45 = vadd.f32 %v5696_v33, %v5667_v29  ;;  %v5504_v17 = vmul.f32 %v12186_v27, %v11921_v62  ;;  %v12281_v44 = vpop.permute.xlu0 %676  ;;  %v1273_v21 = vmul.f32 %v12284_v28, %v11344_v42 }
  0xbd   : > { %v12225_v25 = vmax.f32 %v5881_v34, 0.0  ;;  %18411 = vst [vmem:[#allocation102_spill] sm:$0xff] %v12229_v47  ;;  %v12240_v34 = vmul.f32 %v12216_v53, %v11926_v49  ;;  %18414 = vst [vmem:[#allocation105_spill] sm:$0xff] %v12250_v16  ;;  %v12263_v43 = vpop.permute.xlu1 %681  ;;  %v12303_v42 = vmul.f32 %v12246_v32, %v11926_v49 }
  0xbe   : > { %1014 = vperm.xlu1 %10787, %v11310_v51   ;;  %v5883_v58 = vadd.f32 %v11859_v40, %v5859_v57  ;;  %v12257_v57 = vmul.f32 %v12253_v37, %v11955_v23  ;;  %18417 = vst [vmem:[#allocation108_spill] sm:$0xff] %v12263_v43  ;;  %v5861_v31 = vadd.f32 %v18418_v2, %v5720_v45  ;;  %v10822_v43 = vld [vmem:[%s11010_s11] sm:$0xff]  ;;  %18420 = vst [vmem:[#allocation109_spill] sm:$0xff] %v12281_v44 }
  0xbf   : > { %18410 = vst [vmem:[#allocation101_spill] sm:$0xff] %v12225_v25  ;;  %18413 = vst [vmem:[#allocation104_spill] sm:$0xff] %v12240_v34  ;;  %v18028_v29 = vrot.slane %v12240_v34, 1  ;;  %v5698_v51 = vmul.f32 %v12246_v32, %v11943_v54  ;;  %v1079_v9 = vmul.f32 %v10822_v43, %v11329_v61  ;;  %v1132_v2 = vmul.f32 %v10822_v43, %v11334_v30 }
  0xc0   : > { %18415 = vst [vmem:[#allocation106_spill] sm:$0xff] %v12257_v57  ;;  %5971 = vperm.xlu0 %10783, %v12225_v25   ;;  %v12260_v33 = vmax.f32 %v5883_v58, 0.0  ;;  %v18419_v58 = vrot.slane %v12229_v47, 1  ;;  %v5885_v45 = vadd.f32 %v11859_v40, %v5861_v31  ;;  %v18422_v61 = vrot.slane %v12257_v57, 1  ;;  %18424 = vst [vmem:[#allocation111_spill] sm:$0xff] %v12303_v42  ;;  %v12315_v57 = vld [vmem:[%s11010_s11 + $0xc0] sm:$0xff]  ;;  %v12339_v34 = vpop.permute.xlu0 %686 }
  0xc1   : > { %v18423_v30 = vrot.slane %v12250_v16, 1  ;;  %v18038_v44 = vrot.slane %v12303_v42, 1  ;;  %v12319_v16 = vpop.permute.xlu1 %691  ;;  %18431 = vst [vmem:[#allocation116_spill] sm:$0xff] %v12339_v34  ;;  %v18432_v47 = vmov 0   ;;  %v12367_v34 = vmul.f32 %v12253_v37, %v11926_v49 }
  0xc2   : > { %18416 = vst [vmem:[#allocation107_spill] sm:$0xff] %v12260_v33  ;;  %1022 = vperm.xlu1 %10787, %v11370_v12   ;;  %v5618_v25 = vsel %vm375_vm0, %v18419_v58, %v18028_v29  ;;  %v1326_v12 = vmul.f32 %v12284_v28, %v11358_v26  ;;  %v12305_v26 = vmax.f32 %v5885_v45, 0.0  ;;  %v5753_v45 = vmul.f32 %v12315_v57, %v11955_v23 }
  0xc3   : > { %v5669_v46 = vadd.f32 %v5618_v25, %v5504_v17  ;;  %v5812_v31 = vsel %vm375_vm0, %v18423_v30, %v18422_v61  ;;  %v1180_v17 = vrot.slane %v1132_v2, 1  ;;  %v12297_v25 = vld [vmem:[%s11010_s11 + $0xa8] sm:$0xff]  ;;  %v18426_v2 = vrot.slane %v11353_v3, 1  ;;  %18427 = vst [vmem:[#allocation113_spill] sm:$0xff] %v12319_v16 }
  0xc4   : > { %5981 = vperm.xlu0 %10783, %v12260_v33   ;;  %v5559_v43 = vmul.f32 %v12297_v25, %v11926_v49  ;;  %18425 = vst [vmem:[#allocation112_spill] sm:$0xff] %v12305_v26  ;;  %v1374_v29 = vrot.slane %v1326_v12, 1  ;;  %v5506_v33 = vmul.f32 %v12297_v25, %v11921_v62 }
  0xc5   : > { %v5722_v58 = vadd.f32 %v5698_v51, %v5669_v46  ;;  %v1182_v61 = vsel %vm375_vm0, %v1180_v17, %v18426_v2  ;;  %v5700_v46 = vmul.f32 %v12315_v57, %v11943_v54  ;;  %v18430_v17 = vrot.slane %v11375_v50, 1  ;;  %v12346_v50 = vld [vmem:[%s17855_s1 + $0x4] ss:$0 sm:$0xff] }
  0xc6   : > { %1030 = vperm.xlu1 %10787, %v11427_v63   ;;  %v5619_v30 = vrot.slane %v5559_v43, 1  ;;  %v1244_v12 = vadd.f32 %v1182_v61, %v1079_v9  ;;  %v12324_v63 = vld [vmem:[%s11010_s11 + $0xc8] sm:$0xff]  ;;  %v5813_v9 = vrot.slane %v5753_v45, 1 }
  0xc7   : > { %v5863_v51 = vadd.f32 %v5812_v31, %v5722_v58  ;;  %18428 = vst [vmem:[#allocation114_spill] sm:$0xff] %v12324_v63  ;;  %v12328_v3 = vmul.f32 %v12324_v63, %v11955_v23  ;;  %v1376_v43 = vsel %vm375_vm0, %v1374_v29, %v18430_v17  ;;  %v18434_v17 = vld [vmem:[#allocation14_spill] sm:$0xff]  ;;  %v5510_v7 = vmul.f32 %v12324_v63, %v11921_v62 }
  0xc8   : > { %5991 = vperm.xlu0 %10783, %v12305_v26   ;;  %v5621_v31 = vsel %vm375_vm0, %v5619_v30, %v18038_v44  ;;  %v1297_v2 = vadd.f32 %v1273_v21, %v1244_v12  ;;  %v10827_v26 = vld [vmem:[%s11010_s11 + $0x10] sm:$0x3]  ;;  %v12352_v21 = vld [vmem:[%s17855_s1 + $0x6] ss:$0 sm:$0xff]  ;;  %18436 = vst [vmem:[#allocation14_spill] sm:$0xff] %v12367_v34 }
  0xc9   : > { %18429 = vst [vmem:[#allocation115_spill] sm:$0xff] %v12328_v3  ;;  %v5887_v58 = vadd.f32 %v11859_v40, %v5863_v51  ;;  %v5671_v61 = vadd.f32 %v5621_v31, %v5506_v33  ;;  %v18039_v16 = vrot.slane %v12328_v3, 1  ;;  %v1081_v29 = vmul.f32 %v12346_v50, %v10827_v26 }
  0xca   : > { %10788 = vset.pattern.permute.xlu1 %v18432_v47  ;;  %v1275_v33 = vmul.f32 %v12352_v21, %v11963_v38  ;;  %v1438_v45 = vadd.f32 %v1376_v43, %v1297_v2  ;;  %v18435_v31 = vrot.slane %v18434_v17, 1  ;;  %v5508_v26 = vmul.f32 %v12253_v37, %v11921_v62  ;;  %v12369_v47 = vpop.permute.xlu1 %701 }
  0xcb   : > { %v12356_v30 = vmax.f32 %v5887_v58, 0.0  ;;  %v5724_v51 = vadd.f32 %v5700_v46, %v5671_v61  ;;  %v5815_v12 = vsel %vm375_vm0, %v5813_v9, %v18039_v16  ;;  %18437 = vst [vmem:[#allocation118_spill] sm:$0xff] %v12369_v47  ;;  %v12374_v58 = vld [vmem:[%s11010_s11 + $0xd0] sm:$0x3]  ;;  %v18042_v61 = vrot.slane %v12367_v34, 1  ;;  %v12386_v16 = vpop.permute.xlu0 %696 }
  0xcc   : > { %v1246_v44 = vadd.f32 %v18435_v31, %v1081_v29  ;;  %v1462_v46 = vadd.f32 %v11859_v40, %v1438_v45  ;;  %v12378_v9 = vmul.f32 %v12374_v58, %v11955_v23  ;;  %v5702_v29 = vmul.f32 %v12374_v58, %v11943_v54  ;;  %18439 = vst [vmem:[#allocation120_spill] sm:$0xff] %v12386_v16  ;;  %v18440_v45 = vld [vmem:[#allocation16_spill] sm:$0xff]  ;;  %v12419_v47 = vld [vmem:[%s11010_s11 + $0xe8] sm:$0x3] }
  0xcd   : > { %18433 = vst [vmem:[#allocation117_spill] sm:$0xff] %v12356_v30  ;;  %6001 = vperm.xlu0 %10783, %v12356_v30   ;;  %v5865_v43 = vadd.f32 %v5815_v12, %v5724_v51  ;;  %v18441_v51 = vrot.slane %v18440_v45, 1  ;;  %v5673_v30 = vadd.f32 %v18042_v61, %v5508_v26  ;;  %v12406_v45 = vld [vmem:[%s11010_s11 + $0x30] sm:$0xff]  ;;  %v12423_v3 = vmul.f32 %v12324_v63, %v11926_v49 }
  0xce   : > { %v1299_v2 = vadd.f32 %v1275_v33, %v1246_v44  ;;  %v12383_v17 = vmax.f32 %v1462_v46, 0.0  ;;  %v12396_v33 = vld [vmem:[%s17855_s1 + $0x5] ss:$0 sm:$0xff]  ;;  %18443 = vst [vmem:[#allocation121_spill] sm:$0xff] %v12406_v45  ;;  %v1276_v26 = vmul.f32 %v12406_v45, %v12352_v21  ;;  %v12425_v42 = vpop.permute.xlu1 %711 }
  0xcf   : > { %v5889_v31 = vadd.f32 %v11859_v40, %v5865_v43  ;;  %v1135_v46 = vmul.f32 %v12396_v33, %v12284_v28  ;;  %18444 = vst [vmem:[#allocation122_spill] sm:$0xff] %v12425_v42  ;;  %v18447_v42 = vld [vmem:[#allocation17_spill] sm:$0xff] }
  0xd0   : > { %18438 = vst [vmem:[#allocation119_spill] sm:$0xff] %v12383_v17  ;;  %v1440_v12 = vadd.f32 %v18441_v51, %v1299_v2  ;;  %1512 = vperm.xlu1 %10788, %v12383_v17   ;;  %v1082_v2 = vmul.f32 %v12346_v50, %v12284_v28  ;;  %v12413_v51 = vld [vmem:[%s17855_s1 + $0x7] ss:$0 sm:$0xff]  ;;  %v18448_v28 = vrot.slane %v18447_v42, 1  ;;  %v12451_v17 = vpop.permute.xlu0 %706 }
  0xd1   : > { %v12401_v43 = vmax.f32 %v5889_v31, 0.0  ;;  %v1329_v61 = vmul.f32 %v12413_v51, %v12406_v45  ;;  %v5726_v31 = vadd.f32 %v5702_v29, %v5673_v30  ;;  %v1185_v16 = vrot.slane %v1135_v46, 1  ;;  %18450 = vst [vmem:[#allocation124_spill] sm:$0xff] %v12451_v17 }
  0xd2   : > { %v1464_v44 = vadd.f32 %v11859_v40, %v1440_v12  ;;  %v12432_v45 = vmul.f32 %v12374_v58, %v11926_v49  ;;  %v12436_v30 = vmul.f32 %v11955_v23, %v11901_v4  ;;  %v18446_v12 = vrot.slane %v12378_v9, 1 }
  0xd3   : > { %18442 = vst [vmem:[#allocation16_spill] sm:$0xff] %v12401_v43  ;;  %6011 = vperm.xlu0 %10783, %v12401_v43   ;;  %v1379_v34 = vrot.slane %v1329_v61, 1  ;;  %v1187_v61 = vsel %vm375_vm0, %v1185_v16, %v18448_v28  ;;  %v18058_v43 = vrot.slane %v12423_v3, 1  ;;  %v12449_v49 = vmul.f32 %v11955_v23, %v12419_v47 }
  0xd4   : > { %18445 = vst [vmem:[#allocation123_spill] sm:$0xff] %v12436_v30  ;;  %v12438_v29 = vmax.f32 %v1464_v44, 0.0  ;;  %v5867_v46 = vadd.f32 %v18446_v12, %v5726_v31  ;;  %v1247_v62 = vadd.f32 %v1187_v61, %v1082_v2  ;;  %v18057_v63 = vrot.slane %v12432_v45, 1  ;;  %v18451_v31 = vld [vmem:[#allocation20_spill] sm:$0xff] }
  0xd5   : > { %18449 = vst [vmem:[#allocation17_spill] sm:$0xff] %v12449_v49  ;;  %v18452_v12 = vrot.slane %v18451_v31, 1  ;;  %v5704_v28 = vmul.f32 %v11943_v54, %v11901_v4  ;;  %v18060_v16 = vrot.slane %v12436_v30, 1  ;;  %v18059_v61 = vrot.slane %v12449_v49, 1 }
  0xd6   : > { %1522 = vperm.xlu1 %10788, %v12438_v29   ;;  %v5891_v44 = vadd.f32 %v11859_v40, %v5867_v46  ;;  %v1300_v2 = vadd.f32 %v1276_v26, %v1247_v62  ;;  %v5628_v23 = vsel %vm375_vm0, %v18058_v43, %v18057_v63  ;;  %v1084_v46 = vmul.f32 %v12346_v50, %v11963_v38  ;;  %v18455_v26 = vld [vmem:[#allocation18_spill] sm:$0xff] }
  0xd7   : > { %v1381_v42 = vsel %vm375_vm0, %v1379_v34, %v18452_v12  ;;  %v5675_v34 = vadd.f32 %v5628_v23, %v5510_v7  ;;  %v12471_v12 = vpop.permute.xlu1 %721  ;;  %v5822_v54 = vsel %vm375_vm0, %v18060_v16, %v18059_v61  ;;  %v18456_v62 = vrot.slane %v18455_v26, 1  ;;  %v12491_v26 = vpop.permute.xlu0 %716 }
  0xd8   : > { %v12469_v31 = vmax.f32 %v5891_v44, 0.0  ;;  %18454 = vst [vmem:[#allocation125_spill] sm:$0xff] %v12471_v12  ;;  %v1441_v4 = vadd.f32 %v1381_v42, %v1300_v2  ;;  %v1278_v43 = vmul.f32 %v12352_v21, %v11986_v41  ;;  %v1086_v7 = vmul.f32 %v12346_v50, %v11975_v55  ;;  %v18457_v44 = vld [vmem:[#allocation25_spill] sm:$0xff]  ;;  %v18459_v2 = vld [vmem:[#allocation23_spill] sm:$0xff]  ;;  %18461 = vst [vmem:[#allocation18_spill] sm:$0xff] %v12491_v26 }
  0xd9   : > { %v1249_v63 = vadd.f32 %v18456_v62, %v1084_v46  ;;  %v5728_v38 = vadd.f32 %v5704_v28, %v5675_v34  ;;  %v18458_v42 = vrot.slane %v18457_v44, 1  ;;  %v18460_v23 = vrot.slane %v18459_v2, 1  ;;  %v18463_v34 = vld [vmem:[#allocation21_spill] sm:$0xff]  ;;  %v18466_v2 = vld [vmem:[#allocation24_spill] sm:$0xff] }
  0xda   : > { %18453 = vst [vmem:[#allocation20_spill] sm:$0xff] %v12469_v31  ;;  %6021 = vperm.xlu0 %10783, %v12469_v31   ;;  %v1465_v61 = vadd.f32 %v11859_v40, %v1441_v4  ;;  %v1280_v46 = vmul.f32 %v12352_v21, %v12021_v6  ;;  %v18464_v17 = vrot.slane %v18463_v34, 1  ;;  %v18465_v44 = vrot.slane %v11478_v1, 1 }
  0xdb   : > { %v1194_v12 = vsel %vm375_vm0, %v18460_v23, %v18458_v42  ;;  %v1302_v16 = vadd.f32 %v1278_v43, %v1249_v63  ;;  %v5869_v62 = vadd.f32 %v5822_v54, %v5728_v38  ;;  %v18467_v30 = vrot.slane %v18466_v2, 1  ;;  %v12505_v4 = vpop.permute.xlu1 %731  ;;  %v18474_v2 = vld [vmem:[#allocation27_spill] sm:$0xff] }
  0xdc   : > { %v1251_v31 = vadd.f32 %v1194_v12, %v1086_v7  ;;  %v12495_v28 = vmax.f32 %v1465_v61, 0.0  ;;  %18468 = vst [vmem:[#allocation23_spill] sm:$0xff] %v12505_v4  ;;  %v1141_v54 = vmul.f32 %v12396_v33, %v12044_v48  ;;  %v1335_v1 = vmul.f32 %v12413_v51, %v12060_v22 }
  0xdd   : > { %v1443_v49 = vadd.f32 %v18464_v17, %v1302_v16  ;;  %v1388_v42 = vsel %vm375_vm0, %v18467_v30, %v18465_v44  ;;  %v5893_v63 = vadd.f32 %v11859_v40, %v5869_v62  ;;  %v1088_v17 = vmul.f32 %v12346_v50, %v12044_v48 }
  0xde   : > { %18462 = vst [vmem:[#allocation25_spill] sm:$0xff] %v12495_v28  ;;  %v1304_v43 = vadd.f32 %v1280_v46, %v1251_v31  ;;  %1527 = vperm.xlu1 %10788, %v12495_v28   ;;  %v1090_v30 = vmul.f32 %v12346_v50, %v12030_v10  ;;  %v1195_v12 = vrot.slane %v1141_v54, 1  ;;  %v1284_v38 = vmul.f32 %v12352_v21, %v12089_v8  ;;  %v12523_v23 = vpop.permute.xlu0 %726  ;;  %v18472_v46 = vld [vmem:[#allocation28_spill] sm:$0xff] }
  0xdf   : > { %v1467_v61 = vadd.f32 %v11859_v40, %v1443_v49  ;;  %v12517_v16 = vmax.f32 %v5893_v63, 0.0  ;;  %18471 = vst [vmem:[#allocation126_spill] sm:$0xff] %v12523_v23  ;;  %v1282_v48 = vmul.f32 %v12352_v21, %v12060_v22  ;;  %v1389_v49 = vrot.slane %v1335_v1, 1  ;;  %v18477_v1 = vld [vmem:[#allocation36_spill] sm:$0xff] }
  0xe0   : > { %v1445_v31 = vadd.f32 %v1388_v42, %v1304_v43  ;;  %v18473_v62 = vrot.slane %v18472_v46, 1  ;;  %v18475_v42 = vrot.slane %v18474_v2, 1  ;;  %v1092_v43 = vmul.f32 %v12346_v50, %v12076_v36  ;;  %v18482_v2 = vld [vmem:[#allocation29_spill] sm:$0xff] }
  0xe1   : > { %18469 = vst [vmem:[#allocation21_spill] sm:$0xff] %v12517_v16  ;;  %v12521_v7 = vmax.f32 %v1467_v61, 0.0  ;;  %6031 = vperm.xlu0 %10783, %v12517_v16   ;;  %v12537_v61 = vpop.permute.xlu1 %776  ;;  %v18478_v46 = vrot.slane %v18477_v1, 1  ;;  %v18483_v23 = vrot.slane %v18482_v2, 1  ;;  %v18488_v1 = vld [vmem:[#allocation37_spill] sm:$0xff] }
  0xe2   : > { %v1255_v34 = vadd.f32 %v18473_v62, %v1090_v30  ;;  %v1469_v44 = vadd.f32 %v11859_v40, %v1445_v31  ;;  %v1197_v63 = vsel %vm375_vm0, %v1195_v12, %v18475_v42  ;;  %18476 = vst [vmem:[#allocation28_spill] sm:$0xff] %v12537_v61  ;;  %v18479_v30 = vld [vmem:[#allocation32_spill] sm:$0xff]  ;;  %v12549_v26 = vpop.permute.xlu0 %1517 }
  0xe3   : > { %18470 = vst [vmem:[#allocation24_spill] sm:$0xff] %v12521_v7  ;;  %1537 = vperm.xlu1 %10788, %v12521_v7   ;;  %v1253_v54 = vadd.f32 %v1197_v63, %v1088_v17  ;;  %v18480_v62 = vrot.slane %v18479_v30, 1  ;;  %v1391_v12 = vsel %vm375_vm0, %v1389_v49, %v18483_v23  ;;  %18484 = vst [vmem:[#allocation36_spill] sm:$0xff] %v12549_v26  ;;  %v18485_v17 = vld [vmem:[#allocation31_spill] sm:$0xff] }
  0xe4   : > { %v1308_v22 = vadd.f32 %v1284_v38, %v1255_v34  ;;  %v12544_v31 = vmax.f32 %v1469_v44, 0.0  ;;  %v18486_v63 = vrot.slane %v18485_v17, 1  ;;  %v1286_v38 = vmul.f32 %v12352_v21, %v12126_v5  ;;  %v18490_v44 = vld [vmem:[#allocation34_spill] sm:$0xff] }
  0xe5   : > { %v1204_v16 = vsel %vm375_vm0, %v18480_v62, %v18478_v46  ;;  %v1306_v4 = vadd.f32 %v1282_v48, %v1253_v54  ;;  %v18487_v34 = vmov 1   ;;  %v18489_v46 = vrot.slane %v18488_v1, 1  ;;  %v12565_v48 = vpop.permute.xlu1 %780 }
  0xe6   : > { %18481 = vst [vmem:[#allocation27_spill] sm:$0xff] %v12544_v31  ;;  %v1257_v42 = vadd.f32 %v1204_v16, %v1092_v43  ;;  %v1449_v61 = vadd.f32 %v18486_v63, %v1308_v22  ;;  %10797 = vset.pattern.permute.xlu0 %v18487_v34  ;;  %v18491_v30 = vrot.slane %v18490_v44, 1  ;;  %v1147_v16 = vmul.f32 %v12396_v33, %v12145_v15 }
  0xe7   : > { %772 = vperm.xlu0 %10797, %v11111_v24   ;;  %1547 = vperm.xlu1 %10788, %v12544_v31   ;;  %v1447_v23 = vadd.f32 %v1391_v12, %v1306_v4  ;;  %18492 = vst [vmem:[#allocation32_spill] sm:$0xff] %v12565_v48  ;;  %v1094_v43 = vmul.f32 %v12346_v50, %v12145_v15  ;;  %v18494_v4 = vld [vmem:[#allocation38_spill] sm:$0xff]  ;;  %v18503_v24 = vld [vmem:[#allocation43_spill] sm:$0xff] }
  0xe8   : > { %v1398_v62 = vsel %vm375_vm0, %v18491_v30, %v18489_v46  ;;  %v1310_v49 = vadd.f32 %v1286_v38, %v1257_v42  ;;  %v1473_v54 = vadd.f32 %v11859_v40, %v1449_v61  ;;  %v1205_v22 = vrot.slane %v1147_v16, 1  ;;  %v12575_v46 = vpop.permute.xlu0 %1532 }
  0xe9   : > { %v1471_v2 = vadd.f32 %v11859_v40, %v1447_v23  ;;  %v1288_v63 = vmul.f32 %v12352_v21, %v12175_v13  ;;  %v1341_v1 = vmul.f32 %v12413_v51, %v12175_v13  ;;  %18493 = vst [vmem:[#allocation29_spill] sm:$0xff] %v12575_v46  ;;  %v18495_v12 = vrot.slane %v18494_v4, 1  ;;  %v12587_v44 = vpop.permute.xlu1 %788 }
  0xea   : > { %v1451_v17 = vadd.f32 %v1398_v62, %v1310_v49  ;;  %v1096_v15 = vmul.f32 %v12346_v50, %v12137_v35  ;;  %v1290_v61 = vmul.f32 %v12352_v21, %v12216_v53  ;;  %18497 = vst [vmem:[#allocation37_spill] sm:$0xff] %v12587_v44  ;;  %v18498_v62 = vld [vmem:[#allocation39_spill] sm:$0xff]  ;;  %v1098_v49 = vmul.f32 %v12346_v50, %v12186_v27 }
  0xeb   : > { %v1207_v42 = vsel %vm375_vm0, %v1205_v22, %v18495_v12  ;;  %784 = vperm.xlu0 %10797, %v11127_v39   ;;  %v12585_v38 = vmax.f32 %v1471_v2, 0.0  ;;  %v1399_v13 = vrot.slane %v1341_v1, 1  ;;  %v18499_v16 = vrot.slane %v18498_v62, 1  ;;  %v18501_v39 = vld [vmem:[#allocation46_spill] sm:$0xff] }
  0xec   : > { %v1259_v30 = vadd.f32 %v1207_v42, %v1094_v43  ;;  %v12594_v22 = vmax.f32 %v1473_v54, 0.0  ;;  %v1475_v4 = vadd.f32 %v11859_v40, %v1451_v17  ;;  %v18502_v2 = vrot.slane %v18501_v39, 1  ;;  %v12602_v1 = vpop.permute.xlu0 %1542  ;;  %v18506_v42 = vld [vmem:[#allocation41_spill] sm:$0xff]  ;;  %v18509_v17 = vld [vmem:[#allocation42_spill] sm:$0xff] }
  0xed   : > { %18496 = vst [vmem:[#allocation31_spill] sm:$0xff] %v12585_v38  ;;  %v1261_v23 = vadd.f32 %v18499_v16, %v1096_v15  ;;  %1557 = vperm.xlu1 %10788, %v12585_v38   ;;  %v18504_v46 = vrot.slane %v18503_v24, 1  ;;  %18505 = vst [vmem:[#allocation38_spill] sm:$0xff] %v12602_v1  ;;  %v18507_v15 = vrot.slane %v18506_v42, 1  ;;  %v12608_v26 = vpop.permute.xlu1 %796  ;;  %v1292_v39 = vmul.f32 %v12352_v21, %v12246_v32 }
  0xee   : > { %18500 = vst [vmem:[#allocation34_spill] sm:$0xff] %v12594_v22  ;;  %v1312_v12 = vadd.f32 %v1288_v63, %v1259_v30  ;;  %18508 = vst [vmem:[#allocation39_spill] sm:$0xff] %v12608_v26  ;;  %v18510_v24 = vrot.slane %v18509_v17, 1  ;;  %v12617_v30 = vmax.f32 %v1475_v4, 0.0 }
  0xef   : > { %v1214_v43 = vsel %vm375_vm0, %v18504_v46, %v18502_v2  ;;  %v1401_v62 = vsel %vm375_vm0, %v1399_v13, %v18507_v15  ;;  %v1314_v16 = vadd.f32 %v1290_v61, %v1261_v23  ;;  %792 = vperm.xlu0 %10797, %v11165_v18   ;;  %v1153_v46 = vmul.f32 %v12396_v33, %v12297_v25 }
  0xf0   : > { %v1263_v44 = vadd.f32 %v1214_v43, %v1098_v49  ;;  %v1453_v54 = vadd.f32 %v1401_v62, %v1312_v12  ;;  %18511 = vst [vmem:[#allocation46_spill] sm:$0xff] %v12617_v30  ;;  %v1100_v23 = vmul.f32 %v12346_v50, %v12297_v25  ;;  %v12622_v49 = vpop.permute.xlu0 %1552  ;;  %v18513_v12 = vld [vmem:[#allocation48_spill] sm:$0xff]  ;;  %v18515_v43 = vld [vmem:[#allocation45_spill] sm:$0xff]  ;;  %v1347_v33 = vmul.f32 %v12413_v51, %v12315_v57 }
  0xf1   : > { %v1455_v63 = vadd.f32 %v18510_v24, %v1314_v16  ;;  %1567 = vperm.xlu1 %10788, %v12594_v22   ;;  %18512 = vst [vmem:[#allocation43_spill] sm:$0xff] %v12622_v49  ;;  %v18514_v2 = vrot.slane %v18513_v12, 1  ;;  %v18516_v42 = vrot.slane %v18515_v43, 1  ;;  %v1215_v62 = vrot.slane %v1153_v46, 1  ;;  %v12632_v4 = vpop.permute.xlu1 %804 }
  0xf2   : > { %v1477_v61 = vadd.f32 %v11859_v40, %v1453_v54  ;;  %v1316_v13 = vadd.f32 %v1292_v39, %v1263_v44  ;;  %18517 = vst [vmem:[#allocation41_spill] sm:$0xff] %v12632_v4  ;;  %v1294_v44 = vmul.f32 %v12352_v21, %v12315_v57  ;;  %v1102_v16 = vmul.f32 %v12346_v50, %v12253_v37 }
  0xf3   : > { %v1408_v15 = vsel %vm375_vm0, %v18516_v42, %v18514_v2  ;;  %800 = vperm.xlu0 %10797, %v11209_v11   ;;  %v1479_v54 = vadd.f32 %v11859_v40, %v1455_v63  ;;  %v18518_v39 = vrot.slane %v11666_v20, 1  ;;  %v1409_v24 = vrot.slane %v1347_v33, 1 }
  0xf4   : > { %v12643_v51 = vmax.f32 %v1477_v61, 0.0  ;;  %v1457_v46 = vadd.f32 %v1408_v15, %v1316_v13  ;;  %v18520_v2 = vrot.slane %v11678_v59, 1  ;;  %v12647_v42 = vpop.permute.xlu0 %1562  ;;  %v18522_v50 = vrot.slane %v11693_v52, 1 }
  0xf5   : > { %v1217_v17 = vsel %vm375_vm0, %v1215_v62, %v18518_v39  ;;  %1577 = vperm.xlu1 %10788, %v12617_v30   ;;  %18521 = vst [vmem:[#allocation48_spill] sm:$0xff] %v12647_v42  ;;  %v1296_v20 = vmul.f32 %v12374_v58, %v12352_v21  ;;  %v12655_v62 = vpop.permute.xlu1 %812  ;;  %v12658_v13 = vmax.f32 %v1479_v54, 0.0 }
  0xf6   : > { %18519 = vst [vmem:[#allocation42_spill] sm:$0xff] %v12643_v51  ;;  %v1265_v12 = vadd.f32 %v1217_v17, %v1100_v23  ;;  %v1267_v43 = vadd.f32 %v18520_v2, %v1102_v16  ;;  %v1411_v63 = vsel %vm375_vm0, %v1409_v24, %v18522_v50  ;;  %18523 = vst [vmem:[#allocation45_spill] sm:$0xff] %v12655_v62  ;;  %v18528_v16 = vrot.slane %v11704_v14, 1  ;;  %v18536_v50 = vld [vmem:[#allocation119_spill] sm:$0xff] }
  0xf7   : > { %808 = vperm.xlu0 %10797, %v11247_v60   ;;  %18524 = vst [vmem:[#allocation127_spill] sm:$0xff] %v12658_v13  ;;  %v1481_v59 = vadd.f32 %v11859_v40, %v1457_v46  ;;  %v18549_v60 = vld [vmem:[#allocation33_spill] sm:$0xff] }
  0xf8   : > { %v1318_v61 = vadd.f32 %v1294_v44, %v1265_v12  ;;  %v1320_v15 = vadd.f32 %v1296_v20, %v1267_v43  ;;  %v12661_v33 = vpop.permute.xlu0 %1572 }
  0xf9   : > { %1587 = vperm.xlu1 %10788, %v12643_v51   ;;  %18525 = vst [vmem:[#allocation128_spill] sm:$0xff] %v12661_v33  ;;  %v12664_v52 = vpop.permute.xlu1 %820  ;;  %v12667_v21 = vmax.f32 %v1481_v59, 0.0 }
  0xfa   : > { %v1459_v23 = vadd.f32 %v1411_v63, %v1318_v61  ;;  %18526 = vst [vmem:[#allocation129_spill] sm:$0xff] %v12664_v52  ;;  %v1461_v54 = vadd.f32 %v18528_v16, %v1320_v15  ;;  %v18540_v61 = vld [vmem:[#allocation26_spill] sm:$0xff] }
  0xfb   : > { %816 = vperm.xlu0 %10797, %v11291_v19   ;;  %18527 = vst [vmem:[#allocation130_spill] sm:$0xff] %v12667_v21  ;;  %v18545_v16 = vld [vmem:[#allocation30_spill] sm:$0xff] }
  0xfc   : > { %v1483_v44 = vadd.f32 %v11859_v40, %v1459_v23  ;;  %v12672_v39 = vpop.permute.xlu0 %1582  ;;  %v1485_v46 = vadd.f32 %v11859_v40, %v1461_v54 }
  0xfd   : > { %1597 = vperm.xlu1 %10788, %v12658_v13   ;;  %18529 = vst [vmem:[#allocation131_spill] sm:$0xff] %v12672_v39  ;;  %v12675_v17 = vpop.permute.xlu1 %828 }
  0xfe   : > { %18530 = vst [vmem:[#allocation132_spill] sm:$0xff] %v12675_v17  ;;  %v12678_v24 = vmax.f32 %v1483_v44, 0.0  ;;  %v12687_v14 = vmax.f32 %v1485_v46, 0.0  ;;  %v12719_v46 = vld [vmem:[%s17855_s1 + $0x9] ss:$0 sm:$0xff] }
  0xff   : > { %824 = vperm.xlu0 %10797, %v18376_v56  }
 0x100   : > { %18531 = vst [vmem:[#allocation133_spill] sm:$0xff] %v12678_v24  ;;  %v12681_v12 = vpop.permute.xlu0 %1592  ;;  %18534 = vst [vmem:[#allocation136_spill] sm:$0xff] %v12687_v14 }
 0x101   : > { %1607 = vperm.xlu1 %10788, %v12667_v21   ;;  %18532 = vst [vmem:[#allocation134_spill] sm:$0xff] %v12681_v12  ;;  %v4777_v12 = vmul.f32 %v12719_v46, %v12030_v10 }
 0x102   : > { %v12684_v2 = vpop.permute.xlu1 %873 }
 0x103   : > { %832 = vperm.xlu0 %10797, %v11401_v0   ;;  %18533 = vst [vmem:[#allocation135_spill] sm:$0xff] %v12684_v2  ;;  %v18547_v0 = vld [vmem:[#allocation110_spill] sm:$0xff]  ;;  %v18554_v2 = vld [vmem:[#allocation35_spill] sm:$0xff] }
 0x104   : > { %v12689_v43 = vpop.permute.xlu0 %1602  ;;  %v4769_v56 = vmul.f32 %v12719_v46, %v18547_v0 }
 0x105   : > { %1617 = vperm.xlu1 %10788, %v12678_v24   ;;  %18535 = vst [vmem:[#allocation137_spill] sm:$0xff] %v12689_v43 }
 0x106   : > { %v12692_v63 = vpop.permute.xlu1 %881  ;;  %v4817_v18 = vrot.slane %v4769_v56, 1  ;;  %v12748_v56 = vld [vmem:[%s17855_s1 + $0x8] ss:$0 sm:$0xff] }
 0x107   : > { %1679 = vperm.xlu0 %10797, %v18536_v50   ;;  %18537 = vst [vmem:[#allocation138_spill] sm:$0xff] %v12692_v63 }
 0x108   : > { %v12695_v20 = vpop.permute.xlu0 %1612 }
 0x109   : > { %1627 = vperm.xlu1 %10788, %v12687_v14   ;;  %18538 = vst [vmem:[#allocation139_spill] sm:$0xff] %v12695_v20 }
 0x10a   : > { %v12698_v40 = vpop.permute.xlu1 %885 }
 0x10b   : > { %1691 = vperm.xlu0 %10797, %v12495_v28   ;;  %18539 = vst [vmem:[#allocation140_spill] sm:$0xff] %v12698_v40 }
 0x10c   : > { %v12702_v59 = vpop.permute.xlu0 %1622 }
 0x10d   : > { %10789 = vset.pattern.permute.xlu1 %v18487_v34  ;;  %18541 = vst [vmem:[#allocation26_spill] sm:$0xff] %v12702_v59 }
 0x10e   : > { %1683 = vperm.xlu1 %10789, %v18540_v61   ;;  %v12705_v23 = vpop.permute.xlu1 %893 }
 0x10f   : > { %1699 = vperm.xlu0 %10797, %v12521_v7   ;;  %18542 = vst [vmem:[#allocation141_spill] sm:$0xff] %v12705_v23  ;;  %v4774_v23 = vmul.f32 %v12719_v46, %v11986_v41  ;;  %v4732_v41 = vmul.f32 %v12748_v56, %v18547_v0 }
 0x110   : > { %v12708_v15 = vpop.permute.xlu0 %5090 }
 0x111   : > { %18543 = vst [vmem:[#allocation142_spill] sm:$0xff] %v12708_v15  ;;  %v4825_v17 = vrot.slane %v4774_v23, 1 }
 0x112   : > { %1687 = vperm.xlu1 %10789, %v12438_v29   ;;  %v12711_v44 = vpop.permute.xlu1 %901 }
 0x113   : > { %1707 = vperm.xlu0 %10797, %v12544_v31   ;;  %18544 = vst [vmem:[#allocation143_spill] sm:$0xff] %v12711_v44  ;;  %v12731_v44 = vmul.f32 %v12719_v46, %v11975_v55 }
 0x114   : > { %v12714_v54 = vpop.permute.xlu0 %5105 }
 0x115   : > { %18546 = vst [vmem:[#allocation30_spill] sm:$0xff] %v12714_v54  ;;  %v18553_v54 = vld [vmem:[#allocation121_spill] sm:$0xff]  ;;  %v18075_v43 = vrot.slane %v12731_v44, 1 }
 0x116   : > { %1695 = vperm.xlu1 %10789, %v18545_v16   ;;  %v12724_v19 = vpop.permute.xlu1 %909 }
 0x117   : > { %1715 = vperm.xlu0 %10797, %v12585_v38   ;;  %18548 = vst [vmem:[#allocation110_spill] sm:$0xff] %v12724_v19  ;;  %v12741_v19 = vld [vmem:[%s17855_s1 + $0xb] ss:$0 sm:$0xff] }
 0x118   : > { %v12727_v11 = vpop.permute.xlu0 %5115  ;;  %18552 = vst [vmem:[#allocation145_spill] sm:$0xff] %v12741_v19 }
 0x119   : > { %18550 = vst [vmem:[#allocation33_spill] sm:$0xff] %v12727_v11  ;;  %v4931_v11 = vmul.f32 %v12741_v19, %v18553_v54 }
 0x11a   : > { %1703 = vperm.xlu1 %10789, %v18549_v60   ;;  %v12736_v40 = vpop.permute.xlu1 %917 }
 0x11b   : > { %1723 = vperm.xlu0 %10797, %v12594_v22   ;;  %18551 = vst [vmem:[#allocation144_spill] sm:$0xff] %v12736_v40  ;;  %v18556_v40 = vld [vmem:[#allocation50_spill] sm:$0xff]  ;;  %v4979_v52 = vrot.slane %v4931_v11, 1  ;;  %v4826_v11 = vsel %vm375_vm0, %v18075_v43, %v4825_v17 }
 0x11c   : > { %v12753_v15 = vpop.permute.xlu0 %5125  ;;  %v18557_v59 = vrot.slane %v18556_v40, 1  ;;  %v4735_v40 = vmul.f32 %v12748_v56, %v11975_v55  ;;  %v4780_v55 = vmul.f32 %v12719_v46, %v12089_v8 }
 0x11d   : > { %18555 = vst [vmem:[#allocation121_spill] sm:$0xff] %v12753_v15  ;;  %v12767_v15 = vld [vmem:[%s17855_s1 + $0xa] ss:$0 sm:$0xff] }
 0x11e   : > { %1711 = vperm.xlu1 %10789, %v18554_v2   ;;  %v4819_v20 = vsel %vm375_vm0, %v4817_v18, %v18557_v59  ;;  %v12762_v39 = vpop.permute.xlu1 %925  ;;  %v4894_v18 = vmul.f32 %v12767_v15, %v18553_v54  ;;  %v18559_v59 = vld [vmem:[#allocation40_spill] sm:$0xff]  ;;  %v4876_v43 = vadd.f32 %v4826_v11, %v4735_v40  ;;  %v4897_v26 = vmul.f32 %v12767_v15, %v12021_v6 }
 0x11f   : > { %1731 = vperm.xlu0 %10797, %v12617_v30   ;;  %18558 = vst [vmem:[#allocation35_spill] sm:$0xff] %v12762_v39  ;;  %v4873_v62 = vadd.f32 %v4819_v20, %v4732_v41  ;;  %v12781_v20 = vmul.f32 %v12741_v19, %v12021_v6  ;;  %v4936_v41 = vmul.f32 %v12741_v19, %v12030_v10  ;;  %v4830_v39 = vrot.slane %v4777_v12, 1  ;;  %v18565_v12 = vld [vmem:[#allocation44_spill] sm:$0xff] }
 0x120   : > { %v12774_v23 = vpop.permute.xlu0 %5135  ;;  %v4737_v10 = vmul.f32 %v12748_v56, %v12021_v6  ;;  %v4783_v6 = vmul.f32 %v12719_v46, %v12137_v35  ;;  %v4913_v40 = vadd.f32 %v4897_v26, %v4876_v43  ;;  %v18572_v26 = vld [vmem:[#allocation56_spill] sm:$0xff] }
 0x121   : > { %18560 = vst [vmem:[#allocation50_spill] sm:$0xff] %v12774_v23  ;;  %18561 = vst [vmem:[#allocation40_spill] sm:$0xff] %v12781_v20  ;;  %v18563_v23 = vld [vmem:[#allocation52_spill] sm:$0xff]  ;;  %v4910_v17 = vadd.f32 %v4894_v18, %v4873_v62  ;;  %v18076_v1 = vrot.slane %v12781_v20, 1  ;;  %v4987_v63 = vrot.slane %v4936_v41, 1  ;;  %v4835_v62 = vrot.slane %v4780_v55, 1 }
 0x122   : > { %1719 = vperm.xlu1 %10789, %v18559_v59   ;;  %v12788_v33 = vpop.permute.xlu1 %933  ;;  %v18564_v4 = vrot.slane %v18563_v23, 1  ;;  %v4899_v41 = vmul.f32 %v12767_v15, %v12076_v36  ;;  %v4739_v55 = vmul.f32 %v12748_v56, %v12076_v36  ;;  %v18573_v43 = vrot.slane %v18572_v26, 1 }
 0x123   : > { %1739 = vperm.xlu0 %10797, %v12643_v51   ;;  %18562 = vst [vmem:[#allocation146_spill] sm:$0xff] %v12788_v33  ;;  %v18567_v33 = vld [vmem:[#allocation54_spill] sm:$0xff] }
 0x124   : > { %v4981_v42 = vsel %vm375_vm0, %v4979_v52, %v18564_v4  ;;  %v12798_v49 = vpop.permute.xlu0 %5145  ;;  %v18568_v48 = vrot.slane %v18567_v33, 1  ;;  %v4939_v4 = vmul.f32 %v12741_v19, %v12089_v8  ;;  %v18570_v33 = vld [vmem:[#allocation47_spill] sm:$0xff]  ;;  %v4988_v8 = vsel %vm375_vm0, %v18076_v1, %v4987_v63  ;;  %v12832_v63 = vld [vmem:[%s17856_s2] ss:$0 sm:$0xff] }
 0x125   : > { %18566 = vst [vmem:[#allocation52_spill] sm:$0xff] %v12798_v49  ;;  %v5035_v52 = vadd.f32 %v4981_v42, %v4910_v17  ;;  %v4786_v42 = vmul.f32 %v12719_v46, %v12216_v53  ;;  %v4836_v17 = vsel %vm375_vm0, %v18573_v43, %v4835_v62  ;;  %v18577_v62 = vld [vmem:[#allocation55_spill] sm:$0xff]  ;;  %v4901_v49 = vmul.f32 %v12767_v15, %v12126_v5 }
 0x126   : > { %1727 = vperm.xlu1 %10789, %v18565_v12   ;;  %v4831_v23 = vsel %vm375_vm0, %v18568_v48, %v4830_v39  ;;  %v4992_v39 = vrot.slane %v4939_v4, 1  ;;  %v5038_v4 = vadd.f32 %v4988_v8, %v4913_v40  ;;  %v18578_v43 = vrot.slane %v18577_v62, 1 }
 0x127   : > { %1747 = vperm.xlu0 %10797, %v12658_v13   ;;  %v4878_v11 = vadd.f32 %v4831_v23, %v4737_v10  ;;  %v4942_v10 = vmul.f32 %v12741_v19, %v12137_v35  ;;  %v4840_v23 = vrot.slane %v4783_v6, 1  ;;  %v5051_v36 = vadd.f32 %v12832_v63, %v5035_v52 }
 0x128   : > { %v4993_v35 = vsel %vm375_vm0, %v18578_v43, %v4992_v39  ;;  %v4880_v6 = vadd.f32 %v4836_v17, %v4739_v55  ;;  %v4845_v34 = vrot.slane %v4786_v42, 1  ;;  %v4741_v40 = vmul.f32 %v12748_v56, %v12126_v5 }
 0x129   : > { %v12809_v18 = vpop.permute.xlu1 %978  ;;  %v12814_v48 = vpop.permute.xlu0 %5155  ;;  %v4997_v52 = vrot.slane %v4942_v10, 1  ;;  %v4945_v39 = vmul.f32 %v12741_v19, %v12216_v53  ;;  %v12855_v55 = vmax.f32 %v5051_v36, 0.0  ;;  %v5054_v42 = vadd.f32 %v12832_v63, %v5038_v4  ;;  %v18583_v10 = vld [vmem:[#allocation51_spill] sm:$0xff]  ;;  %v18587_v4 = vld [vmem:[#allocation58_spill] sm:$0xff] }
 0x12a   : > { %18569 = vst [vmem:[#allocation44_spill] sm:$0xff] %v12809_v18  ;;  %1735 = vperm.xlu1 %10789, %v18570_v33   ;;  %18571 = vst [vmem:[#allocation54_spill] sm:$0xff] %v12814_v48  ;;  %v4915_v18 = vadd.f32 %v4899_v41, %v4878_v11  ;;  %v18575_v48 = vld [vmem:[#allocation49_spill] sm:$0xff]  ;;  %v4789_v11 = vmul.f32 %v12719_v46, %v12253_v37  ;;  %v18579_v41 = vld [vmem:[#allocation60_spill] sm:$0xff]  ;;  %v4743_v5 = vmul.f32 %v12748_v56, %v12186_v27 }
 0x12b   : > { %1755 = vperm.xlu0 %10797, %v12667_v21   ;;  %v18580_v8 = vrot.slane %v18579_v41, 1  ;;  %18581 = vst [vmem:[#allocation55_spill] sm:$0xff] %v12855_v55  ;;  %v4917_v41 = vadd.f32 %v4901_v49, %v4880_v6  ;;  %v4792_v49 = vmul.f32 %v12719_v46, %v12374_v58  ;;  %v5002_v6 = vrot.slane %v4945_v39, 1  ;;  %v18593_v39 = vld [vmem:[#allocation66_spill] sm:$0xff] }
 0x12c   : > { %v5040_v17 = vadd.f32 %v4993_v35, %v4915_v18  ;;  %v4948_v18 = vmul.f32 %v12741_v19, %v12253_v37  ;;  %v18588_v35 = vrot.slane %v18587_v4, 1  ;;  %v4850_v20 = vrot.slane %v4789_v11, 1 }
 0x12d   : > { %v12835_v1 = vpop.permute.xlu1 %982  ;;  %v4841_v62 = vsel %vm375_vm0, %v18580_v8, %v4840_v23  ;;  %v4903_v23 = vmul.f32 %v12767_v15, %v12186_v27  ;;  %v18585_v8 = vld [vmem:[#allocation62_spill] sm:$0xff]  ;;  %v4905_v37 = vmul.f32 %v12767_v15, %v12246_v32 }
 0x12e   : > { %18574 = vst [vmem:[#allocation47_spill] sm:$0xff] %v12835_v1  ;;  %1743 = vperm.xlu1 %10789, %v18575_v48   ;;  %v12838_v26 = vpop.permute.xlu0 %5926  ;;  %v18586_v53 = vrot.slane %v18585_v8, 1  ;;  %v4882_v1 = vadd.f32 %v4841_v62, %v4741_v40  ;;  %v5056_v27 = vadd.f32 %v12832_v63, %v5040_v17  ;;  %v4745_v40 = vmul.f32 %v12748_v56, %v12246_v32  ;;  %v12902_v32 = vld [vmem:[%s17855_s1 + $0xd] ss:$0 sm:$0xff] }
 0x12f   : > { %18576 = vst [vmem:[#allocation56_spill] sm:$0xff] %v12838_v26  ;;  %1763 = vperm.xlu0 %10797, %v12678_v24   ;;  %v18594_v17 = vrot.slane %v18593_v39, 1  ;;  %v18599_v39 = vld [vmem:[#allocation57_spill] sm:$0xff] }
 0x130   : > { %v4846_v36 = vsel %vm375_vm0, %v18586_v53, %v4845_v34  ;;  %v18590_v53 = vld [vmem:[#allocation53_spill] sm:$0xff]  ;;  %v4919_v62 = vadd.f32 %v4903_v23, %v4882_v1  ;;  %v5541_v1 = vmul.f32 %v12902_v32, %v18547_v0 }
 0x131   : > { %v12858_v43 = vpop.permute.xlu1 %990  ;;  %v4884_v34 = vadd.f32 %v4846_v36, %v4743_v5  ;;  %v4851_v5 = vsel %vm375_vm0, %v18594_v17, %v4850_v20  ;;  %v4951_v36 = vmul.f32 %v12741_v19, %v12374_v58  ;;  %v18598_v20 = vld [vmem:[#allocation114_spill] sm:$0xff]  ;;  %v18601_v17 = vld [vmem:[#allocation64_spill] sm:$0xff] }
 0x132   : > { %18582 = vst [vmem:[#allocation60_spill] sm:$0xff] %v12858_v43  ;;  %1751 = vperm.xlu1 %10789, %v18583_v10   ;;  %v12863_v26 = vpop.permute.xlu0 %5941  ;;  %v4998_v43 = vsel %vm375_vm0, %v18588_v35, %v4997_v52  ;;  %v5007_v52 = vrot.slane %v4948_v18, 1  ;;  %v4855_v35 = vrot.slane %v4792_v49, 1  ;;  %v4907_v18 = vmul.f32 %v12767_v15, %v18598_v20 }
 0x133   : > { %18584 = vst [vmem:[#allocation147_spill] sm:$0xff] %v12863_v26  ;;  %1771 = vperm.xlu0 %10797, %v12687_v14   ;;  %v12884_v26 = vmax.f32 %v5054_v42, 0.0  ;;  %v5042_v4 = vadd.f32 %v4998_v43, %v4917_v41  ;;  %v18595_v42 = vld [vmem:[#allocation61_spill] sm:$0xff]  ;;  %v12906_v41 = vmax.f32 %v5056_v27, 0.0  ;;  %v4921_v23 = vadd.f32 %v4905_v37, %v4884_v34 }
 0x134   : > { %v4954_v27 = vmul.f32 %v12741_v19, %v12419_v47 }
 0x135   : > { %v12879_v8 = vpop.permute.xlu1 %998  ;;  %18591 = vst [vmem:[#allocation58_spill] sm:$0xff] %v12884_v26  ;;  %18597 = vst [vmem:[#allocation66_spill] sm:$0xff] %v12906_v41  ;;  %v5058_v34 = vadd.f32 %v12832_v63, %v5042_v4 }
 0x136   : > { %18589 = vst [vmem:[#allocation62_spill] sm:$0xff] %v12879_v8  ;;  %1759 = vperm.xlu1 %10789, %v18590_v53   ;;  %v18596_v8 = vrot.slane %v18595_v42, 1  ;;  %v4886_v42 = vadd.f32 %v4851_v5, %v4745_v40  ;;  %v5544_v40 = vmul.f32 %v12902_v32, %v18553_v54  ;;  %v18606_v53 = vmov 2  }
 0x137   : > { %5196 = vperm.xlu0 %10797, %v12855_v55   ;;  %v12889_v11 = vpop.permute.xlu0 %5951  ;;  %v5017_v19 = vrot.slane %v4954_v27, 1 }
 0x138   : > { %18592 = vst [vmem:[#allocation148_spill] sm:$0xff] %v12889_v11  ;;  %v5003_v43 = vsel %vm375_vm0, %v18596_v8, %v5002_v6  ;;  %v18602_v6 = vrot.slane %v18601_v17, 1  ;;  %v4747_v11 = vmul.f32 %v12748_v56, %v18598_v20  ;;  %v4923_v10 = vadd.f32 %v4907_v18, %v4886_v42  ;;  %v12957_v42 = vld [vmem:[%s17855_s1 + $0xf] ss:$0 sm:$0xff] }
 0x139   : > { %v12911_v49 = vpop.permute.xlu1 %1006  ;;  %v5044_v55 = vadd.f32 %v5003_v43, %v4919_v62  ;;  %v12934_v62 = vmax.f32 %v5058_v34, 0.0  ;;  %v18609_v43 = vld [vmem:[#allocation67_spill] sm:$0xff]  ;;  %v5594_v27 = vrot.slane %v5544_v40, 1 }
 0x13a   : > { %1767 = vperm.xlu1 %10789, %v18599_v39   ;;  %18600 = vst [vmem:[#allocation61_spill] sm:$0xff] %v12911_v49  ;;  %v5008_v8 = vsel %vm375_vm0, %v18602_v6, %v5007_v52  ;;  %v5012_v49 = vrot.slane %v4951_v36, 1  ;;  %v18604_v39 = vld [vmem:[#allocation69_spill] sm:$0xff]  ;;  %v5589_v6 = vrot.slane %v5541_v1, 1  ;;  %v18610_v1 = vrot.slane %v18609_v43, 1 }
 0x13b   : > { %5208 = vperm.xlu0 %10797, %v12884_v26   ;;  %v12922_v37 = vpop.permute.xlu0 %5961  ;;  %v18605_v17 = vrot.slane %v18604_v39, 1  ;;  %v5046_v5 = vadd.f32 %v5008_v8, %v4921_v23  ;;  %v10840_v26 = vld [vmem:[%s11010_s11 + $0xe0] sm:$0xff]  ;;  %18607 = vst [vmem:[#allocation64_spill] sm:$0xff] %v12934_v62  ;;  %v5060_v36 = vadd.f32 %v12832_v63, %v5044_v55  ;;  %v18612_v39 = vld [vmem:[#allocation71_spill] sm:$0xff] }
 0x13c   : > { %18603 = vst [vmem:[#allocation114_spill] sm:$0xff] %v12922_v37  ;;  %v4909_v4 = vmul.f32 %v10840_v26, %v12767_v15  ;;  %v5013_v23 = vsel %vm375_vm0, %v18610_v1, %v5012_v49  ;;  %v18613_v8 = vrot.slane %v18612_v39, 1  ;;  %v5735_v49 = vmul.f32 %v12957_v42, %v18553_v54  ;;  %v12974_v40 = vld [vmem:[%s17855_s1 + $0xe] ss:$0 sm:$0xff] }
 0x13d   : > { %v4856_v52 = vsel %vm375_vm0, %v18605_v17, %v4855_v35  ;;  %v12949_v18 = vpop.permute.xlu1 %1014  ;;  %v5062_v34 = vadd.f32 %v12832_v63, %v5046_v5  ;;  %v5048_v17 = vadd.f32 %v5013_v23, %v4923_v10  ;;  %v18618_v5 = vld [vmem:[#allocation76_spill] sm:$0xff]  ;;  %v12984_v23 = vld [vmem:[%s11010_s11 + $0x48] sm:$0xff] }
 0x13e   : > { %10790 = vset.pattern.permute.xlu1 %v18606_v53  ;;  %v4888_v48 = vadd.f32 %v4856_v52, %v4747_v11  ;;  %v12945_v11 = vld [vmem:[%s17855_s1 + $0xc] ss:$0 sm:$0xff]  ;;  %18611 = vst [vmem:[#allocation67_spill] sm:$0xff] %v12949_v18  ;;  %v5591_v55 = vsel %vm375_vm0, %v5589_v6, %v18613_v8  ;;  %v18614_v52 = vld [vmem:[#allocation70_spill] sm:$0xff]  ;;  %v12967_v6 = vmax.f32 %v5060_v36, 0.0  ;;  %v5783_v10 = vrot.slane %v5735_v49, 1 }
 0x13f   : > { %5216 = vperm.xlu0 %10797, %v12906_v41   ;;  %1823 = vperm.xlu1 %10790, %v18536_v50   ;;  %v12937_v35 = vpop.permute.xlu0 %5971  ;;  %v5488_v26 = vmul.f32 %v12945_v11, %v18547_v0  ;;  %v18615_v43 = vrot.slane %v18614_v52, 1  ;;  %v10845_v50 = vld [vmem:[%s11010_s11 + $0x40] sm:$0x3]  ;;  %v12995_v49 = vmax.f32 %v5062_v34, 0.0 }
 0x140   : > { %18608 = vst [vmem:[#allocation69_spill] sm:$0xff] %v12937_v35  ;;  %v4925_v0 = vadd.f32 %v4909_v4, %v4888_v48  ;;  %18616 = vst [vmem:[#allocation71_spill] sm:$0xff] %v12967_v6  ;;  %v5682_v48 = vmul.f32 %v12974_v40, %v18553_v54  ;;  %v18619_v4 = vrot.slane %v18618_v5, 1 }
 0x141   : > { %v5018_v1 = vsel %vm375_vm0, %v18615_v43, %v5017_v19  ;;  %v5653_v8 = vadd.f32 %v5591_v55, %v5488_v26  ;;  %v5491_v19 = vmul.f32 %v12945_v11, %v18553_v54  ;;  %v5738_v26 = vmul.f32 %v12984_v23, %v12957_v42  ;;  %v12989_v52 = vpop.permute.xlu1 %1022  ;;  %18621 = vst [vmem:[#allocation149_spill] sm:$0xff] %v12995_v49 }
 0x142   : > { %v5596_v36 = vsel %vm375_vm0, %v5594_v27, %v18619_v4  ;;  %v5064_v55 = vadd.f32 %v12832_v63, %v5048_v17  ;;  %18620 = vst [vmem:[#allocation76_spill] sm:$0xff] %v12989_v52  ;;  %v5050_v43 = vadd.f32 %v5018_v1, %v4925_v0  ;;  %v5493_v54 = vmul.f32 %v10845_v50, %v12945_v11  ;;  %v18622_v17 = vld [vmem:[#allocation74_spill] sm:$0xff] }
 0x143   : > { %5224 = vperm.xlu0 %10797, %v12934_v62   ;;  %1831 = vperm.xlu1 %10790, %v12438_v29   ;;  %v12969_v39 = vpop.permute.xlu0 %5981  ;;  %v5706_v27 = vadd.f32 %v5682_v48, %v5653_v8  ;;  %v5656_v5 = vadd.f32 %v5596_v36, %v5491_v19  ;;  %v5685_v4 = vmul.f32 %v12984_v23, %v12974_v40  ;;  %v18623_v18 = vrot.slane %v18622_v17, 1  ;;  %v10846_v52 = vld [vmem:[%s11010_s11 + $0x60] sm:$0xff]  ;;  %v10847_v8 = vld [vmem:[%s11010_s11 + $0x58] sm:$0x3]  ;;  %v10848_v19 = vld [vmem:[%s11010_s11 + $0x50] sm:$0xff] }
 0x144   : > { %18617 = vst [vmem:[#allocation70_spill] sm:$0xff] %v12969_v39  ;;  %v5788_v1 = vrot.slane %v5738_v26, 1  ;;  %v5550_v50 = vmul.f32 %v10846_v52, %v12902_v32  ;;  %v5066_v35 = vadd.f32 %v12832_v63, %v5050_v43  ;;  %v5687_v48 = vmul.f32 %v10847_v8, %v12974_v40  ;;  %v18628_v17 = vld [vmem:[#allocation84_spill] sm:$0xff]  ;;  %v18633_v8 = vld [vmem:[#allocation79_spill] sm:$0xff] }
 0x145   : > { %v5785_v0 = vsel %vm375_vm0, %v5783_v10, %v18623_v18  ;;  %v5495_v36 = vmul.f32 %v10848_v19, %v12945_v11  ;;  %v13015_v18 = vmax.f32 %v5064_v55, 0.0  ;;  %v5709_v26 = vadd.f32 %v5685_v4, %v5656_v5  ;;  %v10849_v55 = vld [vmem:[%s11010_s11 + $0x68] sm:$0xff] }
 0x146   : > { %v5847_v10 = vadd.f32 %v5785_v0, %v5706_v27  ;;  %v18629_v43 = vrot.slane %v18628_v17, 1  ;;  %v5689_v27 = vmul.f32 %v10849_v55, %v12974_v40  ;;  %v18642_v55 = vld [vmem:[#allocation86_spill] sm:$0xff] }
 0x147   : > { %5232 = vperm.xlu0 %10797, %v12967_v6   ;;  %1835 = vperm.xlu1 %10790, %v12495_v28   ;;  %v13004_v39 = vpop.permute.xlu0 %5991  ;;  %v18625_v28 = vld [vmem:[#allocation77_spill] sm:$0xff]  ;;  %v18634_v6 = vrot.slane %v18633_v8, 1  ;;  %v10851_v8 = vld [vmem:[%s11010_s11 + $0x70] sm:$0x3] }
 0x148   : > { %18624 = vst [vmem:[#allocation74_spill] sm:$0xff] %v13004_v39  ;;  %v18626_v34 = vrot.slane %v18625_v28, 1  ;;  %18627 = vst [vmem:[#allocation77_spill] sm:$0xff] %v13015_v18  ;;  %v18630_v39 = vld [vmem:[#allocation82_spill] sm:$0xff]  ;;  %v5871_v4 = vadd.f32 %v12832_v63, %v5847_v10  ;;  %v5499_v10 = vmul.f32 %v10851_v8, %v12945_v11 }
 0x149   : > { %v18631_v28 = vrot.slane %v18630_v39, 1  ;;  %v5790_v19 = vsel %vm375_vm0, %v5788_v1, %v18634_v6  ;;  %v13031_v39 = vmax.f32 %v5066_v35, 0.0  ;;  %v5497_v6 = vmul.f32 %v10846_v52, %v12945_v11  ;;  %v18636_v1 = vld [vmem:[#allocation87_spill] sm:$0xff] }
 0x14a   : > { %v5658_v37 = vadd.f32 %v18626_v34, %v5493_v54  ;;  %v13022_v34 = vpop.permute.xlu1 %1030  ;;  %v5850_v0 = vadd.f32 %v5790_v19, %v5709_v26  ;;  %v13050_v52 = vmax.f32 %v5871_v4, 0.0 }
 0x14b   : > { %5240 = vperm.xlu0 %10797, %v12995_v49   ;;  %1843 = vperm.xlu1 %10790, %v12521_v7   ;;  %v5603_v54 = vsel %vm375_vm0, %v18631_v28, %v18629_v43  ;;  %18632 = vst [vmem:[#allocation84_spill] sm:$0xff] %v13022_v34  ;;  %v5604_v49 = vrot.slane %v5550_v50, 1  ;;  %18635 = vst [vmem:[#allocation82_spill] sm:$0xff] %v13031_v39  ;;  %v18639_v43 = vld [vmem:[#allocation80_spill] sm:$0xff] }
 0x14c   : > { %v5711_v62 = vadd.f32 %v5687_v48, %v5658_v37  ;;  %v5660_v7 = vadd.f32 %v5603_v54, %v5495_v36  ;;  %v13033_v5 = vpop.permute.xlu0 %6001  ;;  %v18637_v37 = vrot.slane %v18636_v1, 1  ;;  %v10850_v48 = vld [vmem:[%s11010_s11 + $0x78] sm:$0xff]  ;;  %v18640_v35 = vrot.slane %v18639_v43, 1  ;;  %18641 = vst [vmem:[#allocation87_spill] sm:$0xff] %v13050_v52  ;;  %v10852_v43 = vld [vmem:[%s11010_s11 + $0x90] sm:$0xff] }
 0x14d   : > { %v5744_v36 = vmul.f32 %v10850_v48, %v12957_v42  ;;  %v5691_v19 = vmul.f32 %v10850_v48, %v12974_v40  ;;  %v18643_v1 = vrot.slane %v18642_v55, 1  ;;  %v10854_v48 = vld [vmem:[%s11010_s11 + $0x80] sm:$0xff]  ;;  %v18652_v34 = vld [vmem:[#allocation92_spill] sm:$0xff] }
 0x14e   : > { %v5606_v50 = vsel %vm375_vm0, %v5604_v49, %v18637_v37  ;;  %v5852_v28 = vadd.f32 %v18640_v35, %v5711_v62  ;;  %v5713_v54 = vadd.f32 %v5689_v27, %v5660_v7  ;;  %v5874_v49 = vadd.f32 %v12832_v63, %v5850_v0  ;;  %v18644_v62 = vld [vmem:[#allocation83_spill] sm:$0xff] }
 0x14f   : > { %5248 = vperm.xlu0 %10797, %v13015_v18   ;;  %1851 = vperm.xlu1 %10790, %v12544_v31   ;;  %v13042_v17 = vpop.permute.xlu1 %1512  ;;  %v5662_v26 = vadd.f32 %v5606_v50, %v5497_v6  ;;  %v18645_v7 = vrot.slane %v18644_v62, 1  ;;  %v5798_v37 = vrot.slane %v5744_v36, 1  ;;  %v5556_v35 = vmul.f32 %v10852_v43, %v12902_v32  ;;  %v10853_v6 = vld [vmem:[%s11010_s11 + $0x88] sm:$0x3] }
 0x150   : > { %18638 = vst [vmem:[#allocation79_spill] sm:$0xff] %v13042_v17  ;;  %v5876_v4 = vadd.f32 %v12832_v63, %v5852_v28  ;;  %v5693_v50 = vmul.f32 %v10853_v6, %v12974_v40  ;;  %v5501_v55 = vmul.f32 %v10854_v48, %v12945_v11  ;;  %v13072_v36 = vmax.f32 %v5874_v49, 0.0  ;;  %v18654_v6 = vld [vmem:[#allocation90_spill] sm:$0xff]  ;;  %v10855_v49 = vld [vmem:[%s11010_s11 + $0x98] sm:$0xff] }
 0x151   : > { %v5797_v27 = vsel %vm375_vm0, %v18645_v7, %v18643_v1  ;;  %v5715_v62 = vadd.f32 %v5691_v19, %v5662_v26  ;;  %v18650_v7 = vld [vmem:[#allocation98_spill] sm:$0xff]  ;;  %v5614_v17 = vrot.slane %v5556_v35, 1 }
 0x152   : > { %v13061_v8 = vpop.permute.xlu0 %6011  ;;  %18649 = vst [vmem:[#allocation86_spill] sm:$0xff] %v13072_v36  ;;  %v5854_v1 = vadd.f32 %v5797_v27, %v5713_v54  ;;  %v18651_v28 = vrot.slane %v18650_v7, 1  ;;  %v5695_v54 = vmul.f32 %v10855_v49, %v12974_v40  ;;  %v13090_v26 = vmax.f32 %v5876_v4, 0.0  ;;  %v18657_v35 = vld [vmem:[#allocation102_spill] sm:$0xff]  ;;  %v18659_v7 = vld [vmem:[#allocation91_spill] sm:$0xff] }
 0x153   : > { %5256 = vperm.xlu0 %10797, %v13031_v39   ;;  %1859 = vperm.xlu1 %10790, %v12585_v38   ;;  %18646 = vst [vmem:[#allocation80_spill] sm:$0xff] %v13061_v8  ;;  %v18647_v38 = vld [vmem:[#allocation88_spill] sm:$0xff]  ;;  %v18655_v8 = vrot.slane %v18654_v6, 1  ;;  %v10856_v4 = vld [vmem:[%s11010_s11 + $0xa0] sm:$0x3]  ;;  %v5697_v6 = vmul.f32 %v12974_v40, %v12297_v25 }
 0x154   : > { %v18648_v31 = vrot.slane %v18647_v38, 1  ;;  %v18653_v38 = vrot.slane %v18652_v34, 1  ;;  %18656 = vst [vmem:[#allocation83_spill] sm:$0xff] %v13090_v26  ;;  %v5878_v19 = vadd.f32 %v12832_v63, %v5854_v1  ;;  %v5505_v1 = vmul.f32 %v10856_v4, %v12945_v11 }
 0x155   : > { %v5800_v48 = vsel %vm375_vm0, %v5798_v37, %v18655_v8  ;;  %v5503_v37 = vmul.f32 %v10852_v43, %v12945_v11  ;;  %v18658_v8 = vrot.slane %v18657_v35, 1 }
 0x156   : > { %v5664_v0 = vadd.f32 %v18648_v31, %v5499_v10  ;;  %v5613_v31 = vsel %vm375_vm0, %v18653_v38, %v18651_v28  ;;  %v13079_v10 = vpop.permute.xlu1 %1522  ;;  %v5856_v27 = vadd.f32 %v5800_v48, %v5715_v62  ;;  %v18660_v28 = vrot.slane %v18659_v7, 1  ;;  %v18662_v48 = vld [vmem:[#allocation100_spill] sm:$0xff] }
 0x157   : > { %6088 = vperm.xlu0 %10797, %v13050_v52   ;;  %1867 = vperm.xlu1 %10790, %v12594_v22   ;;  %v5666_v22 = vadd.f32 %v5613_v31, %v5501_v55  ;;  %v13107_v43 = vmax.f32 %v5878_v19, 0.0 }
 0x158   : > { %v5717_v52 = vadd.f32 %v5693_v50, %v5664_v0  ;;  %v5616_v0 = vsel %vm375_vm0, %v5614_v17, %v18658_v8  ;;  %v5750_v50 = vmul.f32 %v12957_v42, %v12297_v25  ;;  %v5880_v17 = vadd.f32 %v12832_v63, %v5856_v27  ;;  %v10857_v25 = vld [vmem:[%s11010_s11 + $0xb8] sm:$0x3] }
 0x159   : > { %v13088_v34 = vpop.permute.xlu0 %6021  ;;  %v5719_v31 = vadd.f32 %v5695_v54, %v5666_v22  ;;  %18661 = vst [vmem:[#allocation88_spill] sm:$0xff] %v13107_v43  ;;  %v5668_v62 = vadd.f32 %v5616_v0, %v5503_v37  ;;  %v18664_v22 = vld [vmem:[#allocation95_spill] sm:$0xff]  ;;  %v5562_v8 = vmul.f32 %v12902_v32, %v12315_v57  ;;  %v18666_v37 = vld [vmem:[#allocation104_spill] sm:$0xff]  ;;  %v5699_v4 = vmul.f32 %v10857_v25, %v12974_v40 }
 0x15a   : > { %v5858_v38 = vadd.f32 %v18660_v28, %v5717_v52  ;;  %v18663_v52 = vrot.slane %v18662_v48, 1  ;;  %v18665_v49 = vrot.slane %v18664_v22, 1  ;;  %v5808_v35 = vrot.slane %v5750_v50, 1  ;;  %v10858_v48 = vld [vmem:[%s11010_s11 + $0xb0] sm:$0xff] }
 0x15b   : > { %6100 = vperm.xlu0 %10797, %v13072_v36   ;;  %1875 = vperm.xlu1 %10790, %v12617_v30   ;;  %v18667_v0 = vrot.slane %v18666_v37, 1  ;;  %v5507_v22 = vmul.f32 %v10858_v48, %v12945_v11  ;;  %v13132_v32 = vmax.f32 %v5880_v17, 0.0  ;;  %v18673_v37 = vld [vmem:[#allocation105_spill] sm:$0xff]  ;;  %v5624_v48 = vrot.slane %v5562_v8, 1  ;;  %v18738_v36 = vld [vmem:[#allocation64_spill] sm:$0xff] }
 0x15c   : > { %v5807_v54 = vsel %vm375_vm0, %v18665_v49, %v18663_v52  ;;  %v5882_v27 = vadd.f32 %v12832_v63, %v5858_v38  ;;  %v5721_v52 = vadd.f32 %v5697_v6, %v5668_v62  ;;  %v18669_v49 = vld [vmem:[#allocation14_spill] sm:$0xff]  ;;  %v18671_v38 = vld [vmem:[#allocation111_spill] sm:$0xff]  ;;  %v5509_v6 = vmul.f32 %v12945_v11, %v12315_v57  ;;  %v10859_v8 = vld [vmem:[%s11010_s11 + $0xd8] sm:$0xff] }
 0x15d   : > { %v13099_v55 = vpop.permute.xlu1 %1527  ;;  %v5670_v28 = vadd.f32 %v18667_v0, %v5505_v1  ;;  %18668 = vst [vmem:[#allocation98_spill] sm:$0xff] %v13132_v32  ;;  %v5860_v50 = vadd.f32 %v5807_v54, %v5719_v31  ;;  %v18672_v30 = vrot.slane %v18671_v38, 1  ;;  %v18674_v0 = vrot.slane %v18673_v37, 1 }
 0x15e   : > { %v5701_v31 = vmul.f32 %v12974_v40, %v18598_v20  ;;  %v13150_v62 = vmax.f32 %v5882_v27, 0.0  ;;  %v18676_v54 = vrot.slane %v12423_v3, 1  ;;  %v18679_v38 = vrot.slane %v12378_v9, 1 }
 0x15f   : > { %6108 = vperm.xlu0 %10797, %v13090_v26   ;;  %1883 = vperm.xlu1 %10790, %v12643_v51   ;;  %v18670_v51 = vrot.slane %v18669_v49, 1  ;;  %v5810_v25 = vsel %vm375_vm0, %v5808_v35, %v18674_v0  ;;  %v5723_v17 = vadd.f32 %v5699_v4, %v5670_v28  ;;  %v5756_v28 = vmul.f32 %v10859_v8, %v12957_v42  ;;  %v18677_v4 = vld [vmem:[#allocation106_spill] sm:$0xff] }
 0x160   : > { %v13119_v7 = vpop.permute.xlu0 %6031  ;;  %18675 = vst [vmem:[#allocation92_spill] sm:$0xff] %v13150_v62  ;;  %v5626_v35 = vsel %vm375_vm0, %v5624_v48, %v18676_v54  ;;  %v5703_v57 = vmul.f32 %v10859_v8, %v12974_v40  ;;  %v18685_v54 = vld [vmem:[#allocation123_spill] sm:$0xff] }
 0x161   : > { %v5623_v1 = vsel %vm375_vm0, %v18672_v30, %v18670_v51  ;;  %v5884_v30 = vadd.f32 %v12832_v63, %v5860_v50  ;;  %v5862_v51 = vadd.f32 %v5810_v25, %v5721_v52  ;;  %v18680_v50 = vld [vmem:[#allocation115_spill] sm:$0xff]  ;;  %v5674_v37 = vadd.f32 %v5626_v35, %v5509_v6 }
 0x162   : > { %v13121_v19 = vpop.permute.xlu1 %1537  ;;  %v18681_v52 = vrot.slane %v18680_v50, 1  ;;  %v5818_v9 = vrot.slane %v5756_v28, 1  ;;  %v18686_v35 = vrot.slane %v18685_v54, 1  ;;  %v18697_v54 = vld [vmem:[#allocation4_spill] sm:$0xff] }
 0x163   : > { %6116 = vperm.xlu0 %10797, %v13107_v43   ;;  %1891 = vperm.xlu1 %10790, %v12658_v13   ;;  %v5672_v13 = vadd.f32 %v5623_v1, %v5507_v22  ;;  %v18678_v22 = vrot.slane %v18677_v4, 1  ;;  %v13172_v3 = vmax.f32 %v5884_v30, 0.0  ;;  %v5886_v42 = vadd.f32 %v12832_v63, %v5862_v51 }
 0x164   : > { %v5817_v1 = vsel %vm375_vm0, %v18681_v52, %v18679_v38  ;;  %v5727_v51 = vadd.f32 %v5703_v57, %v5674_v37  ;;  %v5820_v8 = vsel %vm375_vm0, %v5818_v9, %v18686_v35  ;;  %v18690_v52 = vld [vmem:[#allocation17_spill] sm:$0xff] }
 0x165   : > { %v5864_v49 = vadd.f32 %v18678_v22, %v5723_v17  ;;  %v5725_v27 = vadd.f32 %v5701_v31, %v5672_v13  ;;  %18682 = vst [vmem:[#allocation90_spill] sm:$0xff] %v13172_v3  ;;  %v5511_v13 = vmul.f32 %v12945_v11, %v12374_v58  ;;  %v5705_v17 = vmul.f32 %v12974_v40, %v12419_v47 }
 0x166   : > { %v13142_v26 = vpop.permute.xlu0 %772  ;;  %v13144_v43 = vpop.permute.xlu1 %1547  ;;  %v13185_v31 = vmax.f32 %v5886_v42, 0.0  ;;  %v18684_v58 = vrot.slane %v12432_v45, 1  ;;  %v18687_v47 = vmov 3   ;;  %v5868_v22 = vadd.f32 %v5820_v8, %v5727_v51 }
 0x167   : > { %6124 = vperm.xlu0 %10797, %v13132_v32   ;;  %1899 = vperm.xlu1 %10790, %v12667_v21   ;;  %v5866_v48 = vadd.f32 %v5817_v1, %v5725_v27  ;;  %v5888_v30 = vadd.f32 %v12832_v63, %v5864_v49  ;;  %v18691_v1 = vrot.slane %v18690_v52, 1 }
 0x168   : > { %18683 = vst [vmem:[#allocation102_spill] sm:$0xff] %v13185_v31  ;;  %v5676_v11 = vadd.f32 %v18684_v58, %v5511_v13  ;;  %v5892_v50 = vadd.f32 %v12832_v63, %v5868_v22 }
 0x169   : > { %v13199_v40 = vmax.f32 %v5888_v30, 0.0  ;;  %v5890_v4 = vadd.f32 %v12832_v63, %v5866_v48 }
 0x16a   : > { %v13160_v20 = vpop.permute.xlu0 %784  ;;  %v5729_v49 = vadd.f32 %v5705_v17, %v5676_v11  ;;  %v13219_v13 = vmax.f32 %v5892_v50, 0.0 }
 0x16b   : > { %6132 = vperm.xlu0 %10797, %v13150_v62   ;;  %1907 = vperm.xlu1 %10790, %v12678_v24   ;;  %18688 = vst [vmem:[#allocation91_spill] sm:$0xff] %v13199_v40  ;;  %v13208_v38 = vmax.f32 %v5890_v4, 0.0  ;;  %v10860_v4 = vld [vmem:[%s11010_s11 + $0x30] sm:$0xff]  ;;  %v18723_v62 = vld [vmem:[#allocation57_spill] sm:$0xff] }
 0x16c   : > { %v13177_v0 = vpop.permute.xlu1 %1557  ;;  %v5870_v57 = vadd.f32 %v18691_v1, %v5729_v49  ;;  %18692 = vst [vmem:[#allocation95_spill] sm:$0xff] %v13219_v13  ;;  %v4772_v22 = vmul.f32 %v10860_v4, %v12719_v46  ;;  %v18700_v49 = vld [vmem:[#allocation6_spill] sm:$0xff]  ;;  %v18706_v46 = vrot.slane %v12731_v44, 1  ;;  %v18713_v44 = vld [vmem:[#allocation51_spill] sm:$0xff] }
 0x16d   : > { %18689 = vst [vmem:[#allocation100_spill] sm:$0xff] %v13208_v38 }
 0x16e   : > { %v13179_v25 = vpop.permute.xlu0 %792  ;;  %v5894_v9 = vadd.f32 %v12832_v63, %v5870_v57  ;;  %v4822_v1 = vrot.slane %v4772_v22, 1  ;;  %v18703_v57 = vld [vmem:[#allocation8_spill] sm:$0xff]  ;;  %v18709_v22 = vld [vmem:[#allocation49_spill] sm:$0xff] }
 0x16f   : > { %6140 = vperm.xlu0 %10797, %v13172_v3   ;;  %1915 = vperm.xlu1 %10790, %v12687_v14  }
 0x170   : > { %v13190_v6 = vpop.permute.xlu1 %1567 }
 0x172   : > { %v13195_v28 = vpop.permute.xlu0 %800 }
 0x173   : > { %6148 = vperm.xlu0 %10797, %v13185_v31   ;;  %10791 = vset.pattern.permute.xlu1 %v18687_v47  ;;  %v18741_v47 = vld [vmem:[#allocation71_spill] sm:$0xff] }
 0x174   : > { %1971 = vperm.xlu1 %10791, %v18540_v61   ;;  %v13203_v45 = vpop.permute.xlu1 %1577 }
 0x176   : > { %v13205_v27 = vpop.permute.xlu0 %808 }
 0x177   : > { %6156 = vperm.xlu0 %10797, %v13199_v40   ;;  %v18712_v40 = vld [vmem:[#allocation12_spill] sm:$0xff] }
 0x178   : > { %1975 = vperm.xlu1 %10791, %v12438_v29   ;;  %v13214_v42 = vpop.permute.xlu1 %1587  ;;  %v13228_v29 = vmax.f32 %v5894_v9, 0.0 }
 0x17a   : > { %v13216_v37 = vpop.permute.xlu0 %816  ;;  %18693 = vst [vmem:[#allocation104_spill] sm:$0xff] %v13228_v29 }
 0x17b   : > { %6164 = vperm.xlu0 %10797, %v13208_v38   ;;  %v4896_v38 = vmul.f32 %v12984_v23, %v12767_v15 }
 0x17c   : > { %1983 = vperm.xlu1 %10791, %v18545_v16   ;;  %v13223_v48 = vpop.permute.xlu1 %1597 }
 0x17e   : > { %v13225_v17 = vpop.permute.xlu0 %824 }
 0x17f   : > { %6172 = vperm.xlu0 %10797, %v13219_v13   ;;  %v18708_v13 = vld [vmem:[#allocation10_spill] sm:$0xff] }
 0x180   : > { %1991 = vperm.xlu1 %10791, %v18549_v60   ;;  %v13231_v30 = vpop.permute.xlu1 %1607 }
 0x181   : > { %18694 = vst [vmem:[#allocation14_spill] sm:$0xff] %v13231_v30 }
 0x182   : > { %v13233_v51 = vpop.permute.xlu0 %832 }
 0x183   : > { %6180 = vperm.xlu0 %10797, %v13228_v29   ;;  %v18707_v29 = vld [vmem:[#allocation145_spill] sm:$0xff] }
 0x184   : > { %1999 = vperm.xlu1 %10791, %v18554_v2   ;;  %v13237_v58 = vpop.permute.xlu1 %1617  ;;  %v4934_v24 = vmul.f32 %v12984_v23, %v18707_v29 }
 0x185   : > { %18695 = vst [vmem:[#allocation111_spill] sm:$0xff] %v13237_v58 }
 0x186   : > { %v13239_v11 = vpop.permute.xlu0 %1679 }
 0x187   : > { %18696 = vst [vmem:[#allocation105_spill] sm:$0xff] %v13239_v11  ;;  %10799 = vset.pattern.permute.xlu0 %v18606_v53 }
 0x188   : > { %877 = vperm.xlu0 %10799, %v18697_v54   ;;  %2007 = vperm.xlu1 %10791, %v18559_v59   ;;  %v13244_v35 = vpop.permute.xlu1 %1627  ;;  %v4734_v54 = vmul.f32 %v10860_v4, %v12748_v56  ;;  %v4984_v4 = vrot.slane %v4934_v24, 1 }
 0x189   : > { %18698 = vst [vmem:[#allocation106_spill] sm:$0xff] %v13244_v35  ;;  %v18785_v35 = vld [vmem:[#allocation126_spill] sm:$0xff] }
 0x18a   : > { %v13246_v8 = vpop.permute.xlu0 %1691 }
 0x18b   : > { %18699 = vst [vmem:[#allocation115_spill] sm:$0xff] %v13246_v8 }
 0x18c   : > { %889 = vperm.xlu0 %10799, %v18700_v49   ;;  %2015 = vperm.xlu1 %10791, %v18565_v12   ;;  %v4824_v49 = vsel %vm375_vm0, %v4822_v1, %v18706_v46 }
 0x18d   : > { %v13252_v50 = vpop.permute.xlu1 %1683  ;;  %v4875_v21 = vadd.f32 %v4824_v49, %v4734_v54  ;;  %v18718_v54 = vld [vmem:[#allocation15_spill] sm:$0xff]  ;;  %v18719_v49 = vld [vmem:[#allocation53_spill] sm:$0xff] }
 0x18e   : > { %18701 = vst [vmem:[#allocation123_spill] sm:$0xff] %v13252_v50  ;;  %v13254_v52 = vpop.permute.xlu0 %1699  ;;  %v2130_v50 = vlaneseq }
 0x18f   : > { %18702 = vst [vmem:[#allocation17_spill] sm:$0xff] %v13254_v52  ;;  %v4912_v29 = vadd.f32 %v4896_v38, %v4875_v21  ;;  %v10922_v52 = vmov 1966171168  }
 0x190   : > { %897 = vperm.xlu0 %10799, %v18703_v57   ;;  %2023 = vperm.xlu1 %10791, %v18570_v33  }
 0x191   : > { %v13258_v9 = vpop.permute.xlu1 %1687 }
 0x192   : > { %18704 = vst [vmem:[#allocation4_spill] sm:$0xff] %v13258_v9  ;;  %v13261_v14 = vpop.permute.xlu0 %1707 }
 0x193   : > { %18705 = vst [vmem:[#allocation6_spill] sm:$0xff] %v13261_v14  ;;  %v18779_v14 = vld [vmem:[#allocation23_spill] sm:$0xff] }
 0x194   : > { %905 = vperm.xlu0 %10799, %v18708_v13   ;;  %2031 = vperm.xlu1 %10791, %v18709_v22   ;;  %v18716_v13 = vld [vmem:[#allocation40_spill] sm:$0xff] }
 0x195   : > { %v13270_v57 = vpop.permute.xlu1 %1695  ;;  %v18717_v31 = vrot.slane %v18716_v13, 1 }
 0x196   : > { %18710 = vst [vmem:[#allocation8_spill] sm:$0xff] %v13270_v57  ;;  %v13274_v56 = vpop.permute.xlu0 %1715  ;;  %v18778_v57 = vld [vmem:[#allocation18_spill] sm:$0xff] }
 0x197   : > { %18711 = vst [vmem:[#allocation145_spill] sm:$0xff] %v13274_v56  ;;  %v4986_v3 = vsel %vm375_vm0, %v4984_v4, %v18717_v31  ;;  %v18726_v31 = vmov 0   ;;  %v18727_v4 = vld [vmem:[#allocation55_spill] sm:$0xff] }
 0x198   : > { %913 = vperm.xlu0 %10799, %v18712_v40   ;;  %2039 = vperm.xlu1 %10791, %v18713_v44   ;;  %v5037_v24 = vadd.f32 %v4986_v3, %v4912_v29  ;;  %v18722_v40 = vld [vmem:[#allocation22_spill] sm:$0xff] }
 0x199   : > { %v13278_v1 = vpop.permute.xlu1 %1703 }
 0x19a   : > { %18714 = vst [vmem:[#allocation10_spill] sm:$0xff] %v13278_v1  ;;  %v13280_v46 = vpop.permute.xlu0 %1723  ;;  %v5053_v38 = vadd.f32 %v12832_v63, %v5037_v24  ;;  %v18777_v1 = vld [vmem:[#allocation125_spill] sm:$0xff] }
 0x19b   : > { %18715 = vst [vmem:[#allocation49_spill] sm:$0xff] %v13280_v46  ;;  %v18774_v46 = vld [vmem:[#allocation122_spill] sm:$0xff] }
 0x19c   : > { %921 = vperm.xlu0 %10799, %v18718_v54   ;;  %2047 = vperm.xlu1 %10791, %v18719_v49   ;;  %v13303_v3 = vmax.f32 %v5053_v38, 0.0 }
 0x19d   : > { %v13287_v15 = vpop.permute.xlu1 %1711 }
 0x19e   : > { %18720 = vst [vmem:[#allocation12_spill] sm:$0xff] %v13287_v15  ;;  %v13289_v23 = vpop.permute.xlu0 %1731  ;;  %18729 = vst [vmem:[#allocation22_spill] sm:$0xff] %v13303_v3  ;;  %v18773_v15 = vld [vmem:[#allocation120_spill] sm:$0xff] }
 0x19f   : > { %18721 = vst [vmem:[#allocation51_spill] sm:$0xff] %v13289_v23 }
 0x1a0   : > { %929 = vperm.xlu0 %10799, %v18722_v40   ;;  %2055 = vperm.xlu1 %10791, %v18723_v62  }
 0x1a1   : > { %v13293_v21 = vpop.permute.xlu1 %1719 }
 0x1a2   : > { %18724 = vst [vmem:[#allocation40_spill] sm:$0xff] %v13293_v21  ;;  %v13296_v13 = vpop.permute.xlu0 %1739 }
 0x1a3   : > { %18725 = vst [vmem:[#allocation15_spill] sm:$0xff] %v13296_v13 }
 0x1a4   : > { %1827 = vperm.xlu0 %10799, %v18540_v61   ;;  %10792 = vset.pattern.permute.xlu1 %v18726_v31  ;;  %v18733_v61 = vld [vmem:[#allocation58_spill] sm:$0xff] }
 0x1a5   : > { %5085 = vperm.xlu1 %10792, %v18727_v4   ;;  %v13301_v54 = vpop.permute.xlu1 %1727 }
 0x1a6   : > { %18728 = vst [vmem:[#allocation53_spill] sm:$0xff] %v13301_v54  ;;  %v13305_v29 = vpop.permute.xlu0 %1747 }
 0x1a7   : > { %18730 = vst [vmem:[#allocation57_spill] sm:$0xff] %v13305_v29  ;;  %v18767_v29 = vld [vmem:[#allocation116_spill] sm:$0xff] }
 0x1a8   : > { %1839 = vperm.xlu0 %10799, %v18545_v16  }
 0x1a9   : > { %5095 = vperm.xlu1 %10792, %v13303_v3   ;;  %v13309_v40 = vpop.permute.xlu1 %1735 }
 0x1aa   : > { %18731 = vst [vmem:[#allocation150_spill] sm:$0xff] %v13309_v40  ;;  %v13311_v63 = vpop.permute.xlu0 %1755 }
 0x1ab   : > { %18732 = vst [vmem:[#allocation151_spill] sm:$0xff] %v13311_v63  ;;  %v18765_v63 = vld [vmem:[#allocation109_spill] sm:$0xff] }
 0x1ac   : > { %1847 = vperm.xlu0 %10799, %v18549_v60  }
 0x1ad   : > { %5100 = vperm.xlu1 %10792, %v18733_v61   ;;  %v13315_v24 = vpop.permute.xlu1 %1743 }
 0x1ae   : > { %18734 = vst [vmem:[#allocation152_spill] sm:$0xff] %v13315_v24  ;;  %v13317_v32 = vpop.permute.xlu0 %1763  ;;  %v18764_v24 = vld [vmem:[#allocation108_spill] sm:$0xff] }
 0x1af   : > { %18735 = vst [vmem:[#allocation153_spill] sm:$0xff] %v13317_v32 }
 0x1b0   : > { %1855 = vperm.xlu0 %10799, %v18554_v2  }
 0x1b1   : > { %5110 = vperm.xlu1 %10792, %v12906_v41   ;;  %v13321_v38 = vpop.permute.xlu1 %1751 }
 0x1b2   : > { %18736 = vst [vmem:[#allocation154_spill] sm:$0xff] %v13321_v38  ;;  %v13323_v16 = vpop.permute.xlu0 %1771  ;;  %v18744_v38 = vld [vmem:[#allocation149_spill] sm:$0xff] }
 0x1b3   : > { %18737 = vst [vmem:[#allocation155_spill] sm:$0xff] %v13323_v16 }
 0x1b4   : > { %1863 = vperm.xlu0 %10799, %v18559_v59  }
 0x1b5   : > { %5120 = vperm.xlu1 %10792, %v18738_v36   ;;  %v13327_v31 = vpop.permute.xlu1 %1759 }
 0x1b6   : > { %18739 = vst [vmem:[#allocation156_spill] sm:$0xff] %v13327_v31  ;;  %v13329_v60 = vpop.permute.xlu0 %5196  ;;  %v18763_v31 = vld [vmem:[#allocation103_spill] sm:$0xff] }
 0x1b7   : > { %18740 = vst [vmem:[#allocation157_spill] sm:$0xff] %v13329_v60 }
 0x1b8   : > { %1871 = vperm.xlu0 %10799, %v18565_v12  }
 0x1b9   : > { %5130 = vperm.xlu1 %10792, %v18741_v47   ;;  %v13333_v32 = vpop.permute.xlu1 %1767  ;;  %v18795_v47 = vld [vmem:[#allocation38_spill] sm:$0xff] }
 0x1ba   : > { %18742 = vst [vmem:[#allocation158_spill] sm:$0xff] %v13333_v32  ;;  %v13335_v2 = vpop.permute.xlu0 %5208 }
 0x1bb   : > { %18743 = vst [vmem:[#allocation159_spill] sm:$0xff] %v13335_v2 }
 0x1bc   : > { %1879 = vperm.xlu0 %10799, %v18570_v33  }
 0x1bd   : > { %5140 = vperm.xlu1 %10792, %v18744_v38   ;;  %v18783_v38 = vld [vmem:[#allocation47_spill] sm:$0xff] }
 0x1be   : > { %v13339_v16 = vpop.permute.xlu0 %5216  ;;  %v13341_v59 = vpop.permute.xlu1 %1823 }
 0x1bf   : > { %18745 = vst [vmem:[#allocation160_spill] sm:$0xff] %v13339_v16  ;;  %18746 = vst [vmem:[#allocation161_spill] sm:$0xff] %v13341_v59  ;;  %v18751_v16 = vmov 1  }
 0x1c0   : > { %1887 = vperm.xlu0 %10799, %v18709_v22   ;;  %v18753_v22 = vld [vmem:[#allocation59_spill] sm:$0xff] }
 0x1c1   : > { %5150 = vperm.xlu1 %10792, %v13015_v18  }
 0x1c2   : > { %v13345_v60 = vpop.permute.xlu0 %5224  ;;  %v13347_v12 = vpop.permute.xlu1 %1831 }
 0x1c3   : > { %18747 = vst [vmem:[#allocation162_spill] sm:$0xff] %v13345_v60  ;;  %18748 = vst [vmem:[#allocation163_spill] sm:$0xff] %v13347_v12  ;;  %v18762_v12 = vld [vmem:[#allocation99_spill] sm:$0xff] }
 0x1c4   : > { %1895 = vperm.xlu0 %10799, %v18713_v44  }
 0x1c5   : > { %5160 = vperm.xlu1 %10792, %v13031_v39  }
 0x1c6   : > { %v13351_v2 = vpop.permute.xlu0 %5232  ;;  %v13353_v33 = vpop.permute.xlu1 %1835 }
 0x1c7   : > { %18749 = vst [vmem:[#allocation164_spill] sm:$0xff] %v13351_v2  ;;  %18750 = vst [vmem:[#allocation165_spill] sm:$0xff] %v13353_v33  ;;  %v18758_v2 = vld [vmem:[#allocation96_spill] sm:$0xff] }
 0x1c8   : > { %1903 = vperm.xlu0 %10799, %v18719_v49   ;;  %v13371_v49 = vld [vmem:[%s17857_s3] ss:$0 sm:$0xff] }
 0x1c9   : > { %10793 = vset.pattern.permute.xlu1 %v18751_v16  ;;  %v18757_v16 = vld [vmem:[#allocation93_spill] sm:$0xff]  ;;  %v745_v54 = vmul.f32 %v13371_v49, %v18767_v29  ;;  %v750_v18 = vmul.f32 %v13371_v49, %v18774_v46  ;;  %v752_v56 = vmul.f32 %v13371_v49, %v18777_v1  ;;  %v2128_v1 = vunpack.c.l.s4 %v10922_v52  ;;  %v18787_v52 = vld [vmem:[#allocation36_spill] sm:$0xff] }
 0x1ca   : > { %v13357_v59 = vpop.permute.xlu0 %5240  ;;  %5200 = vperm.xlu1 %10793, %v18753_v22   ;;  %v13360_v32 = vpop.permute.xlu1 %1843  ;;  %v753_v11 = vmul.f32 %v13371_v49, %v18785_v35 }
 0x1cb   : > { %18752 = vst [vmem:[#allocation166_spill] sm:$0xff] %v13357_v59  ;;  %18754 = vst [vmem:[#allocation167_spill] sm:$0xff] %v13360_v32  ;;  %v741_v59 = vmul.f32 %v13371_v49, %v18757_v16  ;;  %v739_v32 = vmul.f32 %v13371_v49, %v18758_v2  ;;  %v740_v16 = vmul.f32 %v13371_v49, %v18763_v31  ;;  %v18768_v31 = vld [vmem:[#allocation118_spill] sm:$0xff] }
 0x1cc   : > { %1911 = vperm.xlu0 %10799, %v18723_v62   ;;  %v744_v2 = vmul.f32 %v13371_v49, %v18764_v24  ;;  %v748_v13 = vmul.f32 %v13371_v49, %v18768_v31  ;;  %v18772_v31 = vld [vmem:[#allocation32_spill] sm:$0xff] }
 0x1ce   : > { %v13363_v60 = vpop.permute.xlu0 %5248  ;;  %5204 = vperm.xlu1 %10793, %v13303_v3   ;;  %v13366_v44 = vpop.permute.xlu1 %1851 }
 0x1cf   : > { %18755 = vst [vmem:[#allocation168_spill] sm:$0xff] %v13363_v60  ;;  %18756 = vst [vmem:[#allocation169_spill] sm:$0xff] %v13366_v44  ;;  %v18760_v60 = vld [vmem:[#allocation63_spill] sm:$0xff]  ;;  %v13386_v44 = vld [vmem:[%s17858_s4] ss:$0 sm:$0xff] }
 0x1d0   : > { %5296 = vperm.xlu0 %10799, %v18753_v22   ;;  %v742_v22 = vmul.f32 %v13371_v49, %v18762_v12  ;;  %v757_v39 = vadd.f32 %v13386_v44, %v741_v59  ;;  %v13403_v12 = vadd.f32 %v13386_v44, %v739_v32  ;;  %v756_v32 = vadd.f32 %v13386_v44, %v740_v16 }
 0x1d1   : > { %v13422_v59 = vadd.f32 %v13386_v44, %v744_v2  ;;  %v761_v2 = vadd.f32 %v13386_v44, %v745_v54  ;;  %v13446_v46 = vadd.f32 %v13386_v44, %v748_v13  ;;  %v13457_v54 = vld [vmem:[%s17857_s3 + $0x3] ss:$0 sm:$0xff]  ;;  %v13468_v8 = vadd.f32 %v13386_v44, %v750_v18 }
 0x1d2   : > { %v13378_v62 = vpop.permute.xlu0 %5256  ;;  %5212 = vperm.xlu1 %10793, %v18760_v60   ;;  %v13381_v33 = vpop.permute.xlu1 %1859  ;;  %v13418_v29 = vadd.f32 %v13386_v44, %v742_v22  ;;  %v13434_v22 = vld [vmem:[%s17857_s3 + $0x2] ss:$0 sm:$0xff]  ;;  %v13481_v18 = vadd.f32 %v13386_v44, %v752_v56  ;;  %v13496_v56 = vshrl.u32 %v2130_v50, 7  ;;  %v18801_v50 = vld [vmem:[#allocation48_spill] sm:$0xff] }
 0x1d3   : > { %18759 = vst [vmem:[#allocation93_spill] sm:$0xff] %v13378_v62  ;;  %18761 = vst [vmem:[#allocation96_spill] sm:$0xff] %v13381_v33  ;;  %v743_v62 = vmul.f32 %v13371_v49, %v18765_v63  ;;  %v18766_v33 = vld [vmem:[#allocation113_spill] sm:$0xff]  ;;  %v13410_v63 = vld [vmem:[%s17857_s3 + $0x1] ss:$0 sm:$0xff] }
 0x1d4   : > { %5308 = vperm.xlu0 %10799, %v18760_v60   ;;  %v746_v40 = vmul.f32 %v13371_v49, %v18766_v33  ;;  %v18770_v60 = vld [vmem:[#allocation65_spill] sm:$0xff]  ;;  %v842_v21 = vmul.f32 %v13410_v63, %v18772_v31  ;;  %v18775_v31 = vld [vmem:[#allocation124_spill] sm:$0xff]  ;;  %18784 = vst [vmem:[#allocation113_spill] sm:$0xff] %v13468_v8  ;;  %18789 = vst [vmem:[#allocation116_spill] sm:$0xff] %v13481_v18 }
 0x1d5   : > { %v759_v23 = vadd.f32 %v13386_v44, %v743_v62  ;;  %v749_v62 = vmul.f32 %v13371_v49, %v18775_v31  ;;  %v18798_v18 = vld [vmem:[#allocation39_spill] sm:$0xff] }
 0x1d6   : > { %v13412_v24 = vpop.permute.xlu0 %6088  ;;  %5220 = vperm.xlu1 %10793, %v18770_v60   ;;  %v13415_v33 = vpop.permute.xlu1 %1867  ;;  %v13438_v16 = vadd.f32 %v13386_v44, %v746_v40  ;;  %v754_v40 = vmul.f32 %v13371_v49, %v18779_v14  ;;  %v858_v9 = vadd.f32 %v842_v21, %v757_v39  ;;  %v1631_v21 = vmul.f32 %v13371_v49, %v18787_v52 }
 0x1d7   : > { %18769 = vst [vmem:[#allocation99_spill] sm:$0xff] %v13412_v24  ;;  %18771 = vst [vmem:[#allocation103_spill] sm:$0xff] %v13415_v33  ;;  %v747_v24 = vmul.f32 %v13371_v49, %v18773_v15  ;;  %v18776_v33 = vld [vmem:[#allocation138_spill] sm:$0xff]  ;;  %v765_v39 = vadd.f32 %v13386_v44, %v749_v62  ;;  %v18793_v62 = vld [vmem:[#allocation72_spill] sm:$0xff] }
 0x1d8   : > { %5316 = vperm.xlu0 %10799, %v18770_v60   ;;  %v943_v15 = vmul.f32 %v13434_v22, %v18776_v33  ;;  %v751_v60 = vmul.f32 %v13371_v49, %v18778_v57  ;;  %v18781_v33 = vld [vmem:[#allocation68_spill] sm:$0xff]  ;;  %v1044_v57 = vmul.f32 %v13457_v54, %v18783_v38  ;;  %v13485_v35 = vadd.f32 %v13386_v44, %v754_v40 }
 0x1d9   : > { %v763_v14 = vadd.f32 %v13386_v44, %v747_v24 }
 0x1da   : > { %v13459_v31 = vpop.permute.xlu0 %6100  ;;  %5228 = vperm.xlu1 %10793, %v18781_v33   ;;  %v13462_v13 = vpop.permute.xlu1 %1875  ;;  %v959_v24 = vadd.f32 %v943_v15, %v858_v9  ;;  %v767_v30 = vadd.f32 %v13386_v44, %v751_v60  ;;  %18790 = vst [vmem:[#allocation118_spill] sm:$0xff] %v13485_v35  ;;  %v1636_v9 = vmul.f32 %v13371_v49, %v18795_v47  ;;  %v2129_v15 = vunpack.c.0.s8 %v2128_v1  ;;  %v18797_v35 = vld [vmem:[#allocation43_spill] sm:$0xff] }
 0x1db   : > { %18780 = vst [vmem:[#allocation108_spill] sm:$0xff] %v13459_v31  ;;  %18782 = vst [vmem:[#allocation109_spill] sm:$0xff] %v13462_v13  ;;  %v18786_v31 = vld [vmem:[#allocation28_spill] sm:$0xff]  ;;  %v18788_v13 = vld [vmem:[#allocation29_spill] sm:$0xff]  ;;  %v769_v60 = vadd.f32 %v13386_v44, %v753_v11  ;;  %v1640_v1 = vmul.f32 %v13371_v49, %v18801_v50 }
 0x1dc   : > { %v841_v58 = vmul.f32 %v13410_v63, %v18786_v31  ;;  %5324 = vperm.xlu0 %10799, %v18781_v33   ;;  %v1634_v38 = vmul.f32 %v13371_v49, %v18788_v13  ;;  %v18791_v31 = vld [vmem:[#allocation37_spill] sm:$0xff]  ;;  %v1060_v13 = vadd.f32 %v1044_v57, %v959_v24  ;;  %v18804_v57 = vld [vmem:[#allocation128_spill] sm:$0xff]  ;;  %v13530_v50 = vadd.f32 %v13386_v44, %v1636_v9 }
 0x1dd   : > { %v844_v33 = vmul.f32 %v13410_v63, %v18791_v31  ;;  %v1638_v31 = vmul.f32 %v13371_v49, %v18797_v35  ;;  %v18802_v11 = vld [vmem:[#allocation41_spill] sm:$0xff]  ;;  %v1642_v24 = vmul.f32 %v13371_v49, %v18804_v57  ;;  %v13548_v9 = vadd.f32 %v13386_v44, %v1640_v1 }
 0x1de   : > { %v13489_v8 = vpop.permute.xlu0 %6108  ;;  %5236 = vperm.xlu1 %10793, %v18793_v62   ;;  %v13492_v52 = vpop.permute.xlu1 %1883  ;;  %v13499_v40 = vadd.f32 %v841_v58, %v756_v32  ;;  %v13510_v47 = vadd.f32 %v13386_v44, %v1634_v38  ;;  %v848_v58 = vmul.f32 %v13410_v63, %v18802_v11  ;;  %v18808_v38 = vld [vmem:[#allocation78_spill] sm:$0xff]  ;;  %18810 = vst [vmem:[#allocation47_spill] sm:$0xff] %v13530_v50 }
 0x1df   : > { %18792 = vst [vmem:[#allocation32_spill] sm:$0xff] %v13489_v8  ;;  %18794 = vst [vmem:[#allocation120_spill] sm:$0xff] %v13492_v52  ;;  %v846_v8 = vmul.f32 %v13410_v63, %v18798_v18  ;;  %v13507_v52 = vadd.f32 %v13386_v44, %v1631_v21  ;;  %v13516_v32 = vadd.f32 %v844_v33, %v759_v23  ;;  %v18805_v18 = vld [vmem:[#allocation45_spill] sm:$0xff]  ;;  %v18811_v23 = vld [vmem:[#allocation131_spill] sm:$0xff] }
 0x1e0   : > { %18796 = vst [vmem:[#allocation122_spill] sm:$0xff] %v13499_v40  ;;  %5332 = vperm.xlu0 %10799, %v18793_v62   ;;  %18800 = vst [vmem:[#allocation138_spill] sm:$0xff] %v13510_v47  ;;  %v850_v35 = vmul.f32 %v13410_v63, %v18805_v18  ;;  %v18806_v62 = vld [vmem:[#allocation129_spill] sm:$0xff]  ;;  %v1644_v33 = vmul.f32 %v13371_v49, %v18811_v23  ;;  %v13535_v11 = vsub.s32 %v2129_v15, %v13496_v56 }
 0x1e1   : > { %18799 = vst [vmem:[#allocation124_spill] sm:$0xff] %v13507_v52  ;;  %18803 = vst [vmem:[#allocation125_spill] sm:$0xff] %v13516_v32  ;;  %v852_v21 = vmul.f32 %v13410_v63, %v18806_v62  ;;  %v2224_v57 = vcombine.high %v1060_v13, %v1060_v13  ;;  %v13538_v18 = vadd.f32 %v13386_v44, %v1638_v31  ;;  %v18815_v52 = vld [vmem:[#allocation132_spill] sm:$0xff]  ;;  %v18817_v15 = vld [vmem:[#allocation137_spill] sm:$0xff] }
 0x1e2   : > { %v13524_v40 = vpop.permute.xlu0 %6116  ;;  %5244 = vperm.xlu1 %10793, %v18808_v38   ;;  %v13527_v47 = vpop.permute.xlu1 %1891  ;;  %18812 = vst [vmem:[#allocation126_spill] sm:$0xff] %v13535_v11  ;;  %v13540_v62 = vadd.f32 %v846_v8, %v761_v2  ;;  %v13550_v23 = vadd.f32 %v848_v58, %v763_v14  ;;  %v1648_v50 = vmul.f32 %v13371_v49, %v18817_v15  ;;  %v18818_v31 = vld [vmem:[#allocation139_spill] sm:$0xff]  ;;  %v18823_v14 = vld [vmem:[#allocation81_spill] sm:$0xff] }
 0x1e3   : > { %18807 = vst [vmem:[#allocation18_spill] sm:$0xff] %v13524_v40  ;;  %18809 = vst [vmem:[#allocation23_spill] sm:$0xff] %v13527_v47  ;;  %v18814_v40 = vld [vmem:[#allocation134_spill] sm:$0xff]  ;;  %v854_v47 = vmul.f32 %v13410_v63, %v18815_v52  ;;  %v1650_v8 = vmul.f32 %v13371_v49, %v18818_v31  ;;  %v13557_v2 = vadd.f32 %v13386_v44, %v1642_v24 }
 0x1e4   : > { %18813 = vst [vmem:[#allocation28_spill] sm:$0xff] %v13540_v62  ;;  %v1646_v32 = vmul.f32 %v13371_v49, %v18814_v40  ;;  %5340 = vperm.xlu0 %10799, %v18808_v38   ;;  %18816 = vst [vmem:[#allocation36_spill] sm:$0xff] %v13550_v23  ;;  %v13559_v40 = vadd.f32 %v850_v35, %v765_v39  ;;  %v13561_v62 = vadd.f32 %v852_v21, %v767_v30  ;;  %v18821_v52 = vld [vmem:[#allocation26_spill] sm:$0xff] }
 0x1e5   : > { %v1652_v38 = vmul.f32 %v13371_v49, %v18821_v52  ;;  %v13571_v15 = vadd.f32 %v13386_v44, %v1644_v33  ;;  %v18825_v31 = vld [vmem:[#allocation142_spill] sm:$0xff]  ;;  %v2231_v39 = vrot.slane %v1060_v13, %v13535_v11  ;;  %v2238_v30 = vrot.slane %v2224_v57, %v13535_v11  ;;  %v18828_v52 = vld [vmem:[#allocation135_spill] sm:$0xff]  ;;  %v18832_v57 = vld [vmem:[#allocation33_spill] sm:$0xff] }
 0x1e6   : > { %18819 = vst [vmem:[#allocation29_spill] sm:$0xff] %v13559_v40  ;;  %18820 = vst [vmem:[#allocation37_spill] sm:$0xff] %v13561_v62  ;;  %v13565_v1 = vpop.permute.xlu0 %6124  ;;  %5252 = vperm.xlu1 %10793, %v18823_v14   ;;  %v13568_v58 = vpop.permute.xlu1 %1899  ;;  %v5164_v24 = vmul.f32 %v13371_v49, %v18825_v31  ;;  %v13578_v35 = vadd.f32 %v13386_v44, %v1646_v32  ;;  %v13580_v21 = vadd.f32 %v854_v47, %v769_v60  ;;  %v18829_v40 = vld [vmem:[#allocation30_spill] sm:$0xff]  ;;  %v18833_v60 = vld [vmem:[#allocation121_spill] sm:$0xff] }
 0x1e7   : > { %18822 = vst [vmem:[#allocation38_spill] sm:$0xff] %v13565_v1  ;;  %18824 = vst [vmem:[#allocation43_spill] sm:$0xff] %v13568_v58  ;;  %v13584_v62 = vmul.f32 %v13434_v22, %v18828_v52  ;;  %v5167_v33 = vmul.f32 %v13371_v49, %v18829_v40  ;;  %v13590_v31 = vadd.f32 %v13386_v44, %v1648_v50  ;;  %v18837_v23 = vld [vmem:[#allocation50_spill] sm:$0xff] }
 0x1e8   : > { %18826 = vst [vmem:[#allocation39_spill] sm:$0xff] %v13578_v35  ;;  %18827 = vst [vmem:[#allocation48_spill] sm:$0xff] %v13580_v21  ;;  %5348 = vperm.xlu0 %10799, %v18823_v14   ;;  %v13593_v13 = vadd.f32 %v13386_v44, %v1650_v8  ;;  %v5169_v32 = vmul.f32 %v13371_v49, %v18832_v57  ;;  %v5171_v47 = vmul.f32 %v13371_v49, %v18833_v60  ;;  %v18835_v21 = vld [vmem:[#allocation140_spill] sm:$0xff]  ;;  %v18836_v14 = vld [vmem:[#allocation141_spill] sm:$0xff] }
 0x1e9   : > { %18830 = vst [vmem:[#allocation41_spill] sm:$0xff] %v13590_v31  ;;  %v13600_v52 = vadd.f32 %v13386_v44, %v1652_v38  ;;  %v13604_v40 = vmul.f32 %v13434_v22, %v18835_v21  ;;  %v13608_v50 = vmul.f32 %v13434_v22, %v18836_v14  ;;  %v5173_v8 = vmul.f32 %v13371_v49, %v18837_v23  ;;  %v18841_v60 = vld [vmem:[#allocation143_spill] sm:$0xff]  ;;  %v18843_v23 = vld [vmem:[#allocation110_spill] sm:$0xff] }
 0x1ea   : > { %18831 = vst [vmem:[#allocation128_spill] sm:$0xff] %v13593_v13  ;;  %v13612_v1 = vpop.permute.xlu0 %6132  ;;  %10794 = vset.pattern.permute.xlu1 %v18606_v53  ;;  %v13615_v57 = vpop.permute.xlu1 %1907  ;;  %v13618_v38 = vadd.f32 %v13386_v44, %v5164_v24  ;;  %v13622_v21 = vmul.f32 %v13434_v22, %v18841_v60  ;;  %v2239_v58 = vcombine.high %v2231_v39, %v2231_v39  ;;  %v18844_v53 = vld [vmem:[#allocation52_spill] sm:$0xff]  ;;  %v18845_v24 = vld [vmem:[#allocation54_spill] sm:$0xff]  ;;  %v18846_v13 = vld [vmem:[#allocation85_spill] sm:$0xff] }
 0x1eb   : > { %18834 = vst [vmem:[#allocation45_spill] sm:$0xff] %v13600_v52  ;;  %18838 = vst [vmem:[#allocation129_spill] sm:$0xff] %v13612_v1  ;;  %v2240_v52 = vcombine.high %v2238_v30, %v2238_v30  ;;  %5292 = vperm.xlu1 %10794, %v18727_v4   ;;  %v13626_v14 = vadd.f32 %v13386_v44, %v5167_v33  ;;  %v13630_v1 = vmul.f32 %v13434_v22, %v18843_v23  ;;  %v18849_v33 = vld [vmem:[#allocation144_spill] sm:$0xff]  ;;  %v18852_v35 = vld [vmem:[#allocation35_spill] sm:$0xff] }
 0x1ec   : > { %18839 = vst [vmem:[#allocation131_spill] sm:$0xff] %v13615_v57  ;;  %18840 = vst [vmem:[#allocation134_spill] sm:$0xff] %v13618_v38  ;;  %v5175_v57 = vmul.f32 %v13371_v49, %v18844_v53  ;;  %v5177_v38 = vmul.f32 %v13371_v49, %v18845_v24  ;;  %6236 = vperm.xlu0 %10799, %v18846_v13   ;;  %v13638_v60 = vadd.f32 %v13386_v44, %v5169_v32  ;;  %v18850_v23 = vld [vmem:[#allocation56_spill] sm:$0xff] }
 0x1ed   : > { %18842 = vst [vmem:[#allocation132_spill] sm:$0xff] %v13626_v14  ;;  %v13641_v4 = vadd.f32 %v13386_v44, %v5171_v47  ;;  %v13645_v14 = vmul.f32 %v13434_v22, %v18849_v33  ;;  %v6040_v31 = vmul.f32 %v13371_v49, %v18850_v23  ;;  %v13650_v53 = vadd.f32 %v13386_v44, %v5173_v8 }
 0x1ee   : > { %18847 = vst [vmem:[#allocation137_spill] sm:$0xff] %v13638_v60  ;;  %v13654_v24 = vmul.f32 %v13434_v22, %v18852_v35  ;;  %v13657_v32 = vrot.slane %v2231_v39, %v13535_v11  ;;  %v18854_v60 = vld [vmem:[#allocation147_spill] sm:$0xff]  ;;  %v13663_v33 = vpop.permute.xlu1 %1915  ;;  %v13666_v13 = vrot.slane %v2238_v30, %v13535_v11  ;;  %v13669_v8 = vrot.slane %v2239_v58, %v13535_v11  ;;  %v18860_v35 = vld [vmem:[#allocation148_spill] sm:$0xff] }
 0x1ef   : > { %18848 = vst [vmem:[#allocation139_spill] sm:$0xff] %v13641_v4  ;;  %18851 = vst [vmem:[#allocation26_spill] sm:$0xff] %v13650_v53  ;;  %v6043_v47 = vmul.f32 %v13371_v49, %v18854_v60  ;;  %v13661_v4 = vpop.permute.xlu0 %6140  ;;  %v13672_v23 = vrot.slane %v2240_v52, %v13535_v11  ;;  %v6045_v39 = vmul.f32 %v13371_v49, %v18860_v35  ;;  %5300 = vperm.xlu1 %10794, %v13303_v3   ;;  %v18862_v53 = vld [vmem:[#allocation146_spill] sm:$0xff]  ;;  %v18864_v58 = vld [vmem:[#allocation44_spill] sm:$0xff] }
 0x1f0   : > { %18853 = vst [vmem:[#allocation142_spill] sm:$0xff] %v13657_v32  ;;  %18855 = vst [vmem:[#allocation135_spill] sm:$0xff] %v13661_v4  ;;  %v13678_v60 = vadd.f32 %v13386_v44, %v5175_v57  ;;  %v13682_v4 = vmul.f32 %v13434_v22, %v18862_v53  ;;  %v13685_v30 = vadd.f32 %v13386_v44, %v5177_v38  ;;  %v18865_v52 = vld [vmem:[#allocation89_spill] sm:$0xff]  ;;  %v18867_v11 = vld [vmem:[#allocation60_spill] sm:$0xff] }
 0x1f1   : > { %18856 = vst [vmem:[#allocation30_spill] sm:$0xff] %v13663_v33  ;;  %18857 = vst [vmem:[#allocation33_spill] sm:$0xff] %v13666_v13  ;;  %v13689_v33 = vmul.f32 %v13457_v54, %v18864_v58  ;;  %6248 = vperm.xlu0 %10799, %v18865_v52   ;;  %v13693_v35 = vadd.f32 %v13386_v44, %v6040_v31  ;;  %v13697_v57 = vmul.f32 %v13457_v54, %v18867_v11  ;;  %v18870_v3 = vld [vmem:[#allocation69_spill] sm:$0xff]  ;;  %v18872_v52 = vld [vmem:[#allocation62_spill] sm:$0xff] }
 0x1f2   : > { %18858 = vst [vmem:[#allocation121_spill] sm:$0xff] %v13669_v8  ;;  %18859 = vst [vmem:[#allocation140_spill] sm:$0xff] %v13672_v23  ;;  %v6049_v38 = vmul.f32 %v13371_v49, %v18870_v3  ;;  %v13706_v58 = vadd.f32 %v13386_v44, %v6043_v47  ;;  %v13710_v31 = vmul.f32 %v13457_v54, %v18872_v52  ;;  %v18877_v32 = vld [vmem:[#allocation74_spill] sm:$0xff]  ;;  %v18878_v13 = vld [vmem:[#allocation79_spill] sm:$0xff] }
 0x1f3   : > { %18861 = vst [vmem:[#allocation141_spill] sm:$0xff] %v13678_v60  ;;  %18863 = vst [vmem:[#allocation50_spill] sm:$0xff] %v13685_v30  ;;  %v18869_v60 = vld [vmem:[#allocation114_spill] sm:$0xff]  ;;  %v13723_v47 = vadd.f32 %v13386_v44, %v6045_v39  ;;  %5304 = vperm.xlu1 %10794, %v18733_v61   ;;  %v13726_v52 = vpop.permute.xlu1 %1971  ;;  %v6055_v3 = vmul.f32 %v13371_v49, %v13033_v5  ;;  %v1630_v30 = vmul.f32 %v13371_v49, %v18878_v13  ;;  %v18882_v61 = vld [vmem:[#allocation67_spill] sm:$0xff] }
 0x1f4   : > { %18866 = vst [vmem:[#allocation143_spill] sm:$0xff] %v13693_v35  ;;  %18868 = vst [vmem:[#allocation110_spill] sm:$0xff] %v13697_v57  ;;  %v6047_v53 = vmul.f32 %v13371_v49, %v18869_v60  ;;  %v18873_v35 = vld [vmem:[#allocation70_spill] sm:$0xff]  ;;  %v13714_v57 = vpop.permute.xlu0 %6148  ;;  %v6053_v60 = vmul.f32 %v13371_v49, %v18877_v32  ;;  %v18883_v23 = vld [vmem:[#allocation80_spill] sm:$0xff] }
 0x1f5   : > { %18871 = vst [vmem:[#allocation52_spill] sm:$0xff] %v13706_v58  ;;  %v6051_v11 = vmul.f32 %v13371_v49, %v18873_v35  ;;  %18874 = vst [vmem:[#allocation54_spill] sm:$0xff] %v13723_v47  ;;  %v18875_v58 = vld [vmem:[#allocation61_spill] sm:$0xff]  ;;  %v18879_v8 = vld [vmem:[#allocation94_spill] sm:$0xff]  ;;  %v13743_v47 = vadd.f32 %v13386_v44, %v6049_v38  ;;  %v6057_v32 = vmul.f32 %v13371_v49, %v18883_v23 }
 0x1f6   : > { %v13730_v35 = vmul.f32 %v13457_v54, %v18875_v58  ;;  %6256 = vperm.xlu0 %10799, %v18879_v8   ;;  %v13740_v39 = vadd.f32 %v13386_v44, %v6047_v53  ;;  %v13747_v58 = vmul.f32 %v13457_v54, %v18882_v61  ;;  %v1632_v53 = vmul.f32 %v13371_v49, %v13079_v10  ;;  %v18886_v61 = vld [vmem:[#allocation84_spill] sm:$0xff] }
 0x1f7   : > { %18881 = vst [vmem:[#allocation35_spill] sm:$0xff] %v13743_v47  ;;  %v13752_v5 = vadd.f32 %v13386_v44, %v6051_v11  ;;  %v6059_v38 = vmul.f32 %v13371_v49, %v13088_v34  ;;  %v1633_v23 = vmul.f32 %v13371_v49, %v13099_v55  ;;  %v840_v11 = vmul.f32 %v13410_v63, %v13142_v26  ;;  %v13775_v10 = vpop.permute.xlu1 %1975  ;;  %v18890_v26 = vld [vmem:[#allocation97_spill] sm:$0xff] }
 0x1f8   : > { %18876 = vst [vmem:[#allocation144_spill] sm:$0xff] %v13730_v35  ;;  %18880 = vst [vmem:[#allocation56_spill] sm:$0xff] %v13740_v39  ;;  %v18885_v35 = vld [vmem:[#allocation76_spill] sm:$0xff]  ;;  %v13762_v47 = vpop.permute.xlu0 %6156  ;;  %v13766_v39 = vmul.f32 %v13457_v54, %v18886_v61  ;;  %5312 = vperm.xlu1 %10794, %v12906_v41   ;;  %v13778_v34 = vadd.f32 %v13386_v44, %v6053_v60  ;;  %v13784_v61 = vadd.f32 %v13386_v44, %v1630_v30 }
 0x1f9   : > { %18884 = vst [vmem:[#allocation147_spill] sm:$0xff] %v13752_v5  ;;  %v13756_v13 = vmul.f32 %v13457_v54, %v18885_v35  ;;  %v843_v35 = vmul.f32 %v13410_v63, %v13160_v20  ;;  %v13781_v5 = vadd.f32 %v13386_v44, %v6055_v3  ;;  %v6061_v55 = vmul.f32 %v13371_v49, %v13119_v7 }
 0x1fa   : > { %18887 = vst [vmem:[#allocation148_spill] sm:$0xff] %v13766_v39  ;;  %18888 = vst [vmem:[#allocation146_spill] sm:$0xff] %v13778_v34  ;;  %6264 = vperm.xlu0 %10799, %v18890_v26   ;;  %v13790_v20 = vadd.f32 %v13386_v44, %v6057_v32  ;;  %v1635_v8 = vmul.f32 %v13371_v49, %v13121_v19  ;;  %v845_v60 = vmul.f32 %v13410_v63, %v13179_v25  ;;  %v18901_v34 = vld [vmem:[#allocation107_spill] sm:$0xff] }
 0x1fb   : > { %18889 = vst [vmem:[#allocation44_spill] sm:$0xff] %v13781_v5  ;;  %v847_v3 = vmul.f32 %v13410_v63, %v13195_v28  ;;  %v13799_v30 = vadd.f32 %v13386_v44, %v1632_v53  ;;  %v13802_v5 = vadd.f32 %v13386_v44, %v6059_v38  ;;  %v1637_v7 = vmul.f32 %v13371_v49, %v13144_v43  ;;  %v13818_v38 = vpop.permute.xlu1 %1983 }
 0x1fc   : > { %18891 = vst [vmem:[#allocation60_spill] sm:$0xff] %v13790_v20  ;;  %v849_v32 = vmul.f32 %v13410_v63, %v13205_v27  ;;  %v13808_v20 = vpop.permute.xlu0 %6164  ;;  %v13811_v19 = vadd.f32 %v13386_v44, %v1633_v23  ;;  %v856_v25 = vadd.f32 %v840_v11, %v13403_v12  ;;  %v859_v28 = vadd.f32 %v843_v35, %v13418_v29  ;;  %v18894_v29 = vld [vmem:[#allocation101_spill] sm:$0xff] }
 0x1fd   : > { %18892 = vst [vmem:[#allocation114_spill] sm:$0xff] %v13802_v5  ;;  %v1639_v53 = vmul.f32 %v13371_v49, %v13177_v0  ;;  %5320 = vperm.xlu1 %10794, %v18738_v36   ;;  %v13821_v43 = vadd.f32 %v13386_v44, %v6061_v55  ;;  %v1641_v27 = vmul.f32 %v13371_v49, %v13190_v6 }
 0x1fe   : > { %v851_v23 = vmul.f32 %v13410_v63, %v13216_v37  ;;  %v853_v12 = vmul.f32 %v13410_v63, %v13225_v17  ;;  %6272 = vperm.xlu0 %10799, %v18894_v29   ;;  %v13831_v0 = vadd.f32 %v13386_v44, %v1635_v8  ;;  %v861_v11 = vadd.f32 %v845_v60, %v13422_v59 }
 0x1ff   : > { %18893 = vst [vmem:[#allocation69_spill] sm:$0xff] %v13821_v43  ;;  %v863_v35 = vadd.f32 %v847_v3, %v13438_v16  ;;  %v1643_v55 = vmul.f32 %v13371_v49, %v13203_v45  ;;  %v1661_v6 = vadd.f32 %v13386_v44, %v1637_v7  ;;  %v865_v43 = vadd.f32 %v849_v32, %v13446_v46  ;;  %v18895_v16 = vld [vmem:[#allocation71_spill] sm:$0xff]  ;;  %v13849_v45 = vpop.permute.xlu1 %1991  ;;  %v18899_v7 = vld [vmem:[#allocation116_spill] sm:$0xff] }
 0x200   : > { %v1645_v37 = vmul.f32 %v13371_v49, %v13214_v42  ;;  %v855_v17 = vmul.f32 %v13410_v63, %v13233_v51  ;;  %v13843_v5 = vpop.permute.xlu0 %6172  ;;  %v1663_v8 = vadd.f32 %v13386_v44, %v1639_v53  ;;  %v1647_v59 = vmul.f32 %v13371_v49, %v13223_v48  ;;  %v18898_v51 = vld [vmem:[#allocation113_spill] sm:$0xff]  ;;  %v18900_v53 = vld [vmem:[#allocation14_spill] sm:$0xff] }
 0x201   : > { %5328 = vperm.xlu1 %10794, %v18895_v16   ;;  %v13852_v60 = vadd.f32 %v13584_v62, %v856_v25  ;;  %v13855_v46 = vadd.f32 %v13604_v40, %v859_v28  ;;  %v13858_v42 = vadd.f32 %v13386_v44, %v1641_v27  ;;  %v867_v3 = vadd.f32 %v851_v23, %v18898_v51  ;;  %v18904_v27 = vld [vmem:[#allocation118_spill] sm:$0xff] }
 0x202   : > { %v869_v32 = vadd.f32 %v853_v12, %v18899_v7  ;;  %v1649_v48 = vmul.f32 %v13371_v49, %v18900_v53  ;;  %6280 = vperm.xlu0 %10799, %v18901_v34   ;;  %v13866_v29 = vadd.f32 %v13386_v44, %v1643_v55  ;;  %v13869_v62 = vsub.s32 0, %v13496_v56  ;;  %v18905_v12 = vld [vmem:[#allocation111_spill] sm:$0xff] }
 0x203   : > { %18896 = vst [vmem:[#allocation62_spill] sm:$0xff] %v13852_v60  ;;  %18897 = vst [vmem:[#allocation70_spill] sm:$0xff] %v13855_v46  ;;  %v13872_v40 = vadd.f32 %v13608_v50, %v861_v11  ;;  %v13875_v25 = vadd.f32 %v13622_v21, %v863_v35  ;;  %v13878_v28 = vadd.f32 %v13386_v44, %v1645_v37  ;;  %v18907_v50 = vld [vmem:[#allocation105_spill] sm:$0xff]  ;;  %v18908_v11 = vld [vmem:[#allocation106_spill] sm:$0xff] }
 0x204   : > { %v871_v23 = vadd.f32 %v855_v17, %v18904_v27  ;;  %v1651_v51 = vmul.f32 %v13371_v49, %v18905_v12  ;;  %v13883_v55 = vpop.permute.xlu0 %6180  ;;  %v13886_v7 = vadd.f32 %v13630_v1, %v865_v43  ;;  %v13889_v53 = vadd.f32 %v13386_v44, %v1647_v59  ;;  %v18909_v37 = vld [vmem:[#allocation115_spill] sm:$0xff]  ;;  %v18910_v27 = vld [vmem:[#allocation149_spill] sm:$0xff]  ;;  %v13898_v12 = vpop.permute.xlu1 %1999  ;;  %v18911_v1 = vld [vmem:[#allocation112_spill] sm:$0xff] }
 0x205   : > { %18902 = vst [vmem:[#allocation61_spill] sm:$0xff] %v13872_v40  ;;  %18903 = vst [vmem:[#allocation74_spill] sm:$0xff] %v13875_v25  ;;  %v1774_v21 = vmul.f32 %v13410_v63, %v18907_v50  ;;  %v1653_v35 = vmul.f32 %v13371_v49, %v18908_v11  ;;  %v1777_v17 = vmul.f32 %v13410_v63, %v18909_v37  ;;  %5336 = vperm.xlu1 %10794, %v18910_v27   ;;  %v10861_v43 = vld [vmem:[%s11010_s11 + $0x28] sm:$0x3]  ;;  %v10862_v59 = vld [vmem:[%s17855_s1 + $0xc] ss:$0 sm:$0xff] }
 0x206   : > { %18906 = vst [vmem:[#allocation79_spill] sm:$0xff] %v13886_v7  ;;  %v13901_v25 = vadd.f32 %v13386_v44, %v1649_v48  ;;  %6288 = vperm.xlu0 %10799, %v18911_v1   ;;  %v5490_v50 = vmul.f32 %v10862_v59, %v10861_v43  ;;  %v13909_v49 = vadd.f32 %v13645_v14, %v867_v3  ;;  %v18914_v37 = vld [vmem:[#allocation123_spill] sm:$0xff]  ;;  %v18915_v40 = vld [vmem:[#allocation17_spill] sm:$0xff]  ;;  %v18916_v46 = vld [vmem:[#allocation4_spill] sm:$0xff] }
 0x207   : > { %v13912_v11 = vadd.f32 %v13654_v24, %v869_v32  ;;  %v1775_v7 = vmul.f32 %v13410_v63, %v18914_v37  ;;  %v1779_v48 = vmul.f32 %v13410_v63, %v18915_v40  ;;  %v1776_v60 = vmul.f32 %v13410_v63, %v18916_v46  ;;  %v18917_v1 = vld [vmem:[#allocation6_spill] sm:$0xff]  ;;  %v18918_v14 = vld [vmem:[#allocation8_spill] sm:$0xff]  ;;  %v18919_v3 = vld [vmem:[#allocation145_spill] sm:$0xff] }
 0x208   : > { %18912 = vst [vmem:[#allocation67_spill] sm:$0xff] %v13909_v49  ;;  %v1781_v34 = vmul.f32 %v13410_v63, %v18917_v1  ;;  %v13923_v43 = vadd.f32 %v13386_v44, %v1651_v51  ;;  %v1778_v24 = vmul.f32 %v13410_v63, %v18918_v14  ;;  %v1783_v32 = vmul.f32 %v13410_v63, %v18919_v3  ;;  %v18921_v1 = vld [vmem:[#allocation10_spill] sm:$0xff]  ;;  %v18922_v49 = vld [vmem:[#allocation77_spill] sm:$0xff]  ;;  %v13942_v14 = vpop.permute.xlu1 %2007 }
 0x209   : > { %18913 = vst [vmem:[#allocation80_spill] sm:$0xff] %v13912_v11  ;;  %v13930_v59 = vadd.f32 %v13682_v4, %v871_v23  ;;  %v13933_v40 = vadd.f32 %v1774_v21, %v13784_v61  ;;  %v1677_v46 = vadd.f32 %v13386_v44, %v1653_v35  ;;  %v13937_v37 = vadd.f32 %v1777_v17, %v13811_v19  ;;  %v878_v11 = vpop.permute.xlu0 %877  ;;  %v18923_v3 = vld [vmem:[#allocation49_spill] sm:$0xff]  ;;  %v10863_v44 = vld [vmem:[%s11010_s11 + $0x40] sm:$0x3]  ;;  %v10864_v19 = vld [vmem:[%s17855_s1 + $0xe] ss:$0 sm:$0xff] }
 0x20a   : > { %v1780_v51 = vmul.f32 %v13410_v63, %v18921_v1  ;;  %5344 = vperm.xlu1 %10794, %v18922_v49   ;;  %v1785_v4 = vmul.f32 %v13410_v63, %v18923_v3  ;;  %v18924_v23 = vld [vmem:[#allocation117_spill] sm:$0xff]  ;;  %v5684_v35 = vmul.f32 %v10864_v19, %v10863_v44  ;;  %v18927_v17 = vld [vmem:[#allocation124_spill] sm:$0xff]  ;;  %v13957_v49 = vadd.f32 %v1779_v48, %v13831_v0  ;;  %v18931_v44 = vld [vmem:[#allocation51_spill] sm:$0xff] }
 0x20b   : > { %18920 = vst [vmem:[#allocation76_spill] sm:$0xff] %v13930_v59  ;;  %6296 = vperm.xlu0 %10799, %v18924_v23   ;;  %v18925_v61 = vld [vmem:[#allocation73_spill] sm:$0xff]  ;;  %v13954_v1 = vadd.f32 %v1775_v7, %v18927_v17  ;;  %v13960_v27 = vadd.f32 %v1776_v60, %v13799_v30  ;;  %v13962_v3 = vadd.f32 %v1781_v34, %v1661_v6  ;;  %v18928_v23 = vld [vmem:[#allocation138_spill] sm:$0xff]  ;;  %v18932_v19 = vld [vmem:[#allocation47_spill] sm:$0xff] }
 0x20c   : > { %v18926_v21 = vrot.slane %v18925_v61, 1  ;;  %v13965_v61 = vadd.f32 %v1778_v24, %v18928_v23  ;;  %v1787_v7 = vmul.f32 %v13410_v63, %v18931_v44  ;;  %v13974_v17 = vadd.f32 %v1780_v51, %v18932_v19  ;;  %v18933_v0 = vld [vmem:[#allocation40_spill] sm:$0xff]  ;;  %v18934_v60 = vld [vmem:[#allocation15_spill] sm:$0xff]  ;;  %v18935_v48 = vld [vmem:[#allocation82_spill] sm:$0xff] }
 0x20d   : > { %v1784_v30 = vmul.f32 %v13410_v63, %v18933_v0  ;;  %v1789_v34 = vmul.f32 %v13410_v63, %v18934_v60  ;;  %v890_v6 = vpop.permute.xlu0 %889  ;;  %v10923_v24 = vmov 1983009808   ;;  %v13984_v23 = vadd.f32 %v1785_v4, %v13858_v42  ;;  %v18937_v44 = vld [vmem:[#allocation57_spill] sm:$0xff]  ;;  %v18938_v0 = vld [vmem:[#allocation16_spill] sm:$0xff]  ;;  %v18939_v60 = vld [vmem:[#allocation150_spill] sm:$0xff] }
 0x20e   : > { %v5655_v59 = vadd.f32 %v18926_v21, %v5490_v50  ;;  %18929 = vst [vmem:[#allocation84_spill] sm:$0xff] %v13965_v61  ;;  %v13967_v50 = vadd.f32 %v1783_v32, %v1663_v8  ;;  %v18930_v21 = vld [vmem:[#allocation12_spill] sm:$0xff]  ;;  %5352 = vperm.xlu1 %10794, %v18935_v48   ;;  %v13981_v8 = vpop.permute.xlu1 %2015  ;;  %v9394_v32 = vunpack.c.l.s4 %v10923_v24  ;;  %v1791_v19 = vmul.f32 %v13410_v63, %v18937_v44  ;;  %v18940_v48 = vld [vmem:[#allocation151_spill] sm:$0xff]  ;;  %v18943_v44 = vld [vmem:[#allocation153_spill] sm:$0xff] }
 0x20f   : > { %v1782_v16 = vmul.f32 %v13410_v63, %v18930_v21  ;;  %v18936_v21 = vld [vmem:[#allocation53_spill] sm:$0xff]  ;;  %6304 = vperm.xlu0 %10799, %v18938_v0   ;;  %v1788_v36 = vmul.f32 %v13410_v63, %v18939_v60  ;;  %v1793_v41 = vmul.f32 %v13410_v63, %v18940_v48  ;;  %v18941_v61 = vld [vmem:[#allocation152_spill] sm:$0xff]  ;;  %v942_v42 = vmul.f32 %v13434_v22, %v878_v11 }
 0x210   : > { %v1786_v51 = vmul.f32 %v13410_v63, %v18936_v21  ;;  %v5708_v26 = vadd.f32 %v5684_v35, %v5655_v59  ;;  %v1790_v24 = vmul.f32 %v13410_v63, %v18941_v61  ;;  %v14002_v21 = vadd.f32 %v1787_v7, %v13866_v29  ;;  %v18944_v35 = vld [vmem:[#allocation154_spill] sm:$0xff]  ;;  %v18946_v61 = vld [vmem:[#allocation155_spill] sm:$0xff] }
 0x211   : > { %v13999_v4 = vadd.f32 %v1782_v16, %v13538_v18  ;;  %v1795_v59 = vmul.f32 %v13410_v63, %v18943_v44  ;;  %v1792_v60 = vmul.f32 %v13410_v63, %v18944_v35  ;;  %v14009_v0 = vadd.f32 %v1784_v30, %v13548_v9  ;;  %v14016_v18 = vpop.permute.xlu0 %897  ;;  %v18949_v9 = vld [vmem:[#allocation156_spill] sm:$0xff] }
 0x212   : > { %v14012_v48 = vadd.f32 %v1789_v34, %v13878_v28  ;;  %v1797_v11 = vmul.f32 %v13410_v63, %v18946_v61  ;;  %v18947_v16 = vmov 3   ;;  %v14019_v29 = vpop.permute.xlu1 %2023  ;;  %v9395_v7 = vunpack.c.0.s8 %v9394_v32  ;;  %v18950_v30 = vld [vmem:[#allocation20_spill] sm:$0xff]  ;;  %v18951_v34 = vld [vmem:[#allocation75_spill] sm:$0xff] }
 0x213   : > { %18942 = vst [vmem:[#allocation113_spill] sm:$0xff] %v13999_v4  ;;  %18945 = vst [vmem:[#allocation116_spill] sm:$0xff] %v14009_v0  ;;  %10795 = vset.pattern.permute.xlu1 %v18947_v16  ;;  %v14022_v44 = vadd.f32 %v1786_v51, %v13557_v2  ;;  %v14025_v35 = vadd.f32 %v1791_v19, %v13889_v53  ;;  %v1794_v28 = vmul.f32 %v13410_v63, %v18949_v9  ;;  %v18953_v32 = vld [vmem:[#allocation39_spill] sm:$0xff]  ;;  %v18954_v51 = vld [vmem:[#allocation122_spill] sm:$0xff] }
 0x214   : > { %6312 = vperm.xlu0 %10799, %v18950_v30   ;;  %v18952_v61 = vrot.slane %v18951_v34, 1  ;;  %v14033_v0 = vadd.f32 %v1788_v36, %v13571_v15  ;;  %v14036_v39 = vadd.f32 %v1793_v41, %v13901_v25  ;;  %v14039_v2 = vadd.f32 %v1790_v24, %v18953_v32  ;;  %v18955_v19 = vld [vmem:[#allocation59_spill] sm:$0xff]  ;;  %v18956_v30 = vld [vmem:[#allocation41_spill] sm:$0xff] }
 0x215   : > { %18948 = vst [vmem:[#allocation14_spill] sm:$0xff] %v14022_v44  ;;  %v958_v53 = vadd.f32 %v942_v42, %v18954_v51  ;;  %5392 = vperm.xlu1 %10795, %v18955_v19   ;;  %v14044_v9 = vadd.f32 %v1795_v59, %v13923_v43  ;;  %v14047_v44 = vadd.f32 %v1792_v60, %v18956_v30  ;;  %v18958_v15 = vld [vmem:[#allocation163_spill] sm:$0xff]  ;;  %v18959_v24 = vld [vmem:[#allocation157_spill] sm:$0xff]  ;;  %v14061_v43 = vpop.permute.xlu0 %905  ;;  %v18962_v30 = vld [vmem:[#allocation128_spill] sm:$0xff] }
 0x216   : > { %v5849_v4 = vadd.f32 %v18952_v61, %v5708_v26  ;;  %v18957_v26 = vld [vmem:[#allocation158_spill] sm:$0xff]  ;;  %v1920_v41 = vmul.f32 %v13434_v22, %v18958_v15  ;;  %v14053_v25 = vadd.f32 %v1797_v11, %v1677_v46  ;;  %v14057_v34 = vmul.f32 %v13410_v63, %v18959_v24  ;;  %v18961_v42 = vld [vmem:[#allocation161_spill] sm:$0xff]  ;;  %v14063_v59 = vpop.permute.xlu1 %2031  ;;  %v18965_v15 = vld [vmem:[#allocation159_spill] sm:$0xff] }
 0x217   : > { %v1796_v36 = vmul.f32 %v13410_v63, %v18957_v26  ;;  %v1918_v61 = vmul.f32 %v13434_v22, %v18961_v42  ;;  %v14066_v60 = vsub.s32 %v9395_v7, %v13496_v56  ;;  %v14069_v32 = vadd.f32 %v1794_v28, %v18962_v30  ;;  %v18964_v51 = vld [vmem:[#allocation21_spill] sm:$0xff]  ;;  %v10865_v19 = vld [vmem:[%s17856_s2] ss:$0 sm:$0xff]  ;;  %v18968_v28 = vld [vmem:[#allocation167_spill] sm:$0xff] }
 0x218   : > { %18960 = vst [vmem:[#allocation118_spill] sm:$0xff] %v14057_v34  ;;  %v2064_v46 = vmul.f32 %v13457_v54, %v13775_v10  ;;  %v945_v11 = vmul.f32 %v13434_v22, %v890_v6  ;;  %6320 = vperm.xlu0 %10799, %v18964_v51   ;;  %v5873_v26 = vadd.f32 %v10865_v19, %v5849_v4  ;;  %v18967_v56 = vld [vmem:[#allocation165_spill] sm:$0xff]  ;;  %v18969_v6 = vld [vmem:[#allocation22_spill] sm:$0xff]  ;;  %v18972_v34 = vld [vmem:[#allocation160_spill] sm:$0xff] }
 0x219   : > { %18963 = vst [vmem:[#allocation111_spill] sm:$0xff] %v14069_v32  ;;  %v14080_v24 = vmul.f32 %v13410_v63, %v18965_v15  ;;  %v1921_v7 = vmul.f32 %v13434_v22, %v18967_v56  ;;  %v1923_v42 = vmul.f32 %v13434_v22, %v18968_v28  ;;  %v1059_v10 = vadd.f32 %v13689_v33, %v958_v53  ;;  %v18970_v30 = vld [vmem:[#allocation45_spill] sm:$0xff]  ;;  %v18976_v28 = vld [vmem:[#allocation162_spill] sm:$0xff]  ;;  %v18978_v53 = vld [vmem:[#allocation164_spill] sm:$0xff] }
 0x21a   : > { %5396 = vperm.xlu1 %10795, %v18969_v6   ;;  %v14089_v51 = vadd.f32 %v1796_v36, %v18970_v30  ;;  %v14093_v4 = vmul.f32 %v13410_v63, %v18972_v34  ;;  %v1944_v19 = vadd.f32 %v1920_v41, %v13960_v27  ;;  %v18974_v15 = vld [vmem:[#allocation169_spill] sm:$0xff]  ;;  %v14099_v56 = vadd.f32 %v1918_v61, %v13933_v40  ;;  %v18980_v6 = vld [vmem:[#allocation96_spill] sm:$0xff]  ;;  %v14111_v30 = vpop.permute.xlu0 %913  ;;  %v14113_v27 = vpop.permute.xlu1 %2039  ;;  %v18981_v41 = vld [vmem:[#allocation103_spill] sm:$0xff] }
 0x21b   : > { %18966 = vst [vmem:[#allocation105_spill] sm:$0xff] %v14080_v24  ;;  %v1925_v24 = vmul.f32 %v13434_v22, %v18974_v15  ;;  %v14103_v33 = vmul.f32 %v13410_v63, %v18976_v28  ;;  %v14107_v36 = vmul.f32 %v13410_v63, %v18978_v53  ;;  %v1927_v34 = vmul.f32 %v13434_v22, %v18980_v6  ;;  %v18982_v61 = vld [vmem:[#allocation125_spill] sm:$0xff]  ;;  %v18988_v32 = vld [vmem:[#allocation63_spill] sm:$0xff] }
 0x21c   : > { %18971 = vst [vmem:[#allocation106_spill] sm:$0xff] %v14089_v51  ;;  %18973 = vst [vmem:[#allocation115_spill] sm:$0xff] %v14093_v4  ;;  %v1929_v15 = vmul.f32 %v13434_v22, %v18981_v41  ;;  %v2088_v40 = vadd.f32 %v2064_v46, %v1944_v19  ;;  %10801 = vset.pattern.permute.xlu0 %v18947_v16  ;;  %v14119_v28 = vmax.f32 %v5873_v26, 0.0  ;;  %v18989_v46 = vld [vmem:[#allocation168_spill] sm:$0xff]  ;;  %v18992_v19 = vld [vmem:[#allocation109_spill] sm:$0xff] }
 0x21d   : > { %18975 = vst [vmem:[#allocation123_spill] sm:$0xff] %v14099_v56  ;;  %18977 = vst [vmem:[#allocation17_spill] sm:$0xff] %v14103_v33  ;;  %v961_v56 = vadd.f32 %v945_v11, %v18982_v61  ;;  %v14122_v53 = vadd.f32 %v1921_v7, %v13937_v37  ;;  %v14129_v33 = vadd.f32 %v1923_v42, %v13957_v49  ;;  %v18993_v7 = vld [vmem:[#allocation120_spill] sm:$0xff]  ;;  %v18994_v41 = vld [vmem:[#allocation2_spill] sm:$0xff] }
 0x21e   : > { %18979 = vst [vmem:[#allocation4_spill] sm:$0xff] %v14107_v36  ;;  %18983 = vst [vmem:[#allocation6_spill] sm:$0xff] %v14119_v28  ;;  %v18985_v36 = vld [vmem:[#allocation166_spill] sm:$0xff]  ;;  %v2175_v4 = vcombine.high %v1059_v10, %v1059_v10  ;;  %5404 = vperm.xlu1 %10795, %v18988_v32   ;;  %v14134_v11 = vmul.f32 %v13410_v63, %v18989_v46  ;;  %v14137_v26 = vadd.f32 %v1925_v24, %v13962_v3  ;;  %v18995_v49 = vld [vmem:[#allocation93_spill] sm:$0xff] }
 0x21f   : > { %18984 = vst [vmem:[#allocation8_spill] sm:$0xff] %v14122_v53  ;;  %v14126_v6 = vmul.f32 %v13410_v63, %v18985_v36  ;;  %18987 = vst [vmem:[#allocation10_spill] sm:$0xff] %v14129_v33  ;;  %v1931_v37 = vmul.f32 %v13434_v22, %v18992_v19  ;;  %v1933_v36 = vmul.f32 %v13434_v22, %v18993_v7  ;;  %974 = vperm.xlu0 %10801, %v18994_v41   ;;  %v18998_v61 = vld [vmem:[#allocation99_spill] sm:$0xff]  ;;  %v14157_v19 = vpop.permute.xlu0 %921  ;;  %v19003_v33 = vld [vmem:[#allocation126_spill] sm:$0xff] }
 0x220   : > { %18990 = vst [vmem:[#allocation49_spill] sm:$0xff] %v14134_v11  ;;  %18991 = vst [vmem:[#allocation73_spill] sm:$0xff] %v14137_v26  ;;  %v14146_v42 = vmul.f32 %v13410_v63, %v18995_v49  ;;  %v14149_v32 = vadd.f32 %v1927_v34, %v13967_v50  ;;  %v14153_v46 = vmul.f32 %v13410_v63, %v18998_v61  ;;  %v19000_v3 = vld [vmem:[#allocation23_spill] sm:$0xff]  ;;  %v14159_v26 = vpop.permute.xlu1 %2047  ;;  %v19004_v34 = vld [vmem:[#allocation110_spill] sm:$0xff] }
 0x221   : > { %18986 = vst [vmem:[#allocation145_spill] sm:$0xff] %v14126_v6  ;;  %v1935_v24 = vmul.f32 %v13434_v22, %v19000_v3  ;;  %v14162_v7 = vadd.f32 %v1929_v15, %v13984_v23  ;;  %v19002_v41 = vld [vmem:[#allocation43_spill] sm:$0xff]  ;;  %v3166_v50 = vrot.slane %v2088_v40, %v19003_v33  ;;  %v19005_v53 = vld [vmem:[#allocation108_spill] sm:$0xff]  ;;  %v19008_v16 = vld [vmem:[#allocation30_spill] sm:$0xff]  ;;  %v2189_v23 = vrot.slane %v2175_v4, %v19003_v33 }
 0x222   : > { %18996 = vst [vmem:[#allocation124_spill] sm:$0xff] %v14146_v42  ;;  %18997 = vst [vmem:[#allocation138_spill] sm:$0xff] %v14149_v32  ;;  %v1937_v49 = vmul.f32 %v13434_v22, %v19002_v41  ;;  %v1062_v32 = vadd.f32 %v19004_v34, %v961_v56  ;;  %v14170_v61 = vmul.f32 %v13410_v63, %v19005_v53  ;;  %v19009_v15 = vld [vmem:[#allocation65_spill] sm:$0xff]  ;;  %v19011_v40 = vld [vmem:[#allocation32_spill] sm:$0xff] }
 0x223   : > { %18999 = vst [vmem:[#allocation12_spill] sm:$0xff] %v14153_v46  ;;  %19001 = vst [vmem:[#allocation51_spill] sm:$0xff] %v14162_v7  ;;  %v19007_v46 = vld [vmem:[#allocation131_spill] sm:$0xff]  ;;  %v1941_v42 = vmul.f32 %v13434_v22, %v19008_v16  ;;  %5412 = vperm.xlu1 %10795, %v19009_v15   ;;  %v14179_v41 = vadd.f32 %v1931_v37, %v14002_v21  ;;  %v14183_v56 = vmul.f32 %v13410_v63, %v19011_v40  ;;  %v19015_v16 = vld [vmem:[#allocation18_spill] sm:$0xff] }
 0x224   : > { %19006 = vst [vmem:[#allocation47_spill] sm:$0xff] %v14170_v61  ;;  %v1939_v3 = vmul.f32 %v13434_v22, %v19007_v46  ;;  %v14186_v53 = vadd.f32 %v1933_v36, %v14012_v48  ;;  %v947_v46 = vmul.f32 %v13434_v22, %v14016_v18  ;;  %v19014_v34 = vld [vmem:[#allocation3_spill] sm:$0xff]  ;;  %v14193_v4 = vmul.f32 %v13410_v63, %v19015_v16  ;;  %v19018_v21 = vld [vmem:[#allocation38_spill] sm:$0xff]  ;;  %v14203_v48 = vpop.permute.xlu0 %929  ;;  %v14205_v36 = vpop.permute.xlu1 %2055  ;;  %v19047_v61 = vld [vmem:[#allocation81_spill] sm:$0xff] }
 0x225   : > { %19010 = vst [vmem:[#allocation40_spill] sm:$0xff] %v14179_v41  ;;  %19012 = vst [vmem:[#allocation15_spill] sm:$0xff] %v14183_v56  ;;  %986 = vperm.xlu0 %10801, %v19014_v34   ;;  %v14196_v15 = vadd.f32 %v1935_v24, %v14025_v35  ;;  %v14200_v37 = vmul.f32 %v13410_v63, %v19018_v21  ;;  %v2182_v40 = vrot.slane %v1059_v10, %v19003_v33  ;;  %v19021_v34 = vld [vmem:[#allocation129_spill] sm:$0xff]  ;;  %v19055_v41 = vld [vmem:[#allocation87_spill] sm:$0xff] }
 0x226   : > { %19013 = vst [vmem:[#allocation53_spill] sm:$0xff] %v14186_v53  ;;  %19016 = vst [vmem:[#allocation57_spill] sm:$0xff] %v14193_v4  ;;  %v14208_v18 = vadd.f32 %v1937_v49, %v14036_v39  ;;  %v14212_v16 = vmul.f32 %v13410_v63, %v19021_v34  ;;  %v14215_v35 = vrot.slane %v3166_v50, %v19003_v33  ;;  %v19027_v49 = vld [vmem:[#allocation68_spill] sm:$0xff] }
 0x227   : > { %19017 = vst [vmem:[#allocation150_spill] sm:$0xff] %v14196_v15  ;;  %19019 = vst [vmem:[#allocation151_spill] sm:$0xff] %v14200_v37  ;;  %v2322_v24 = vcombine.high %v1062_v32, %v1062_v32  ;;  %v14218_v21 = vadd.f32 %v1939_v3, %v14044_v9  ;;  %v19024_v37 = vld [vmem:[#allocation135_spill] sm:$0xff]  ;;  %v14225_v4 = vadd.f32 %v1941_v42, %v14053_v25  ;;  %5420 = vperm.xlu1 %10795, %v19027_v49   ;;  %v19029_v3 = vld [vmem:[#allocation28_spill] sm:$0xff] }
 0x228   : > { %19020 = vst [vmem:[#allocation152_spill] sm:$0xff] %v14208_v18  ;;  %19022 = vst [vmem:[#allocation153_spill] sm:$0xff] %v14212_v16  ;;  %v14222_v10 = vmul.f32 %v13410_v63, %v19024_v37  ;;  %v2191_v39 = vcombine.high %v2189_v23, %v2189_v23  ;;  %v14230_v34 = vmul.f32 %v13410_v63, %v13714_v57  ;;  %v19030_v37 = vld [vmem:[#allocation5_spill] sm:$0xff] }
 0x229   : > { %19023 = vst [vmem:[#allocation154_spill] sm:$0xff] %v14218_v21  ;;  %19026 = vst [vmem:[#allocation156_spill] sm:$0xff] %v14225_v4  ;;  %v2063_v50 = vmul.f32 %v13457_v54, %v13726_v52  ;;  %v2329_v9 = vrot.slane %v1062_v32, %v19003_v33  ;;  %v963_v16 = vadd.f32 %v947_v46, %v19029_v3  ;;  %994 = vperm.xlu0 %10801, %v19030_v37   ;;  %v1828_v52 = vpop.permute.xlu0 %1827  ;;  %v14258_v3 = vpop.permute.xlu1 %5085 }
 0x22a   : > { %19025 = vst [vmem:[#allocation155_spill] sm:$0xff] %v14222_v10  ;;  %19028 = vst [vmem:[#allocation75_spill] sm:$0xff] %v14230_v34  ;;  %v14239_v25 = vmul.f32 %v13410_v63, %v13762_v47  ;;  %v14243_v42 = vmul.f32 %v13410_v63, %v13808_v20  ;;  %v2190_v57 = vcombine.high %v2182_v40, %v2182_v40  ;;  %v19043_v34 = vld [vmem:[#allocation144_spill] sm:$0xff] }
 0x22b   : > { %v949_v49 = vmul.f32 %v13434_v22, %v14061_v43  ;;  %v4021_v32 = vrot.slane %v14215_v35, %v13869_v62  ;;  %v14251_v46 = vmul.f32 %v13457_v54, %v13818_v38  ;;  %v14255_v47 = vmul.f32 %v13410_v63, %v13843_v5 }
 0x22c   : > { %19031 = vst [vmem:[#allocation39_spill] sm:$0xff] %v14239_v25  ;;  %19032 = vst [vmem:[#allocation122_spill] sm:$0xff] %v14243_v42  ;;  %v2336_v20 = vrot.slane %v2322_v24, %v19003_v33  ;;  %v14262_v43 = vmul.f32 %v13457_v54, %v13849_v45  ;;  %v14266_v37 = vmul.f32 %v13410_v63, %v13883_v55  ;;  %v19035_v42 = vld [vmem:[#allocation72_spill] sm:$0xff]  ;;  %v19036_v63 = vld [vmem:[#allocation7_spill] sm:$0xff] }
 0x22d   : > { %19033 = vst [vmem:[#allocation59_spill] sm:$0xff] %v14255_v47  ;;  %v14269_v35 = vrot.slane %v2191_v39, %v19003_v33  ;;  %v1919_v38 = vmul.f32 %v13434_v22, %v1828_v52  ;;  %5428 = vperm.xlu1 %10795, %v19035_v42   ;;  %v14275_v5 = vmul.f32 %v13457_v54, %v13898_v12  ;;  %v19037_v42 = vld [vmem:[#allocation36_spill] sm:$0xff] }
 0x22e   : > { %19034 = vst [vmem:[#allocation41_spill] sm:$0xff] %v14266_v37  ;;  %v14279_v24 = vmul.f32 %v13457_v54, %v13942_v14  ;;  %v2337_v45 = vcombine.high %v2329_v9, %v2329_v9  ;;  %v1064_v47 = vadd.f32 %v13710_v31, %v963_v16  ;;  %1002 = vperm.xlu0 %10801, %v19036_v63   ;;  %v14294_v14 = vpop.permute.xlu0 %1839  ;;  %v14303_v63 = vpop.permute.xlu1 %5095 }
 0x22f   : > { %v14285_v55 = vrot.slane %v2182_v40, %v19003_v33  ;;  %v14288_v39 = vrot.slane %v2189_v23, %v19003_v33  ;;  %v14291_v12 = vrot.slane %v2190_v57, %v19003_v33  ;;  %v965_v52 = vadd.f32 %v949_v49, %v19037_v42  ;;  %v19040_v42 = vld [vmem:[#allocation78_spill] sm:$0xff] }
 0x230   : > { %v2338_v37 = vcombine.high %v2336_v20, %v2336_v20  ;;  %v14298_v31 = vmul.f32 %v13457_v54, %v13981_v8  ;;  %v951_v16 = vmul.f32 %v13434_v22, %v14111_v30  ;;  %v1943_v40 = vadd.f32 %v1919_v38, %v13954_v1 }
 0x231   : > { %v2223_v23 = vcombine.high %v14269_v35, %v14269_v35  ;;  %v14308_v57 = vrot.slane %v2329_v9, %v19003_v33  ;;  %v14311_v49 = vrot.slane %v2336_v20, %v19003_v33  ;;  %v14315_v8 = vmul.f32 %v13457_v54, %v14019_v29  ;;  %5436 = vperm.xlu1 %10795, %v19040_v42   ;;  %v19042_v20 = vld [vmem:[#allocation9_spill] sm:$0xff] }
 0x232   : > { %v14325_v1 = vrot.slane %v2337_v45, %v19003_v33  ;;  %v2420_v30 = vcombine.high %v1064_v47, %v1064_v47  ;;  %v2427_v9 = vrot.slane %v1064_v47, %v19003_v33  ;;  %v2087_v38 = vadd.f32 %v2063_v50, %v1943_v40  ;;  %1010 = vperm.xlu0 %10801, %v19042_v20   ;;  %v14336_v10 = vpop.permute.xlu0 %1847  ;;  %v19046_v40 = vld [vmem:[#allocation29_spill] sm:$0xff]  ;;  %v14346_v56 = vpop.permute.xlu1 %5100 }
 0x233   : > { %19038 = vst [vmem:[#allocation158_spill] sm:$0xff] %v14311_v49  ;;  %19039 = vst [vmem:[#allocation163_spill] sm:$0xff] %v14315_v8  ;;  %v2222_v25 = vcombine.high %v14291_v12, %v14291_v12  ;;  %v1066_v45 = vadd.f32 %v19043_v34, %v965_v52  ;;  %v14339_v47 = vrot.slane %v2338_v37, %v19003_v33  ;;  %v19057_v8 = vld [vmem:[#allocation19_spill] sm:$0xff] }
 0x234   : > { %v14343_v50 = vmul.f32 %v13457_v54, %v14063_v59  ;;  %v967_v20 = vadd.f32 %v951_v16, %v19046_v40  ;;  %v3111_v29 = vcombine.high %v2087_v38, %v2087_v38  ;;  %v14349_v42 = vsel %vm4598_vm1, %v2223_v23, %v4021_v32  ;;  %v19049_v40 = vld [vmem:[#allocation11_spill] sm:$0xff] }
 0x235   : > { %19044 = vst [vmem:[#allocation157_spill] sm:$0xff] %v14339_v47  ;;  %v3118_v37 = vrot.slane %v2087_v38, %v19003_v33  ;;  %5444 = vperm.xlu1 %10795, %v19047_v61   ;;  %v14366_v32 = vrot.slane %v2420_v30, %v19003_v33  ;;  %v2435_v16 = vcombine.high %v2427_v9, %v2427_v9  ;;  %v19051_v30 = vmov 0  }
 0x236   : > { %19045 = vst [vmem:[#allocation161_spill] sm:$0xff] %v14343_v50  ;;  %v14369_v23 = vrot.slane %v2427_v9, %v19003_v33  ;;  %1018 = vperm.xlu0 %10801, %v19049_v40   ;;  %v2518_v38 = vcombine.high %v1066_v45, %v1066_v45  ;;  %v3125_v61 = vrot.slane %v3111_v29, %v19003_v33  ;;  %v14376_v4 = vpop.permute.xlu0 %1855  ;;  %v14388_v21 = vpop.permute.xlu1 %5110 }
 0x237   : > { %v3126_v52 = vcombine.high %v3118_v37, %v3118_v37  ;;  %v14374_v34 = vrot.slane %v3118_v37, %v19003_v33  ;;  %v14381_v59 = vrot.slane %v1066_v45, %v19003_v33  ;;  %v1068_v9 = vadd.f32 %v13747_v58, %v967_v20  ;;  %v19054_v20 = vld [vmem:[#allocation13_spill] sm:$0xff] }
 0x238   : > { %19048 = vst [vmem:[#allocation128_spill] sm:$0xff] %v14369_v23  ;;  %v14386_v40 = vmul.f32 %v13457_v54, %v14113_v27  ;;  %v3127_v29 = vcombine.high %v3125_v61, %v3125_v61  ;;  %v3141_v37 = vrot.slane %v3125_v61, %v19003_v33  ;;  %v2436_v58 = vcombine.high %v14366_v32, %v14366_v32 }
 0x239   : > { %19050 = vst [vmem:[#allocation159_spill] sm:$0xff] %v14374_v34  ;;  %v3148_v18 = vrot.slane %v3126_v52, %v19003_v33  ;;  %v3156_v15 = vcombine.high %v14374_v34, %v14374_v34  ;;  %10796 = vset.pattern.permute.xlu1 %v19051_v30  ;;  %v14401_v54 = vrot.slane %v14366_v32, %v19003_v33 }
 0x23a   : > { %v14404_v27 = vrot.slane %v2435_v16, %v19003_v33  ;;  %v953_v45 = vmul.f32 %v13434_v22, %v14157_v19  ;;  %1026 = vperm.xlu0 %10801, %v19054_v20   ;;  %v3155_v52 = vrot.slane %v3127_v29, %v19003_v33  ;;  %v3157_v61 = vcombine.high %v3141_v37, %v3141_v37  ;;  %v14412_v7 = vpop.permute.xlu0 %1863  ;;  %v14417_v19 = vpop.permute.xlu1 %5120 }
 0x23b   : > { %19052 = vst [vmem:[#allocation165_spill] sm:$0xff] %v14401_v54  ;;  %v3158_v30 = vcombine.high %v3148_v18, %v3148_v18  ;;  %v3993_v53 = vrot.slane %v3148_v18, %v13869_v62  ;;  %5921 = vperm.xlu1 %10796, %v19055_v41   ;;  %v2532_v32 = vrot.slane %v2518_v38, %v19003_v33  ;;  %v19056_v41 = vld [vmem:[#allocation37_spill] sm:$0xff] }
 0x23c   : > { %19053 = vst [vmem:[#allocation167_spill] sm:$0xff] %v14404_v27  ;;  %v2616_v16 = vcombine.high %v1068_v9, %v1068_v9  ;;  %v3997_v11 = vrot.slane %v3156_v15, %v13869_v62  ;;  %v4005_v22 = vrot.slane %v3141_v37, %v13869_v62  ;;  %v3159_v29 = vcombine.high %v3155_v52, %v3155_v52  ;;  %v19077_v27 = vld [vmem:[#allocation27_spill] sm:$0xff] }
 0x23d   : > { %v4001_v20 = vrot.slane %v3158_v30, %v13869_v62  ;;  %v4009_v18 = vrot.slane %v3155_v52, %v13869_v62  ;;  %v4013_v6 = vrot.slane %v3157_v61, %v13869_v62  ;;  %v969_v51 = vadd.f32 %v953_v45, %v19056_v41 }
 0x23e   : > { %v4607_v38 = vsel %vm4598_vm1, %v14285_v55, %v3993_v53  ;;  %v4608_v15 = vsel %vm4598_vm1, %v14291_v12, %v3997_v11  ;;  %v4610_v37 = vsel %vm4598_vm1, %v2222_v25, %v4005_v22  ;;  %1034 = vperm.xlu0 %10801, %v19057_v8   ;;  %v4017_v50 = vrot.slane %v3159_v29, %v13869_v62  ;;  %v14441_v11 = vpop.permute.xlu0 %1871  ;;  %v14445_v61 = vpop.permute.xlu1 %5130 }
 0x23f   : > { %v19058_v30 = vcombine.high %v14285_v55, %v14285_v55  ;;  %v4611_v41 = vsel %vm4598_vm1, %v14288_v39, %v4009_v18  ;;  %v4612_v53 = vsel %vm4598_vm1, %v14269_v35, %v4013_v6  ;;  %5931 = vperm.xlu1 %10796, %v14119_v28   ;;  %v2623_v25 = vrot.slane %v1068_v9, %v19003_v33  ;;  %v19069_v55 = vld [vmem:[#allocation48_spill] sm:$0xff] }
 0x240   : > { %v9425_v12 = vcombine.low %v4607_v38, %v4608_v15  ;;  %v9442_v45 = vcombine.low %v4611_v41, %v4612_v53  ;;  %v2533_v22 = vcombine.high %v14381_v59, %v14381_v59  ;;  %v14453_v6 = vrot.slane %v14381_v59, %v19003_v33  ;;  %v19060_v15 = vld [vmem:[#allocation119_spill] sm:$0xff] }
 0x241   : > { %v4609_v52 = vsel %vm4598_vm1, %v19058_v30, %v4001_v20  ;;  %v19059_v35 = vcombine.high %v14288_v39, %v14288_v39  ;;  %v2534_v29 = vcombine.high %v2532_v32, %v2532_v32  ;;  %v14469_v59 = vrot.slane %v2436_v58, %v19003_v33  ;;  %v19062_v30 = vld [vmem:[#allocation86_spill] sm:$0xff] }
 0x242   : > { %v9426_v8 = vcombine.low %v4609_v52, %v4610_v37  ;;  %v9433_v20 = vrot.slane %v9425_v12, %v14066_v60  ;;  %1967 = vperm.xlu0 %10801, %v19060_v15   ;;  %v14472_v39 = vrot.slane %v2532_v32, %v19003_v33  ;;  %v1070_v37 = vadd.f32 %v13756_v13, %v969_v51  ;;  %v14481_v58 = vpop.permute.xlu1 %5140  ;;  %v14493_v51 = vld [vmem:[%s17857_s3 + $0x2] ss:$0 sm:$0xff]  ;;  %v19066_v15 = vld [vmem:[#allocation83_spill] sm:$0xff] }
 0x243   : > { %v4613_v9 = vsel %vm4598_vm1, %v19059_v35, %v4017_v50  ;;  %19061 = vst [vmem:[#allocation22_spill] sm:$0xff] %v14469_v59  ;;  %v2630_v50 = vrot.slane %v2616_v16, %v19003_v33  ;;  %5936 = vperm.xlu1 %10796, %v19062_v30   ;;  %v2631_v52 = vcombine.high %v2623_v25, %v2623_v25 }
 0x244   : > { %v9440_v18 = vrot.slane %v9426_v8, %v14066_v60  ;;  %v9443_v38 = vcombine.low %v4613_v9, %v14349_v42  ;;  %v14477_v42 = vpop.permute.xlu0 %1879  ;;  %v9450_v53 = vrot.slane %v9442_v45, %v14066_v60  ;;  %v14488_v13 = vrot.slane %v2533_v22, %v19003_v33 }
 0x245   : > { %v955_v8 = vmul.f32 %v14493_v51, %v14203_v48  ;;  %v14498_v45 = vrot.slane %v2534_v29, %v19003_v33  ;;  %v1924_v22 = vmul.f32 %v14493_v51, %v14336_v10  ;;  %v14510_v48 = vrot.slane %v2623_v25, %v19003_v33 }
 0x246   : > { %v9441_v41 = vcombine.low %v9433_v20, %v9440_v18  ;;  %v9457_v12 = vrot.slane %v9443_v38, %v14066_v60  ;;  %v19064_v20 = vld [vmem:[#allocation25_spill] sm:$0xff]  ;;  %v2632_v38 = vcombine.high %v2630_v50, %v2630_v50  ;;  %v2714_v29 = vcombine.high %v1070_v37, %v1070_v37  ;;  %v14526_v25 = vpop.permute.xlu1 %5150 }
 0x247   : > { %19063 = vst [vmem:[#allocation45_spill] sm:$0xff] %v14498_v45  ;;  %1979 = vperm.xlu0 %10801, %v19064_v20   ;;  %19065 = vst [vmem:[#allocation160_spill] sm:$0xff] %v14510_v48  ;;  %5946 = vperm.xlu1 %10796, %v19066_v15   ;;  %v14521_v10 = vrot.slane %v2631_v52, %v19003_v33  ;;  %v2721_v16 = vrot.slane %v1070_v37, %v19003_v33 }
 0x248   : > { %v9458_v9 = vcombine.low %v9450_v53, %v9457_v12  ;;  %10546 = vst.msk [vmem:[%s14466_s28 + $0x10] sm:$0xff] %vm10543_vm2, %v9441_v41  ;;  %v14513_v32 = vpop.permute.xlu0 %1887  ;;  %v14518_v53 = vrot.slane %v2630_v50, %v19003_v33  ;;  %v1948_v12 = vadd.f32 %v1924_v22, %v13974_v17  ;;  %v971_v18 = vadd.f32 %v955_v8, %v19069_v55  ;;  %v19072_v8 = vld [vmem:[#allocation24_spill] sm:$0xff] }
 0x249   : > { %19068 = vst [vmem:[#allocation162_spill] sm:$0xff] %v14521_v10  ;;  %v1922_v50 = vmul.f32 %v14493_v51, %v14294_v14  ;;  %v14552_v14 = vrot.slane %v2632_v38, %v19003_v33  ;;  %v2728_v52 = vrot.slane %v2714_v29, %v19003_v33  ;;  %v19074_v41 = vld [vmem:[#allocation88_spill] sm:$0xff]  ;;  %v2729_v22 = vcombine.high %v2721_v16, %v2721_v16 }
 0x24a   : > { %19067 = vst [vmem:[#allocation169_spill] sm:$0xff] %v14518_v53  ;;  %10547 = vst.msk [vmem:[%s14466_s28 + $0x18] sm:$0xff] %vm10543_vm2, %v9458_v9  ;;  %v14539_v9 = vld [vmem:[%s17857_s3 + $0x3] ss:$0 sm:$0xff]  ;;  %v2092_v55 = vadd.f32 %v14262_v43, %v1948_v12  ;;  %v19075_v29 = vld [vmem:[#allocation148_spill] sm:$0xff]  ;;  %v14579_v43 = vrot.slane %v2721_v16, %v19003_v33 }
 0x24b   : > { %19070 = vst [vmem:[#allocation164_spill] sm:$0xff] %v14539_v9  ;;  %v14543_v17 = vmul.f32 %v14539_v9, %v14159_v26  ;;  %v14547_v37 = vmul.f32 %v14539_v9, %v14205_v36  ;;  %1987 = vperm.xlu0 %10801, %v19072_v8   ;;  %19073 = vst [vmem:[#allocation103_spill] sm:$0xff] %v14552_v14  ;;  %v1930_v26 = vmul.f32 %v14493_v51, %v14441_v11  ;;  %v14567_v8 = vpop.permute.xlu1 %5160  ;;  %v14573_v11 = vld [vmem:[%s17857_s3] ss:$0 sm:$0xff]  ;;  %v19076_v36 = vld [vmem:[#allocation84_spill] sm:$0xff] }
 0x24c   : > { %5956 = vperm.xlu1 %10796, %v19074_v41   ;;  %v14560_v20 = vpop.permute.xlu0 %1895  ;;  %v3286_v38 = vcombine.high %v2092_v55, %v2092_v55  ;;  %v3293_v12 = vrot.slane %v2092_v55, %v19003_v33  ;;  %v1072_v35 = vadd.f32 %v19075_v29, %v971_v18  ;;  %v5163_v48 = vmul.f32 %v14573_v11, %v14258_v3  ;;  %v19078_v3 = vld [vmem:[#allocation14_spill] sm:$0xff]  ;;  %v19081_v14 = vld [vmem:[#allocation31_spill] sm:$0xff] }
 0x24d   : > { %19071 = vst [vmem:[#allocation96_spill] sm:$0xff] %v14543_v17  ;;  %v1946_v53 = vadd.f32 %v1922_v50, %v19076_v36  ;;  %v2730_v29 = vcombine.high %v2728_v52, %v2728_v52  ;;  %v14587_v23 = vrot.slane %v2728_v52, %v19003_v33  ;;  %v1954_v15 = vadd.f32 %v1930_v26, %v19078_v3  ;;  %v19079_v50 = vld [vmem:[#allocation98_spill] sm:$0xff] }
 0x24e   : > { %v3300_v55 = vrot.slane %v3286_v38, %v19003_v33  ;;  %v3301_v10 = vcombine.high %v3293_v12, %v3293_v12  ;;  %v3309_v54 = vrot.slane %v3293_v12, %v19003_v33  ;;  %v2812_v18 = vcombine.high %v1072_v35, %v1072_v35 }
 0x24f   : > { %1995 = vperm.xlu0 %10801, %v19077_v27   ;;  %v14596_v27 = vrot.slane %v2729_v22, %v19003_v33  ;;  %v2819_v41 = vrot.slane %v1072_v35, %v19003_v33  ;;  %v2090_v52 = vadd.f32 %v14251_v46, %v1946_v53  ;;  %v14600_v9 = vpop.permute.xlu1 %5200  ;;  %v2098_v46 = vadd.f32 %v14298_v31, %v1954_v15  ;;  %v19083_v53 = vld [vmem:[#allocation92_spill] sm:$0xff] }
 0x250   : > { %5966 = vperm.xlu1 %10796, %v19079_v50   ;;  %v14591_v16 = vpop.permute.xlu0 %1903  ;;  %v3302_v36 = vcombine.high %v3300_v55, %v3300_v55  ;;  %v3316_v38 = vrot.slane %v3300_v55, %v19003_v33  ;;  %v3323_v12 = vrot.slane %v3301_v10, %v19003_v33  ;;  %v3331_v30 = vcombine.high %v3309_v54, %v3309_v54 }
 0x251   : > { %19080 = vst [vmem:[#allocation125_spill] sm:$0xff] %v14600_v9  ;;  %v14608_v54 = vrot.slane %v2730_v29, %v19003_v33  ;;  %v3223_v9 = vcombine.high %v2090_v52, %v2090_v52 }
 0x252   : > { %v14603_v26 = vrot.slane %v3302_v36, %v19003_v33  ;;  %v3332_v3 = vcombine.high %v3316_v38, %v3316_v38  ;;  %v3333_v50 = vcombine.high %v3323_v12, %v3323_v12  ;;  %v4089_v55 = vrot.slane %v3323_v12, %v13869_v62 }
 0x253   : > { %2003 = vperm.xlu0 %10801, %v19081_v14   ;;  %19082 = vst [vmem:[#allocation166_spill] sm:$0xff] %v14608_v54  ;;  %v4093_v10 = vrot.slane %v3331_v30, %v13869_v62  ;;  %v4101_v35 = vrot.slane %v3316_v38, %v13869_v62  ;;  %v5165_v36 = vmul.f32 %v14573_v11, %v14303_v63  ;;  %v14627_v38 = vpop.permute.xlu1 %5204 }
 0x254   : > { %5976 = vperm.xlu1 %10796, %v19083_v53   ;;  %v14614_v22 = vpop.permute.xlu0 %1911  ;;  %v4097_v12 = vrot.slane %v3333_v50, %v13869_v62  ;;  %v4105_v14 = vrot.slane %v14603_v26, %v13869_v62  ;;  %v4109_v29 = vrot.slane %v3332_v3, %v13869_v62  ;;  %v2826_v30 = vrot.slane %v2812_v18, %v19003_v33 }
 0x255   : > { %v4631_v31 = vsel %vm4598_vm1, %v14308_v57, %v4089_v55  ;;  %v4632_v15 = vsel %vm4598_vm1, %v14325_v1, %v4093_v10  ;;  %19084 = vst [vmem:[#allocation63_spill] sm:$0xff] %v14627_v38  ;;  %v19085_v63 = vcombine.high %v14308_v57, %v14308_v57  ;;  %v19086_v53 = vcombine.high %v14325_v1, %v14325_v1  ;;  %v19089_v10 = vld [vmem:[#allocation34_spill] sm:$0xff] }
 0x256   : > { %v14639_v18 = vsel %vm4598_vm1, %v14311_v49, %v4105_v14  ;;  %v14643_v55 = vsel %vm4598_vm1, %v14339_v47, %v4109_v29  ;;  %v9663_v38 = vcombine.low %v4631_v31, %v4632_v15  ;;  %v14657_v14 = vld [vmem:[%s17858_s4] ss:$0 sm:$0xff]  ;;  %v3230_v31 = vrot.slane %v2090_v52, %v19003_v33 }
 0x257   : > { %v4633_v50 = vsel %vm4598_vm1, %v19085_v63, %v4097_v12  ;;  %v4634_v3 = vsel %vm4598_vm1, %v19086_v53, %v4101_v35  ;;  %19087 = vst [vmem:[#allocation168_spill] sm:$0xff] %v14639_v18  ;;  %19088 = vst [vmem:[#allocation109_spill] sm:$0xff] %v14643_v55  ;;  %2011 = vperm.xlu0 %10801, %v19089_v10   ;;  %v3510_v12 = vcombine.high %v2098_v46, %v2098_v46  ;;  %v19090_v63 = vld [vmem:[#allocation90_spill] sm:$0xff]  ;;  %v14669_v10 = vpop.permute.xlu1 %5212 }
 0x258   : > { %v9664_v17 = vcombine.low %v4633_v50, %v4634_v3  ;;  %5986 = vperm.xlu1 %10796, %v19090_v63   ;;  %v14649_v1 = vpop.permute.xlu0 %5296  ;;  %v2827_v35 = vcombine.high %v2819_v41, %v2819_v41  ;;  %v14652_v53 = vrot.slane %v2819_v41, %v19003_v33  ;;  %v14660_v29 = vadd.f32 %v14657_v14, %v5163_v48  ;;  %v19094_v15 = vld [vmem:[#allocation46_spill] sm:$0xff] }
 0x259   : > { %19091 = vst [vmem:[#allocation120_spill] sm:$0xff] %v14649_v1  ;;  %v9671_v3 = vrot.slane %v9663_v38, %v14066_v60  ;;  %v2828_v52 = vcombine.high %v2826_v30, %v2826_v30  ;;  %v3237_v47 = vrot.slane %v3223_v9, %v19003_v33  ;;  %v14678_v50 = vadd.f32 %v14657_v14, %v5165_v36  ;;  %v19096_v55 = vld [vmem:[#allocation102_spill] sm:$0xff]  ;;  %v19111_v1 = vld [vmem:[#allocation116_spill] sm:$0xff] }
 0x25a   : > { %19092 = vst [vmem:[#allocation2_spill] sm:$0xff] %v14652_v53  ;;  %19093 = vst [vmem:[#allocation93_spill] sm:$0xff] %v14660_v29  ;;  %v9678_v41 = vrot.slane %v9664_v17, %v14066_v60  ;;  %v3517_v17 = vrot.slane %v2098_v46, %v19003_v33  ;;  %v3524_v63 = vrot.slane %v3510_v12, %v19003_v33  ;;  %v19102_v53 = vld [vmem:[#allocation42_spill] sm:$0xff] }
 0x25b   : > { %2019 = vperm.xlu0 %10801, %v19094_v15   ;;  %19095 = vst [vmem:[#allocation99_spill] sm:$0xff] %v14678_v50  ;;  %v14686_v57 = vrot.slane %v2826_v30, %v19003_v33  ;;  %v14689_v48 = vrot.slane %v2827_v35, %v19003_v33  ;;  %v3238_v36 = vcombine.high %v3230_v31, %v3230_v31  ;;  %v19103_v50 = vld [vmem:[#allocation91_spill] sm:$0xff] }
 0x25c   : > { %v9679_v38 = vcombine.low %v9671_v3, %v9678_v41  ;;  %5996 = vperm.xlu1 %10796, %v19096_v55   ;;  %v14683_v18 = vpop.permute.xlu0 %5308  ;;  %v3525_v15 = vcombine.high %v3517_v17, %v3517_v17  ;;  %v3526_v46 = vcombine.high %v3524_v63, %v3524_v63  ;;  %v3533_v12 = vrot.slane %v3517_v17, %v19003_v33  ;;  %v14697_v41 = vpop.permute.xlu1 %5220 }
 0x25d   : > { %19097 = vst [vmem:[#allocation23_spill] sm:$0xff] %v14683_v18  ;;  %19098 = vst [vmem:[#allocation43_spill] sm:$0xff] %v14686_v57  ;;  %v3540_v3 = vrot.slane %v3524_v63, %v19003_v33  ;;  %v14700_v30 = vrot.slane %v2828_v52, %v19003_v33  ;;  %v3239_v55 = vcombine.high %v3237_v47, %v3237_v47  ;;  %v19109_v57 = vld [vmem:[#allocation127_spill] sm:$0xff] }
 0x25e   : > { %19099 = vst [vmem:[#allocation126_spill] sm:$0xff] %v14689_v48  ;;  %10560 = vst.msk [vmem:[%s14466_s28 + $0x80] sm:$0xff] %vm10543_vm2, %v9679_v38  ;;  %v14703_v35 = vrot.slane %v3230_v31, %v19003_v33  ;;  %v1936_v9 = vmul.f32 %v14493_v51, %v14560_v20  ;;  %v3547_v38 = vrot.slane %v3525_v15, %v19003_v33 }
 0x25f   : > { %19100 = vst [vmem:[#allocation110_spill] sm:$0xff] %v14697_v41  ;;  %19101 = vst [vmem:[#allocation108_spill] sm:$0xff] %v14700_v30  ;;  %2027 = vperm.xlu0 %10801, %v19102_v53   ;;  %v14710_v17 = vrot.slane %v3526_v46, %v19003_v33  ;;  %v3555_v63 = vcombine.high %v3533_v12, %v3533_v12  ;;  %v3556_v29 = vcombine.high %v3540_v3, %v3540_v3 }
 0x260   : > { %6006 = vperm.xlu1 %10796, %v19103_v50   ;;  %v14713_v52 = vpop.permute.xlu0 %5316  ;;  %v14718_v18 = vrot.slane %v3237_v47, %v19003_v33  ;;  %v14721_v20 = vrot.slane %v3238_v36, %v19003_v33  ;;  %v1928_v53 = vmul.f32 %v14493_v51, %v14412_v7  ;;  %v3557_v15 = vcombine.high %v3547_v38, %v3547_v38 }
 0x261   : > { %19104 = vst [vmem:[#allocation131_spill] sm:$0xff] %v14713_v52  ;;  %v4217_v46 = vrot.slane %v3547_v38, %v13869_v62  ;;  %v4221_v12 = vrot.slane %v3555_v63, %v13869_v62  ;;  %v4229_v50 = vrot.slane %v3540_v3, %v13869_v62  ;;  %v14728_v52 = vpop.permute.xlu1 %5228  ;;  %v14731_v31 = vrot.slane %v3239_v55, %v19003_v33 }
 0x262   : > { %19105 = vst [vmem:[#allocation30_spill] sm:$0xff] %v14718_v18  ;;  %19106 = vst [vmem:[#allocation65_spill] sm:$0xff] %v14721_v20  ;;  %v3268_v47 = vcombine.high %v14703_v35, %v14703_v35  ;;  %v4233_v36 = vrot.slane %v14710_v17, %v13869_v62  ;;  %v4237_v7 = vrot.slane %v3556_v29, %v13869_v62 }
 0x263   : > { %19107 = vst [vmem:[#allocation32_spill] sm:$0xff] %v14728_v52  ;;  %19108 = vst [vmem:[#allocation3_spill] sm:$0xff] %v14731_v31  ;;  %2035 = vperm.xlu0 %10801, %v19109_v57   ;;  %v4225_v38 = vrot.slane %v3557_v15, %v13869_v62  ;;  %v4663_v3 = vsel %vm4598_vm1, %v14453_v6, %v4217_v46  ;;  %v4664_v63 = vsel %vm4598_vm1, %v14488_v13, %v4221_v12  ;;  %v19110_v52 = vld [vmem:[#allocation100_spill] sm:$0xff] }
 0x264   : > { %v1960_v55 = vadd.f32 %v1936_v9, %v14047_v44  ;;  %6016 = vperm.xlu1 %10796, %v19110_v52   ;;  %v14746_v49 = vpop.permute.xlu0 %5324  ;;  %v1952_v41 = vadd.f32 %v1928_v53, %v19111_v1  ;;  %v14751_v29 = vsel %vm4598_vm1, %v14472_v39, %v4233_v36  ;;  %v14755_v57 = vsel %vm4598_vm1, %v14498_v45, %v4237_v7  ;;  %v19115_v7 = vld [vmem:[#allocation95_spill] sm:$0xff] }
 0x265   : > { %v9935_v15 = vcombine.low %v4663_v3, %v4664_v63  ;;  %v3270_v46 = vcombine.high %v14721_v20, %v14721_v20  ;;  %v19112_v44 = vcombine.high %v14453_v6, %v14453_v6  ;;  %v19113_v1 = vcombine.high %v14488_v13, %v14488_v13  ;;  %v14769_v36 = vpop.permute.xlu1 %5236  ;;  %v19114_v63 = vld [vmem:[#allocation130_spill] sm:$0xff] }
 0x266   : > { %v1926_v6 = vmul.f32 %v14493_v51, %v14376_v4  ;;  %v4053_v4 = vrot.slane %v14703_v35, %v13869_v62  ;;  %v14796_v3 = vrot.slane %v3268_v47, %v13869_v62  ;;  %v1934_v13 = vmul.f32 %v14493_v51, %v14513_v32  ;;  %v19119_v47 = vld [vmem:[#allocation133_spill] sm:$0xff] }
 0x267   : > { %v4665_v9 = vsel %vm4598_vm1, %v19112_v44, %v4225_v38  ;;  %v4666_v53 = vsel %vm4598_vm1, %v19113_v1, %v4229_v50  ;;  %2043 = vperm.xlu0 %10801, %v19114_v63   ;;  %v3269_v50 = vcombine.high %v14718_v18, %v14718_v18  ;;  %v3271_v44 = vcombine.high %v14731_v31, %v14731_v31  ;;  %v19129_v18 = vld [vmem:[#allocation55_spill] sm:$0xff] }
 0x268   : > { %v9936_v38 = vcombine.low %v4665_v9, %v4666_v53  ;;  %v2104_v1 = vadd.f32 %v14386_v40, %v1960_v55  ;;  %6026 = vperm.xlu1 %10796, %v19115_v7   ;;  %v14786_v12 = vpop.permute.xlu0 %5332  ;;  %v2096_v9 = vadd.f32 %v14279_v24, %v1952_v41  ;;  %v9943_v53 = vrot.slane %v9935_v15, %v14066_v60  ;;  %v19118_v41 = vld [vmem:[#allocation113_spill] sm:$0xff]  ;;  %v19122_v7 = vld [vmem:[#allocation104_spill] sm:$0xff] }
 0x269   : > { %19116 = vst [vmem:[#allocation18_spill] sm:$0xff] %v14796_v3  ;;  %v14799_v40 = vrot.slane %v3270_v46, %v13869_v62  ;;  %v14803_v35 = vpop.permute.xlu1 %5244  ;;  %v1950_v15 = vadd.f32 %v1926_v6, %v19118_v41  ;;  %v14812_v46 = vrot.slane %v3269_v50, %v13869_v62  ;;  %v14815_v48 = vrot.slane %v3271_v44, %v13869_v62  ;;  %v19123_v6 = vld [vmem:[#allocation140_spill] sm:$0xff] }
 0x26a   : > { %v9950_v63 = vrot.slane %v9936_v38, %v14066_v60  ;;  %v3734_v55 = vcombine.high %v2104_v1, %v2104_v1  ;;  %v3741_v45 = vrot.slane %v2104_v1, %v19003_v33  ;;  %v5166_v50 = vmul.f32 %v14573_v11, %v14346_v56 }
 0x26b   : > { %19117 = vst [vmem:[#allocation38_spill] sm:$0xff] %v14799_v40  ;;  %2051 = vperm.xlu0 %10801, %v19119_v47   ;;  %19120 = vst [vmem:[#allocation129_spill] sm:$0xff] %v14812_v46  ;;  %v1932_v44 = vmul.f32 %v14493_v51, %v14477_v42  ;;  %v14835_v1 = vmul.f32 %v14573_v11, %v14388_v21  ;;  %v3454_v56 = vrot.slane %v2096_v9, %v19003_v33 }
 0x26c   : > { %v9951_v38 = vcombine.low %v9943_v53, %v9950_v63  ;;  %19121 = vst [vmem:[#allocation135_spill] sm:$0xff] %v14815_v48  ;;  %6036 = vperm.xlu1 %10796, %v19122_v7   ;;  %v14819_v24 = vpop.permute.xlu0 %5340  ;;  %v19124_v53 = vcombine.high %v19123_v6, %v19123_v6  ;;  %v3447_v63 = vcombine.high %v2096_v9, %v2096_v9 }
 0x26d   : > { %v3748_v41 = vrot.slane %v3734_v55, %v19003_v33  ;;  %v3749_v47 = vcombine.high %v3741_v45, %v3741_v45  ;;  %v3757_v6 = vrot.slane %v3741_v45, %v19003_v33  ;;  %v1958_v42 = vadd.f32 %v1934_v13, %v14039_v2  ;;  %v19128_v13 = vld [vmem:[#allocation85_spill] sm:$0xff] }
 0x26e   : > { %v14825_v32 = vsel %vm4598_vm1, %v19124_v53, %v4053_v4  ;;  %10576 = vst.msk [vmem:[%s14466_s28 + $0x100] sm:$0xff] %vm10543_vm2, %v9951_v38  ;;  %v14839_v4 = vpop.permute.xlu1 %5252  ;;  %v2094_v53 = vadd.f32 %v14275_v5, %v1950_v15  ;;  %v5170_v38 = vmul.f32 %v14573_v11, %v14417_v19  ;;  %v19127_v45 = vmov 1  }
 0x26f   : > { %19125 = vst [vmem:[#allocation68_spill] sm:$0xff] %v14825_v32  ;;  %v19126_v32 = vld [vmem:[#allocation136_spill] sm:$0xff]  ;;  %v3750_v21 = vcombine.high %v3748_v41, %v3748_v41  ;;  %v3764_v48 = vrot.slane %v3748_v41, %v19003_v33  ;;  %v3771_v55 = vrot.slane %v3749_v47, %v19003_v33  ;;  %v3779_v7 = vcombine.high %v3757_v6, %v3757_v6 }
 0x270   : > { %2059 = vperm.xlu0 %10801, %v19126_v32   ;;  %10798 = vset.pattern.permute.xlu1 %v19127_v45  ;;  %v14850_v46 = vpop.permute.xlu0 %5348  ;;  %v14853_v5 = vadd.f32 %v14657_v14, %v5166_v50  ;;  %v3461_v9 = vrot.slane %v3447_v63, %v19003_v33  ;;  %v5172_v2 = vmul.f32 %v14573_v11, %v14445_v61 }
 0x271   : > { %v1956_v19 = vadd.f32 %v1932_v44, %v14033_v0  ;;  %6092 = vperm.xlu1 %10798, %v19128_v13   ;;  %v14861_v15 = vrot.slane %v3750_v21, %v19003_v33  ;;  %v3780_v6 = vcombine.high %v3764_v48, %v3764_v48  ;;  %v3781_v32 = vcombine.high %v3771_v55, %v3771_v55  ;;  %v19130_v0 = vld [vmem:[#allocation161_spill] sm:$0xff] }
 0x272   : > { %v4345_v41 = vrot.slane %v3771_v55, %v13869_v62  ;;  %v3390_v47 = vrot.slane %v2094_v53, %v19003_v33  ;;  %v3462_v50 = vcombine.high %v3454_v56, %v3454_v56  ;;  %v4349_v45 = vrot.slane %v3779_v7, %v13869_v62  ;;  %v14868_v61 = vpop.permute.xlu1 %5292 }
 0x273   : > { %v4357_v63 = vrot.slane %v3764_v48, %v13869_v62  ;;  %v2102_v44 = vadd.f32 %v19130_v0, %v1958_v42  ;;  %v4353_v21 = vrot.slane %v3781_v32, %v13869_v62  ;;  %v4361_v13 = vrot.slane %v14861_v15, %v13869_v62 }
 0x274   : > { %5388 = vperm.xlu0 %10801, %v19129_v18   ;;  %v4365_v55 = vrot.slane %v3780_v6, %v13869_v62  ;;  %v14875_v40 = vpop.permute.xlu0 %6236  ;;  %v3463_v53 = vcombine.high %v3461_v9, %v3461_v9  ;;  %v4695_v7 = vsel %vm4598_vm1, %v14579_v43, %v4345_v41  ;;  %v4696_v18 = vsel %vm4598_vm1, %v14596_v27, %v4349_v45 }
 0x275   : > { %v1940_v48 = vmul.f32 %v14493_v51, %v14614_v22  ;;  %6096 = vperm.xlu1 %10798, %v14119_v28   ;;  %v19131_v42 = vcombine.high %v14579_v43, %v14579_v43  ;;  %v19132_v6 = vcombine.high %v14596_v27, %v14596_v27  ;;  %v14894_v41 = vsel %vm4598_vm1, %v14587_v23, %v4361_v13 }
 0x276   : > { %v14898_v45 = vsel %vm4598_vm1, %v14608_v54, %v4365_v55  ;;  %v14901_v22 = vrot.slane %v3454_v56, %v19003_v33  ;;  %v10207_v31 = vcombine.low %v4695_v7, %v4696_v18  ;;  %v14906_v27 = vpop.permute.xlu1 %5300  ;;  %v14912_v13 = vrot.slane %v3462_v50, %v19003_v33  ;;  %v19138_v18 = vld [vmem:[#allocation163_spill] sm:$0xff]  ;;  %v19141_v54 = vld [vmem:[#allocation106_spill] sm:$0xff] }
 0x277   : > { %v4697_v32 = vsel %vm4598_vm1, %v19131_v42, %v4353_v21  ;;  %v4698_v0 = vsel %vm4598_vm1, %v19132_v6, %v4357_v63  ;;  %19133 = vst [vmem:[#allocation28_spill] sm:$0xff] %v14898_v45  ;;  %v19134_v42 = vld [vmem:[#allocation58_spill] sm:$0xff]  ;;  %v14909_v63 = vrot.slane %v3390_v47, %v19003_v33  ;;  %v5174_v55 = vmul.f32 %v14573_v11, %v14481_v58  ;;  %v19139_v47 = vld [vmem:[#allocation89_spill] sm:$0xff] }
 0x278   : > { %v10208_v43 = vcombine.low %v4697_v32, %v4698_v0  ;;  %5400 = vperm.xlu0 %10801, %v19134_v42   ;;  %19136 = vst [vmem:[#allocation72_spill] sm:$0xff] %v14912_v13  ;;  %v3671_v56 = vcombine.high %v2102_v44, %v2102_v44  ;;  %v14916_v6 = vpop.permute.xlu0 %6248  ;;  %v14919_v7 = vrot.slane %v3461_v9, %v19003_v33 }
 0x279   : > { %19135 = vst [vmem:[#allocation5_spill] sm:$0xff] %v14909_v63  ;;  %v2100_v32 = vadd.f32 %v19138_v18, %v1956_v19  ;;  %v10215_v0 = vrot.slane %v10207_v31, %v14066_v60  ;;  %6104 = vperm.xlu1 %10798, %v19139_v47   ;;  %v3334_v50 = vcombine.high %v14603_v26, %v14603_v26  ;;  %v19142_v26 = vld [vmem:[#allocation66_spill] sm:$0xff] }
 0x27a   : > { %19137 = vst [vmem:[#allocation7_spill] sm:$0xff] %v14919_v7  ;;  %v10222_v42 = vrot.slane %v10208_v43, %v14066_v60  ;;  %v14928_v21 = vrot.slane %v3463_v53, %v19003_v33  ;;  %v3678_v58 = vrot.slane %v2102_v44, %v19003_v33  ;;  %v1964_v3 = vadd.f32 %v1940_v48, %v19141_v54  ;;  %v14942_v53 = vpop.permute.xlu1 %5304 }
 0x27b   : > { %v14934_v9 = vadd.f32 %v14657_v14, %v14835_v1  ;;  %v3492_v31 = vcombine.high %v14901_v22, %v14901_v22  ;;  %v14939_v19 = vadd.f32 %v14657_v14, %v5170_v38  ;;  %v3494_v44 = vcombine.high %v14912_v13, %v14912_v13 }
 0x27c   : > { %19140 = vst [vmem:[#allocation36_spill] sm:$0xff] %v14928_v21  ;;  %v10223_v43 = vcombine.low %v10215_v0, %v10222_v42  ;;  %5408 = vperm.xlu0 %10801, %v19142_v26   ;;  %v14947_v54 = vadd.f32 %v14657_v14, %v5172_v2  ;;  %v3685_v1 = vrot.slane %v3671_v56, %v19003_v33  ;;  %v14952_v18 = vpop.permute.xlu0 %6256  ;;  %v19143_v2 = vld [vmem:[#allocation94_spill] sm:$0xff] }
 0x27d   : > { %v1938_v48 = vmul.f32 %v14493_v51, %v14591_v16  ;;  %v3493_v0 = vcombine.high %v14919_v7, %v14919_v7  ;;  %v3614_v42 = vrot.slane %v2100_v32, %v19003_v33  ;;  %v14960_v26 = vadd.f32 %v14657_v14, %v5174_v55  ;;  %6112 = vperm.xlu1 %10798, %v19143_v2   ;;  %v19145_v2 = vld [vmem:[#allocation64_spill] sm:$0xff]  ;;  %v19150_v55 = vld [vmem:[#allocation97_spill] sm:$0xff] }
 0x27e   : > { %10592 = vst.msk [vmem:[%s14466_s28 + $0x180] sm:$0xff] %vm10543_vm2, %v10223_v43  ;;  %v14966_v56 = vrot.slane %v3334_v50, %v13869_v62  ;;  %v3495_v16 = vcombine.high %v14928_v21, %v14928_v21  ;;  %v3686_v20 = vcombine.high %v3678_v58, %v3678_v58  ;;  %v2108_v38 = vadd.f32 %v14547_v37, %v1964_v3  ;;  %v14980_v50 = vpop.permute.xlu1 %5312  ;;  %v19164_v21 = vld [vmem:[#allocation149_spill] sm:$0xff] }
 0x27f   : > { %v4181_v63 = vrot.slane %v14901_v22, %v13869_v62  ;;  %v14976_v32 = vrot.slane %v3492_v31, %v13869_v62  ;;  %v3694_v43 = vrot.slane %v3678_v58, %v19003_v33  ;;  %v14983_v34 = vrot.slane %v3494_v44, %v13869_v62  ;;  %v19147_v22 = vld [vmem:[#allocation111_spill] sm:$0xff] }
 0x280   : > { %5416 = vperm.xlu0 %10801, %v19145_v2   ;;  %v3687_v3 = vcombine.high %v3685_v1, %v3685_v1  ;;  %v1962_v52 = vadd.f32 %v1938_v48, %v19147_v22  ;;  %v14988_v28 = vpop.permute.xlu0 %6264  ;;  %v3558_v31 = vcombine.high %v14710_v17, %v14710_v17  ;;  %v14993_v58 = vrot.slane %v3614_v42, %v19003_v33 }
 0x281   : > { %19144 = vst [vmem:[#allocation78_spill] sm:$0xff] %v14976_v32  ;;  %19146 = vst [vmem:[#allocation9_spill] sm:$0xff] %v14983_v34  ;;  %v14996_v2 = vrot.slane %v3685_v1, %v19003_v33  ;;  %v5176_v44 = vmul.f32 %v14573_v11, %v14526_v25  ;;  %6120 = vperm.xlu1 %10798, %v19150_v55   ;;  %v15004_v48 = vrot.slane %v3493_v0, %v13869_v62  ;;  %v19154_v55 = vld [vmem:[#allocation71_spill] sm:$0xff]  ;;  %v19170_v32 = vld [vmem:[#allocation120_spill] sm:$0xff] }
 0x282   : > { %19148 = vst [vmem:[#allocation144_spill] sm:$0xff] %v14993_v58  ;;  %v15007_v22 = vrot.slane %v3686_v20, %v19003_v33  ;;  %v3895_v17 = vcombine.high %v2108_v38, %v2108_v38  ;;  %v15010_v42 = vrot.slane %v3495_v16, %v13869_v62  ;;  %v3716_v1 = vcombine.high %v3694_v43, %v3694_v43  ;;  %v15016_v34 = vpop.permute.xlu1 %5320 }
 0x283   : > { %19149 = vst [vmem:[#allocation29_spill] sm:$0xff] %v14996_v2  ;;  %19151 = vst [vmem:[#allocation81_spill] sm:$0xff] %v15004_v48  ;;  %v4309_v7 = vrot.slane %v3694_v43, %v13869_v62  ;;  %v3782_v25 = vcombine.high %v14861_v15, %v14861_v15  ;;  %v19155_v0 = vcombine.high %v14469_v59, %v14469_v59  ;;  %v19158_v43 = vld [vmem:[#allocation96_spill] sm:$0xff] }
 0x284   : > { %19152 = vst [vmem:[#allocation11_spill] sm:$0xff] %v15007_v22  ;;  %19153 = vst [vmem:[#allocation13_spill] sm:$0xff] %v15010_v42  ;;  %5424 = vperm.xlu0 %10801, %v19154_v55   ;;  %v15025_v37 = vrot.slane %v3687_v3, %v19003_v33  ;;  %v5178_v16 = vmul.f32 %v14573_v11, %v14567_v8  ;;  %v2106_v42 = vadd.f32 %v19158_v43, %v1962_v52  ;;  %v15030_v48 = vpop.permute.xlu0 %6272  ;;  %v19159_v3 = vld [vmem:[#allocation101_spill] sm:$0xff] }
 0x285   : > { %v15022_v20 = vsel %vm4598_vm1, %v19155_v0, %v4181_v63  ;;  %v4241_v15 = vrot.slane %v3558_v31, %v13869_v62  ;;  %v3717_v59 = vcombine.high %v14996_v2, %v14996_v2  ;;  %v15038_v63 = vadd.f32 %v14657_v14, %v5176_v44  ;;  %6128 = vperm.xlu1 %10798, %v19159_v3   ;;  %v19161_v44 = vld [vmem:[#allocation103_spill] sm:$0xff]  ;;  %v10870_v0 = vld [vmem:[%s17857_s3 + $0x1] ss:$0 sm:$0xff] }
 0x286   : > { %19156 = vst [vmem:[#allocation37_spill] sm:$0xff] %v15022_v20  ;;  %19157 = vst [vmem:[#allocation19_spill] sm:$0xff] %v15025_v37  ;;  %v3718_v8 = vcombine.high %v15007_v22, %v15007_v22  ;;  %v3902_v52 = vrot.slane %v2108_v38, %v19003_v33  ;;  %v3909_v31 = vrot.slane %v3895_v17, %v19003_v33  ;;  %v15060_v11 = vpop.permute.xlu1 %5328  ;;  %v19169_v17 = vld [vmem:[#allocation107_spill] sm:$0xff] }
 0x287   : > { %v15050_v43 = vrot.slane %v3716_v1, %v13869_v62  ;;  %v19162_v55 = vcombine.high %v19161_v44, %v19161_v44  ;;  %v4369_v58 = vrot.slane %v3782_v25, %v13869_v62  ;;  %v3719_v38 = vcombine.high %v15025_v37, %v15025_v37  ;;  %v19167_v25 = vld [vmem:[#allocation63_spill] sm:$0xff] }
 0x288   : > { %5432 = vperm.xlu0 %10801, %v19164_v21   ;;  %v3838_v1 = vrot.slane %v2106_v42, %v19003_v33  ;;  %v15074_v21 = vrot.slane %v3717_v59, %v13869_v62  ;;  %v5261_v44 = vmul.f32 %v10870_v0, %v19167_v25  ;;  %v5263_v2 = vmul.f32 %v10870_v0, %v14669_v10 }
 0x289   : > { %19160 = vst [vmem:[#allocation119_spill] sm:$0xff] %v15050_v43  ;;  %v15056_v20 = vsel %vm4598_vm1, %v19162_v55, %v4309_v7  ;;  %v19165_v7 = vld [vmem:[#allocation125_spill] sm:$0xff]  ;;  %v19168_v43 = vld [vmem:[#allocation110_spill] sm:$0xff]  ;;  %6136 = vperm.xlu1 %10798, %v19169_v17   ;;  %v3910_v42 = vcombine.high %v3902_v52, %v3902_v52  ;;  %v3911_v37 = vcombine.high %v3909_v31, %v3909_v31 }
 0x28a   : > { %19163 = vst [vmem:[#allocation25_spill] sm:$0xff] %v15056_v20  ;;  %v5260_v55 = vmul.f32 %v10870_v0, %v19165_v7  ;;  %v15071_v20 = vpop.permute.xlu0 %6280  ;;  %19166 = vst [vmem:[#allocation48_spill] sm:$0xff] %v15074_v21  ;;  %v5265_v22 = vmul.f32 %v10870_v0, %v19168_v43  ;;  %v5356_v13 = vmul.f32 %v14493_v51, %v19170_v32  ;;  %v19171_v7 = vld [vmem:[#allocation158_spill] sm:$0xff]  ;;  %v19175_v43 = vld [vmem:[#allocation77_spill] sm:$0xff]  ;;  %v15094_v17 = vpop.permute.xlu1 %5336 }
 0x28b   : > { %v19172_v45 = vcombine.high %v19171_v7, %v19171_v7  ;;  %v3918_v25 = vrot.slane %v3902_v52, %v19003_v33  ;;  %v15091_v10 = vrot.slane %v3909_v31, %v19003_v33  ;;  %v19176_v21 = vcombine.high %v14472_v39, %v14472_v39 }
 0x28c   : > { %5440 = vperm.xlu0 %10801, %v19175_v43   ;;  %v19178_v7 = vcombine.high %v14587_v23, %v14587_v23  ;;  %v15112_v52 = vadd.f32 %v14657_v14, %v5178_v16  ;;  %v15115_v31 = vrot.slane %v3838_v1, %v19003_v33  ;;  %v19181_v43 = vld [vmem:[#allocation134_spill] sm:$0xff]  ;;  %v15128_v14 = vrot.slane %v3719_v38, %v13869_v62 }
 0x28d   : > { %v15087_v59 = vsel %vm4598_vm1, %v19172_v45, %v14966_v56  ;;  %19174 = vst [vmem:[#allocation148_spill] sm:$0xff] %v15091_v10  ;;  %v15100_v32 = vsel %vm4598_vm1, %v19176_v21, %v4241_v15  ;;  %v15109_v56 = vrot.slane %v3718_v8, %v13869_v62  ;;  %v5276_v39 = vadd.f32 %v5260_v55, %v19181_v43  ;;  %v19183_v15 = vld [vmem:[#allocation132_spill] sm:$0xff] }
 0x28e   : > { %19173 = vst [vmem:[#allocation24_spill] sm:$0xff] %v15087_v59  ;;  %19177 = vst [vmem:[#allocation84_spill] sm:$0xff] %v15100_v32  ;;  %v15106_v45 = vsel %vm4598_vm1, %v19178_v7, %v4369_v58  ;;  %v15118_v59 = vpop.permute.xlu0 %6288  ;;  %v5279_v21 = vadd.f32 %v5263_v2, %v19183_v15  ;;  %v19184_v32 = vld [vmem:[#allocation23_spill] sm:$0xff]  ;;  %v19185_v58 = vld [vmem:[#allocation137_spill] sm:$0xff]  ;;  %v15131_v16 = vrot.slane %v3910_v42, %v19003_v33  ;;  %v15143_v38 = vpop.permute.xlu1 %5344 }
 0x28f   : > { %19179 = vst [vmem:[#allocation27_spill] sm:$0xff] %v15106_v45  ;;  %19180 = vst [vmem:[#allocation14_spill] sm:$0xff] %v15109_v56  ;;  %v5359_v23 = vmul.f32 %v14493_v51, %v19184_v32  ;;  %v5281_v7 = vadd.f32 %v5265_v22, %v19185_v58  ;;  %v19186_v45 = vld [vmem:[#allocation131_spill] sm:$0xff]  ;;  %v19187_v56 = vld [vmem:[#allocation112_spill] sm:$0xff]  ;;  %v15134_v1 = vrot.slane %v3911_v37, %v19003_v33 }
 0x290   : > { %19182 = vst [vmem:[#allocation31_spill] sm:$0xff] %v15118_v59  ;;  %v5361_v8 = vmul.f32 %v14493_v51, %v19186_v45  ;;  %6144 = vperm.xlu1 %10798, %v19187_v56   ;;  %19188 = vst [vmem:[#allocation34_spill] sm:$0xff] %v15128_v14  ;;  %v19190_v2 = vld [vmem:[#allocation32_spill] sm:$0xff]  ;;  %v3940_v43 = vcombine.high %v3918_v25, %v3918_v25  ;;  %v3941_v22 = vcombine.high %v15091_v10, %v15091_v10  ;;  %v19191_v32 = vld [vmem:[#allocation99_spill] sm:$0xff] }
 0x291   : > { %19189 = vst [vmem:[#allocation46_spill] sm:$0xff] %v15134_v1  ;;  %v5267_v55 = vmul.f32 %v10870_v0, %v19190_v2  ;;  %v5277_v15 = vadd.f32 %v5261_v44, %v19191_v32  ;;  %v15140_v45 = vadd.f32 %v5356_v13, %v5276_v39  ;;  %v19192_v58 = vld [vmem:[#allocation82_spill] sm:$0xff]  ;;  %v4437_v37 = vrot.slane %v3918_v25, %v13869_v62  ;;  %v19193_v32 = vld [vmem:[#allocation117_spill] sm:$0xff]  ;;  %v19194_v2 = vld [vmem:[#allocation139_spill] sm:$0xff] }
 0x292   : > { %5448 = vperm.xlu0 %10801, %v19192_v58   ;;  %v5269_v14 = vmul.f32 %v10870_v0, %v14769_v36  ;;  %v15151_v56 = vpop.permute.xlu0 %6296  ;;  %v15153_v59 = vadd.f32 %v5359_v23, %v5279_v21  ;;  %v15155_v13 = vadd.f32 %v5361_v8, %v5281_v7  ;;  %v5271_v44 = vmul.f32 %v10870_v0, %v14803_v35  ;;  %v19196_v7 = vld [vmem:[#allocation87_spill] sm:$0xff]  ;;  %v5353_v8 = vpop.permute.xlu1 %5352  ;;  %v19201_v10 = vld [vmem:[#allocation50_spill] sm:$0xff] }
 0x293   : > { %v5273_v39 = vmul.f32 %v10870_v0, %v14839_v4  ;;  %v3942_v25 = vcombine.high %v15131_v16, %v15131_v16  ;;  %v3943_v58 = vcombine.high %v15134_v1, %v15134_v1  ;;  %v5283_v36 = vadd.f32 %v5267_v55, %v19194_v2  ;;  %v19199_v2 = vld [vmem:[#allocation26_spill] sm:$0xff] }
 0x294   : > { %6152 = vperm.xlu1 %10798, %v19193_v32   ;;  %v5363_v21 = vmul.f32 %v14493_v51, %v14746_v49  ;;  %v15170_v35 = vrot.slane %v3940_v43, %v13869_v62  ;;  %v15175_v0 = vrot.slane %v3941_v22, %v13869_v62  ;;  %v19197_v55 = vcombine.high %v14700_v30, %v14700_v30  ;;  %v19200_v22 = vld [vmem:[#allocation141_spill] sm:$0xff] }
 0x295   : > { %v5285_v23 = vadd.f32 %v5269_v14, %v19199_v2  ;;  %v5365_v43 = vmul.f32 %v14493_v51, %v14786_v12  ;;  %v5367_v4 = vmul.f32 %v14493_v51, %v14819_v24  ;;  %v5289_v1 = vadd.f32 %v5273_v39, %v19201_v10  ;;  %v19204_v10 = vld [vmem:[#allocation93_spill] sm:$0xff]  ;;  %v19205_v39 = vld [vmem:[#allocation118_spill] sm:$0xff] }
 0x296   : > { %19195 = vst [vmem:[#allocation42_spill] sm:$0xff] %v15175_v0  ;;  %6376 = vperm.xlu0 %10801, %v19196_v7   ;;  %v15182_v49 = vsel %vm4598_vm1, %v19197_v55, %v4437_v37  ;;  %v15189_v42 = vpop.permute.xlu0 %6304  ;;  %v5287_v0 = vadd.f32 %v5271_v44, %v19200_v22  ;;  %v5369_v30 = vmul.f32 %v14493_v51, %v14850_v46  ;;  %v19202_v55 = vld [vmem:[#allocation16_spill] sm:$0xff] }
 0x297   : > { %19198 = vst [vmem:[#allocation127_spill] sm:$0xff] %v15182_v49  ;;  %v5355_v37 = vmul.f32 %v14493_v51, %v14868_v61  ;;  %v15199_v14 = vrot.slane %v3942_v25, %v13869_v62  ;;  %v15202_v12 = vrot.slane %v3943_v58, %v13869_v62  ;;  %v15204_v24 = vadd.f32 %v5363_v21, %v5283_v36  ;;  %v19208_v36 = vld [vmem:[#allocation105_spill] sm:$0xff]  ;;  %v19324_v49 = vld [vmem:[#allocation19_spill] sm:$0xff] }
 0x298   : > { %6160 = vperm.xlu1 %10798, %v19202_v55   ;;  %v5357_v44 = vmul.f32 %v14493_v51, %v14906_v27  ;;  %v5275_v2 = vadd.f32 %v19205_v39, %v19204_v10  ;;  %v15212_v46 = vmul.f32 %v14493_v51, %v14875_v40  ;;  %v5358_v61 = vmul.f32 %v14493_v51, %v14942_v53 }
 0x299   : > { %19203 = vst [vmem:[#allocation116_spill] sm:$0xff] %v15202_v12  ;;  %v5360_v25 = vmul.f32 %v14493_v51, %v14980_v50  ;;  %v15219_v58 = vadd.f32 %v5365_v43, %v5285_v23  ;;  %v15223_v27 = vmul.f32 %v14493_v51, %v14916_v6  ;;  %v5278_v21 = vadd.f32 %v19208_v36, %v14853_v5  ;;  %v19211_v43 = vld [vmem:[#allocation20_spill] sm:$0xff]  ;;  %v5393_v6 = vpop.permute.xlu1 %5392 }
 0x29a   : > { %19206 = vst [vmem:[#allocation130_spill] sm:$0xff] %v15212_v46  ;;  %6392 = vperm.xlu0 %10801, %v19139_v47   ;;  %v5362_v40 = vmul.f32 %v14493_v51, %v15016_v34  ;;  %v6313_v22 = vpop.permute.xlu0 %6312  ;;  %v15229_v10 = vadd.f32 %v5367_v4, %v5287_v0  ;;  %v15231_v53 = vadd.f32 %v5369_v30, %v5289_v1  ;;  %v19210_v47 = vld [vmem:[#allocation115_spill] sm:$0xff]  ;;  %v19213_v34 = vld [vmem:[#allocation17_spill] sm:$0xff]  ;;  %v19214_v4 = vld [vmem:[#allocation164_spill] sm:$0xff] }
 0x29b   : > { %19207 = vst [vmem:[#allocation113_spill] sm:$0xff] %v15223_v27  ;;  %v15233_v50 = vadd.f32 %v5355_v37, %v5275_v2  ;;  %v5280_v23 = vadd.f32 %v19210_v47, %v14934_v9  ;;  %v5373_v39 = vadd.f32 %v5357_v44, %v5277_v15  ;;  %v15240_v5 = vmul.f32 %v14493_v51, %v14952_v18  ;;  %v19218_v37 = vld [vmem:[#allocation88_spill] sm:$0xff]  ;;  %v19224_v47 = vld [vmem:[#allocation49_spill] sm:$0xff] }
 0x29c   : > { %6168 = vperm.xlu1 %10798, %v19211_v43   ;;  %v5282_v36 = vadd.f32 %v19213_v34, %v14939_v19  ;;  %v5452_v0 = vmul.f32 %v19214_v4, %v5393_v6  ;;  %v15245_v30 = vadd.f32 %v5358_v61, %v5278_v21  ;;  %v15251_v9 = vmul.f32 %v14493_v51, %v14988_v28  ;;  %v19221_v44 = vld [vmem:[#allocation4_spill] sm:$0xff] }
 0x29d   : > { %19209 = vst [vmem:[#allocation133_spill] sm:$0xff] %v15233_v50  ;;  %19212 = vst [vmem:[#allocation136_spill] sm:$0xff] %v15240_v5  ;;  %v15247_v1 = vadd.f32 %v5360_v25, %v5280_v23  ;;  %v5364_v15 = vmul.f32 %v14493_v51, %v15060_v11  ;;  %v15260_v19 = vmul.f32 %v14493_v51, %v15030_v48  ;;  %v19223_v11 = vld [vmem:[#allocation145_spill] sm:$0xff]  ;;  %v5397_v6 = vpop.permute.xlu1 %5396  ;;  %v19321_v50 = vld [vmem:[#allocation144_spill] sm:$0xff] }
 0x29e   : > { %19215 = vst [vmem:[#allocation55_spill] sm:$0xff] %v15245_v30  ;;  %19217 = vst [vmem:[#allocation58_spill] sm:$0xff] %v15251_v9  ;;  %6404 = vperm.xlu0 %10801, %v19218_v37   ;;  %v15256_v18 = vadd.f32 %v5362_v40, %v5282_v36  ;;  %v5284_v2 = vadd.f32 %v19221_v44, %v14947_v54  ;;  %v5468_v61 = vadd.f32 %v5452_v0, %v15140_v45  ;;  %v6321_v25 = vpop.permute.xlu0 %6320  ;;  %v19225_v23 = vld [vmem:[#allocation21_spill] sm:$0xff] }
 0x29f   : > { %19216 = vst [vmem:[#allocation161_spill] sm:$0xff] %v15247_v1  ;;  %19220 = vst [vmem:[#allocation89_spill] sm:$0xff] %v15260_v19  ;;  %v15267_v28 = vmul.f32 %v14493_v51, %v15071_v20  ;;  %v5286_v21 = vadd.f32 %v19223_v11, %v14960_v26  ;;  %v5366_v40 = vmul.f32 %v14493_v51, %v15094_v17  ;;  %v19227_v26 = vld [vmem:[#allocation124_spill] sm:$0xff]  ;;  %v19229_v17 = vld [vmem:[#allocation109_spill] sm:$0xff] }
 0x2a0   : > { %19219 = vst [vmem:[#allocation163_spill] sm:$0xff] %v15256_v18  ;;  %v5288_v48 = vadd.f32 %v19224_v47, %v15038_v63  ;;  %6176 = vperm.xlu1 %10798, %v19225_v23   ;;  %v5368_v54 = vmul.f32 %v14493_v51, %v15143_v38  ;;  %v6584_v45 = vcombine.high %v5468_v61, %v5468_v61  ;;  %v19228_v63 = vld [vmem:[#allocation168_spill] sm:$0xff]  ;;  %v19275_v5 = vld [vmem:[#allocation65_spill] sm:$0xff] }
 0x2a1   : > { %19222 = vst [vmem:[#allocation106_spill] sm:$0xff] %v15267_v28  ;;  %v6591_v34 = vrot.slane %v5468_v61, %v19003_v33  ;;  %v5453_v20 = vmul.f32 %v19214_v4, %v5397_v6  ;;  %v15280_v36 = vadd.f32 %v5364_v15, %v5284_v2  ;;  %v5290_v0 = vadd.f32 %v19227_v26, %v15112_v52  ;;  %v19294_v19 = vld [vmem:[#allocation5_spill] sm:$0xff] }
 0x2a2   : > { %6416 = vperm.xlu0 %10801, %v19159_v3   ;;  %v19230_v44 = vcombine.low %v19228_v63, %v19229_v17  ;;  %v19231_v38 = vcombine.low %v14751_v29, %v14755_v57  ;;  %v5370_v15 = vmul.f32 %v14493_v51, %v5353_v8  ;;  %v6598_v2 = vrot.slane %v6584_v45, %v19003_v33  ;;  %v19233_v3 = vld [vmem:[#allocation28_spill] sm:$0xff]  ;;  %v19237_v63 = vld [vmem:[#allocation31_spill] sm:$0xff] }
 0x2a3   : > { %19226 = vst [vmem:[#allocation66_spill] sm:$0xff] %v15280_v36  ;;  %v5469_v47 = vadd.f32 %v5453_v20, %v5373_v39  ;;  %v19234_v52 = vcombine.low %v14894_v41, %v19233_v3  ;;  %v15305_v26 = vadd.f32 %v5366_v40, %v5286_v21  ;;  %v15309_v17 = vmul.f32 %v14493_v51, %v19237_v63  ;;  %v5405_v39 = vpop.permute.xlu1 %5404  ;;  %v975_v40 = vpop.permute.xlu0 %974 }
 0x2a4   : > { %v15289_v11 = vrot.slane %v19230_v44, %v14066_v60  ;;  %v15295_v61 = vrot.slane %v19231_v38, %v14066_v60  ;;  %v15313_v29 = vmul.f32 %v14493_v51, %v15151_v56  ;;  %v6599_v57 = vcombine.high %v6591_v34, %v6591_v34 }
 0x2a5   : > { %v15303_v6 = vrot.slane %v19234_v52, %v14066_v60  ;;  %19236 = vst [vmem:[#allocation71_spill] sm:$0xff] %v15305_v26  ;;  %19238 = vst [vmem:[#allocation96_spill] sm:$0xff] %v15309_v17  ;;  %v19240_v8 = vmov 2   ;;  %v15316_v45 = vadd.f32 %v5368_v54, %v5288_v48  ;;  %v6600_v20 = vcombine.high %v6598_v2, %v6598_v2  ;;  %v19244_v52 = vld [vmem:[#allocation90_spill] sm:$0xff] }
 0x2a6   : > { %19232 = vst [vmem:[#allocation64_spill] sm:$0xff] %v15295_v61  ;;  %19239 = vst [vmem:[#allocation101_spill] sm:$0xff] %v15313_v29  ;;  %10800 = vset.pattern.permute.xlu1 %v19240_v8  ;;  %v15319_v41 = vrot.slane %v6591_v34, %v19003_v33  ;;  %v15322_v21 = vrot.slane %v6598_v2, %v19003_v33  ;;  %v6633_v44 = vcombine.high %v5469_v47, %v5469_v47  ;;  %v19258_v17 = vld [vmem:[#allocation86_spill] sm:$0xff] }
 0x2a7   : > { %19235 = vst [vmem:[#allocation111_spill] sm:$0xff] %v15303_v6  ;;  %19241 = vst [vmem:[#allocation149_spill] sm:$0xff] %v15316_v45  ;;  %6232 = vperm.xlu1 %10800, %v19196_v7   ;;  %v6640_v56 = vrot.slane %v5469_v47, %v19003_v33  ;;  %v5455_v38 = vmul.f32 %v19214_v4, %v5405_v39  ;;  %v1042_v3 = vmul.f32 %v19214_v4, %v975_v40  ;;  %v19252_v40 = vld [vmem:[#allocation6_spill] sm:$0xff] }
 0x2a8   : > { %19242 = vst [vmem:[#allocation125_spill] sm:$0xff] %v15319_v41  ;;  %19243 = vst [vmem:[#allocation63_spill] sm:$0xff] %v15322_v21  ;;  %6428 = vperm.xlu0 %10801, %v19244_v52   ;;  %v15329_v48 = vadd.f32 %v5370_v15, %v5290_v0  ;;  %v15333_v54 = vmul.f32 %v14493_v51, %v15189_v42  ;;  %v15336_v34 = vmul.f32 %v14493_v51, %v6313_v22  ;;  %v5413_v0 = vpop.permute.xlu1 %5412  ;;  %v19251_v22 = vld [vmem:[#allocation62_spill] sm:$0xff]  ;;  %v987_v42 = vpop.permute.xlu0 %986 }
 0x2a9   : > { %v15339_v7 = vmul.f32 %v14493_v51, %v6321_v25  ;;  %v15342_v2 = vrot.slane %v6599_v57, %v19003_v33  ;;  %v6647_v47 = vrot.slane %v6633_v44, %v19003_v33  ;;  %v6648_v63 = vcombine.high %v6640_v56, %v6640_v56  ;;  %v19299_v45 = vld [vmem:[#allocation78_spill] sm:$0xff] }
 0x2aa   : > { %19245 = vst [vmem:[#allocation110_spill] sm:$0xff] %v15329_v48  ;;  %19246 = vst [vmem:[#allocation120_spill] sm:$0xff] %v15333_v54  ;;  %v5471_v8 = vadd.f32 %v5455_v38, %v15153_v59  ;;  %v15347_v15 = vrot.slane %v6600_v20, %v19003_v33  ;;  %v1058_v39 = vadd.f32 %v1042_v3, %v19251_v22  ;;  %v19330_v61 = vld [vmem:[#allocation94_spill] sm:$0xff] }
 0x2ab   : > { %19247 = vst [vmem:[#allocation158_spill] sm:$0xff] %v15336_v34  ;;  %19248 = vst [vmem:[#allocation77_spill] sm:$0xff] %v15339_v7  ;;  %6240 = vperm.xlu1 %10800, %v19252_v40   ;;  %v5457_v51 = vmul.f32 %v19214_v4, %v5413_v0  ;;  %v6649_v57 = vcombine.high %v6647_v47, %v6647_v47  ;;  %v15357_v44 = vrot.slane %v6640_v56, %v19003_v33  ;;  %v19278_v7 = vld [vmem:[#allocation3_spill] sm:$0xff] }
 0x2ac   : > { %19249 = vst [vmem:[#allocation134_spill] sm:$0xff] %v15342_v2  ;;  %19250 = vst [vmem:[#allocation132_spill] sm:$0xff] %v15347_v15  ;;  %v15360_v59 = vrot.slane %v6647_v47, %v19003_v33  ;;  %6440 = vperm.xlu0 %10801, %v19193_v32   ;;  %v6731_v20 = vcombine.high %v5471_v8, %v5471_v8  ;;  %v6738_v38 = vrot.slane %v5471_v8, %v19003_v33 }
 0x2ad   : > { %19253 = vst [vmem:[#allocation23_spill] sm:$0xff] %v15357_v44  ;;  %v2126_v3 = vcombine.high %v1058_v39, %v1058_v39  ;;  %v2133_v22 = vrot.slane %v1058_v39, %v19003_v33  ;;  %v15368_v25 = vrot.slane %v6648_v63, %v19003_v33  ;;  %v15371_v56 = vrot.slane %v6649_v57, %v19003_v33  ;;  %v19262_v63 = vld [vmem:[#allocation83_spill] sm:$0xff] }
 0x2ae   : > { %19254 = vst [vmem:[#allocation137_spill] sm:$0xff] %v15360_v59  ;;  %v5473_v47 = vadd.f32 %v5457_v51, %v15155_v13  ;;  %v6745_v32 = vrot.slane %v6731_v20, %v19003_v33  ;;  %v6746_v34 = vcombine.high %v6738_v38, %v6738_v38  ;;  %v15376_v8 = vrot.slane %v6738_v38, %v19003_v33  ;;  %v19259_v13 = vld [vmem:[#allocation100_spill] sm:$0xff]  ;;  %v5421_v59 = vpop.permute.xlu1 %5420 }
 0x2af   : > { %19255 = vst [vmem:[#allocation131_spill] sm:$0xff] %v15368_v25  ;;  %19256 = vst [vmem:[#allocation32_spill] sm:$0xff] %v15371_v56  ;;  %v2140_v39 = vrot.slane %v2126_v3, %v19003_v33  ;;  %6244 = vperm.xlu1 %10800, %v19258_v17   ;;  %v2141_v0 = vcombine.high %v2133_v22, %v2133_v22  ;;  %v15383_v57 = vrot.slane %v2133_v22, %v19003_v33 }
 0x2b0   : > { %19257 = vst [vmem:[#allocation99_spill] sm:$0xff] %v15376_v8  ;;  %v6829_v9 = vcombine.high %v5473_v47, %v5473_v47  ;;  %6452 = vperm.xlu0 %10801, %v19259_v13   ;;  %v6747_v38 = vcombine.high %v6745_v32, %v6745_v32  ;;  %v15391_v3 = vrot.slane %v6745_v32, %v19003_v33  ;;  %v995_v8 = vpop.permute.xlu0 %994 }
 0x2b1   : > { %v15398_v54 = vrot.slane %v6746_v34, %v19003_v33  ;;  %v2142_v15 = vcombine.high %v2140_v39, %v2140_v39  ;;  %v15403_v44 = vrot.slane %v2140_v39, %v19003_v33  ;;  %v15406_v20 = vrot.slane %v2141_v0, %v19003_v33 }
 0x2b2   : > { %19260 = vst [vmem:[#allocation82_spill] sm:$0xff] %v15391_v3  ;;  %v6836_v32 = vrot.slane %v5473_v47, %v19003_v33  ;;  %v15411_v22 = vrot.slane %v6747_v38, %v19003_v33  ;;  %v6843_v39 = vrot.slane %v6829_v9, %v19003_v33  ;;  %v1045_v38 = vmul.f32 %v19214_v4, %v987_v42  ;;  %v15433_v9 = vld [vmem:[%s17857_s3 + $0x3] ss:$0 sm:$0xff] }
 0x2b3   : > { %19261 = vst [vmem:[#allocation117_spill] sm:$0xff] %v15398_v54  ;;  %6252 = vperm.xlu1 %10800, %v19262_v63   ;;  %v15414_v34 = vrot.slane %v2142_v15, %v19003_v33  ;;  %v19266_v4 = vld [vmem:[#allocation70_spill] sm:$0xff]  ;;  %v1047_v15 = vmul.f32 %v15433_v9, %v995_v8  ;;  %v19276_v46 = vrot.slane %v19275_v5, %v13869_v62  ;;  %v19281_v5 = vld [vmem:[#allocation91_spill] sm:$0xff] }
 0x2b4   : > { %19263 = vst [vmem:[#allocation139_spill] sm:$0xff] %v15411_v22  ;;  %6464 = vperm.xlu0 %10801, %v19225_v23   ;;  %v6844_v47 = vcombine.high %v6836_v32, %v6836_v32  ;;  %v15423_v25 = vrot.slane %v6836_v32, %v19003_v33  ;;  %v6845_v21 = vcombine.high %v6843_v39, %v6843_v39  ;;  %v19277_v22 = vld [vmem:[#allocation18_spill] sm:$0xff] }
 0x2b5   : > { %v2174_v51 = vcombine.high %v15414_v34, %v15414_v34  ;;  %v5459_v23 = vmul.f32 %v15433_v9, %v5421_v59  ;;  %v15439_v0 = vrot.slane %v6843_v39, %v19003_v33  ;;  %v1061_v42 = vadd.f32 %v1045_v38, %v19266_v4  ;;  %v19269_v4 = vld [vmem:[#allocation159_spill] sm:$0xff] }
 0x2b6   : > { %19264 = vst [vmem:[#allocation87_spill] sm:$0xff] %v15423_v25  ;;  %v15447_v54 = vrot.slane %v6844_v47, %v19003_v33  ;;  %v15450_v59 = vrot.slane %v6845_v21, %v19003_v33  ;;  %v19270_v47 = vrot.slane %v19269_v4, %v13869_v62 }
 0x2b7   : > { %19265 = vst [vmem:[#allocation26_spill] sm:$0xff] %v15439_v0  ;;  %6260 = vperm.xlu1 %10800, %v19218_v37   ;;  %v5475_v32 = vadd.f32 %v5459_v23, %v15204_v24  ;;  %v2273_v37 = vcombine.high %v1061_v42, %v1061_v42  ;;  %v2280_v38 = vrot.slane %v1061_v42, %v19003_v33  ;;  %v19271_v23 = vld [vmem:[#allocation61_spill] sm:$0xff]  ;;  %v19272_v42 = vld [vmem:[#allocation98_spill] sm:$0xff]  ;;  %v5429_v0 = vpop.permute.xlu1 %5428 }
 0x2b8   : > { %19267 = vst [vmem:[#allocation141_spill] sm:$0xff] %v15447_v54  ;;  %19268 = vst [vmem:[#allocation50_spill] sm:$0xff] %v15450_v59  ;;  %6396 = vperm.xlu0 %10801, %v19262_v63   ;;  %v15463_v3 = vsel %vm4598_vm1, %v2174_v51, %v19270_v47  ;;  %v1063_v63 = vadd.f32 %v1047_v15, %v19271_v23  ;;  %v19273_v15 = vld [vmem:[#allocation92_spill] sm:$0xff]  ;;  %v5461_v59 = vmul.f32 %v15433_v9, %v5429_v0 }
 0x2b9   : > { %v6927_v21 = vcombine.high %v5475_v32, %v5475_v32  ;;  %v6934_v24 = vrot.slane %v5475_v32, %v19003_v33  ;;  %v2287_v2 = vrot.slane %v2273_v37, %v19003_v33  ;;  %v2288_v8 = vcombine.high %v2280_v38, %v2280_v38 }
 0x2ba   : > { %v2296_v25 = vrot.slane %v2280_v38, %v19003_v33  ;;  %v2371_v4 = vcombine.high %v1063_v63, %v1063_v63  ;;  %v2378_v51 = vrot.slane %v1063_v63, %v19003_v33 }
 0x2bb   : > { %6268 = vperm.xlu1 %10800, %v19272_v42   ;;  %v6941_v32 = vrot.slane %v6927_v21, %v19003_v33  ;;  %v6942_v47 = vcombine.high %v6934_v24, %v6934_v24  ;;  %v2289_v23 = vcombine.high %v2287_v2, %v2287_v2  ;;  %v15479_v39 = vrot.slane %v2287_v2, %v19003_v33 }
 0x2bc   : > { %6420 = vperm.xlu0 %10801, %v19273_v15   ;;  %v2310_v37 = vrot.slane %v2288_v8, %v19003_v33  ;;  %v2318_v38 = vcombine.high %v2296_v25, %v2296_v25  ;;  %v15483_v28 = vrot.slane %v6934_v24, %v19003_v33  ;;  %v4623_v2 = vsel %vm4598_vm1, %v2296_v25, %v19276_v46  ;;  %v19282_v46 = vld [vmem:[#allocation38_spill] sm:$0xff] }
 0x2bd   : > { %v6943_v41 = vcombine.high %v6941_v32, %v6941_v32  ;;  %v15487_v21 = vrot.slane %v2289_v23, %v19003_v33  ;;  %v19279_v24 = vrot.slane %v19278_v7, %v13869_v62  ;;  %v15502_v23 = vrot.slane %v6941_v32, %v19003_v33  ;;  %v19285_v7 = vld [vmem:[#allocation129_spill] sm:$0xff] }
 0x2be   : > { %19274 = vst [vmem:[#allocation16_spill] sm:$0xff] %v15483_v28  ;;  %v2320_v54 = vcombine.high %v2310_v37, %v2310_v37  ;;  %v4624_v8 = vsel %vm4598_vm1, %v2310_v37, %v19277_v22  ;;  %v4625_v25 = vsel %vm4598_vm1, %v2318_v38, %v19282_v46  ;;  %v19283_v22 = vld [vmem:[#allocation30_spill] sm:$0xff]  ;;  %v1003_v38 = vpop.permute.xlu0 %1002 }
 0x2bf   : > { %6276 = vperm.xlu1 %10800, %v19273_v15   ;;  %v4627_v63 = vsel %vm4598_vm1, %v15479_v39, %v19279_v24  ;;  %v9561_v29 = vcombine.low %v4623_v2, %v4624_v8  ;;  %19280 = vst [vmem:[#allocation93_spill] sm:$0xff] %v15502_v23  ;;  %v19284_v15 = vrot.slane %v19283_v22, %v13869_v62 }
 0x2c0   : > { %6444 = vperm.xlu0 %10801, %v19281_v5   ;;  %v4628_v24 = vsel %vm4598_vm1, %v15487_v21, %v19285_v7  ;;  %v15516_v2 = vrot.slane %v6942_v47, %v19003_v33  ;;  %v15521_v56 = vrot.slane %v6943_v41, %v19003_v33  ;;  %v2385_v22 = vrot.slane %v2371_v4, %v19003_v33 }
 0x2c1   : > { %v4626_v37 = vsel %vm4598_vm1, %v2320_v54, %v19284_v15  ;;  %v9578_v8 = vcombine.low %v4627_v63, %v4628_v24  ;;  %v2386_v15 = vcombine.high %v2378_v51, %v2378_v51  ;;  %v9569_v47 = vrot.slane %v9561_v29, %v14066_v60  ;;  %v5437_v29 = vpop.permute.xlu1 %5436 }
 0x2c2   : > { %19286 = vst [vmem:[#allocation118_spill] sm:$0xff] %v15516_v2  ;;  %v9562_v32 = vcombine.low %v4625_v25, %v4626_v37  ;;  %19287 = vst [vmem:[#allocation105_spill] sm:$0xff] %v15521_v56  ;;  %v5477_v63 = vadd.f32 %v5461_v59, %v15219_v58  ;;  %v19288_v37 = vld [vmem:[#allocation104_spill] sm:$0xff]  ;;  %v2387_v7 = vcombine.high %v2385_v22, %v2385_v22  ;;  %v1011_v59 = vpop.permute.xlu0 %1010 }
 0x2c3   : > { %6284 = vperm.xlu1 %10800, %v19244_v52   ;;  %v15536_v24 = vrot.slane %v2378_v51, %v19003_v33  ;;  %v15539_v4 = vrot.slane %v2385_v22, %v19003_v33  ;;  %v1049_v52 = vmul.f32 %v15433_v9, %v1003_v38  ;;  %v19289_v22 = vld [vmem:[#allocation74_spill] sm:$0xff]  ;;  %v15563_v51 = vrot.slane %v9578_v8, %v14066_v60 }
 0x2c4   : > { %v9576_v25 = vrot.slane %v9562_v32, %v14066_v60  ;;  %6468 = vperm.xlu0 %10801, %v19288_v37   ;;  %v15543_v32 = vrot.slane %v2386_v15, %v19003_v33  ;;  %v7025_v41 = vcombine.high %v5477_v63, %v5477_v63  ;;  %v7032_v58 = vrot.slane %v5477_v63, %v19003_v33  ;;  %v19290_v38 = vld [vmem:[#allocation102_spill] sm:$0xff] }
 0x2c5   : > { %v15551_v46 = vrot.slane %v2387_v7, %v19003_v33  ;;  %v1065_v0 = vadd.f32 %v1049_v52, %v19289_v22  ;;  %v5463_v63 = vmul.f32 %v15433_v9, %v5437_v29  ;;  %v1051_v7 = vmul.f32 %v15433_v9, %v1011_v59 }
 0x2c6   : > { %v9577_v54 = vcombine.low %v9569_v47, %v9576_v25  ;;  %v7039_v15 = vrot.slane %v7025_v41, %v19003_v33  ;;  %v7040_v47 = vcombine.high %v7032_v58, %v7032_v58  ;;  %v15559_v25 = vrot.slane %v7032_v58, %v19003_v33 }
 0x2c7   : > { %6292 = vperm.xlu1 %10800, %v19290_v38   ;;  %v2469_v52 = vcombine.high %v1065_v0, %v1065_v0  ;;  %v2476_v22 = vrot.slane %v1065_v0, %v19003_v33  ;;  %v2419_v58 = vcombine.high %v15551_v46, %v15551_v46  ;;  %v5479_v2 = vadd.f32 %v5463_v63, %v15229_v10  ;;  %v5445_v10 = vpop.permute.xlu1 %5444  ;;  %v1019_v63 = vpop.permute.xlu0 %1018 }
 0x2c8   : > { %10554 = vst.msk [vmem:[%s14466_s28 + $0x50] sm:$0xff] %vm10543_vm2, %v9577_v54  ;;  %19291 = vst [vmem:[#allocation115_spill] sm:$0xff] %v15559_v25  ;;  %v7041_v29 = vcombine.high %v7039_v15, %v7039_v15  ;;  %v15579_v0 = vrot.slane %v7039_v15, %v19003_v33  ;;  %v15582_v54 = vrot.slane %v7040_v47, %v19003_v33 }
 0x2c9   : > { %v2483_v23 = vrot.slane %v2469_v52, %v19003_v33  ;;  %v2484_v8 = vcombine.high %v2476_v22, %v2476_v22  ;;  %v2492_v28 = vrot.slane %v2476_v22, %v19003_v33  ;;  %v7123_v27 = vcombine.high %v5479_v2, %v5479_v2 }
 0x2ca   : > { %19292 = vst [vmem:[#allocation20_spill] sm:$0xff] %v15579_v0  ;;  %19293 = vst [vmem:[#allocation17_spill] sm:$0xff] %v15582_v54  ;;  %v15598_v47 = vrot.slane %v7041_v29, %v19003_v33  ;;  %v7130_v41 = vrot.slane %v5479_v2, %v19003_v33  ;;  %v19300_v2 = vld [vmem:[#allocation36_spill] sm:$0xff] }
 0x2cb   : > { %6300 = vperm.xlu1 %10800, %v19281_v5   ;;  %v2485_v56 = vcombine.high %v2483_v23, %v2483_v23  ;;  %v15588_v52 = vrot.slane %v2483_v23, %v19003_v33  ;;  %v2506_v22 = vrot.slane %v2484_v8, %v19003_v33  ;;  %v2514_v59 = vcombine.high %v2492_v28, %v2492_v28  ;;  %v19297_v8 = vld [vmem:[#allocation72_spill] sm:$0xff] }
 0x2cc   : > { %v19295_v5 = vrot.slane %v19294_v19, %v13869_v62  ;;  %19296 = vst [vmem:[#allocation164_spill] sm:$0xff] %v15598_v47  ;;  %v19298_v48 = vrot.slane %v19297_v8, %v13869_v62  ;;  %v7137_v36 = vrot.slane %v7123_v27, %v19003_v33  ;;  %v19302_v8 = vld [vmem:[#allocation9_spill] sm:$0xff]  ;;  %v7138_v0 = vcombine.high %v7130_v41, %v7130_v41 }
 0x2cd   : > { %v15602_v23 = vrot.slane %v2485_v56, %v19003_v33  ;;  %v2516_v25 = vcombine.high %v2506_v22, %v2506_v22 }
 0x2ce   : > { %v15595_v15 = vsel %vm4598_vm1, %v2419_v58, %v19295_v5  ;;  %v4655_v19 = vsel %vm4598_vm1, %v2492_v28, %v19298_v48  ;;  %v4656_v58 = vsel %vm4598_vm1, %v2506_v22, %v19299_v45  ;;  %v19301_v5 = vrot.slane %v19300_v2, %v13869_v62  ;;  %v19303_v48 = vld [vmem:[#allocation7_spill] sm:$0xff]  ;;  %v19305_v22 = vld [vmem:[#allocation81_spill] sm:$0xff]  ;;  %v5922_v2 = vpop.permute.xlu1 %5921 }
 0x2cf   : > { %6308 = vperm.xlu1 %10800, %v19259_v13   ;;  %v9833_v26 = vcombine.low %v4655_v19, %v4656_v58  ;;  %v4657_v28 = vsel %vm4598_vm1, %v2514_v59, %v19302_v8  ;;  %v19304_v45 = vrot.slane %v19303_v48, %v13869_v62  ;;  %v4660_v29 = vsel %vm4598_vm1, %v15602_v23, %v19305_v22 }
 0x2d0   : > { %v4659_v56 = vsel %vm4598_vm1, %v15588_v52, %v19301_v5  ;;  %v7139_v58 = vcombine.high %v7137_v36, %v7137_v36  ;;  %v15635_v8 = vrot.slane %v7130_v41, %v19003_v33  ;;  %v15648_v41 = vrot.slane %v7137_v36, %v19003_v33 }
 0x2d1   : > { %v4658_v13 = vsel %vm4598_vm1, %v2516_v25, %v19304_v45  ;;  %v9850_v19 = vcombine.low %v4659_v56, %v4660_v29  ;;  %v19307_v25 = vld [vmem:[#allocation79_spill] sm:$0xff]  ;;  %v5465_v56 = vmul.f32 %v15433_v9, %v5445_v10  ;;  %v1053_v36 = vmul.f32 %v15433_v9, %v1019_v63 }
 0x2d2   : > { %v9834_v5 = vcombine.low %v4657_v28, %v4658_v13  ;;  %19306 = vst [vmem:[#allocation88_spill] sm:$0xff] %v15635_v8  ;;  %v1067_v48 = vadd.f32 %v1051_v7, %v19307_v25  ;;  %v19308_v45 = vld [vmem:[#allocation95_spill] sm:$0xff]  ;;  %v9841_v28 = vrot.slane %v9833_v26, %v14066_v60  ;;  %v1027_v13 = vpop.permute.xlu0 %1026  ;;  %19309 = vst [vmem:[#allocation4_spill] sm:$0xff] %v15648_v41 }
 0x2d3   : > { %6316 = vperm.xlu1 %10800, %v19308_v45   ;;  %v15645_v27 = vrot.slane %v9850_v19, %v14066_v60  ;;  %v15651_v7 = vrot.slane %v7138_v0, %v19003_v33  ;;  %v15654_v26 = vrot.slane %v7139_v58, %v19003_v33  ;;  %v5481_v10 = vadd.f32 %v5465_v56, %v15231_v53  ;;  %v19312_v63 = vld [vmem:[#allocation67_spill] sm:$0xff] }
 0x2d4   : > { %v9848_v29 = vrot.slane %v9834_v5, %v14066_v60  ;;  %v2567_v25 = vcombine.high %v1067_v48, %v1067_v48  ;;  %v2574_v5 = vrot.slane %v1067_v48, %v19003_v33  ;;  %v1055_v54 = vmul.f32 %v15433_v9, %v1027_v13 }
 0x2d5   : > { %19310 = vst [vmem:[#allocation145_spill] sm:$0xff] %v15651_v7  ;;  %19311 = vst [vmem:[#allocation49_spill] sm:$0xff] %v15654_v26  ;;  %v7221_v48 = vcombine.high %v5481_v10, %v5481_v10  ;;  %v7228_v53 = vrot.slane %v5481_v10, %v19003_v33  ;;  %v1069_v13 = vadd.f32 %v1053_v36, %v19312_v63  ;;  %v15683_v10 = vpop.permute.xlu1 %5931  ;;  %v19316_v63 = vmov 3  }
 0x2d6   : > { %v9849_v22 = vcombine.low %v9841_v28, %v9848_v29  ;;  %v2581_v19 = vrot.slane %v2567_v25, %v19003_v33  ;;  %v2582_v0 = vcombine.high %v2574_v5, %v2574_v5  ;;  %v15667_v58 = vrot.slane %v2574_v5, %v19003_v33  ;;  %v19313_v5 = vld [vmem:[#allocation80_spill] sm:$0xff]  ;;  %v15681_v8 = vpop.permute.xlu0 %1034  ;;  %v15701_v28 = vld [vmem:[%s17857_s3] ss:$0 sm:$0xff] }
 0x2d7   : > { %6324 = vperm.xlu1 %10800, %v19288_v37   ;;  %v7236_v25 = vcombine.high %v7228_v53, %v7228_v53  ;;  %v1071_v59 = vadd.f32 %v1055_v54, %v19313_v5  ;;  %v15691_v36 = vrot.slane %v7228_v53, %v19003_v33  ;;  %v19317_v53 = vld [vmem:[#allocation85_spill] sm:$0xff] }
 0x2d8   : > { %10570 = vst.msk [vmem:[%s14466_s28 + $0xd0] sm:$0xff] %vm10543_vm2, %v9849_v22  ;;  %v2583_v29 = vcombine.high %v2581_v19, %v2581_v19  ;;  %v15673_v56 = vrot.slane %v2581_v19, %v19003_v33  ;;  %v15677_v37 = vrot.slane %v2582_v0, %v19003_v33  ;;  %v7235_v22 = vrot.slane %v7221_v48, %v19003_v33 }
 0x2d9   : > { %19315 = vst [vmem:[#allocation124_spill] sm:$0xff] %v15691_v36  ;;  %v2665_v0 = vcombine.high %v1069_v13, %v1069_v13  ;;  %v2672_v48 = vrot.slane %v1069_v13, %v19003_v33  ;;  %v2770_v7 = vrot.slane %v1071_v59, %v19003_v33  ;;  %v5937_v30 = vpop.permute.xlu1 %5936 }
 0x2da   : > { %v15688_v19 = vrot.slane %v2583_v29, %v19003_v33  ;;  %v7237_v5 = vcombine.high %v7235_v22, %v7235_v22  ;;  %v15704_v29 = vmul.f32 %v15701_v28, %v5922_v2  ;;  %v15710_v41 = vrot.slane %v7235_v22, %v19003_v33 }
 0x2db   : > { %10802 = vset.pattern.permute.xlu1 %v19316_v63  ;;  %v2679_v54 = vrot.slane %v2665_v0, %v19003_v33  ;;  %v15719_v2 = vrot.slane %v7236_v25, %v19003_v33  ;;  %v2680_v47 = vcombine.high %v2672_v48, %v2672_v48  ;;  %v2688_v18 = vrot.slane %v2672_v48, %v19003_v33  ;;  %v1968_v25 = vpop.permute.xlu0 %1967 }
 0x2dc   : > { %19314 = vst [vmem:[#allocation21_spill] sm:$0xff] %v15688_v19  ;;  %6380 = vperm.xlu1 %10802, %v19317_v53   ;;  %19318 = vst [vmem:[#allocation168_spill] sm:$0xff] %v15710_v41  ;;  %v2615_v26 = vcombine.high %v15688_v19, %v15688_v19  ;;  %v2763_v53 = vcombine.high %v1071_v59, %v1071_v59  ;;  %v15725_v13 = vrot.slane %v7237_v5, %v19003_v33 }
 0x2dd   : > { %19319 = vst [vmem:[#allocation109_spill] sm:$0xff] %v15719_v2  ;;  %v2681_v22 = vcombine.high %v2679_v54, %v2679_v54  ;;  %v15728_v0 = vrot.slane %v2679_v54, %v19003_v33  ;;  %v2702_v36 = vrot.slane %v2680_v47, %v19003_v33  ;;  %v2710_v5 = vcombine.high %v2688_v18, %v2688_v18 }
 0x2de   : > { %19320 = vst [vmem:[#allocation28_spill] sm:$0xff] %v15725_v13  ;;  %v2777_v1 = vrot.slane %v2763_v53, %v19003_v33  ;;  %v19322_v54 = vrot.slane %v19321_v50, %v13869_v62  ;;  %v19328_v50 = vld [vmem:[#allocation119_spill] sm:$0xff] }
 0x2df   : > { %v15737_v48 = vrot.slane %v2681_v22, %v19003_v33  ;;  %v2712_v41 = vcombine.high %v2702_v36, %v2702_v36  ;;  %v19326_v22 = vld [vmem:[#allocation11_spill] sm:$0xff] }
 0x2e0   : > { %6388 = vperm.xlu1 %10802, %v19258_v17   ;;  %v15743_v59 = vsel %vm4598_vm1, %v2615_v26, %v19322_v54  ;;  %v19325_v17 = vrot.slane %v19324_v49, %v13869_v62  ;;  %v2779_v47 = vcombine.high %v2777_v1, %v2777_v1  ;;  %v19327_v6 = vrot.slane %v19326_v22, %v13869_v62  ;;  %v19331_v22 = vld [vmem:[#allocation14_spill] sm:$0xff] }
 0x2e1   : > { %19323 = vst [vmem:[#allocation31_spill] sm:$0xff] %v15743_v59  ;;  %v4688_v26 = vsel %vm4598_vm1, %v2702_v36, %v19328_v50  ;;  %v2778_v54 = vcombine.high %v2770_v7, %v2770_v7  ;;  %v19329_v59 = vld [vmem:[#allocation48_spill] sm:$0xff]  ;;  %v15762_v49 = vrot.slane %v2770_v7, %v19003_v33 }
 0x2e2   : > { %v4691_v63 = vsel %vm4598_vm1, %v15728_v0, %v19325_v17  ;;  %v4687_v12 = vsel %vm4598_vm1, %v2688_v18, %v19327_v6  ;;  %v4692_v53 = vsel %vm4598_vm1, %v15737_v48, %v19329_v59  ;;  %v15765_v17 = vrot.slane %v2777_v1, %v19003_v33  ;;  %v19332_v6 = vld [vmem:[#allocation29_spill] sm:$0xff] }
 0x2e3   : > { %v10105_v2 = vcombine.low %v4687_v12, %v4688_v26  ;;  %v4689_v18 = vsel %vm4598_vm1, %v2710_v5, %v19331_v22  ;;  %v19333_v36 = vrot.slane %v19332_v6, %v13869_v62  ;;  %v10122_v19 = vcombine.low %v4691_v63, %v4692_v53  ;;  %v1980_v5 = vpop.permute.xlu0 %1979  ;;  %v5947_v26 = vpop.permute.xlu1 %5946  ;;  %v19334_v63 = vld [vmem:[#allocation76_spill] sm:$0xff] }
 0x2e4   : > { %6400 = vperm.xlu1 %10802, %v19330_v61   ;;  %v15775_v59 = vrot.slane %v2779_v47, %v19003_v33  ;;  %v19335_v61 = vld [vmem:[#allocation123_spill] sm:$0xff] }
 0x2e5   : > { %v4690_v50 = vsel %vm4598_vm1, %v2712_v41, %v19333_v36  ;;  %v10113_v22 = vrot.slane %v10105_v2, %v14066_v60  ;;  %v15785_v41 = vrot.slane %v2778_v54, %v19003_v33  ;;  %v2062_v2 = vmul.f32 %v15433_v9, %v1968_v25  ;;  %v19337_v25 = vld [vmem:[#allocation8_spill] sm:$0xff] }
 0x2e6   : > { %v10106_v7 = vcombine.low %v4689_v18, %v4690_v50  ;;  %v2811_v6 = vcombine.high %v15775_v59, %v15775_v59  ;;  %v1057_v18 = vmul.f32 %v15433_v9, %v15681_v8  ;;  %v6041_v54 = vmul.f32 %v15701_v28, %v15683_v10  ;;  %v15813_v10 = vld [vmem:[%s17858_s4] ss:$0 sm:$0xff] }
 0x2e7   : > { %v6042_v36 = vmul.f32 %v15701_v28, %v5937_v30  ;;  %v2065_v50 = vmul.f32 %v15433_v9, %v1980_v5  ;;  %v15804_v53 = vrot.slane %v10122_v19, %v14066_v60  ;;  %v2086_v1 = vadd.f32 %v2062_v2, %v19335_v61  ;;  %v19338_v19 = vld [vmem:[#allocation135_spill] sm:$0xff] }
 0x2e8   : > { %v10120_v47 = vrot.slane %v10106_v7, %v14066_v60  ;;  %6412 = vperm.xlu1 %10802, %v19272_v42   ;;  %v6044_v7 = vmul.f32 %v15701_v28, %v5947_v26  ;;  %v1073_v8 = vadd.f32 %v1057_v18, %v19334_v63  ;;  %v15817_v30 = vadd.f32 %v15813_v10, %v15704_v29  ;;  %v19340_v2 = vld [vmem:[#allocation107_spill] sm:$0xff] }
 0x2e9   : > { %v2089_v5 = vadd.f32 %v2065_v50, %v19337_v25  ;;  %v19339_v26 = vcombine.high %v15479_v39, %v15479_v39  ;;  %v3069_v18 = vrot.slane %v2086_v1, %v19003_v33  ;;  %v19341_v29 = vrot.slane %v15115_v31, %v13869_v62  ;;  %v1988_v31 = vpop.permute.xlu0 %1987 }
 0x2ea   : > { %v10121_v12 = vcombine.low %v10113_v22, %v10120_v47  ;;  %19336 = vst [vmem:[#allocation90_spill] sm:$0xff] %v15817_v30  ;;  %v2861_v22 = vcombine.high %v1073_v8, %v1073_v8  ;;  %v2868_v63 = vrot.slane %v1073_v8, %v19003_v33  ;;  %v3062_v47 = vcombine.high %v2086_v1, %v2086_v1 }
 0x2eb   : > { %v15825_v61 = vsel %vm4598_vm1, %v19339_v26, %v19338_v19  ;;  %v15836_v50 = vsel %vm4598_vm1, %v2811_v6, %v19341_v29  ;;  %v15839_v39 = vadd.f32 %v15813_v10, %v6041_v54  ;;  %v15842_v25 = vadd.f32 %v15813_v10, %v6042_v36 }
 0x2ec   : > { %10586 = vst.msk [vmem:[%s14466_s28 + $0x150] sm:$0xff] %vm10543_vm2, %v10121_v12  ;;  %6424 = vperm.xlu1 %10802, %v19340_v2   ;;  %19342 = vst [vmem:[#allocation62_spill] sm:$0xff] %v15836_v50  ;;  %v15845_v12 = vadd.f32 %v15813_v10, %v6044_v7  ;;  %v2875_v8 = vrot.slane %v2861_v22, %v19003_v33  ;;  %v2876_v1 = vcombine.high %v2868_v63, %v2868_v63 }
 0x2ed   : > { %19343 = vst [vmem:[#allocation6_spill] sm:$0xff] %v15839_v39  ;;  %19344 = vst [vmem:[#allocation86_spill] sm:$0xff] %v15842_v25  ;;  %v2884_v19 = vrot.slane %v2868_v63, %v19003_v33  ;;  %v3076_v26 = vrot.slane %v3062_v47, %v19003_v33  ;;  %v3077_v2 = vcombine.high %v3069_v18, %v3069_v18  ;;  %v15871_v25 = vpop.permute.xlu1 %5956  ;;  %v19351_v39 = vld [vmem:[#allocation42_spill] sm:$0xff] }
 0x2ee   : > { %19345 = vst [vmem:[#allocation100_spill] sm:$0xff] %v15845_v12  ;;  %v3085_v6 = vrot.slane %v3069_v18, %v19003_v33  ;;  %v3174_v29 = vcombine.high %v2089_v5, %v2089_v5  ;;  %v3181_v54 = vrot.slane %v2089_v5, %v19003_v33  ;;  %v2877_v42 = vcombine.high %v2875_v8, %v2875_v8 }
 0x2ef   : > { %v15853_v36 = vrot.slane %v2875_v8, %v19003_v33  ;;  %v2898_v7 = vrot.slane %v2876_v1, %v19003_v33  ;;  %v2906_v13 = vcombine.high %v2884_v19, %v2884_v19  ;;  %v19346_v22 = vrot.slane %v15131_v16, %v13869_v62  ;;  %v19347_v16 = vld [vmem:[#allocation46_spill] sm:$0xff] }
 0x2f0   : > { %6436 = vperm.xlu1 %10802, %v19290_v38   ;;  %v3078_v47 = vcombine.high %v3076_v26, %v3076_v26  ;;  %v3092_v18 = vrot.slane %v3076_v26, %v19003_v33  ;;  %v15863_v12 = vmul.f32 %v15433_v9, %v1988_v31  ;;  %v15866_v5 = vrot.slane %v2877_v42, %v19003_v33 }
 0x2f1   : > { %v4719_v63 = vsel %vm4598_vm1, %v2884_v19, %v19346_v22  ;;  %v2908_v8 = vcombine.high %v2898_v7, %v2898_v7  ;;  %v4720_v1 = vsel %vm4598_vm1, %v2898_v7, %v15170_v35  ;;  %v3099_v38 = vrot.slane %v3077_v2, %v19003_v33  ;;  %v19349_v35 = vld [vmem:[#allocation148_spill] sm:$0xff]  ;;  %v15907_v50 = vpop.permute.xlu1 %5966 }
 0x2f2   : > { %v19348_v19 = vrot.slane %v19347_v16, %v13869_v62  ;;  %v10377_v31 = vcombine.low %v4719_v63, %v4720_v1  ;;  %v3106_v22 = vrot.slane %v3078_v47, %v19003_v33  ;;  %v3188_v42 = vrot.slane %v3174_v29, %v19003_v33 }
 0x2f3   : > { %v4721_v30 = vsel %vm4598_vm1, %v2906_v13, %v15199_v14  ;;  %v19350_v2 = vrot.slane %v19349_v35, %v13869_v62  ;;  %v15891_v16 = vsel %vm4598_vm1, %v15866_v5, %v19351_v39  ;;  %v3108_v47 = vcombine.high %v3092_v18, %v3092_v18 }
 0x2f4   : > { %v15878_v26 = vsel %vm4598_vm1, %v15853_v36, %v19348_v19  ;;  %v3107_v19 = vcombine.high %v3085_v6, %v3085_v6  ;;  %6448 = vperm.xlu1 %10802, %v19202_v55   ;;  %v3189_v1 = vcombine.high %v3181_v54, %v3181_v54  ;;  %v3109_v14 = vcombine.high %v3099_v38, %v3099_v38 }
 0x2f5   : > { %v4722_v7 = vsel %vm4598_vm1, %v2908_v8, %v19350_v2  ;;  %v3110_v13 = vcombine.high %v3106_v22, %v3106_v22  ;;  %v3961_v35 = vrot.slane %v3099_v38, %v13869_v62  ;;  %v10385_v2 = vrot.slane %v10377_v31, %v14066_v60 }
 0x2f6   : > { %v10378_v63 = vcombine.low %v4721_v30, %v4722_v7  ;;  %v3965_v8 = vrot.slane %v3107_v19, %v13869_v62  ;;  %v3973_v6 = vrot.slane %v3092_v18, %v13869_v62  ;;  %v3977_v55 = vrot.slane %v3106_v22, %v13869_v62 }
 0x2f7   : > { %v3969_v30 = vrot.slane %v3109_v14, %v13869_v62  ;;  %v3981_v7 = vrot.slane %v3108_v47, %v13869_v62  ;;  %v3985_v29 = vrot.slane %v3110_v13, %v13869_v62  ;;  %v4599_v38 = vsel %vm4598_vm1, %v15383_v57, %v3961_v35 }
 0x2f8   : > { %v10392_v39 = vrot.slane %v10378_v63, %v14066_v60  ;;  %6460 = vperm.xlu1 %10802, %v19308_v45   ;;  %v4600_v18 = vsel %vm4598_vm1, %v15406_v20, %v3965_v8  ;;  %v19352_v22 = vcombine.high %v15406_v20, %v15406_v20  ;;  %v4603_v63 = vsel %vm4598_vm1, %v15403_v44, %v3977_v55  ;;  %v1996_v20 = vpop.permute.xlu0 %1995 }
 0x2f9   : > { %v19353_v47 = vcombine.high %v15383_v57, %v15383_v57  ;;  %v4604_v45 = vsel %vm4598_vm1, %v15414_v34, %v3981_v7  ;;  %v19354_v13 = vcombine.high %v15403_v44, %v15403_v44  ;;  %v9391_v8 = vcombine.low %v4599_v38, %v4600_v18 }
 0x2fa   : > { %v10393_v31 = vcombine.low %v10385_v2, %v10392_v39  ;;  %v4602_v19 = vsel %vm4598_vm1, %v19352_v22, %v3973_v6  ;;  %v9408_v39 = vcombine.low %v4603_v63, %v4604_v45  ;;  %v3190_v55 = vcombine.high %v3188_v42, %v3188_v42 }
 0x2fb   : > { %v4601_v14 = vsel %vm4598_vm1, %v19353_v47, %v3969_v30  ;;  %v4605_v35 = vsel %vm4598_vm1, %v19354_v13, %v3985_v29  ;;  %v9399_v57 = vrot.slane %v9391_v8, %v14066_v60  ;;  %v3197_v30 = vrot.slane %v3181_v54, %v19003_v33  ;;  %v19355_v8 = vld [vmem:[#allocation97_spill] sm:$0xff] }
 0x2fc   : > { %10602 = vst.msk [vmem:[%s14466_s28 + $0x1d0] sm:$0xff] %vm10543_vm2, %v10393_v31  ;;  %v9392_v2 = vcombine.low %v4601_v14, %v4602_v19  ;;  %v9409_v6 = vcombine.low %v4605_v35, %v15463_v3  ;;  %v3204_v34 = vrot.slane %v3188_v42, %v19003_v33  ;;  %v3211_v7 = vrot.slane %v3189_v1, %v19003_v33  ;;  %v15941_v42 = vpop.permute.xlu1 %5976  ;;  %v2004_v35 = vpop.permute.xlu0 %2003 }
 0x2fd   : > { %6384 = vperm.xlu1 %10802, %v19252_v40   ;;  %v9416_v29 = vrot.slane %v9408_v39, %v14066_v60  ;;  %v3218_v31 = vrot.slane %v3190_v55, %v19003_v33  ;;  %v3219_v3 = vcombine.high %v3197_v30, %v3197_v30  ;;  %v19356_v39 = vld [vmem:[#allocation142_spill] sm:$0xff]  ;;  %v19357_v55 = vld [vmem:[#allocation121_spill] sm:$0xff] }
 0x2fe   : > { %v9406_v44 = vrot.slane %v9392_v2, %v14066_v60  ;;  %v9423_v38 = vrot.slane %v9409_v6, %v14066_v60  ;;  %v3220_v18 = vcombine.high %v3204_v34, %v3204_v34  ;;  %v3221_v22 = vcombine.high %v3211_v7, %v3211_v7 }
 0x2ff   : > { %v4025_v54 = vrot.slane %v3211_v7, %v13869_v62  ;;  %v3222_v40 = vcombine.high %v3218_v31, %v3218_v31  ;;  %v4037_v63 = vrot.slane %v3204_v34, %v13869_v62  ;;  %v4029_v47 = vrot.slane %v3219_v3, %v13869_v62  ;;  %v19359_v34 = vld [vmem:[#allocation10_spill] sm:$0xff] }
 0x300   : > { %v9407_v1 = vcombine.low %v9399_v57, %v9406_v44  ;;  %v9424_v19 = vcombine.low %v9416_v29, %v9423_v38  ;;  %v4033_v14 = vrot.slane %v3221_v22, %v13869_v62  ;;  %v4041_v45 = vrot.slane %v3218_v31, %v13869_v62  ;;  %v19361_v31 = vld [vmem:[#allocation33_spill] sm:$0xff] }
 0x301   : > { %v4045_v13 = vrot.slane %v3220_v18, %v13869_v62  ;;  %6408 = vperm.xlu1 %10802, %v19355_v8   ;;  %v4049_v2 = vrot.slane %v3222_v40, %v13869_v62  ;;  %v4615_v6 = vsel %vm4598_vm1, %v19356_v39, %v4025_v54  ;;  %v19358_v57 = vcombine.high %v19357_v55, %v19357_v55  ;;  %v19362_v18 = vld [vmem:[#allocation140_spill] sm:$0xff] }
 0x302   : > { %10544 = vst.msk [vmem:[%s14466_s28] sm:$0xff] %vm10543_vm2, %v9407_v1  ;;  %10545 = vst.msk [vmem:[%s14466_s28 + $0x8] sm:$0xff] %vm10543_vm2, %v9424_v19  ;;  %v2091_v7 = vadd.f32 %v15863_v12, %v19359_v34  ;;  %v4616_v44 = vsel %vm4598_vm1, %v19357_v55, %v4029_v47  ;;  %v19360_v29 = vcombine.high %v19356_v39, %v19356_v39  ;;  %v15981_v39 = vpop.permute.xlu1 %5986  ;;  %v19366_v34 = vld [vmem:[#allocation73_spill] sm:$0xff] }
 0x303   : > { %v4618_v30 = vsel %vm4598_vm1, %v19358_v57, %v4037_v63  ;;  %v4619_v3 = vsel %vm4598_vm1, %v19361_v31, %v4041_v45  ;;  %v4620_v22 = vsel %vm4598_vm1, %v19362_v18, %v4045_v13  ;;  %v19363_v54 = vcombine.high %v19361_v31, %v19361_v31  ;;  %v19364_v63 = vld [vmem:[#allocation68_spill] sm:$0xff]  ;;  %v19368_v18 = vld [vmem:[#allocation13_spill] sm:$0xff] }
 0x304   : > { %v4617_v38 = vsel %vm4598_vm1, %v19360_v29, %v4033_v14  ;;  %v9527_v12 = vcombine.low %v4615_v6, %v4616_v44  ;;  %v9544_v40 = vcombine.low %v4619_v3, %v4620_v22  ;;  %v3278_v8 = vrot.slane %v2091_v7, %v19003_v33  ;;  %v19365_v13 = vld [vmem:[#allocation112_spill] sm:$0xff]  ;;  %v2012_v44 = vpop.permute.xlu0 %2011 }
 0x305   : > { %v4621_v1 = vsel %vm4598_vm1, %v19363_v54, %v4049_v2  ;;  %v9528_v19 = vcombine.low %v4617_v38, %v4618_v30  ;;  %v6046_v14 = vmul.f32 %v15701_v28, %v15871_v25  ;;  %v2069_v45 = vmul.f32 %v15433_v9, %v1996_v20  ;;  %6432 = vperm.xlu1 %10802, %v19365_v13  }
 0x306   : > { %v9545_v47 = vcombine.low %v4621_v1, %v19364_v63  ;;  %v2907_v55 = vcombine.high %v15853_v36, %v15853_v36  ;;  %v9535_v2 = vrot.slane %v9527_v12, %v14066_v60  ;;  %v9552_v57 = vrot.slane %v9544_v40, %v14066_v60  ;;  %v16030_v13 = vpop.permute.xlu1 %5996 }
 0x307   : > { %v9542_v6 = vrot.slane %v9528_v19, %v14066_v60  ;;  %v3285_v25 = vrot.slane %v3278_v8, %v19003_v33  ;;  %v2093_v20 = vadd.f32 %v2069_v45, %v19366_v34  ;;  %v2071_v7 = vmul.f32 %v15433_v9, %v2004_v35 }
 0x308   : > { %v9559_v30 = vrot.slane %v9545_v47, %v14066_v60  ;;  %v2909_v29 = vcombine.high %v15866_v5, %v15866_v5  ;;  %v19367_v38 = vcombine.low %v15878_v26, %v15891_v16  ;;  %v19369_v22 = vcombine.high %v15588_v52, %v15588_v52  ;;  %v19370_v52 = vld [vmem:[#allocation138_spill] sm:$0xff] }
 0x309   : > { %v9543_v3 = vcombine.low %v9535_v2, %v9542_v6  ;;  %v4085_v1 = vrot.slane %v3285_v25, %v13869_v62  ;;  %v3335_v12 = vcombine.high %v2093_v20, %v2093_v20  ;;  %v3342_v19 = vrot.slane %v2093_v20, %v19003_v33  ;;  %6456 = vperm.xlu1 %10802, %v19211_v43  }
 0x30a   : > { %v15999_v31 = vrot.slane %v19367_v38, %v14066_v60  ;;  %v16006_v54 = vsel %vm4598_vm1, %v19369_v22, %v19368_v18  ;;  %v9560_v35 = vcombine.low %v9552_v57, %v9559_v30  ;;  %v16014_v26 = vadd.f32 %v15813_v10, %v6046_v14  ;;  %v19372_v57 = vld [vmem:[#allocation51_spill] sm:$0xff] }
 0x30b   : > { %10552 = vst.msk [vmem:[%s14466_s28 + $0x40] sm:$0xff] %vm10543_vm2, %v9543_v3  ;;  %v16018_v16 = vmul.f32 %v15701_v28, %v15907_v50  ;;  %v2095_v40 = vadd.f32 %v2071_v7, %v19370_v52  ;;  %v2073_v63 = vmul.f32 %v15433_v9, %v2012_v44  ;;  %v19371_v47 = vcombine.high %v15487_v21, %v15487_v21 }
 0x30c   : > { %10553 = vst.msk [vmem:[%s14466_s28 + $0x48] sm:$0xff] %vm10543_vm2, %v9560_v35  ;;  %v3349_v8 = vrot.slane %v3335_v12, %v19003_v33  ;;  %v3350_v45 = vcombine.high %v3342_v19, %v3342_v19  ;;  %v3358_v14 = vrot.slane %v3342_v19, %v19003_v33 }
 0x30d   : > { %v4630_v43 = vsel %vm4598_vm1, %v19371_v47, %v4085_v1  ;;  %v3398_v2 = vcombine.high %v2095_v40, %v2095_v40  ;;  %v3405_v6 = vrot.slane %v2095_v40, %v19003_v33  ;;  %v16035_v30 = vadd.f32 %v2073_v63, %v19372_v57  ;;  %v16044_v1 = vpop.permute.xlu0 %2019  ;;  %v19373_v40 = vld [vmem:[#allocation157_spill] sm:$0xff] }
 0x30e   : > { %v9579_v50 = vcombine.low %v15825_v61, %v4630_v43  ;;  %v3351_v25 = vcombine.high %v3349_v8, %v3349_v8  ;;  %v3365_v21 = vrot.slane %v3349_v8, %v19003_v33  ;;  %v3372_v34 = vrot.slane %v3350_v45, %v19003_v33 }
 0x30f   : > { %v3380_v20 = vcombine.high %v3358_v14, %v3358_v14  ;;  %v4117_v44 = vrot.slane %v3358_v14, %v13869_v62  ;;  %v3412_v38 = vrot.slane %v3398_v2, %v19003_v33  ;;  %v3413_v61 = vcombine.high %v3405_v6, %v3405_v6 }
 0x310   : > { %v9593_v7 = vrot.slane %v9579_v50, %v14066_v60  ;;  %v3379_v3 = vrot.slane %v3351_v25, %v19003_v33  ;;  %v3381_v18 = vcombine.high %v3365_v21, %v3365_v21  ;;  %v3382_v22 = vcombine.high %v3372_v34, %v3372_v34  ;;  %v16056_v50 = vpop.permute.xlu1 %6006 }
 0x311   : > { %v4121_v35 = vrot.slane %v3372_v34, %v13869_v62  ;;  %v4125_v19 = vrot.slane %v3380_v20, %v13869_v62  ;;  %v4133_v52 = vrot.slane %v3365_v21, %v13869_v62  ;;  %v19374_v63 = vcombine.high %v19373_v40, %v19373_v40  ;;  %v19376_v21 = vld [vmem:[#allocation24_spill] sm:$0xff] }
 0x312   : > { %v9594_v12 = vcombine.low %v15563_v51, %v9593_v7  ;;  %v3383_v43 = vcombine.high %v3379_v3, %v3379_v3  ;;  %v4129_v8 = vrot.slane %v3382_v22, %v13869_v62  ;;  %v4137_v45 = vrot.slane %v3379_v3, %v13869_v62 }
 0x313   : > { %v4638_v47 = vsel %vm4598_vm1, %v19374_v63, %v4117_v44  ;;  %v4141_v14 = vrot.slane %v3381_v18, %v13869_v62  ;;  %v4639_v51 = vsel %vm4598_vm1, %v15536_v24, %v4121_v35  ;;  %v4640_v2 = vsel %vm4598_vm1, %v15543_v32, %v4125_v19 }
 0x314   : > { %10555 = vst.msk [vmem:[%s14466_s28 + $0x58] sm:$0xff] %vm10543_vm2, %v9594_v12  ;;  %v19375_v57 = vcombine.high %v15543_v32, %v15543_v32  ;;  %v9681_v34 = vcombine.low %v19376_v21, %v4638_v47  ;;  %v4145_v20 = vrot.slane %v3383_v43, %v13869_v62  ;;  %v19377_v7 = vcombine.high %v15536_v24, %v15536_v24  ;;  %v2028_v47 = vpop.permute.xlu0 %2027 }
 0x315   : > { %v4643_v3 = vsel %vm4598_vm1, %v15539_v4, %v4137_v45  ;;  %v4644_v18 = vsel %vm4598_vm1, %v15551_v46, %v4141_v14  ;;  %v9697_v32 = vcombine.low %v4639_v51, %v4640_v2  ;;  %v19378_v19 = vcombine.high %v15539_v4, %v15539_v4 }
 0x316   : > { %v4642_v25 = vsel %vm4598_vm1, %v19375_v57, %v4133_v52  ;;  %v4641_v44 = vsel %vm4598_vm1, %v19377_v7, %v4129_v8  ;;  %v9695_v22 = vrot.slane %v9681_v34, %v14066_v60  ;;  %v9714_v12 = vcombine.low %v4643_v3, %v4644_v18 }
 0x317   : > { %v9698_v35 = vcombine.low %v4641_v44, %v4642_v25  ;;  %v4645_v52 = vsel %vm4598_vm1, %v19378_v19, %v4145_v20  ;;  %v3414_v24 = vcombine.high %v3412_v38, %v3412_v38  ;;  %v3421_v40 = vrot.slane %v3405_v6, %v19003_v33  ;;  %v16092_v6 = vpop.permute.xlu1 %6016 }
 0x318   : > { %v3428_v63 = vrot.slane %v3412_v38, %v19003_v33  ;;  %v9696_v43 = vcombine.low %v15289_v11, %v9695_v22  ;;  %v9705_v46 = vrot.slane %v9697_v32, %v14066_v60  ;;  %v9715_v45 = vcombine.low %v4645_v52, %v15595_v15  ;;  %v19379_v32 = vld [vmem:[#allocation128_spill] sm:$0xff]  ;;  %v2036_v52 = vpop.permute.xlu0 %2035 }
 0x319   : > { %v9712_v8 = vrot.slane %v9698_v35, %v14066_v60  ;;  %v9722_v4 = vrot.slane %v9714_v12, %v14066_v60  ;;  %v3435_v14 = vrot.slane %v3413_v61, %v19003_v33  ;;  %v3442_v51 = vrot.slane %v3414_v24, %v19003_v33  ;;  %v19380_v12 = vld [vmem:[#allocation167_spill] sm:$0xff]  ;;  %v19381_v24 = vld [vmem:[#allocation165_spill] sm:$0xff] }
 0x31a   : > { %v3443_v2 = vcombine.high %v3421_v40, %v3421_v40  ;;  %v9729_v57 = vrot.slane %v9715_v45, %v14066_v60  ;;  %10561 = vst.msk [vmem:[%s14466_s28 + $0x88] sm:$0xff] %vm10543_vm2, %v9696_v43  ;;  %v3444_v11 = vcombine.high %v3428_v63, %v3428_v63  ;;  %v4165_v25 = vrot.slane %v3428_v63, %v13869_v62  ;;  %v19382_v63 = vld [vmem:[#allocation22_spill] sm:$0xff] }
 0x31b   : > { %v9713_v38 = vcombine.low %v9705_v46, %v9712_v8  ;;  %v3445_v15 = vcombine.high %v3435_v14, %v3435_v14  ;;  %v3446_v21 = vcombine.high %v3442_v51, %v3442_v51  ;;  %v4153_v34 = vrot.slane %v3435_v14, %v13869_v62 }
 0x31c   : > { %v4157_v61 = vrot.slane %v3443_v2, %v13869_v62  ;;  %v9730_v20 = vcombine.low %v9722_v4, %v9729_v57  ;;  %v4169_v7 = vrot.slane %v3442_v51, %v13869_v62  ;;  %v4173_v44 = vrot.slane %v3444_v11, %v13869_v62  ;;  %v16132_v57 = vpop.permute.xlu1 %6026 }
 0x31d   : > { %10562 = vst.msk [vmem:[%s14466_s28 + $0x90] sm:$0xff] %vm10543_vm2, %v9713_v38  ;;  %v6050_v3 = vmul.f32 %v15701_v28, %v15941_v42  ;;  %v4161_v18 = vrot.slane %v3445_v15, %v13869_v62  ;;  %v4177_v22 = vrot.slane %v3446_v21, %v13869_v62  ;;  %v4647_v35 = vsel %vm4598_vm1, %v19379_v32, %v4153_v34  ;;  %v19386_v15 = vld [vmem:[#allocation37_spill] sm:$0xff] }
 0x31e   : > { %v4648_v19 = vsel %vm4598_vm1, %v19380_v12, %v4157_v61  ;;  %10563 = vst.msk [vmem:[%s14466_s28 + $0x98] sm:$0xff] %vm10543_vm2, %v9730_v20  ;;  %v4651_v40 = vsel %vm4598_vm1, %v19381_v24, %v4169_v7  ;;  %v4652_v43 = vsel %vm4598_vm1, %v19382_v63, %v4173_v44  ;;  %v3502_v46 = vrot.slane %v16035_v30, %v19003_v33 }
 0x31f   : > { %v9799_v42 = vcombine.low %v4647_v35, %v4648_v19  ;;  %v19383_v8 = vcombine.high %v19379_v32, %v19379_v32  ;;  %v19384_v4 = vcombine.high %v19380_v12, %v19380_v12  ;;  %v19385_v51 = vcombine.high %v19381_v24, %v19381_v24  ;;  %v19388_v12 = vld [vmem:[#allocation53_spill] sm:$0xff]  ;;  %v19389_v19 = vld [vmem:[#allocation34_spill] sm:$0xff] }
 0x320   : > { %v9816_v38 = vcombine.low %v4651_v40, %v4652_v43  ;;  %v16136_v30 = vadd.f32 %v15813_v10, %v16018_v16  ;;  %v3509_v34 = vrot.slane %v3502_v46, %v19003_v33  ;;  %v2075_v20 = vmul.f32 %v15433_v9, %v16044_v1  ;;  %v2044_v40 = vpop.permute.xlu0 %2043 }
 0x321   : > { %v4649_v45 = vsel %vm4598_vm1, %v19383_v8, %v4161_v18  ;;  %v4650_v14 = vsel %vm4598_vm1, %v19384_v4, %v4165_v25  ;;  %v4653_v2 = vsel %vm4598_vm1, %v19385_v51, %v4177_v22  ;;  %v9807_v61 = vrot.slane %v9799_v42, %v14066_v60 }
 0x322   : > { %v9800_v11 = vcombine.low %v4649_v45, %v4650_v14  ;;  %v9817_v21 = vcombine.low %v4653_v2, %v19386_v15  ;;  %v16142_v25 = vadd.f32 %v15813_v10, %v6050_v3  ;;  %v2077_v7 = vmul.f32 %v15433_v9, %v2028_v47  ;;  %v19387_v3 = vld [vmem:[#allocation40_spill] sm:$0xff]  ;;  %v16174_v14 = vpop.permute.xlu1 %6036 }
 0x323   : > { %v9824_v16 = vrot.slane %v9816_v38, %v14066_v60  ;;  %v4213_v22 = vrot.slane %v3509_v34, %v13869_v62  ;;  %v16153_v32 = vmul.f32 %v15701_v28, %v15981_v39  ;;  %v2099_v35 = vadd.f32 %v2075_v20, %v19387_v3 }
 0x324   : > { %v9814_v44 = vrot.slane %v9800_v11, %v14066_v60  ;;  %v9831_v18 = vrot.slane %v9817_v21, %v14066_v60  ;;  %v2101_v1 = vadd.f32 %v2077_v7, %v19388_v12  ;;  %v19390_v47 = vcombine.high %v15728_v0, %v15728_v0 }
 0x325   : > { %v19391_v42 = vcombine.high %v15602_v23, %v15602_v23  ;;  %v16170_v46 = vmul.f32 %v15701_v28, %v16030_v13  ;;  %v3559_v45 = vcombine.high %v2099_v35, %v2099_v35  ;;  %v3566_v0 = vrot.slane %v2099_v35, %v19003_v33  ;;  %v16202_v35 = vpop.permute.xlu0 %2051 }
 0x326   : > { %v16162_v24 = vsel %vm4598_vm1, %v19390_v47, %v19389_v19  ;;  %v9815_v63 = vcombine.low %v9807_v61, %v9814_v44  ;;  %v9832_v43 = vcombine.low %v9824_v16, %v9831_v18  ;;  %v3622_v4 = vcombine.high %v2101_v1, %v2101_v1  ;;  %v16208_v47 = vpop.permute.xlu1 %6092 }
 0x327   : > { %v4662_v39 = vsel %vm4598_vm1, %v19391_v42, %v4213_v22  ;;  %v3629_v23 = vrot.slane %v2101_v1, %v19003_v33  ;;  %v16183_v51 = vmul.f32 %v15701_v28, %v16056_v50  ;;  %v2079_v13 = vmul.f32 %v15433_v9, %v2036_v52  ;;  %v19392_v50 = vld [vmem:[#allocation150_spill] sm:$0xff] }
 0x328   : > { %v9851_v8 = vcombine.low %v16006_v54, %v4662_v39  ;;  %10568 = vst.msk [vmem:[%s14466_s28 + $0xc0] sm:$0xff] %vm10543_vm2, %v9815_v63  ;;  %10569 = vst.msk [vmem:[%s14466_s28 + $0xc8] sm:$0xff] %vm10543_vm2, %v9832_v43  ;;  %v16187_v54 = vmul.f32 %v15433_v9, %v2044_v40  ;;  %v3573_v38 = vrot.slane %v3559_v45, %v19003_v33  ;;  %v19393_v43 = vld [vmem:[#allocation45_spill] sm:$0xff] }
 0x329   : > { %v3574_v11 = vcombine.high %v3566_v0, %v3566_v0  ;;  %v3582_v15 = vrot.slane %v3566_v0, %v19003_v33  ;;  %v3636_v21 = vrot.slane %v3622_v4, %v19003_v33  ;;  %v3637_v34 = vcombine.high %v3629_v23, %v3629_v23 }
 0x32a   : > { %v9865_v2 = vrot.slane %v9851_v8, %v14066_v60  ;;  %v3645_v61 = vrot.slane %v3629_v23, %v19003_v33  ;;  %v16195_v20 = vadd.f32 %v2079_v13, %v19392_v50  ;;  %v3575_v9 = vcombine.high %v3573_v38, %v3573_v38 }
 0x32b   : > { %v3589_v7 = vrot.slane %v3573_v38, %v19003_v33  ;;  %v3596_v44 = vrot.slane %v3574_v11, %v19003_v33  ;;  %v3604_v16 = vcombine.high %v3582_v15, %v3582_v15  ;;  %v4245_v18 = vrot.slane %v3582_v15, %v13869_v62  ;;  %v19396_v15 = vld [vmem:[#allocation84_spill] sm:$0xff] }
 0x32c   : > { %v9866_v52 = vcombine.low %v15645_v27, %v9865_v2  ;;  %v3638_v22 = vcombine.high %v3636_v21, %v3636_v21  ;;  %v3652_v3 = vrot.slane %v3636_v21, %v19003_v33  ;;  %v3603_v12 = vrot.slane %v3575_v9, %v19003_v33 }
 0x32d   : > { %v3605_v1 = vcombine.high %v3589_v7, %v3589_v7  ;;  %v3606_v19 = vcombine.high %v3596_v44, %v3596_v44  ;;  %v4249_v27 = vrot.slane %v3596_v44, %v13869_v62  ;;  %v4253_v40 = vrot.slane %v3604_v16, %v13869_v62 }
 0x32e   : > { %10571 = vst.msk [vmem:[%s14466_s28 + $0xd8] sm:$0xff] %vm10543_vm2, %v9866_v52  ;;  %v4261_v63 = vrot.slane %v3589_v7, %v13869_v62  ;;  %v19394_v42 = vcombine.high %v19393_v43, %v19393_v43  ;;  %v3659_v8 = vrot.slane %v3637_v34, %v19003_v33  ;;  %v3607_v45 = vcombine.high %v3603_v12, %v3603_v12  ;;  %v19398_v7 = vld [vmem:[#allocation21_spill] sm:$0xff]  ;;  %v16246_v43 = vpop.permute.xlu1 %6096 }
 0x32f   : > { %v4257_v0 = vrot.slane %v3606_v19, %v13869_v62  ;;  %v4265_v4 = vrot.slane %v3603_v12, %v13869_v62  ;;  %v4269_v23 = vrot.slane %v3605_v1, %v13869_v62  ;;  %v4671_v13 = vsel %vm4598_vm1, %v15667_v58, %v4249_v27  ;;  %v16239_v1 = vpop.permute.xlu0 %2059 }
 0x330   : > { %v4670_v39 = vsel %vm4598_vm1, %v19394_v42, %v4245_v18  ;;  %v4672_v2 = vsel %vm4598_vm1, %v15677_v37, %v4253_v40  ;;  %v19395_v38 = vcombine.high %v15677_v37, %v15677_v37  ;;  %v4273_v34 = vrot.slane %v3607_v45, %v13869_v62  ;;  %v19400_v42 = vld [vmem:[#allocation64_spill] sm:$0xff] }
 0x331   : > { %v9953_v21 = vcombine.low %v19396_v15, %v4670_v39  ;;  %v19397_v50 = vcombine.high %v15667_v58, %v15667_v58  ;;  %v4675_v9 = vsel %vm4598_vm1, %v15673_v56, %v4265_v4  ;;  %v4676_v44 = vsel %vm4598_vm1, %v19398_v7, %v4269_v23  ;;  %v19401_v4 = vld [vmem:[#allocation31_spill] sm:$0xff] }
 0x332   : > { %v4674_v11 = vsel %vm4598_vm1, %v19395_v38, %v4261_v63  ;;  %v9969_v37 = vcombine.low %v4671_v13, %v4672_v2  ;;  %v9986_v12 = vcombine.low %v4675_v9, %v4676_v44  ;;  %v19399_v19 = vcombine.high %v15673_v56, %v15673_v56  ;;  %v19403_v44 = vld [vmem:[#allocation162_spill] sm:$0xff] }
 0x333   : > { %v4673_v52 = vsel %vm4598_vm1, %v19397_v50, %v4257_v0  ;;  %v9967_v16 = vrot.slane %v9953_v21, %v14066_v60  ;;  %v3666_v27 = vrot.slane %v3638_v22, %v19003_v33  ;;  %v3667_v40 = vcombine.high %v3645_v61, %v3645_v61 }
 0x334   : > { %v9970_v18 = vcombine.low %v4673_v52, %v4674_v11  ;;  %v4677_v58 = vsel %vm4598_vm1, %v19399_v19, %v4273_v34  ;;  %v3668_v63 = vcombine.high %v3652_v3, %v3652_v3  ;;  %v9977_v45 = vrot.slane %v9969_v37, %v14066_v60 }
 0x335   : > { %v9968_v39 = vcombine.low %v19400_v42, %v9967_v16  ;;  %v9987_v23 = vcombine.low %v4677_v58, %v19401_v4  ;;  %v9994_v56 = vrot.slane %v9986_v12, %v14066_v60  ;;  %v3669_v13 = vcombine.high %v3659_v8, %v3659_v8  ;;  %v19406_v58 = vld [vmem:[#allocation169_spill] sm:$0xff] }
 0x336   : > { %v9984_v0 = vrot.slane %v9970_v18, %v14066_v60  ;;  %v3670_v2 = vcombine.high %v3666_v27, %v3666_v27  ;;  %v4281_v38 = vrot.slane %v3659_v8, %v13869_v62  ;;  %v4285_v11 = vrot.slane %v3667_v40, %v13869_v62  ;;  %v19402_v8 = vld [vmem:[#allocation160_spill] sm:$0xff]  ;;  %v16273_v18 = vpop.permute.xlu0 %5388  ;;  %v19407_v40 = vld [vmem:[#allocation103_spill] sm:$0xff] }
 0x337   : > { %v10001_v61 = vrot.slane %v9987_v23, %v14066_v60  ;;  %10577 = vst.msk [vmem:[%s14466_s28 + $0x108] sm:$0xff] %vm10543_vm2, %v9968_v39  ;;  %v4293_v15 = vrot.slane %v3652_v3, %v13869_v62  ;;  %v4289_v21 = vrot.slane %v3669_v13, %v13869_v62  ;;  %v4297_v34 = vrot.slane %v3666_v27, %v13869_v62 }
 0x338   : > { %v9985_v22 = vcombine.low %v9977_v45, %v9984_v0  ;;  %v4301_v50 = vrot.slane %v3668_v63, %v13869_v62  ;;  %v4305_v52 = vrot.slane %v3670_v2, %v13869_v62  ;;  %v4679_v7 = vsel %vm4598_vm1, %v19402_v8, %v4281_v38  ;;  %v16287_v45 = vpop.permute.xlu1 %6104 }
 0x339   : > { %v10002_v9 = vcombine.low %v9994_v56, %v10001_v61  ;;  %v4680_v16 = vsel %vm4598_vm1, %v19403_v44, %v4285_v11  ;;  %v19404_v3 = vcombine.high %v19403_v44, %v19403_v44  ;;  %v19405_v12 = vcombine.high %v19402_v8, %v19402_v8  ;;  %v19409_v56 = vld [vmem:[#allocation25_spill] sm:$0xff]  ;;  %v19410_v61 = vld [vmem:[#allocation152_spill] sm:$0xff] }
 0x33a   : > { %10578 = vst.msk [vmem:[%s14466_s28 + $0x110] sm:$0xff] %vm10543_vm2, %v9985_v22  ;;  %v4683_v27 = vsel %vm4598_vm1, %v19406_v58, %v4297_v34  ;;  %v4684_v63 = vsel %vm4598_vm1, %v19407_v40, %v4301_v50  ;;  %v19408_v42 = vcombine.high %v19406_v58, %v19406_v58  ;;  %v10071_v0 = vcombine.low %v4679_v7, %v4680_v16  ;;  %v16319_v7 = vld [vmem:[%s17857_s3 + $0x3] ss:$0 sm:$0xff]  ;;  %v16323_v44 = vpop.permute.xlu0 %5400 }
 0x33b   : > { %v4682_v37 = vsel %vm4598_vm1, %v19404_v3, %v4293_v15  ;;  %v4681_v19 = vsel %vm4598_vm1, %v19405_v12, %v4289_v21  ;;  %10579 = vst.msk [vmem:[%s14466_s28 + $0x118] sm:$0xff] %vm10543_vm2, %v10002_v9  ;;  %v10088_v23 = vcombine.low %v4683_v27, %v4684_v63  ;;  %v16294_v2 = vadd.f32 %v15813_v10, %v16153_v32  ;;  %v19412_v58 = vld [vmem:[#allocation154_spill] sm:$0xff]  ;;  %v19413_v27 = vld [vmem:[#allocation116_spill] sm:$0xff] }
 0x33c   : > { %v4685_v39 = vsel %vm4598_vm1, %v19408_v42, %v4305_v52  ;;  %v10072_v4 = vcombine.low %v4681_v19, %v4682_v37  ;;  %v3726_v38 = vrot.slane %v16195_v20, %v19003_v33  ;;  %v6058_v22 = vmul.f32 %v15701_v28, %v16092_v6  ;;  %v16328_v19 = vpop.permute.xlu1 %6112 }
 0x33d   : > { %v10089_v13 = vcombine.low %v4685_v39, %v19409_v56  ;;  %v2105_v11 = vadd.f32 %v16187_v54, %v19410_v61  ;;  %v10079_v15 = vrot.slane %v10071_v0, %v14066_v60  ;;  %v10096_v34 = vrot.slane %v10088_v23, %v14066_v60 }
 0x33e   : > { %v10086_v21 = vrot.slane %v10072_v4, %v14066_v60  ;;  %v16308_v32 = vadd.f32 %v15813_v10, %v16170_v46  ;;  %v3733_v20 = vrot.slane %v3726_v38, %v19003_v33  ;;  %v16314_v8 = vadd.f32 %v15813_v10, %v16183_v51 }
 0x33f   : > { %v10103_v50 = vrot.slane %v10089_v13, %v14066_v60  ;;  %v3783_v6 = vcombine.high %v2105_v11, %v2105_v11  ;;  %v3790_v52 = vrot.slane %v2105_v11, %v19003_v33  ;;  %v2083_v46 = vmul.f32 %v16319_v7, %v16202_v35 }
 0x340   : > { %v10087_v54 = vcombine.low %v10079_v15, %v10086_v21  ;;  %v4341_v16 = vrot.slane %v3733_v20, %v13869_v62  ;;  %v16335_v51 = vadd.f32 %v15813_v10, %v6058_v22  ;;  %v16343_v40 = vsel %vm4598_vm1, %v2907_v55, %v19413_v27  ;;  %v19415_v21 = vld [vmem:[#allocation166_spill] sm:$0xff] }
 0x341   : > { %v10104_v9 = vcombine.low %v10096_v34, %v10103_v50  ;;  %v3797_v3 = vrot.slane %v3783_v6, %v19003_v33  ;;  %v3798_v37 = vcombine.high %v3790_v52, %v3790_v52  ;;  %v3806_v12 = vrot.slane %v3790_v52, %v19003_v33  ;;  %v16364_v50 = vpop.permute.xlu0 %5408 }
 0x342   : > { %10584 = vst.msk [vmem:[%s14466_s28 + $0x140] sm:$0xff] %vm10543_vm2, %v10087_v54  ;;  %19411 = vst [vmem:[#allocation83_spill] sm:$0xff] %v16335_v51  ;;  %v2107_v35 = vadd.f32 %v2083_v46, %v19412_v58  ;;  %v2085_v63 = vmul.f32 %v16319_v7, %v16239_v1  ;;  %v19414_v42 = vcombine.high %v15737_v48, %v15737_v48 }
 0x343   : > { %10585 = vst.msk [vmem:[%s14466_s28 + $0x148] sm:$0xff] %vm10543_vm2, %v10104_v9  ;;  %v3799_v0 = vcombine.high %v3797_v3, %v3797_v3  ;;  %v3813_v4 = vrot.slane %v3797_v3, %v19003_v33  ;;  %v3820_v23 = vrot.slane %v3798_v37, %v19003_v33  ;;  %v3828_v13 = vcombine.high %v3806_v12, %v3806_v12  ;;  %v16369_v9 = vpop.permute.xlu1 %6120 }
 0x344   : > { %v4694_v39 = vsel %vm4598_vm1, %v19414_v42, %v4341_v16  ;;  %v4373_v36 = vrot.slane %v3806_v12, %v13869_v62  ;;  %v3846_v55 = vcombine.high %v2107_v35, %v2107_v35  ;;  %v19416_v34 = vcombine.high %v19415_v21, %v19415_v21 }
 0x345   : > { %v10123_v56 = vcombine.low %v16162_v24, %v4694_v39  ;;  %v3827_v38 = vrot.slane %v3799_v0, %v19003_v33  ;;  %v3829_v22 = vcombine.high %v3813_v4, %v3813_v4  ;;  %v3830_v1 = vcombine.high %v3820_v23, %v3820_v23  ;;  %v19419_v0 = vld [vmem:[#allocation27_spill] sm:$0xff]  ;;  %v16403_v21 = vpop.permute.xlu0 %5416 }
 0x346   : > { %v4377_v61 = vrot.slane %v3820_v23, %v13869_v62  ;;  %v4381_v11 = vrot.slane %v3828_v13, %v13869_v62  ;;  %v4389_v15 = vrot.slane %v3813_v4, %v13869_v62  ;;  %v4702_v24 = vsel %vm4598_vm1, %v19416_v34, %v4373_v36 }
 0x347   : > { %v10137_v48 = vrot.slane %v10123_v56, %v14066_v60  ;;  %v3831_v20 = vcombine.high %v3827_v38, %v3827_v38  ;;  %v4385_v6 = vrot.slane %v3830_v1, %v13869_v62  ;;  %v4393_v52 = vrot.slane %v3827_v38, %v13869_v62 }
 0x348   : > { %v4397_v54 = vrot.slane %v3829_v22, %v13869_v62  ;;  %v4703_v16 = vsel %vm4598_vm1, %v15762_v49, %v4377_v61  ;;  %v4704_v3 = vsel %vm4598_vm1, %v15785_v41, %v4381_v11  ;;  %v19417_v37 = vcombine.high %v15785_v41, %v15785_v41  ;;  %v19421_v22 = vld [vmem:[#allocation156_spill] sm:$0xff]  ;;  %v19422_v11 = vld [vmem:[#allocation62_spill] sm:$0xff] }
 0x349   : > { %v10138_v46 = vcombine.low %v15804_v53, %v10137_v48  ;;  %v4401_v58 = vrot.slane %v3831_v20, %v13869_v62  ;;  %v19418_v27 = vcombine.high %v15762_v49, %v15762_v49  ;;  %v4707_v53 = vsel %vm4598_vm1, %v15765_v17, %v4393_v52 }
 0x34a   : > { %v4706_v12 = vsel %vm4598_vm1, %v19417_v37, %v4389_v15  ;;  %v4708_v39 = vsel %vm4598_vm1, %v15775_v59, %v4397_v54  ;;  %v10225_v4 = vcombine.low %v19419_v0, %v4702_v24  ;;  %v10241_v41 = vcombine.low %v4703_v16, %v4704_v3  ;;  %v16407_v24 = vpop.permute.xlu1 %6128 }
 0x34b   : > { %v4705_v42 = vsel %vm4598_vm1, %v19418_v27, %v4385_v6  ;;  %10587 = vst.msk [vmem:[%s14466_s28 + $0x158] sm:$0xff] %vm10543_vm2, %v10138_v46  ;;  %v10258_v56 = vcombine.low %v4707_v53, %v4708_v39  ;;  %v19420_v13 = vcombine.high %v15765_v17, %v15765_v17  ;;  %v3853_v36 = vrot.slane %v2107_v35, %v19003_v33 }
 0x34c   : > { %v10242_v23 = vcombine.low %v4705_v42, %v4706_v12  ;;  %v3860_v38 = vrot.slane %v3846_v55, %v19003_v33  ;;  %v2109_v1 = vadd.f32 %v2085_v63, %v19421_v22  ;;  %v10239_v59 = vrot.slane %v10225_v4, %v14066_v60  ;;  %v19423_v63 = vld [vmem:[#allocation111_spill] sm:$0xff] }
 0x34d   : > { %v4709_v49 = vsel %vm4598_vm1, %v19420_v13, %v4401_v58  ;;  %v10249_v61 = vrot.slane %v10241_v41, %v14066_v60  ;;  %v10266_v17 = vrot.slane %v10258_v56, %v14066_v60  ;;  %v3861_v34 = vcombine.high %v3853_v36, %v3853_v36  ;;  %v16431_v13 = vpop.permute.xlu0 %5424 }
 0x34e   : > { %v10256_v48 = vrot.slane %v10242_v23, %v14066_v60  ;;  %v10259_v15 = vcombine.low %v4709_v49, %v19422_v11  ;;  %v3862_v35 = vcombine.high %v3860_v38, %v3860_v38  ;;  %v3869_v55 = vrot.slane %v3853_v36, %v19003_v33 }
 0x34f   : > { %v10240_v20 = vcombine.low %v19423_v63, %v10239_v59  ;;  %v3876_v54 = vrot.slane %v3860_v38, %v19003_v33  ;;  %v3883_v46 = vrot.slane %v3861_v34, %v19003_v33  ;;  %v3950_v37 = vrot.slane %v2109_v1, %v19003_v33  ;;  %v19424_v38 = vld [vmem:[#allocation2_spill] sm:$0xff] }
 0x350   : > { %v10257_v6 = vcombine.low %v10249_v61, %v10256_v48  ;;  %v10273_v52 = vrot.slane %v10259_v15, %v14066_v60  ;;  %v3890_v16 = vrot.slane %v3862_v35, %v19003_v33  ;;  %v3891_v3 = vcombine.high %v3869_v55, %v3869_v55  ;;  %v19425_v1 = vld [vmem:[#allocation126_spill] sm:$0xff]  ;;  %v16439_v61 = vpop.permute.xlu1 %6136  ;;  %v19426_v48 = vld [vmem:[#allocation43_spill] sm:$0xff] }
 0x351   : > { %10593 = vst.msk [vmem:[%s14466_s28 + $0x188] sm:$0xff] %vm10543_vm2, %v10240_v20  ;;  %v6060_v58 = vmul.f32 %v15701_v28, %v16132_v57  ;;  %v3892_v27 = vcombine.high %v3876_v54, %v3876_v54  ;;  %v4421_v42 = vrot.slane %v3876_v54, %v13869_v62  ;;  %v3893_v53 = vcombine.high %v3883_v46, %v3883_v46 }
 0x352   : > { %v10274_v12 = vcombine.low %v10266_v17, %v10273_v52  ;;  %10594 = vst.msk [vmem:[%s14466_s28 + $0x190] sm:$0xff] %vm10543_vm2, %v10257_v6  ;;  %v3894_v39 = vcombine.high %v3890_v16, %v3890_v16  ;;  %v4409_v0 = vrot.slane %v3883_v46, %v13869_v62  ;;  %v4413_v4 = vrot.slane %v3891_v3, %v13869_v62 }
 0x353   : > { %v4425_v41 = vrot.slane %v3890_v16, %v13869_v62  ;;  %v4429_v23 = vrot.slane %v3892_v27, %v13869_v62  ;;  %v6062_v56 = vmul.f32 %v15701_v28, %v16174_v14  ;;  %v3957_v57 = vrot.slane %v3950_v37, %v19003_v33  ;;  %v19427_v28 = vld [vmem:[#allocation108_spill] sm:$0xff]  ;;  %v19432_v16 = vld [vmem:[#allocation127_spill] sm:$0xff] }
 0x354   : > { %10595 = vst.msk [vmem:[%s14466_s28 + $0x198] sm:$0xff] %vm10543_vm2, %v10274_v12  ;;  %v4417_v49 = vrot.slane %v3893_v53, %v13869_v62  ;;  %v4433_v36 = vrot.slane %v3894_v39, %v13869_v62  ;;  %v4711_v22 = vsel %vm4598_vm1, %v19424_v38, %v4409_v0  ;;  %v4712_v59 = vsel %vm4598_vm1, %v19425_v1, %v4413_v4  ;;  %v16482_v0 = vpop.permute.xlu0 %5432 }
 0x355   : > { %v4715_v11 = vsel %vm4598_vm1, %v19426_v48, %v4425_v41  ;;  %v4716_v14 = vsel %vm4598_vm1, %v19427_v28, %v4429_v23  ;;  %v10343_v15 = vcombine.low %v4711_v22, %v4712_v59  ;;  %v4469_v17 = vrot.slane %v3957_v57, %v13869_v62  ;;  %v19434_v41 = vld [vmem:[#allocation133_spill] sm:$0xff]  ;;  %v16491_v57 = vpop.permute.xlu1 %6144 }
 0x356   : > { %v19428_v34 = vcombine.high %v19424_v38, %v19424_v38  ;;  %v19429_v55 = vcombine.high %v19425_v1, %v19425_v1  ;;  %v19430_v20 = vcombine.high %v19426_v48, %v19426_v48  ;;  %v10360_v52 = vcombine.low %v4715_v11, %v4716_v14  ;;  %v19435_v38 = vld [vmem:[#allocation55_spill] sm:$0xff]  ;;  %v19436_v59 = vld [vmem:[#allocation161_spill] sm:$0xff] }
 0x357   : > { %v16459_v54 = vadd.f32 %v15813_v10, %v6060_v58  ;;  %v4726_v37 = vsel %vm4598_vm1, %v2909_v29, %v4469_v17  ;;  %v10351_v12 = vrot.slane %v10343_v15, %v14066_v60  ;;  %v5451_v53 = vmul.f32 %v16319_v7, %v16273_v18 }
 0x358   : > { %v4713_v35 = vsel %vm4598_vm1, %v19428_v34, %v4417_v49  ;;  %v4714_v63 = vsel %vm4598_vm1, %v19429_v55, %v4421_v42  ;;  %v4717_v6 = vsel %vm4598_vm1, %v19430_v20, %v4433_v36  ;;  %v10395_v27 = vcombine.low %v16343_v40, %v4726_v37  ;;  %v16471_v42 = vld [vmem:[%s17857_s3 + $0x1] ss:$0 sm:$0xff] }
 0x359   : > { %19431 = vst [vmem:[#allocation70_spill] sm:$0xff] %v16459_v54  ;;  %v10344_v46 = vcombine.low %v4713_v35, %v4714_v63  ;;  %v10361_v3 = vcombine.low %v4717_v6, %v19432_v16  ;;  %v6184_v58 = vmul.f32 %v16471_v42, %v16208_v47  ;;  %v10368_v5 = vrot.slane %v10360_v52, %v14066_v60  ;;  %v5441_v6 = vpop.permute.xlu0 %5440  ;;  %v16528_v37 = vpop.permute.xlu1 %6152 }
 0x35a   : > { %v5454_v40 = vmul.f32 %v16319_v7, %v16323_v44  ;;  %v16485_v4 = vadd.f32 %v15813_v10, %v6062_v56  ;;  %v10409_v47 = vrot.slane %v10395_v27, %v14066_v60  ;;  %v5467_v18 = vadd.f32 %v5451_v53, %v19434_v41 }
 0x35b   : > { %v10358_v39 = vrot.slane %v10344_v46, %v14066_v60  ;;  %v10375_v29 = vrot.slane %v10361_v3, %v14066_v60  ;;  %v5456_v23 = vmul.f32 %v16319_v7, %v16364_v50  ;;  %v6185_v44 = vmul.f32 %v16471_v42, %v16246_v43  ;;  %v19437_v50 = vld [vmem:[#allocation143_spill] sm:$0xff]  ;;  %v19439_v46 = vld [vmem:[#allocation6_spill] sm:$0xff] }
 0x35c   : > { %19433 = vst [vmem:[#allocation159_spill] sm:$0xff] %v16485_v4  ;;  %v5470_v22 = vadd.f32 %v5454_v40, %v19435_v38  ;;  %v10410_v10 = vcombine.low %v15999_v31, %v10409_v47  ;;  %v6535_v56 = vcombine.high %v5467_v18, %v5467_v18  ;;  %v6542_v1 = vrot.slane %v5467_v18, %v19003_v33 }
 0x35d   : > { %v10359_v49 = vcombine.low %v10351_v12, %v10358_v39  ;;  %v10376_v36 = vcombine.low %v10368_v5, %v10375_v29  ;;  %v5472_v48 = vadd.f32 %v5456_v23, %v19436_v59  ;;  %v16504_v11 = vadd.f32 %v6184_v58, %v19437_v50  ;;  %v19441_v5 = vld [vmem:[#allocation52_spill] sm:$0xff]  ;;  %v16570_v59 = vpop.permute.xlu0 %5448 }
 0x35e   : > { %v6682_v28 = vcombine.high %v5470_v22, %v5470_v22  ;;  %v6689_v14 = vrot.slane %v5470_v22, %v19003_v33  ;;  %v6187_v43 = vmul.f32 %v16471_v42, %v16287_v45  ;;  %10603 = vst.msk [vmem:[%s14466_s28 + $0x1d8] sm:$0xff] %vm10543_vm2, %v10410_v10  ;;  %v6549_v31 = vrot.slane %v6535_v56, %v19003_v33  ;;  %v19442_v56 = vld [vmem:[#allocation163_spill] sm:$0xff] }
 0x35f   : > { %10600 = vst.msk [vmem:[%s14466_s28 + $0x1c0] sm:$0xff] %vm10543_vm2, %v10359_v49  ;;  %10601 = vst.msk [vmem:[%s14466_s28 + $0x1c8] sm:$0xff] %vm10543_vm2, %v10376_v36  ;;  %v6550_v15 = vcombine.high %v6542_v1, %v6542_v1  ;;  %v16513_v17 = vrot.slane %v6542_v1, %v19003_v33  ;;  %v6780_v34 = vcombine.high %v5472_v48, %v5472_v48  ;;  %v19450_v49 = vld [vmem:[#allocation35_spill] sm:$0xff] }
 0x360   : > { %19438 = vst [vmem:[#allocation61_spill] sm:$0xff] %v16504_v11  ;;  %v6696_v35 = vrot.slane %v6682_v28, %v19003_v33  ;;  %v6697_v55 = vcombine.high %v6689_v14, %v6689_v14  ;;  %v16517_v63 = vrot.slane %v6689_v14, %v19003_v33  ;;  %v6787_v20 = vrot.slane %v5472_v48, %v19003_v33 }
 0x361   : > { %v6551_v52 = vcombine.high %v6549_v31, %v6549_v31  ;;  %v16521_v45 = vrot.slane %v6549_v31, %v19003_v33  ;;  %v16524_v16 = vadd.f32 %v6185_v44, %v19439_v46  ;;  %v5458_v3 = vmul.f32 %v16319_v7, %v16403_v21  ;;  %v19443_v31 = vld [vmem:[#allocation54_spill] sm:$0xff] }
 0x362   : > { %v16531_v12 = vrot.slane %v6550_v15, %v19003_v33  ;;  %v6698_v27 = vcombine.high %v6696_v35, %v6696_v35  ;;  %v16534_v58 = vrot.slane %v6696_v35, %v19003_v33  ;;  %v16537_v53 = vrot.slane %v6697_v55, %v19003_v33 }
 0x363   : > { %v16540_v39 = vrot.slane %v6551_v52, %v19003_v33  ;;  %v16543_v29 = vadd.f32 %v6187_v43, %v19441_v5  ;;  %v6794_v21 = vrot.slane %v6780_v34, %v19003_v33  ;;  %v6189_v40 = vmul.f32 %v16471_v42, %v16328_v19  ;;  %v16582_v43 = vpop.permute.xlu1 %6160  ;;  %v19455_v19 = vld [vmem:[#allocation147_spill] sm:$0xff] }
 0x364   : > { %v16551_v41 = vrot.slane %v6698_v27, %v19003_v33  ;;  %v6795_v23 = vcombine.high %v6787_v20, %v6787_v20  ;;  %v16558_v44 = vrot.slane %v6787_v20, %v19003_v33  ;;  %v5474_v1 = vadd.f32 %v5458_v3, %v19442_v56 }
 0x365   : > { %19440 = vst [vmem:[#allocation98_spill] sm:$0xff] %v16540_v39  ;;  %v6796_v36 = vcombine.high %v6794_v21, %v6794_v21  ;;  %v16561_v38 = vrot.slane %v6794_v21, %v19003_v33  ;;  %v16585_v15 = vadd.f32 %v6189_v40, %v19443_v31  ;;  %v5460_v55 = vmul.f32 %v16319_v7, %v16431_v13  ;;  %v19445_v21 = vld [vmem:[#allocation66_spill] sm:$0xff] }
 0x366   : > { %v16577_v28 = vrot.slane %v6795_v23, %v19003_v33  ;;  %v6878_v34 = vcombine.high %v5474_v1, %v5474_v1  ;;  %v6885_v35 = vrot.slane %v5474_v1, %v19003_v33  ;;  %v6191_v46 = vmul.f32 %v16471_v42, %v16369_v9  ;;  %v19446_v9 = vld [vmem:[#allocation71_spill] sm:$0xff] }
 0x367   : > { %v16580_v14 = vrot.slane %v6796_v36, %v19003_v33  ;;  %19444 = vst [vmem:[#allocation92_spill] sm:$0xff] %v16585_v15  ;;  %v5462_v3 = vmul.f32 %v16319_v7, %v16482_v0  ;;  %v5476_v40 = vadd.f32 %v5460_v55, %v19445_v21  ;;  %v6193_v13 = vmul.f32 %v16471_v42, %v16407_v24  ;;  %v6377_v55 = vpop.permute.xlu0 %6376 }
 0x368   : > { %v6892_v27 = vrot.slane %v6878_v34, %v19003_v33  ;;  %v6893_v5 = vcombine.high %v6885_v35, %v6885_v35  ;;  %v16607_v56 = vrot.slane %v6885_v35, %v19003_v33  ;;  %v5464_v24 = vmul.f32 %v16319_v7, %v5441_v6  ;;  %v16619_v35 = vpop.permute.xlu1 %6168 }
 0x369   : > { %v5478_v1 = vadd.f32 %v5462_v3, %v19446_v9  ;;  %v6976_v21 = vcombine.high %v5476_v40, %v5476_v40  ;;  %v6983_v52 = vrot.slane %v5476_v40, %v19003_v33  ;;  %v19448_v9 = vld [vmem:[#allocation56_spill] sm:$0xff]  ;;  %v6195_v6 = vmul.f32 %v16471_v42, %v16439_v61 }
 0x36a   : > { %v6894_v0 = vcombine.high %v6892_v27, %v6892_v27  ;;  %v16611_v31 = vrot.slane %v6892_v27, %v19003_v33  ;;  %v16614_v34 = vrot.slane %v6893_v5, %v19003_v33  ;;  %v16625_v27 = vadd.f32 %v6191_v46, %v19448_v9 }
 0x36b   : > { %v7074_v48 = vcombine.high %v5478_v1, %v5478_v1  ;;  %v7081_v36 = vrot.slane %v5478_v1, %v19003_v33  ;;  %v16628_v5 = vadd.f32 %v6193_v13, %v19450_v49  ;;  %v6990_v50 = vrot.slane %v6976_v21, %v19003_v33  ;;  %v19452_v49 = vld [vmem:[#allocation149_spill] sm:$0xff] }
 0x36c   : > { %v16622_v3 = vrot.slane %v6894_v0, %v19003_v33  ;;  %19449 = vst [vmem:[#allocation18_spill] sm:$0xff] %v16625_v27  ;;  %v6991_v40 = vcombine.high %v6983_v52, %v6983_v52  ;;  %v16634_v23 = vrot.slane %v6983_v52, %v19003_v33  ;;  %v5480_v13 = vadd.f32 %v5464_v24, %v19452_v49  ;;  %v6393_v24 = vpop.permute.xlu0 %6392  ;;  %v6177_v0 = vpop.permute.xlu1 %6176 }
 0x36d   : > { %v7088_v1 = vrot.slane %v7074_v48, %v19003_v33  ;;  %v7089_v20 = vcombine.high %v7081_v36, %v7081_v36  ;;  %v16640_v46 = vrot.slane %v7081_v36, %v19003_v33  ;;  %v6992_v9 = vcombine.high %v6990_v50, %v6990_v50 }
 0x36e   : > { %19447 = vst [vmem:[#allocation65_spill] sm:$0xff] %v16622_v3  ;;  %19451 = vst [vmem:[#allocation3_spill] sm:$0xff] %v16634_v23  ;;  %v16648_v52 = vrot.slane %v6990_v50, %v19003_v33  ;;  %v16653_v22 = vrot.slane %v6991_v40, %v19003_v33  ;;  %v16656_v47 = vadd.f32 %v6195_v6, %v19455_v19  ;;  %v19459_v19 = vld [vmem:[#allocation110_spill] sm:$0xff] }
 0x36f   : > { %v7090_v36 = vcombine.high %v7088_v1, %v7088_v1  ;;  %v16661_v61 = vrot.slane %v7088_v1, %v19003_v33  ;;  %v16664_v50 = vrot.slane %v7089_v20, %v19003_v33  ;;  %v7172_v21 = vcombine.high %v5480_v13, %v5480_v13 }
 0x370   : > { %19453 = vst [vmem:[#allocation91_spill] sm:$0xff] %v16648_v52  ;;  %19454 = vst [vmem:[#allocation38_spill] sm:$0xff] %v16653_v22  ;;  %v16667_v48 = vrot.slane %v6992_v9, %v19003_v33  ;;  %v7179_v6 = vrot.slane %v5480_v13, %v19003_v33  ;;  %v6197_v20 = vmul.f32 %v16471_v42, %v16491_v57  ;;  %v6405_v15 = vpop.permute.xlu0 %6404 }
 0x371   : > { %19456 = vst [vmem:[#allocation30_spill] sm:$0xff] %v16656_v47  ;;  %v16670_v40 = vrot.slane %v7090_v36, %v19003_v33  ;;  %v7186_v49 = vrot.slane %v7172_v21, %v19003_v33  ;;  %v5466_v9 = vmul.f32 %v16319_v7, %v16570_v59  ;;  %v6199_v13 = vmul.f32 %v16471_v42, %v16528_v37  ;;  %v19462_v47 = vld [vmem:[#allocation146_spill] sm:$0xff]  ;;  %v6233_v59 = vpop.permute.xlu1 %6232 }
 0x372   : > { %19457 = vst [vmem:[#allocation129_spill] sm:$0xff] %v16667_v48  ;;  %v7187_v10 = vcombine.high %v7179_v6, %v7179_v6  ;;  %v16685_v18 = vrot.slane %v7179_v6, %v19003_v33  ;;  %v16703_v37 = vadd.f32 %v6197_v20, %v19462_v47  ;;  %v19465_v47 = vld [vmem:[#allocation113_spill] sm:$0xff] }
 0x373   : > { %v7188_v57 = vcombine.high %v7186_v49, %v7186_v49  ;;  %v5482_v27 = vadd.f32 %v5466_v9, %v19459_v19  ;;  %v16697_v36 = vrot.slane %v7186_v49, %v19003_v33  ;;  %v19464_v19 = vld [vmem:[#allocation44_spill] sm:$0xff]  ;;  %v16712_v49 = vmul.f32 %v16319_v7, %v6377_v55 }
 0x374   : > { %19458 = vst [vmem:[#allocation104_spill] sm:$0xff] %v16685_v18  ;;  %v16700_v6 = vrot.slane %v7187_v10, %v19003_v33  ;;  %19463 = vst [vmem:[#allocation5_spill] sm:$0xff] %v16703_v37  ;;  %v16709_v9 = vadd.f32 %v6199_v13, %v19464_v19  ;;  %v6201_v10 = vmul.f32 %v16471_v42, %v16582_v43 }
 0x375   : > { %19460 = vst [vmem:[#allocation74_spill] sm:$0xff] %v16697_v36  ;;  %v7270_v21 = vcombine.high %v5482_v27, %v5482_v27  ;;  %v7277_v11 = vrot.slane %v5482_v27, %v19003_v33  ;;  %v6355_v20 = vadd.f32 %v19465_v47, %v16543_v29  ;;  %v6475_v37 = vmul.f32 %v16319_v7, %v6393_v24  ;;  %v19467_v47 = vld [vmem:[#allocation60_spill] sm:$0xff]  ;;  %v16756_v43 = vpop.permute.xlu1 %6240 }
 0x376   : > { %19461 = vst [vmem:[#allocation102_spill] sm:$0xff] %v16700_v6  ;;  %v16720_v1 = vrot.slane %v7188_v57, %v19003_v33  ;;  %v6203_v29 = vmul.f32 %v16471_v42, %v16619_v35  ;;  %v16743_v36 = vmul.f32 %v16319_v7, %v6405_v15 }
 0x377   : > { %v7284_v27 = vrot.slane %v7270_v21, %v19003_v33  ;;  %v7285_v18 = vcombine.high %v7277_v11, %v7277_v11  ;;  %v16724_v13 = vrot.slane %v7277_v11, %v19003_v33  ;;  %v6499_v19 = vadd.f32 %v6475_v37, %v6355_v20  ;;  %v6417_v20 = vpop.permute.xlu0 %6416 }
 0x378   : > { %19466 = vst [vmem:[#allocation72_spill] sm:$0xff] %v16720_v1  ;;  %v16739_v11 = vadd.f32 %v6201_v10, %v19467_v47  ;;  %v6205_v37 = vmul.f32 %v16471_v42, %v6177_v0  ;;  %v19469_v10 = vld [vmem:[#allocation114_spill] sm:$0xff] }
 0x379   : > { %v7286_v24 = vcombine.high %v7284_v27, %v7284_v27  ;;  %v16733_v57 = vrot.slane %v7284_v27, %v19003_v33  ;;  %v16736_v21 = vrot.slane %v7285_v18, %v19003_v33  ;;  %v7632_v1 = vcombine.high %v6499_v19, %v6499_v19  ;;  %v19472_v27 = vld [vmem:[#allocation89_spill] sm:$0xff] }
 0x37a   : > { %19468 = vst [vmem:[#allocation78_spill] sm:$0xff] %v16739_v11  ;;  %v7639_v55 = vrot.slane %v6499_v19, %v19003_v33  ;;  %v16754_v47 = vadd.f32 %v6203_v29, %v19469_v10  ;;  %v6361_v6 = vadd.f32 %v19472_v27, %v16628_v5  ;;  %v6481_v18 = vmul.f32 %v16319_v7, %v6417_v20  ;;  %v16771_v29 = vld [vmem:[%s17857_s3 + $0x2] ss:$0 sm:$0xff] }
 0x37b   : > { %v16747_v35 = vrot.slane %v7286_v24, %v19003_v33  ;;  %v7646_v42 = vrot.slane %v7632_v1, %v19003_v33  ;;  %v19471_v24 = vld [vmem:[#allocation69_spill] sm:$0xff]  ;;  %v6327_v10 = vmul.f32 %v16771_v29, %v6233_v59  ;;  %v19473_v20 = vld [vmem:[#allocation90_spill] sm:$0xff]  ;;  %v6429_v4 = vpop.permute.xlu0 %6428 }
 0x37c   : > { %19470 = vst [vmem:[#allocation36_spill] sm:$0xff] %v16754_v47  ;;  %v7647_v0 = vcombine.high %v7639_v55, %v7639_v55  ;;  %v7655_v19 = vrot.slane %v7639_v55, %v19003_v33  ;;  %v16763_v11 = vadd.f32 %v6205_v37, %v19471_v24  ;;  %v6505_v27 = vadd.f32 %v6481_v18, %v6361_v6  ;;  %v19474_v24 = vld [vmem:[#allocation12_spill] sm:$0xff]  ;;  %v16785_v37 = vpop.permute.xlu1 %6244 }
 0x37d   : > { %v7648_v15 = vcombine.high %v7646_v42, %v7646_v42  ;;  %v7662_v1 = vrot.slane %v7646_v42, %v19003_v33  ;;  %v6207_v48 = vadd.f32 %v19474_v24, %v19473_v20  ;;  %v19480_v24 = vcombine.high %v16537_v53, %v16537_v53 }
 0x37e   : > { %v7669_v55 = vrot.slane %v7647_v0, %v19003_v33  ;;  %v7677_v47 = vcombine.high %v7655_v19, %v7655_v19  ;;  %v8462_v5 = vrot.slane %v7655_v19, %v13869_v62  ;;  %v7856_v54 = vcombine.high %v6505_v27, %v6505_v27 }
 0x37f   : > { %v7676_v52 = vrot.slane %v7648_v15, %v19003_v33  ;;  %v7678_v22 = vcombine.high %v7662_v1, %v7662_v1  ;;  %v8478_v0 = vrot.slane %v7662_v1, %v13869_v62  ;;  %v6351_v51 = vadd.f32 %v6327_v10, %v6207_v48  ;;  %v19476_v48 = vld [vmem:[#allocation32_spill] sm:$0xff] }
 0x380   : > { %v7679_v23 = vcombine.high %v7669_v55, %v7669_v55  ;;  %v8466_v59 = vrot.slane %v7669_v55, %v13869_v62  ;;  %v8470_v42 = vrot.slane %v7677_v47, %v13869_v62  ;;  %v7863_v47 = vrot.slane %v6505_v27, %v19003_v33 }
 0x381   : > { %v7680_v19 = vcombine.high %v7676_v52, %v7676_v52  ;;  %v8482_v18 = vrot.slane %v7676_v52, %v13869_v62  ;;  %v8486_v15 = vrot.slane %v7678_v22, %v13869_v62  ;;  %v16796_v1 = vmul.f32 %v16319_v7, %v6429_v4 }
 0x382   : > { %v8474_v6 = vrot.slane %v7679_v23, %v13869_v62  ;;  %v9031_v20 = vsel %vm4598_vm1, %v16517_v63, %v8466_v59  ;;  %v9032_v55 = vsel %vm4598_vm1, %v16537_v53, %v8470_v42  ;;  %v19477_v10 = vcombine.high %v19476_v48, %v19476_v48 }
 0x383   : > { %19475 = vst [vmem:[#allocation9_spill] sm:$0xff] %v16796_v1  ;;  %v19479_v22 = vcombine.high %v16517_v63, %v16517_v63  ;;  %v9034_v59 = vsel %vm4598_vm1, %v19480_v24, %v8478_v0  ;;  %v16814_v4 = vsel %vm4598_vm1, %v16534_v58, %v8482_v18  ;;  %v16818_v27 = vsel %vm4598_vm1, %v16551_v41, %v8486_v15 }
 0x384   : > { %v16802_v23 = vsel %vm4598_vm1, %v19477_v10, %v8462_v5  ;;  %v9629_v5 = vcombine.low %v9031_v20, %v9032_v55  ;;  %v7870_v10 = vrot.slane %v7856_v54, %v19003_v33  ;;  %v16822_v63 = vrot.slane %v7680_v19, %v13869_v62  ;;  %v16829_v20 = vpop.permute.xlu1 %6252 }
 0x385   : > { %19478 = vst [vmem:[#allocation7_spill] sm:$0xff] %v16802_v23  ;;  %v9033_v52 = vsel %vm4598_vm1, %v19479_v22, %v8474_v6  ;;  %v7871_v6 = vcombine.high %v7863_v47, %v7863_v47  ;;  %v7879_v53 = vrot.slane %v7863_v47, %v19003_v33  ;;  %v6495_v0 = vadd.f32 %v16712_v49, %v6351_v51 }
 0x386   : > { %v9630_v42 = vcombine.low %v9033_v52, %v9034_v59  ;;  %v9637_v22 = vrot.slane %v9629_v5, %v14066_v60  ;;  %v7872_v24 = vcombine.high %v7870_v10, %v7870_v10  ;;  %v7886_v15 = vrot.slane %v7870_v10, %v19003_v33 }
 0x387   : > { %v7893_v19 = vrot.slane %v7871_v6, %v19003_v33  ;;  %v7901_v55 = vcombine.high %v7879_v53, %v7879_v53  ;;  %v8590_v47 = vrot.slane %v7879_v53, %v13869_v62  ;;  %v7471_v59 = vcombine.high %v6495_v0, %v6495_v0 }
 0x388   : > { %v9644_v18 = vrot.slane %v9630_v42, %v14066_v60  ;;  %v7900_v51 = vrot.slane %v7872_v24, %v19003_v33  ;;  %v7902_v49 = vcombine.high %v7886_v15, %v7886_v15  ;;  %v8606_v23 = vrot.slane %v7886_v15, %v13869_v62 }
 0x389   : > { %v7903_v5 = vcombine.high %v7893_v19, %v7893_v19  ;;  %v8594_v42 = vrot.slane %v7893_v19, %v13869_v62  ;;  %v8598_v10 = vrot.slane %v7901_v55, %v13869_v62  ;;  %v6329_v53 = vmul.f32 %v16771_v29, %v16756_v43  ;;  %v6441_v19 = vpop.permute.xlu0 %6440  ;;  %v19481_v55 = vld [vmem:[#allocation50_spill] sm:$0xff] }
 0x38a   : > { %v9645_v52 = vcombine.low %v9637_v22, %v9644_v18  ;;  %v7904_v54 = vcombine.high %v7900_v51, %v7900_v51  ;;  %v8610_v6 = vrot.slane %v7900_v51, %v13869_v62  ;;  %v8614_v48 = vrot.slane %v7902_v49, %v13869_v62 }
 0x38b   : > { %v8602_v22 = vrot.slane %v7903_v5, %v13869_v62  ;;  %v9063_v18 = vsel %vm4598_vm1, %v16607_v56, %v8594_v42  ;;  %v9064_v24 = vsel %vm4598_vm1, %v16614_v34, %v8598_v10  ;;  %v7478_v15 = vrot.slane %v6495_v0, %v19003_v33  ;;  %v16861_v42 = vpop.permute.xlu1 %6260 }
 0x38c   : > { %10558 = vst.msk [vmem:[%s14466_s28 + $0x70] sm:$0xff] %vm10543_vm2, %v9645_v52  ;;  %v19482_v52 = vcombine.high %v19481_v55, %v19481_v55  ;;  %v9067_v43 = vsel %vm4598_vm1, %v16611_v31, %v8610_v6  ;;  %v9068_v49 = vsel %vm4598_vm1, %v16622_v3, %v8614_v48  ;;  %v9901_v5 = vcombine.low %v9063_v18, %v9064_v24 }
 0x38d   : > { %v19484_v10 = vcombine.high %v16607_v56, %v16607_v56  ;;  %v19485_v55 = vcombine.high %v16614_v34, %v16614_v34  ;;  %v16873_v6 = vrot.slane %v7904_v54, %v13869_v62  ;;  %v9918_v18 = vcombine.low %v9067_v43, %v9068_v49 }
 0x38e   : > { %v16855_v51 = vsel %vm4598_vm1, %v19482_v52, %v8590_v47  ;;  %v7485_v52 = vrot.slane %v7471_v59, %v19003_v33  ;;  %v7494_v24 = vrot.slane %v7478_v15, %v19003_v33  ;;  %v9909_v3 = vrot.slane %v9901_v5, %v14066_v60  ;;  %v19486_v59 = vld [vmem:[#allocation101_spill] sm:$0xff] }
 0x38f   : > { %19483 = vst [vmem:[#allocation81_spill] sm:$0xff] %v16855_v51  ;;  %v9065_v0 = vsel %vm4598_vm1, %v19484_v10, %v8602_v22  ;;  %v9066_v47 = vsel %vm4598_vm1, %v19485_v55, %v8606_v23  ;;  %v7486_v51 = vcombine.high %v7478_v15, %v7478_v15  ;;  %v6367_v55 = vadd.f32 %v19486_v59, %v16709_v9 }
 0x390   : > { %v9902_v48 = vcombine.low %v9065_v0, %v9066_v47  ;;  %v7487_v56 = vcombine.high %v7485_v52, %v7485_v52  ;;  %v7501_v22 = vrot.slane %v7485_v52, %v19003_v33  ;;  %v7516_v23 = vcombine.high %v7494_v24, %v7494_v24  ;;  %v6453_v0 = vpop.permute.xlu0 %6452  ;;  %v16887_v24 = vpop.permute.xlu1 %6268 }
 0x391   : > { %v7508_v10 = vrot.slane %v7486_v51, %v19003_v33  ;;  %v6487_v54 = vmul.f32 %v16319_v7, %v6441_v19 }
 0x392   : > { %v9916_v34 = vrot.slane %v9902_v48, %v14066_v60  ;;  %v7515_v43 = vrot.slane %v7487_v56, %v19003_v33  ;;  %v7517_v49 = vcombine.high %v7501_v22, %v7501_v22  ;;  %v8374_v52 = vrot.slane %v7516_v23, %v13869_v62 }
 0x393   : > { %v7518_v15 = vcombine.high %v7508_v10, %v7508_v10  ;;  %v8370_v5 = vrot.slane %v7508_v10, %v13869_v62  ;;  %v8382_v51 = vrot.slane %v7501_v22, %v13869_v62  ;;  %v6511_v48 = vadd.f32 %v6487_v54, %v6367_v55 }
 0x394   : > { %v9917_v47 = vcombine.low %v9909_v3, %v9916_v34  ;;  %v7519_v1 = vcombine.high %v7515_v43, %v7515_v43  ;;  %v8386_v19 = vrot.slane %v7515_v43, %v13869_v62  ;;  %v8390_v56 = vrot.slane %v7517_v49, %v13869_v62 }
 0x395   : > { %v8378_v9 = vrot.slane %v7518_v15, %v13869_v62  ;;  %v9007_v10 = vsel %vm4598_vm1, %v16513_v17, %v8370_v5  ;;  %v9008_v3 = vsel %vm4598_vm1, %v16531_v12, %v8374_v52  ;;  %v16899_v22 = vadd.f32 %v6329_v53, %v16524_v16 }
 0x396   : > { %10574 = vst.msk [vmem:[%s14466_s28 + $0xf0] sm:$0xff] %vm10543_vm2, %v9917_v47  ;;  %v8080_v34 = vcombine.high %v6511_v48, %v6511_v48  ;;  %v19488_v23 = vcombine.high %v16513_v17, %v16513_v17  ;;  %v19489_v55 = vcombine.high %v16531_v12, %v16531_v12  ;;  %v16911_v43 = vsel %vm4598_vm1, %v16521_v45, %v8386_v19 }
 0x397   : > { %19487 = vst [vmem:[#allocation79_spill] sm:$0xff] %v16899_v22  ;;  %v16915_v49 = vsel %vm4598_vm1, %v16540_v39, %v8390_v56  ;;  %v9459_v16 = vcombine.low %v9007_v10, %v9008_v3  ;;  %v8087_v15 = vrot.slane %v6511_v48, %v19003_v33  ;;  %v16921_v5 = vrot.slane %v9918_v18, %v14066_v60  ;;  %v16932_v10 = vpop.permute.xlu1 %6276  ;;  %v19490_v3 = vld [vmem:[#allocation86_spill] sm:$0xff] }
 0x398   : > { %v9009_v59 = vsel %vm4598_vm1, %v19488_v23, %v8378_v9  ;;  %v9010_v54 = vsel %vm4598_vm1, %v19489_v55, %v8382_v51  ;;  %v16924_v12 = vrot.slane %v7519_v1, %v13869_v62  ;;  %v8094_v47 = vrot.slane %v8080_v34, %v19003_v33  ;;  %v6465_v51 = vpop.permute.xlu0 %6464  ;;  %v19491_v23 = vld [vmem:[#allocation47_spill] sm:$0xff] }
 0x399   : > { %v9460_v53 = vcombine.low %v9009_v59, %v9010_v54  ;;  %v6330_v52 = vmul.f32 %v16771_v29, %v16785_v37  ;;  %v9467_v9 = vrot.slane %v9459_v16, %v14066_v60  ;;  %v8095_v56 = vcombine.high %v8087_v15, %v8087_v15 }
 0x39a   : > { %v8103_v48 = vrot.slane %v8087_v15, %v19003_v33  ;;  %v8096_v18 = vcombine.high %v8094_v47, %v8094_v47  ;;  %v8110_v1 = vrot.slane %v8094_v47, %v19003_v33  ;;  %v6210_v34 = vadd.f32 %v19491_v23, %v19490_v3 }
 0x39b   : > { %v9474_v19 = vrot.slane %v9460_v53, %v14066_v60  ;;  %v16938_v59 = vmul.f32 %v16319_v7, %v6453_v0  ;;  %v8117_v55 = vrot.slane %v8095_v56, %v19003_v33 }
 0x39c   : > { %v8125_v54 = vcombine.high %v8103_v48, %v8103_v48  ;;  %v8718_v16 = vrot.slane %v8103_v48, %v13869_v62  ;;  %v8124_v53 = vrot.slane %v8096_v18, %v19003_v33  ;;  %v8126_v15 = vcombine.high %v8110_v1, %v8110_v1  ;;  %v19495_v18 = vld [vmem:[#allocation164_spill] sm:$0xff] }
 0x39d   : > { %v9475_v37 = vcombine.low %v9467_v9, %v9474_v19  ;;  %v8734_v17 = vrot.slane %v8110_v1, %v13869_v62  ;;  %v16944_v22 = vadd.f32 %v6330_v52, %v6210_v34  ;;  %v8127_v47 = vcombine.high %v8117_v55, %v8117_v55  ;;  %v19493_v9 = vld [vmem:[#allocation100_spill] sm:$0xff]  ;;  %v19494_v19 = vld [vmem:[#allocation15_spill] sm:$0xff]  ;;  %v6397_v34 = vpop.permute.xlu0 %6396 }
 0x39e   : > { %v8722_v3 = vrot.slane %v8117_v55, %v13869_v62  ;;  %v8726_v0 = vrot.slane %v8125_v54, %v13869_v62  ;;  %v6212_v56 = vadd.f32 %v19494_v19, %v19493_v9  ;;  %v8738_v23 = vrot.slane %v8124_v53, %v13869_v62 }
 0x39f   : > { %19492 = vst [vmem:[#allocation95_spill] sm:$0xff] %v16944_v22  ;;  %10548 = vst.msk [vmem:[%s14466_s28 + $0x20] sm:$0xff] %vm10543_vm2, %v9475_v37  ;;  %v8742_v48 = vrot.slane %v8126_v15, %v13869_v62  ;;  %v19496_v39 = vcombine.high %v19495_v18, %v19495_v18  ;;  %v6332_v1 = vmul.f32 %v16771_v29, %v16829_v20  ;;  %v16967_v15 = vpop.permute.xlu1 %6284 }
 0x3a0   : > { %v8128_v37 = vcombine.high %v8124_v53, %v8124_v53  ;;  %v8730_v55 = vrot.slane %v8127_v47, %v13869_v62  ;;  %v9095_v54 = vsel %vm4598_vm1, %v16640_v46, %v8722_v3  ;;  %v9096_v9 = vsel %vm4598_vm1, %v16664_v50, %v8726_v0 }
 0x3a1   : > { %v16958_v52 = vsel %vm4598_vm1, %v19496_v39, %v8718_v16  ;;  %v19498_v19 = vcombine.high %v16664_v50, %v16664_v50  ;;  %v9099_v20 = vsel %vm4598_vm1, %v16661_v61, %v8738_v23  ;;  %v9100_v16 = vsel %vm4598_vm1, %v16670_v40, %v8742_v48 }
 0x3a2   : > { %19497 = vst [vmem:[#allocation67_spill] sm:$0xff] %v16958_v52  ;;  %v10173_v53 = vcombine.low %v9095_v54, %v9096_v9  ;;  %v19499_v47 = vcombine.high %v16640_v46, %v16640_v46  ;;  %v10190_v0 = vcombine.low %v9099_v20, %v9100_v16  ;;  %v19500_v52 = vld [vmem:[#allocation77_spill] sm:$0xff]  ;;  %v6493_v50 = vmul.f32 %v16319_v7, %v6465_v51 }
 0x3a3   : > { %v9098_v39 = vsel %vm4598_vm1, %v19498_v19, %v8734_v17  ;;  %v6373_v18 = vadd.f32 %v19500_v52, %v16763_v11  ;;  %v6356_v17 = vadd.f32 %v6332_v1, %v6212_v56  ;;  %v19501_v19 = vld [vmem:[#allocation57_spill] sm:$0xff]  ;;  %v6334_v48 = vmul.f32 %v16771_v29, %v16861_v42  ;;  %v6421_v52 = vpop.permute.xlu0 %6420 }
 0x3a4   : > { %v9097_v3 = vsel %vm4598_vm1, %v19499_v47, %v8730_v55  ;;  %v6214_v23 = vadd.f32 %v19501_v19, %v16014_v26  ;;  %v16989_v54 = vrot.slane %v8128_v37, %v13869_v62  ;;  %v10181_v46 = vrot.slane %v10173_v53, %v14066_v60 }
 0x3a5   : > { %v10174_v22 = vcombine.low %v9097_v3, %v9098_v39  ;;  %v16993_v55 = vrot.slane %v10190_v0, %v14066_v60  ;;  %v6517_v9 = vadd.f32 %v6493_v50, %v6373_v18  ;;  %v19502_v56 = vcombine.high %v16534_v58, %v16534_v58  ;;  %v17013_v58 = vpop.permute.xlu1 %6292 }
 0x3a6   : > { %v6358_v51 = vadd.f32 %v6334_v48, %v6214_v23  ;;  %v6476_v42 = vmul.f32 %v16319_v7, %v6397_v34  ;;  %v19503_v18 = vcombine.low %v16814_v4, %v16818_v27  ;;  %v6336_v39 = vmul.f32 %v16771_v29, %v16887_v24  ;;  %v19504_v34 = vld [vmem:[#allocation151_spill] sm:$0xff] }
 0x3a7   : > { %v10188_v11 = vrot.slane %v10174_v22, %v14066_v60  ;;  %v17001_v26 = vsel %vm4598_vm1, %v19502_v56, %v16822_v63  ;;  %v8304_v1 = vcombine.high %v6517_v9, %v6517_v9  ;;  %v8311_v37 = vrot.slane %v6517_v9, %v19003_v33 }
 0x3a8   : > { %v17009_v22 = vrot.slane %v19503_v18, %v14066_v60  ;;  %v6502_v20 = vadd.f32 %v16743_v36, %v6358_v51  ;;  %v17016_v16 = vadd.f32 %v6476_v42, %v6356_v17  ;;  %v6216_v53 = vadd.f32 %v19504_v34, %v16136_v30  ;;  %v19505_v36 = vld [vmem:[#allocation153_spill] sm:$0xff]  ;;  %v19506_v34 = vld [vmem:[#allocation28_spill] sm:$0xff] }
 0x3a9   : > { %v10189_v63 = vcombine.low %v10181_v46, %v10188_v11  ;;  %v8318_v47 = vrot.slane %v8304_v1, %v19003_v33  ;;  %v8319_v3 = vcombine.high %v8311_v37, %v8311_v37  ;;  %v8327_v4 = vrot.slane %v8311_v37, %v19003_v33 }
 0x3aa   : > { %v17023_v27 = vmul.f32 %v16319_v7, %v6421_v52  ;;  %v7744_v24 = vcombine.high %v6502_v20, %v6502_v20  ;;  %v7751_v0 = vrot.slane %v6502_v20, %v19003_v33  ;;  %v17028_v50 = vadd.f32 %v6336_v39, %v6216_v53  ;;  %v17044_v52 = vpop.permute.xlu1 %6300 }
 0x3ab   : > { %10590 = vst.msk [vmem:[%s14466_s28 + $0x170] sm:$0xff] %vm10543_vm2, %v10189_v63  ;;  %v17032_v17 = vadd.f32 %v19505_v36, %v16142_v25  ;;  %v8320_v30 = vcombine.high %v8318_v47, %v8318_v47  ;;  %v8334_v19 = vrot.slane %v8318_v47, %v19003_v33  ;;  %v8341_v23 = vrot.slane %v8319_v3, %v19003_v33 }
 0x3ac   : > { %v8349_v48 = vcombine.high %v8327_v4, %v8327_v4  ;;  %v8846_v7 = vrot.slane %v8327_v4, %v13869_v62  ;;  %v7758_v46 = vrot.slane %v7744_v24, %v19003_v33  ;;  %v7687_v9 = vrot.slane %v17016_v16, %v19003_v33 }
 0x3ad   : > { %v6338_v11 = vmul.f32 %v16771_v29, %v16932_v10  ;;  %v8348_v51 = vrot.slane %v8320_v30, %v19003_v33  ;;  %v8350_v25 = vcombine.high %v8334_v19, %v8334_v19  ;;  %v8351_v56 = vcombine.high %v8341_v23, %v8341_v23 }
 0x3ae   : > { %v8850_v42 = vrot.slane %v8341_v23, %v13869_v62  ;;  %v8854_v1 = vrot.slane %v8349_v48, %v13869_v62  ;;  %v8862_v37 = vrot.slane %v8334_v19, %v13869_v62  ;;  %v7759_v18 = vcombine.high %v7751_v0, %v7751_v0 }
 0x3af   : > { %v7767_v39 = vrot.slane %v7751_v0, %v19003_v33  ;;  %v8858_v63 = vrot.slane %v8351_v56, %v13869_v62  ;;  %v8866_v20 = vrot.slane %v8348_v51, %v13869_v62  ;;  %v8870_v10 = vrot.slane %v8350_v25, %v13869_v62 }
 0x3b0   : > { %v7760_v16 = vcombine.high %v7758_v46, %v7758_v46  ;;  %v19507_v53 = vcombine.high %v19506_v34, %v19506_v34  ;;  %v9127_v3 = vsel %vm4598_vm1, %v16724_v13, %v8850_v42  ;;  %v9128_v4 = vsel %vm4598_vm1, %v16736_v21, %v8854_v1 }
 0x3b1   : > { %v7774_v24 = vrot.slane %v7758_v46, %v19003_v33  ;;  %v19508_v0 = vcombine.high %v16724_v13, %v16724_v13  ;;  %v19509_v30 = vcombine.high %v16736_v21, %v16736_v21  ;;  %v9131_v23 = vsel %vm4598_vm1, %v16733_v57, %v8866_v20 }
 0x3b2   : > { %v17056_v47 = vsel %vm4598_vm1, %v19507_v53, %v8846_v7  ;;  %v9132_v48 = vsel %vm4598_vm1, %v16747_v35, %v8870_v10  ;;  %v8352_v7 = vcombine.high %v8348_v51, %v8348_v51  ;;  %v10445_v25 = vcombine.low %v9127_v3, %v9128_v4  ;;  %v6309_v53 = vpop.permute.xlu1 %6308 }
 0x3b3   : > { %v9129_v36 = vsel %vm4598_vm1, %v19508_v0, %v8858_v63  ;;  %v9130_v19 = vsel %vm4598_vm1, %v19509_v30, %v8862_v37  ;;  %v7781_v46 = vrot.slane %v7759_v18, %v19003_v33  ;;  %v10462_v42 = vcombine.low %v9131_v23, %v9132_v48 }
 0x3b4   : > { %v10446_v56 = vcombine.low %v9129_v36, %v9130_v19  ;;  %v7788_v13 = vrot.slane %v7760_v16, %v19003_v33  ;;  %v7789_v1 = vcombine.high %v7767_v39, %v7767_v39  ;;  %v7790_v63 = vcombine.high %v7774_v24, %v7774_v24 }
 0x3b5   : > { %v10453_v21 = vrot.slane %v10445_v25, %v14066_v60  ;;  %v7791_v20 = vcombine.high %v7781_v46, %v7781_v46  ;;  %v8526_v0 = vrot.slane %v7767_v39, %v13869_v62  ;;  %v8530_v51 = vrot.slane %v7781_v46, %v13869_v62 }
 0x3b6   : > { %v10460_v37 = vrot.slane %v10446_v56, %v14066_v60  ;;  %v7792_v10 = vcombine.high %v7788_v13, %v7788_v13  ;;  %v8534_v3 = vrot.slane %v7789_v1, %v13869_v62  ;;  %v8542_v18 = vrot.slane %v7774_v24, %v13869_v62  ;;  %v6445_v24 = vpop.permute.xlu0 %6444 }
 0x3b7   : > { %v8538_v16 = vrot.slane %v7791_v20, %v13869_v62  ;;  %v8546_v36 = vrot.slane %v7788_v13, %v13869_v62  ;;  %v8550_v30 = vrot.slane %v7790_v63, %v13869_v62  ;;  %v17087_v19 = vrot.slane %v8352_v7, %v13869_v62  ;;  %v19512_v20 = vld [vmem:[#allocation139_spill] sm:$0xff] }
 0x3b8   : > { %v10461_v4 = vcombine.low %v10453_v21, %v10460_v37  ;;  %v17090_v23 = vrot.slane %v10462_v42, %v14066_v60  ;;  %v9047_v39 = vsel %vm4598_vm1, %v16558_v44, %v8530_v51  ;;  %v9048_v48 = vsel %vm4598_vm1, %v16577_v28, %v8534_v3  ;;  %v6317_v37 = vpop.permute.xlu1 %6316 }
 0x3b9   : > { %v19510_v25 = vcombine.high %v16558_v44, %v16558_v44  ;;  %v19511_v7 = vcombine.high %v16577_v28, %v16577_v28  ;;  %v17108_v42 = vsel %vm4598_vm1, %v16561_v38, %v8546_v36  ;;  %v17112_v13 = vsel %vm4598_vm1, %v16580_v14, %v8550_v30 }
 0x3ba   : > { %10606 = vst.msk [vmem:[%s14466_s28 + $0x1f0] sm:$0xff] %vm10543_vm2, %v10461_v4  ;;  %v9765_v1 = vcombine.low %v9047_v39, %v9048_v48  ;;  %v9782_v44 = vcombine.low %v17108_v42, %v17112_v13  ;;  %v7694_v21 = vrot.slane %v7687_v9, %v19003_v33  ;;  %v17118_v28 = vrot.slane %v7792_v10, %v13869_v62  ;;  %v19514_v4 = vld [vmem:[#allocation155_spill] sm:$0xff] }
 0x3bb   : > { %v9049_v56 = vsel %vm4598_vm1, %v19510_v25, %v8538_v16  ;;  %v9050_v46 = vsel %vm4598_vm1, %v19511_v7, %v8542_v18  ;;  %v19513_v51 = vcombine.high %v19512_v20, %v19512_v20  ;;  %v6362_v18 = vadd.f32 %v6338_v11, %v17032_v17 }
 0x3bc   : > { %v9766_v63 = vcombine.low %v9049_v56, %v9050_v46  ;;  %v6220_v16 = vadd.f32 %v19514_v4, %v16294_v2  ;;  %v9773_v36 = vrot.slane %v9765_v1, %v14066_v60  ;;  %v8494_v9 = vrot.slane %v7694_v21, %v13869_v62  ;;  %v19516_v2 = vld [vmem:[#allocation75_spill] sm:$0xff]  ;;  %v19519_v21 = vld [vmem:[#allocation9_spill] sm:$0xff] }
 0x3bd   : > { %v17124_v3 = vsel %vm4598_vm1, %v19513_v51, %v8526_v0  ;;  %v6340_v10 = vmul.f32 %v16771_v29, %v16967_v15  ;;  %v6506_v39 = vadd.f32 %v17023_v27, %v6362_v18  ;;  %v19515_v0 = vcombine.high %v16611_v31, %v16611_v31  ;;  %v6469_v27 = vpop.permute.xlu0 %6468  ;;  %v19518_v46 = vld [vmem:[#allocation39_spill] sm:$0xff] }
 0x3be   : > { %v9780_v30 = vrot.slane %v9766_v63, %v14066_v60  ;;  %v6222_v11 = vadd.f32 %v19516_v2, %v16308_v32  ;;  %v6342_v48 = vmul.f32 %v16771_v29, %v17013_v58  ;;  %v19517_v56 = vcombine.high %v16551_v41, %v16551_v41  ;;  %v17161_v41 = vld [vmem:[%s17857_s3 + $0x3] ss:$0 sm:$0xff]  ;;  %v19520_v51 = vld [vmem:[#allocation83_spill] sm:$0xff] }
 0x3bf   : > { %v9069_v17 = vsel %vm4598_vm1, %v19515_v0, %v16873_v6  ;;  %v6364_v7 = vadd.f32 %v6340_v10, %v6220_v16  ;;  %v6224_v1 = vadd.f32 %v19518_v46, %v16314_v8  ;;  %v7911_v6 = vrot.slane %v6506_v39, %v19003_v33  ;;  %v6325_v16 = vpop.permute.xlu1 %6324  ;;  %v19524_v46 = vld [vmem:[#allocation59_spill] sm:$0xff] }
 0x3c0   : > { %v9781_v25 = vcombine.low %v9773_v36, %v9780_v30  ;;  %v9038_v15 = vsel %vm4598_vm1, %v19517_v56, %v8494_v9  ;;  %v17152_v63 = vadd.f32 %v6342_v48, %v6222_v11  ;;  %v6344_v32 = vmul.f32 %v16771_v29, %v17044_v52 }
 0x3c1   : > { %v9647_v31 = vcombine.low %v17001_v26, %v9038_v15  ;;  %v6488_v58 = vmul.f32 %v17161_v41, %v6445_v24  ;;  %v6508_v8 = vadd.f32 %v19519_v21, %v6364_v7  ;;  %v19521_v26 = vld [vmem:[#allocation122_spill] sm:$0xff]  ;;  %v6346_v4 = vmul.f32 %v16771_v29, %v6309_v53 }
 0x3c2   : > { %10566 = vst.msk [vmem:[%s14466_s28 + $0xb0] sm:$0xff] %vm10543_vm2, %v9781_v25  ;;  %v6226_v18 = vadd.f32 %v19521_v26, %v19520_v51  ;;  %v7918_v52 = vrot.slane %v7911_v6, %v19003_v33  ;;  %v17171_v30 = vmul.f32 %v17161_v41, %v6469_v27  ;;  %v6368_v9 = vadd.f32 %v6344_v32, %v6224_v1  ;;  %v19523_v27 = vld [vmem:[#allocation70_spill] sm:$0xff]  ;;  %v19528_v32 = vld [vmem:[#allocation41_spill] sm:$0xff] }
 0x3c3   : > { %v9661_v36 = vrot.slane %v9647_v31, %v14066_v60  ;;  %v7968_v10 = vcombine.high %v6508_v8, %v6508_v8  ;;  %v7975_v24 = vrot.slane %v6508_v8, %v19003_v33  ;;  %v19522_v39 = vcombine.high %v16661_v61, %v16661_v61  ;;  %v19525_v61 = vld [vmem:[#allocation65_spill] sm:$0xff] }
 0x3c4   : > { %v6370_v53 = vadd.f32 %v6346_v4, %v6226_v18  ;;  %v8622_v11 = vrot.slane %v7918_v52, %v13869_v62  ;;  %v6512_v48 = vadd.f32 %v6488_v58, %v6368_v9  ;;  %v6348_v25 = vmul.f32 %v16771_v29, %v6317_v37  ;;  %v19527_v37 = vld [vmem:[#allocation159_spill] sm:$0xff]  ;;  %v17200_v18 = vpop.permute.xlu1 %6380 }
 0x3c5   : > { %v17179_v0 = vsel %vm4598_vm1, %v19522_v39, %v16989_v54  ;;  %v9662_v2 = vcombine.low %v17009_v22, %v9661_v36  ;;  %v7982_v56 = vrot.slane %v7968_v10, %v19003_v33  ;;  %v7983_v15 = vcombine.high %v7975_v24, %v7975_v24 }
 0x3c6   : > { %v7991_v7 = vrot.slane %v7975_v24, %v19003_v33  ;;  %v6228_v1 = vadd.f32 %v19524_v46, %v19523_v27  ;;  %v19526_v54 = vcombine.high %v19525_v61, %v19525_v61  ;;  %v8135_v31 = vrot.slane %v6512_v48, %v19003_v33  ;;  %v19530_v46 = vld [vmem:[#allocation38_spill] sm:$0xff] }
 0x3c7   : > { %10559 = vst.msk [vmem:[%s14466_s28 + $0x78] sm:$0xff] %vm10543_vm2, %v9662_v2  ;;  %v6514_v6 = vadd.f32 %v16938_v59, %v6370_v53  ;;  %v6230_v58 = vadd.f32 %v19528_v32, %v19527_v37  ;;  %v7984_v8 = vcombine.high %v7982_v56, %v7982_v56  ;;  %v7998_v51 = vrot.slane %v7982_v56, %v19003_v33 }
 0x3c8   : > { %v9070_v22 = vsel %vm4598_vm1, %v19526_v54, %v8622_v11  ;;  %v8005_v26 = vrot.slane %v7983_v15, %v19003_v33  ;;  %v8013_v4 = vcombine.high %v7991_v7, %v7991_v7  ;;  %v8654_v36 = vrot.slane %v7991_v7, %v13869_v62  ;;  %v19529_v7 = vld [vmem:[#allocation3_spill] sm:$0xff] }
 0x3c9   : > { %v9919_v21 = vcombine.low %v9069_v17, %v9070_v22  ;;  %v17203_v52 = vadd.f32 %v6348_v25, %v6228_v1  ;;  %v6350_v9 = vmul.f32 %v16771_v29, %v6325_v16  ;;  %v8012_v10 = vrot.slane %v7984_v8, %v19003_v33  ;;  %v19534_v8 = vld [vmem:[#allocation129_spill] sm:$0xff] }
 0x3ca   : > { %v8014_v17 = vcombine.high %v7998_v51, %v7998_v51  ;;  %v8015_v24 = vcombine.high %v8005_v26, %v8005_v26  ;;  %v8658_v39 = vrot.slane %v8005_v26, %v13869_v62  ;;  %v8662_v53 = vrot.slane %v8013_v4, %v13869_v62 }
 0x3cb   : > { %v9933_v59 = vrot.slane %v9919_v21, %v14066_v60  ;;  %v8670_v2 = vrot.slane %v7998_v51, %v13869_v62  ;;  %v8142_v11 = vrot.slane %v8135_v31, %v19003_v33  ;;  %v8674_v29 = vrot.slane %v8012_v10, %v13869_v62  ;;  %v19533_v31 = vld [vmem:[#allocation91_spill] sm:$0xff]  ;;  %v6389_v21 = vpop.permute.xlu1 %6388 }
 0x3cc   : > { %v8666_v25 = vrot.slane %v8015_v24, %v13869_v62  ;;  %v8192_v16 = vcombine.high %v6514_v6, %v6514_v6  ;;  %v8016_v56 = vcombine.high %v8012_v10, %v8012_v10  ;;  %v8678_v15 = vrot.slane %v8014_v17, %v13869_v62 }
 0x3cd   : > { %v9934_v48 = vcombine.low %v16921_v5, %v9933_v59  ;;  %v9079_v27 = vsel %vm4598_vm1, %v19529_v7, %v8658_v39  ;;  %v9080_v1 = vsel %vm4598_vm1, %v19530_v46, %v8662_v53  ;;  %v19531_v61 = vcombine.high %v19529_v7, %v19529_v7 }
 0x3ce   : > { %v19532_v54 = vcombine.high %v19530_v46, %v19530_v46  ;;  %v17232_v37 = vsel %vm4598_vm1, %v19533_v31, %v8674_v29  ;;  %v10037_v32 = vcombine.low %v9079_v27, %v9080_v1  ;;  %v17236_v51 = vsel %vm4598_vm1, %v19534_v8, %v8678_v15 }
 0x3cf   : > { %10575 = vst.msk [vmem:[%s14466_s28 + $0xf8] sm:$0xff] %vm10543_vm2, %v9934_v48  ;;  %v9081_v5 = vsel %vm4598_vm1, %v19531_v61, %v8666_v25  ;;  %v8750_v4 = vrot.slane %v8142_v11, %v13869_v62  ;;  %v8199_v59 = vrot.slane %v6514_v6, %v19003_v33  ;;  %v10054_v17 = vcombine.low %v17232_v37, %v17236_v51  ;;  %v19536_v6 = vld [vmem:[#allocation105_spill] sm:$0xff] }
 0x3d0   : > { %v9082_v22 = vsel %vm4598_vm1, %v19532_v54, %v8670_v2  ;;  %v10045_v10 = vrot.slane %v10037_v32, %v14066_v60  ;;  %v8206_v24 = vrot.slane %v8192_v16, %v19003_v33  ;;  %v6374_v39 = vadd.f32 %v6350_v9, %v6230_v58 }
 0x3d1   : > { %v10038_v26 = vcombine.low %v9081_v5, %v9082_v22  ;;  %v19535_v2 = vcombine.high %v16670_v40, %v16670_v40  ;;  %v8207_v25 = vcombine.high %v8199_v59, %v8199_v59  ;;  %v17250_v11 = vrot.slane %v8199_v59, %v19003_v33  ;;  %v6401_v5 = vpop.permute.xlu1 %6400 }
 0x3d2   : > { %v19537_v29 = vcombine.high %v19536_v6, %v19536_v6  ;;  %v8208_v9 = vcombine.high %v8206_v24, %v8206_v24  ;;  %v8222_v16 = vrot.slane %v8206_v24, %v19003_v33  ;;  %v17261_v40 = vrot.slane %v8016_v56, %v13869_v62 }
 0x3d3   : > { %v10052_v53 = vrot.slane %v10038_v26, %v14066_v60  ;;  %v9102_v48 = vsel %vm4598_vm1, %v19535_v2, %v8750_v4  ;;  %v8229_v27 = vrot.slane %v8207_v25, %v19003_v33  ;;  %v8237_v46 = vcombine.high %v17250_v11, %v17250_v11  ;;  %v19538_v2 = vld [vmem:[#allocation104_spill] sm:$0xff]  ;;  %v19539_v25 = vld [vmem:[#allocation102_spill] sm:$0xff] }
 0x3d4   : > { %v17256_v15 = vsel %vm4598_vm1, %v19537_v29, %v8654_v36  ;;  %v10191_v58 = vcombine.low %v17179_v0, %v9102_v48  ;;  %v17268_v61 = vrot.slane %v8208_v9, %v19003_v33  ;;  %v8238_v36 = vcombine.high %v8222_v16, %v8222_v16  ;;  %v19541_v29 = vld [vmem:[#allocation74_spill] sm:$0xff]  ;;  %v19542_v9 = vld [vmem:[#allocation72_spill] sm:$0xff] }
 0x3d5   : > { %v10053_v7 = vcombine.low %v10045_v10, %v10052_v53  ;;  %v8798_v0 = vrot.slane %v8222_v16, %v13869_v62  ;;  %v8239_v56 = vcombine.high %v8229_v27, %v8229_v27  ;;  %v8786_v54 = vrot.slane %v8229_v27, %v13869_v62 }
 0x3d6   : > { %v10205_v1 = vrot.slane %v10191_v58, %v14066_v60  ;;  %v8790_v22 = vrot.slane %v8237_v46, %v13869_v62  ;;  %v6518_v32 = vadd.f32 %v17171_v30, %v6374_v39  ;;  %v8782_v4 = vrot.slane %v17250_v11, %v13869_v62 }
 0x3d7   : > { %10582 = vst.msk [vmem:[%s14466_s28 + $0x130] sm:$0xff] %vm10543_vm2, %v10053_v7  ;;  %v8802_v59 = vrot.slane %v17268_v61, %v13869_v62  ;;  %v8806_v10 = vrot.slane %v8238_v36, %v13869_v62  ;;  %v8240_v24 = vcombine.high %v17268_v61, %v17268_v61  ;;  %v8794_v53 = vrot.slane %v8239_v56, %v13869_v62 }
 0x3d8   : > { %v10206_v26 = vcombine.low %v16993_v55, %v10205_v1  ;;  %v9111_v48 = vsel %vm4598_vm1, %v19538_v2, %v8786_v54  ;;  %v9112_v30 = vsel %vm4598_vm1, %v19539_v25, %v8790_v22  ;;  %v19540_v55 = vcombine.high %v19539_v25, %v19539_v25 }
 0x3d9   : > { %v17297_v58 = vsel %vm4598_vm1, %v19541_v29, %v8802_v59  ;;  %v17301_v16 = vsel %vm4598_vm1, %v19542_v9, %v8806_v10  ;;  %v10309_v7 = vcombine.low %v9111_v48, %v9112_v30  ;;  %v19543_v27 = vcombine.high %v19538_v2, %v19538_v2  ;;  %v19546_v59 = vld [vmem:[#allocation130_spill] sm:$0xff]  ;;  %v6413_v2 = vpop.permute.xlu1 %6412 }
 0x3da   : > { %10591 = vst.msk [vmem:[%s14466_s28 + $0x178] sm:$0xff] %vm10543_vm2, %v10206_v26  ;;  %v9114_v39 = vsel %vm4598_vm1, %v19540_v55, %v8798_v0  ;;  %v10326_v1 = vcombine.low %v17297_v58, %v17301_v16  ;;  %v8359_v36 = vrot.slane %v6518_v32, %v19003_v33  ;;  %v19544_v0 = vcombine.high %v16733_v57, %v16733_v57  ;;  %v19545_v26 = vld [vmem:[#allocation61_spill] sm:$0xff] }
 0x3db   : > { %v9113_v46 = vsel %vm4598_vm1, %v19543_v27, %v8794_v53  ;;  %v10317_v22 = vrot.slane %v10309_v7, %v14066_v60  ;;  %v6352_v10 = vadd.f32 %v19546_v59, %v19545_v26  ;;  %v6472_v53 = vmul.f32 %v17161_v41, %v17200_v18  ;;  %v19550_v7 = vld [vmem:[#allocation136_spill] sm:$0xff] }
 0x3dc   : > { %v9133_v56 = vsel %vm4598_vm1, %v19544_v0, %v17087_v19  ;;  %v10310_v54 = vcombine.low %v9113_v46, %v9114_v39  ;;  %v8366_v48 = vrot.slane %v8359_v36, %v19003_v33  ;;  %v19547_v32 = vcombine.high %v16521_v45, %v16521_v45  ;;  %v19549_v39 = vld [vmem:[#allocation92_spill] sm:$0xff] }
 0x3dd   : > { %v19548_v19 = vcombine.low %v16911_v43, %v16915_v49  ;;  %v6474_v30 = vmul.f32 %v17161_v41, %v6389_v21  ;;  %v6496_v18 = vadd.f32 %v6472_v53, %v6352_v10  ;;  %v6357_v27 = vadd.f32 %v19550_v7, %v19549_v39  ;;  %v19552_v43 = vld [vmem:[#allocation30_spill] sm:$0xff] }
 0x3de   : > { %v9013_v57 = vsel %vm4598_vm1, %v19547_v32, %v16924_v12  ;;  %v10324_v55 = vrot.slane %v10310_v54, %v14066_v60  ;;  %v6477_v46 = vmul.f32 %v17161_v41, %v6401_v5  ;;  %v8878_v45 = vrot.slane %v8366_v48, %v13869_v62  ;;  %v19551_v12 = vld [vmem:[#allocation95_spill] sm:$0xff]  ;;  %v19553_v49 = vld [vmem:[#allocation106_spill] sm:$0xff] }
 0x3df   : > { %v17330_v25 = vrot.slane %v19548_v19, %v14066_v60  ;;  %v6498_v36 = vadd.f32 %v6474_v30, %v19551_v12  ;;  %v6480_v0 = vmul.f32 %v17161_v41, %v6413_v2  ;;  %v17342_v26 = vadd.f32 %v19553_v49, %v19552_v43 }
 0x3e0   : > { %v10325_v21 = vcombine.low %v10317_v22, %v10324_v55  ;;  %v7520_v59 = vcombine.high %v6496_v18, %v6496_v18  ;;  %v7527_v54 = vrot.slane %v6496_v18, %v19003_v33  ;;  %v17345_v10 = vadd.f32 %v6477_v46, %v6357_v27 }
 0x3e1   : > { %v19554_v53 = vcombine.high %v16747_v35, %v16747_v35  ;;  %v7583_v48 = vcombine.high %v6498_v36, %v6498_v36  ;;  %v7590_v32 = vrot.slane %v6498_v36, %v19003_v33  ;;  %v17353_v2 = vadd.f32 %v6480_v0, %v17028_v50 }
 0x3e2   : > { %10598 = vst.msk [vmem:[%s14466_s28 + $0x1b0] sm:$0xff] %vm10543_vm2, %v10325_v21  ;;  %v7534_v22 = vrot.slane %v7520_v59, %v19003_v33  ;;  %v7535_v30 = vcombine.high %v7527_v54, %v7527_v54  ;;  %v7543_v55 = vrot.slane %v7527_v54, %v19003_v33  ;;  %v7695_v7 = vcombine.high %v17345_v10, %v17345_v10 }
 0x3e3   : > { %v9134_v5 = vsel %vm4598_vm1, %v19554_v53, %v8878_v45  ;;  %v7597_v18 = vrot.slane %v7583_v48, %v19003_v33  ;;  %v7598_v39 = vcombine.high %v7590_v32, %v7590_v32  ;;  %v7606_v35 = vrot.slane %v7590_v32, %v19003_v33  ;;  %v19555_v48 = vld [vmem:[#allocation98_spill] sm:$0xff] }
 0x3e4   : > { %v10463_v19 = vcombine.low %v9133_v56, %v9134_v5  ;;  %v7536_v50 = vcombine.high %v7534_v22, %v7534_v22  ;;  %v7550_v46 = vrot.slane %v7534_v22, %v19003_v33  ;;  %v7557_v56 = vrot.slane %v7535_v30, %v19003_v33 }
 0x3e5   : > { %v7565_v45 = vcombine.high %v7543_v55, %v7543_v55  ;;  %v8398_v12 = vrot.slane %v7543_v55, %v13869_v62  ;;  %v7599_v36 = vcombine.high %v7597_v18, %v7597_v18  ;;  %v7613_v0 = vrot.slane %v7597_v18, %v19003_v33  ;;  %v19557_v18 = vld [vmem:[#allocation125_spill] sm:$0xff] }
 0x3e6   : > { %v10477_v27 = vrot.slane %v10463_v19, %v14066_v60  ;;  %v7564_v49 = vrot.slane %v7536_v50, %v19003_v33  ;;  %v7566_v21 = vcombine.high %v7550_v46, %v7550_v46  ;;  %v7567_v59 = vcombine.high %v7557_v56, %v7557_v56  ;;  %v19558_v50 = vld [vmem:[#allocation134_spill] sm:$0xff] }
 0x3e7   : > { %v8402_v54 = vrot.slane %v7557_v56, %v13869_v62  ;;  %v8406_v53 = vrot.slane %v7565_v45, %v13869_v62  ;;  %v8414_v5 = vrot.slane %v7550_v46, %v13869_v62  ;;  %v19556_v32 = vcombine.high %v19555_v48, %v19555_v48  ;;  %v19562_v48 = vld [vmem:[#allocation132_spill] sm:$0xff] }
 0x3e8   : > { %v10478_v43 = vcombine.low %v17090_v23, %v10477_v27  ;;  %v7568_v22 = vcombine.high %v7564_v49, %v7564_v49  ;;  %v8410_v23 = vrot.slane %v7567_v59, %v13869_v62  ;;  %v8418_v30 = vrot.slane %v7564_v49, %v13869_v62  ;;  %v19561_v59 = vld [vmem:[#allocation63_spill] sm:$0xff] }
 0x3e9   : > { %v9014_v19 = vsel %vm4598_vm1, %v19556_v32, %v8398_v12  ;;  %v8422_v55 = vrot.slane %v7566_v21, %v13869_v62  ;;  %v9015_v27 = vsel %vm4598_vm1, %v19557_v18, %v8402_v54  ;;  %v9016_v46 = vsel %vm4598_vm1, %v19558_v50, %v8406_v53 }
 0x3ea   : > { %10607 = vst.msk [vmem:[%s14466_s28 + $0x1f8] sm:$0xff] %vm10543_vm2, %v10478_v43  ;;  %v19559_v56 = vcombine.high %v19558_v50, %v19558_v50  ;;  %v9477_v12 = vcombine.low %v9013_v57, %v9014_v19  ;;  %v17391_v43 = vrot.slane %v7568_v22, %v13869_v62  ;;  %v19560_v49 = vcombine.high %v19557_v18, %v19557_v18 }
 0x3eb   : > { %v17399_v54 = vsel %vm4598_vm1, %v19561_v59, %v8418_v30  ;;  %v17403_v53 = vsel %vm4598_vm1, %v19562_v48, %v8422_v55  ;;  %v7620_v22 = vrot.slane %v7598_v39, %v19003_v33  ;;  %v7628_v18 = vcombine.high %v7606_v35, %v7606_v35 }
 0x3ec   : > { %v9018_v45 = vsel %vm4598_vm1, %v19559_v56, %v8414_v5  ;;  %v9017_v21 = vsel %vm4598_vm1, %v19560_v49, %v8410_v23  ;;  %v9491_v32 = vrot.slane %v9477_v12, %v14066_v60  ;;  %v9493_v5 = vcombine.low %v9015_v27, %v9016_v46 }
 0x3ed   : > { %v9494_v57 = vcombine.low %v9017_v21, %v9018_v45  ;;  %v9510_v19 = vcombine.low %v17399_v54, %v17403_v53  ;;  %v7627_v23 = vrot.slane %v7599_v36, %v19003_v33  ;;  %v7629_v50 = vcombine.high %v7613_v0, %v7613_v0  ;;  %v19563_v36 = vld [vmem:[#allocation131_spill] sm:$0xff] }
 0x3ee   : > { %v9492_v30 = vcombine.low %v17330_v25, %v9491_v32  ;;  %v9501_v56 = vrot.slane %v9493_v5, %v14066_v60  ;;  %v8446_v27 = vrot.slane %v7613_v0, %v13869_v62  ;;  %v7630_v46 = vcombine.high %v7620_v22, %v7620_v22 }
 0x3ef   : > { %v9508_v55 = vrot.slane %v9494_v57, %v14066_v60  ;;  %v7631_v45 = vcombine.high %v7627_v23, %v7627_v23  ;;  %v8434_v12 = vrot.slane %v7620_v22, %v13869_v62  ;;  %v8438_v49 = vrot.slane %v7628_v18, %v13869_v62  ;;  %v19565_v57 = vld [vmem:[#allocation23_spill] sm:$0xff] }
 0x3f0   : > { %10549 = vst.msk [vmem:[%s14466_s28 + $0x28] sm:$0xff] %vm10543_vm2, %v9492_v30  ;;  %v8450_v35 = vrot.slane %v7627_v23, %v13869_v62  ;;  %v8454_v25 = vrot.slane %v7629_v50, %v13869_v62  ;;  %v19564_v21 = vcombine.high %v19563_v36, %v19563_v36  ;;  %v8442_v0 = vrot.slane %v7630_v46, %v13869_v62  ;;  %v19566_v23 = vld [vmem:[#allocation137_spill] sm:$0xff]  ;;  %v19567_v30 = vld [vmem:[#allocation32_spill] sm:$0xff] }
 0x3f1   : > { %v9509_v39 = vcombine.low %v9501_v56, %v9508_v55  ;;  %v8458_v5 = vrot.slane %v7631_v45, %v13869_v62  ;;  %v9023_v22 = vsel %vm4598_vm1, %v19565_v57, %v8434_v12  ;;  %v9024_v18 = vsel %vm4598_vm1, %v19563_v36, %v8438_v49 }
 0x3f2   : > { %v9026_v32 = vsel %vm4598_vm1, %v19564_v21, %v8446_v27  ;;  %v9027_v50 = vsel %vm4598_vm1, %v19566_v23, %v8450_v35  ;;  %v9028_v56 = vsel %vm4598_vm1, %v19567_v30, %v8454_v25  ;;  %v9595_v55 = vcombine.low %v9023_v22, %v9024_v18  ;;  %v19570_v21 = vld [vmem:[#allocation7_spill] sm:$0xff] }
 0x3f3   : > { %10550 = vst.msk [vmem:[%s14466_s28 + $0x30] sm:$0xff] %vm10543_vm2, %v9509_v39  ;;  %v7702_v27 = vrot.slane %v17345_v10, %v19003_v33  ;;  %v19568_v46 = vcombine.high %v19565_v57, %v19565_v57  ;;  %v19569_v12 = vcombine.high %v19566_v23, %v19566_v23  ;;  %v9612_v39 = vcombine.low %v9027_v50, %v9028_v56 }
 0x3f4   : > { %v7709_v35 = vrot.slane %v7695_v7, %v19003_v33  ;;  %v9603_v36 = vrot.slane %v9595_v55, %v14066_v60  ;;  %v7807_v7 = vcombine.high %v17353_v2, %v17353_v2  ;;  %v19627_v53 = vcombine.high %v19541_v29, %v19541_v29 }
 0x3f5   : > { %v9025_v45 = vsel %vm4598_vm1, %v19568_v46, %v8442_v0  ;;  %v9029_v49 = vsel %vm4598_vm1, %v19569_v12, %v8458_v5  ;;  %v7710_v18 = vcombine.high %v7702_v27, %v7702_v27  ;;  %v9620_v57 = vrot.slane %v9612_v39, %v14066_v60 }
 0x3f6   : > { %v9596_v25 = vcombine.low %v9025_v45, %v9026_v32  ;;  %v9613_v22 = vcombine.low %v9029_v49, %v19570_v21  ;;  %v7711_v0 = vcombine.high %v7709_v35, %v7709_v35  ;;  %v7718_v30 = vrot.slane %v7702_v27, %v19003_v33  ;;  %v6425_v27 = vpop.permute.xlu1 %6424 }
 0x3f7   : > { %v7725_v23 = vrot.slane %v7709_v35, %v19003_v33  ;;  %v7732_v10 = vrot.slane %v7710_v18, %v19003_v33 }
 0x3f8   : > { %v9610_v5 = vrot.slane %v9596_v25, %v14066_v60  ;;  %v9627_v50 = vrot.slane %v9613_v22, %v14066_v60  ;;  %v7739_v32 = vrot.slane %v7711_v0, %v19003_v33  ;;  %v7740_v56 = vcombine.high %v7718_v30, %v7718_v30  ;;  %v19571_v0 = vld [vmem:[#allocation99_spill] sm:$0xff] }
 0x3f9   : > { %v7741_v55 = vcombine.high %v7725_v23, %v7725_v23  ;;  %v8510_v46 = vrot.slane %v7725_v23, %v13869_v62  ;;  %v7742_v49 = vcombine.high %v7732_v10, %v7732_v10  ;;  %v8498_v39 = vrot.slane %v7732_v10, %v13869_v62 }
 0x3fa   : > { %v9611_v45 = vcombine.low %v9603_v36, %v9610_v5  ;;  %v9628_v12 = vcombine.low %v9620_v57, %v9627_v50  ;;  %v7743_v35 = vcombine.high %v7739_v32, %v7739_v32  ;;  %v8502_v25 = vrot.slane %v7740_v56, %v13869_v62  ;;  %v19572_v57 = vld [vmem:[#allocation117_spill] sm:$0xff] }
 0x3fb   : > { %v8514_v21 = vrot.slane %v7739_v32, %v13869_v62  ;;  %v8518_v22 = vrot.slane %v7741_v55, %v13869_v62  ;;  %v8506_v18 = vrot.slane %v7742_v49, %v13869_v62  ;;  %v9039_v36 = vsel %vm4598_vm1, %v19571_v0, %v8498_v39  ;;  %v19574_v32 = vld [vmem:[#allocation82_spill] sm:$0xff] }
 0x3fc   : > { %10556 = vst.msk [vmem:[%s14466_s28 + $0x60] sm:$0xff] %vm10543_vm2, %v9611_v45  ;;  %10557 = vst.msk [vmem:[%s14466_s28 + $0x68] sm:$0xff] %vm10543_vm2, %v9628_v12  ;;  %v19573_v30 = vcombine.high %v19572_v57, %v19572_v57  ;;  %v7814_v5 = vrot.slane %v17353_v2, %v19003_v33  ;;  %v8522_v50 = vrot.slane %v7743_v35, %v13869_v62 }
 0x3fd   : > { %v9040_v10 = vsel %vm4598_vm1, %v19572_v57, %v8502_v25  ;;  %v9043_v56 = vsel %vm4598_vm1, %v19574_v32, %v8514_v21  ;;  %v9044_v55 = vsel %vm4598_vm1, %v19512_v20, %v8518_v22  ;;  %v19575_v45 = vcombine.high %v19571_v0, %v19571_v0 }
 0x3fe   : > { %v9042_v23 = vsel %vm4598_vm1, %v19573_v30, %v8510_v46  ;;  %v9731_v46 = vcombine.low %v9039_v36, %v9040_v10  ;;  %v9748_v49 = vcombine.low %v9043_v56, %v9044_v55  ;;  %v7821_v2 = vrot.slane %v7807_v7, %v19003_v33  ;;  %v6437_v30 = vpop.permute.xlu1 %6436 }
 0x3ff   : > { %v9041_v12 = vsel %vm4598_vm1, %v19575_v45, %v8506_v18  ;;  %v19576_v39 = vcombine.high %v19574_v32, %v19574_v32  ;;  %v7822_v57 = vcombine.high %v7814_v5, %v7814_v5  ;;  %v7830_v21 = vrot.slane %v7814_v5, %v19003_v33 }
 0x400   : > { %v9732_v25 = vcombine.low %v9041_v12, %v9042_v23  ;;  %v9739_v20 = vrot.slane %v9731_v46, %v14066_v60  ;;  %v9756_v18 = vrot.slane %v9748_v49, %v14066_v60  ;;  %v7823_v0 = vcombine.high %v7821_v2, %v7821_v2 }
 0x401   : > { %v9045_v35 = vsel %vm4598_vm1, %v19576_v39, %v8522_v50  ;;  %v7837_v7 = vrot.slane %v7821_v2, %v19003_v33  ;;  %v7844_v10 = vrot.slane %v7822_v57, %v19003_v33  ;;  %v7852_v50 = vcombine.high %v7830_v21, %v7830_v21  ;;  %v19577_v57 = vld [vmem:[#allocation87_spill] sm:$0xff] }
 0x402   : > { %v9749_v22 = vcombine.low %v9045_v35, %v17124_v3  ;;  %v9746_v36 = vrot.slane %v9732_v25, %v14066_v60  ;;  %v7851_v5 = vrot.slane %v7823_v0, %v19003_v33  ;;  %v6483_v32 = vmul.f32 %v17161_v41, %v6425_v27 }
 0x403   : > { %v6486_v3 = vmul.f32 %v17161_v41, %v6437_v30  ;;  %v7853_v55 = vcombine.high %v7837_v7, %v7837_v7  ;;  %v7854_v45 = vcombine.high %v7844_v10, %v7844_v10  ;;  %v8562_v12 = vrot.slane %v7844_v10, %v13869_v62 }
 0x404   : > { %v9763_v23 = vrot.slane %v9749_v22, %v14066_v60  ;;  %v9747_v56 = vcombine.low %v9739_v20, %v9746_v36  ;;  %v7855_v49 = vcombine.high %v7851_v5, %v7851_v5  ;;  %v8566_v2 = vrot.slane %v7852_v50, %v13869_v62  ;;  %v19578_v20 = vld [vmem:[#allocation141_spill] sm:$0xff]  ;;  %v19581_v50 = vld [vmem:[#allocation26_spill] sm:$0xff] }
 0x405   : > { %v8574_v39 = vrot.slane %v7837_v7, %v13869_v62  ;;  %v8570_v35 = vrot.slane %v7854_v45, %v13869_v62  ;;  %v8578_v25 = vrot.slane %v7851_v5, %v13869_v62  ;;  %v8582_v27 = vrot.slane %v7853_v55, %v13869_v62  ;;  %v19582_v5 = vld [vmem:[#allocation50_spill] sm:$0xff] }
 0x406   : > { %v9764_v46 = vcombine.low %v9756_v18, %v9763_v23  ;;  %10564 = vst.msk [vmem:[%s14466_s28 + $0xa0] sm:$0xff] %vm10543_vm2, %v9747_v56  ;;  %v9055_v21 = vsel %vm4598_vm1, %v19577_v57, %v8562_v12  ;;  %v8586_v30 = vrot.slane %v7855_v49, %v13869_v62  ;;  %v9056_v22 = vsel %vm4598_vm1, %v19578_v20, %v8566_v2  ;;  %v19584_v2 = vld [vmem:[#allocation81_spill] sm:$0xff] }
 0x407   : > { %v19579_v18 = vcombine.high %v19578_v20, %v19578_v20  ;;  %v6507_v36 = vadd.f32 %v6483_v32, %v17342_v26  ;;  %v19580_v7 = vcombine.high %v19577_v57, %v19577_v57  ;;  %v9059_v23 = vsel %vm4598_vm1, %v19581_v50, %v8578_v25  ;;  %v17545_v20 = vpop.permute.xlu1 %6448 }
 0x408   : > { %10565 = vst.msk [vmem:[%s14466_s28 + $0xa8] sm:$0xff] %vm10543_vm2, %v9764_v46  ;;  %v9060_v56 = vsel %vm4598_vm1, %v19582_v5, %v8582_v27  ;;  %v9867_v55 = vcombine.low %v9055_v21, %v9056_v22  ;;  %v19583_v45 = vcombine.high %v19581_v50, %v19581_v50  ;;  %v6510_v25 = vadd.f32 %v6486_v3, %v17152_v63  ;;  %v19586_v22 = vld [vmem:[#allocation120_spill] sm:$0xff] }
 0x409   : > { %v9058_v0 = vsel %vm4598_vm1, %v19579_v18, %v8574_v39  ;;  %v9057_v10 = vsel %vm4598_vm1, %v19580_v7, %v8570_v35  ;;  %v9884_v49 = vcombine.low %v9059_v23, %v9060_v56  ;;  %v7919_v26 = vcombine.high %v6507_v36, %v6507_v36 }
 0x40a   : > { %v9061_v12 = vsel %vm4598_vm1, %v19583_v45, %v8586_v30  ;;  %v9868_v46 = vcombine.low %v9057_v10, %v9058_v0  ;;  %v9875_v32 = vrot.slane %v9867_v55, %v14066_v60  ;;  %v7926_v35 = vrot.slane %v6507_v36, %v19003_v33  ;;  %v19585_v30 = vld [vmem:[#allocation78_spill] sm:$0xff] }
 0x40b   : > { %v9885_v39 = vcombine.low %v9061_v12, %v19584_v2  ;;  %v9892_v27 = vrot.slane %v9884_v49, %v14066_v60  ;;  %v7933_v21 = vrot.slane %v7919_v26, %v19003_v33  ;;  %v17549_v18 = vadd.f32 %v19586_v22, %v19585_v30 }
 0x40c   : > { %v9882_v57 = vrot.slane %v9868_v46, %v14066_v60  ;;  %v7934_v7 = vcombine.high %v7926_v35, %v7926_v35  ;;  %v7942_v36 = vrot.slane %v7926_v35, %v19003_v33  ;;  %v8031_v63 = vcombine.high %v6510_v25, %v6510_v25 }
 0x40d   : > { %v9899_v0 = vrot.slane %v9885_v39, %v14066_v60  ;;  %v7935_v10 = vcombine.high %v7933_v21, %v7933_v21  ;;  %v7949_v50 = vrot.slane %v7933_v21, %v19003_v33  ;;  %v8038_v23 = vrot.slane %v6510_v25, %v19003_v33  ;;  %v19587_v21 = vld [vmem:[#allocation118_spill] sm:$0xff] }
 0x40e   : > { %v9883_v3 = vcombine.low %v9875_v32, %v9882_v57  ;;  %v7956_v56 = vrot.slane %v7934_v7, %v19003_v33  ;;  %v7964_v55 = vcombine.high %v7942_v36, %v7942_v36  ;;  %v8045_v45 = vrot.slane %v8031_v63, %v19003_v33  ;;  %v19589_v36 = vld [vmem:[#allocation16_spill] sm:$0xff] }
 0x40f   : > { %v9900_v5 = vcombine.low %v9892_v27, %v9899_v0  ;;  %v7963_v12 = vrot.slane %v7935_v10, %v19003_v33  ;;  %v7965_v46 = vcombine.high %v7949_v50, %v7949_v50  ;;  %v8638_v49 = vrot.slane %v7949_v50, %v13869_v62  ;;  %v6461_v0 = vpop.permute.xlu1 %6460 }
 0x410   : > { %10572 = vst.msk [vmem:[%s14466_s28 + $0xe0] sm:$0xff] %vm10543_vm2, %v9883_v3  ;;  %v8046_v26 = vcombine.high %v8038_v23, %v8038_v23  ;;  %v7966_v32 = vcombine.high %v7956_v56, %v7956_v56  ;;  %v8626_v2 = vrot.slane %v7956_v56, %v13869_v62  ;;  %v8630_v39 = vrot.slane %v7964_v55, %v13869_v62 }
 0x411   : > { %10573 = vst.msk [vmem:[%s14466_s28 + $0xe8] sm:$0xff] %vm10543_vm2, %v9900_v5  ;;  %v8047_v35 = vcombine.high %v8045_v45, %v8045_v45  ;;  %v7967_v25 = vcombine.high %v7963_v12, %v7963_v12  ;;  %v8642_v57 = vrot.slane %v7963_v12, %v13869_v62  ;;  %v8646_v27 = vrot.slane %v7965_v46, %v13869_v62  ;;  %v19590_v5 = vld [vmem:[#allocation93_spill] sm:$0xff] }
 0x412   : > { %v19588_v30 = vcombine.high %v19587_v21, %v19587_v21  ;;  %v8634_v7 = vrot.slane %v7966_v32, %v13869_v62  ;;  %v9071_v63 = vsel %vm4598_vm1, %v19589_v36, %v8626_v2  ;;  %v9072_v3 = vsel %vm4598_vm1, %v19587_v21, %v8630_v39 }
 0x413   : > { %v8054_v10 = vrot.slane %v8038_v23, %v19003_v33  ;;  %v8650_v50 = vrot.slane %v7967_v25, %v13869_v62  ;;  %v9075_v56 = vsel %vm4598_vm1, %v19590_v5, %v8642_v57  ;;  %v9076_v55 = vsel %vm4598_vm1, %v19536_v6, %v8646_v27 }
 0x414   : > { %v9074_v22 = vsel %vm4598_vm1, %v19588_v30, %v8638_v49  ;;  %v10003_v12 = vcombine.low %v9071_v63, %v9072_v3  ;;  %v19591_v46 = vcombine.high %v19589_v36, %v19589_v36  ;;  %v10020_v32 = vcombine.low %v9075_v56, %v9076_v55 }
 0x415   : > { %v8061_v2 = vrot.slane %v8045_v45, %v19003_v33  ;;  %v8068_v39 = vrot.slane %v8046_v26, %v19003_v33  ;;  %v19592_v23 = vcombine.high %v19590_v5, %v19590_v5  ;;  %v8075_v6 = vrot.slane %v8047_v35, %v19003_v33  ;;  %v6385_v5 = vpop.permute.xlu1 %6384 }
 0x416   : > { %v9073_v49 = vsel %vm4598_vm1, %v19591_v46, %v8634_v7  ;;  %v10011_v21 = vrot.slane %v10003_v12, %v14066_v60  ;;  %v10028_v30 = vrot.slane %v10020_v32, %v14066_v60  ;;  %v8076_v7 = vcombine.high %v8054_v10, %v8054_v10 }
 0x417   : > { %v9077_v25 = vsel %vm4598_vm1, %v19592_v23, %v8650_v50  ;;  %v10004_v57 = vcombine.low %v9073_v49, %v9074_v22  ;;  %v8077_v36 = vcombine.high %v8061_v2, %v8061_v2  ;;  %v8078_v63 = vcombine.high %v8068_v39, %v8068_v39  ;;  %v19593_v49 = vld [vmem:[#allocation115_spill] sm:$0xff] }
 0x418   : > { %v10021_v27 = vcombine.low %v9077_v25, %v17256_v15  ;;  %v8079_v26 = vcombine.high %v8075_v6, %v8075_v6  ;;  %v8690_v3 = vrot.slane %v8068_v39, %v13869_v62  ;;  %v8694_v50 = vrot.slane %v8076_v7, %v13869_v62  ;;  %v19594_v39 = vld [vmem:[#allocation17_spill] sm:$0xff] }
 0x419   : > { %v10018_v45 = vrot.slane %v10004_v57, %v14066_v60  ;;  %v8702_v35 = vrot.slane %v8061_v2, %v13869_v62  ;;  %v8706_v15 = vrot.slane %v8075_v6, %v13869_v62  ;;  %v8698_v10 = vrot.slane %v8078_v63, %v13869_v62  ;;  %v19597_v6 = vld [vmem:[#allocation20_spill] sm:$0xff] }
 0x41a   : > { %v10035_v22 = vrot.slane %v10021_v27, %v14066_v60  ;;  %v8710_v55 = vrot.slane %v8077_v36, %v13869_v62  ;;  %v8714_v12 = vrot.slane %v8079_v26, %v13869_v62  ;;  %v9087_v32 = vsel %vm4598_vm1, %v19593_v49, %v8690_v3 }
 0x41b   : > { %v10019_v56 = vcombine.low %v10011_v21, %v10018_v45  ;;  %v9088_v23 = vsel %vm4598_vm1, %v19594_v39, %v8694_v50  ;;  %v19595_v25 = vcombine.high %v19594_v39, %v19594_v39  ;;  %v19596_v57 = vcombine.high %v19593_v49, %v19593_v49 }
 0x41c   : > { %v10036_v46 = vcombine.low %v10028_v30, %v10035_v22  ;;  %v9091_v27 = vsel %vm4598_vm1, %v19597_v6, %v8706_v15  ;;  %v19598_v30 = vld [vmem:[#allocation164_spill] sm:$0xff]  ;;  %v19599_v36 = vcombine.high %v19597_v6, %v19597_v6  ;;  %v10139_v63 = vcombine.low %v9087_v32, %v9088_v23  ;;  %v19600_v22 = vld [vmem:[#allocation67_spill] sm:$0xff]  ;;  %v19606_v6 = vld [vmem:[#allocation58_spill] sm:$0xff] }
 0x41d   : > { %v9090_v2 = vsel %vm4598_vm1, %v19595_v25, %v8702_v35  ;;  %10580 = vst.msk [vmem:[%s14466_s28 + $0x120] sm:$0xff] %vm10543_vm2, %v10019_v56  ;;  %v9089_v21 = vsel %vm4598_vm1, %v19596_v57, %v8698_v10  ;;  %v9092_v7 = vsel %vm4598_vm1, %v19598_v30, %v8710_v55  ;;  %v6489_v35 = vmul.f32 %v17161_v41, %v17545_v20  ;;  %v19604_v23 = vld [vmem:[#allocation79_spill] sm:$0xff] }
 0x41e   : > { %v9093_v45 = vsel %vm4598_vm1, %v19599_v36, %v8714_v12  ;;  %10581 = vst.msk [vmem:[%s14466_s28 + $0x128] sm:$0xff] %vm10543_vm2, %v10036_v46  ;;  %v10140_v26 = vcombine.low %v9089_v21, %v9090_v2  ;;  %v10156_v3 = vcombine.low %v9091_v27, %v9092_v7  ;;  %v6492_v15 = vmul.f32 %v17161_v41, %v6461_v0  ;;  %v6409_v12 = vpop.permute.xlu1 %6408  ;;  %v19602_v0 = vld [vmem:[#allocation49_spill] sm:$0xff]  ;;  %v19605_v21 = vld [vmem:[#allocation18_spill] sm:$0xff] }
 0x41f   : > { %v10157_v50 = vcombine.low %v9093_v45, %v19600_v22  ;;  %v6473_v56 = vmul.f32 %v17161_v41, %v6385_v5  ;;  %v19601_v10 = vcombine.high %v19561_v59, %v19561_v59  ;;  %v10147_v46 = vrot.slane %v10139_v63, %v14066_v60 }
 0x420   : > { %v10154_v49 = vrot.slane %v10140_v26, %v14066_v60  ;;  %v10164_v32 = vrot.slane %v10156_v3, %v14066_v60  ;;  %v19603_v59 = vcombine.high %v19602_v0, %v19602_v0  ;;  %v6513_v5 = vadd.f32 %v6489_v35, %v17549_v18 }
 0x421   : > { %v17639_v55 = vsel %vm4598_vm1, %v19601_v10, %v17391_v43  ;;  %v10171_v20 = vrot.slane %v10157_v50, %v14066_v60  ;;  %v6516_v39 = vadd.f32 %v6492_v15, %v17203_v52  ;;  %v6497_v25 = vadd.f32 %v6473_v56, %v19604_v23 }
 0x422   : > { %v17652_v43 = vsel %vm4598_vm1, %v19603_v59, %v8782_v4  ;;  %v10155_v2 = vcombine.low %v10147_v46, %v10154_v49  ;;  %v6359_v27 = vadd.f32 %v19606_v6, %v19605_v21  ;;  %v6479_v30 = vmul.f32 %v17161_v41, %v6409_v12 }
 0x423   : > { %v10172_v57 = vcombine.low %v10164_v32, %v10171_v20  ;;  %v8143_v11 = vcombine.high %v6513_v5, %v6513_v5  ;;  %v8150_v7 = vrot.slane %v6513_v5, %v19003_v33  ;;  %v8255_v36 = vcombine.high %v6516_v39, %v6516_v39 }
 0x424   : > { %v8262_v4 = vrot.slane %v6516_v39, %v19003_v33  ;;  %v17666_v52 = vrot.slane %v8240_v24, %v13869_v62  ;;  %10588 = vst.msk [vmem:[%s14466_s28 + $0x160] sm:$0xff] %vm10543_vm2, %v10155_v2  ;;  %v7575_v18 = vrot.slane %v6497_v25, %v19003_v33  ;;  %v17673_v45 = vadd.f32 %v6479_v30, %v6359_v27 }
 0x425   : > { %10589 = vst.msk [vmem:[%s14466_s28 + $0x168] sm:$0xff] %vm10543_vm2, %v10172_v57  ;;  %v19607_v63 = vcombine.high %v16561_v38, %v16561_v38  ;;  %v8157_v3 = vrot.slane %v8143_v11, %v19003_v33  ;;  %v8158_v61 = vcombine.high %v8150_v7, %v8150_v7  ;;  %v8166_v24 = vrot.slane %v8150_v7, %v19003_v33  ;;  %v19608_v7 = vld [vmem:[#allocation88_spill] sm:$0xff] }
 0x426   : > { %v8269_v22 = vrot.slane %v8255_v36, %v19003_v33  ;;  %v8270_v50 = vcombine.high %v8262_v4, %v8262_v4  ;;  %v8278_v35 = vrot.slane %v8262_v4, %v19003_v33  ;;  %v17687_v15 = vrot.slane %v7575_v18, %v19003_v33  ;;  %v19609_v4 = vld [vmem:[#allocation145_spill] sm:$0xff] }
 0x427   : > { %v17680_v26 = vsel %vm4598_vm1, %v19607_v63, %v17118_v28  ;;  %v7799_v56 = vrot.slane %v17673_v45, %v19003_v33  ;;  %v8159_v38 = vcombine.high %v8157_v3, %v8157_v3  ;;  %v8173_v28 = vrot.slane %v8157_v3, %v19003_v33 }
 0x428   : > { %v8180_v10 = vrot.slane %v8158_v61, %v19003_v33  ;;  %v8188_v12 = vcombine.high %v8166_v24, %v8166_v24  ;;  %v8271_v46 = vcombine.high %v8269_v22, %v8269_v22  ;;  %v8285_v49 = vrot.slane %v8269_v22, %v19003_v33 }
 0x429   : > { %v8292_v32 = vrot.slane %v8270_v50, %v19003_v33  ;;  %v8300_v20 = vcombine.high %v8278_v35, %v8278_v35  ;;  %v8187_v59 = vrot.slane %v8159_v38, %v19003_v33  ;;  %v8189_v5 = vcombine.high %v8173_v28, %v8173_v28  ;;  %v19612_v50 = vld [vmem:[#allocation4_spill] sm:$0xff] }
 0x42a   : > { %v8190_v39 = vcombine.high %v8180_v10, %v8180_v10  ;;  %v8754_v23 = vrot.slane %v8180_v10, %v13869_v62  ;;  %v8758_v25 = vrot.slane %v8188_v12, %v13869_v62  ;;  %v8766_v2 = vrot.slane %v8173_v28, %v13869_v62 }
 0x42b   : > { %v8299_v57 = vrot.slane %v8271_v46, %v19003_v33  ;;  %v8301_v21 = vcombine.high %v8285_v49, %v8285_v49  ;;  %v8191_v6 = vcombine.high %v8187_v59, %v8187_v59  ;;  %v8770_v30 = vrot.slane %v8187_v59, %v13869_v62 }
 0x42c   : > { %v8762_v27 = vrot.slane %v8190_v39, %v13869_v62  ;;  %v8774_v11 = vrot.slane %v8189_v5, %v13869_v62  ;;  %v9103_v36 = vsel %vm4598_vm1, %v19608_v7, %v8754_v23  ;;  %v9104_v18 = vsel %vm4598_vm1, %v19609_v4, %v8758_v25 }
 0x42d   : > { %v19610_v45 = vcombine.high %v19609_v4, %v19609_v4  ;;  %v8302_v3 = vcombine.high %v8292_v32, %v8292_v32  ;;  %v8778_v61 = vrot.slane %v8191_v6, %v13869_v62  ;;  %v19611_v24 = vcombine.high %v19608_v7, %v19608_v7 }
 0x42e   : > { %v9107_v35 = vsel %vm4598_vm1, %v19612_v50, %v8770_v30  ;;  %v9108_v38 = vsel %vm4598_vm1, %v19602_v0, %v8774_v11  ;;  %v10275_v28 = vcombine.low %v9103_v36, %v9104_v18  ;;  %v8303_v46 = vcombine.high %v8299_v57, %v8299_v57  ;;  %v19614_v18 = vld [vmem:[#allocation124_spill] sm:$0xff] }
 0x42f   : > { %v9106_v63 = vsel %vm4598_vm1, %v19610_v45, %v8766_v2  ;;  %v9105_v22 = vsel %vm4598_vm1, %v19611_v24, %v8762_v27  ;;  %v10292_v12 = vcombine.low %v9107_v35, %v9108_v38  ;;  %v19613_v59 = vcombine.high %v19612_v50, %v19612_v50 }
 0x430   : > { %v10276_v10 = vcombine.low %v9105_v22, %v9106_v63  ;;  %v8818_v39 = vrot.slane %v8292_v32, %v13869_v62  ;;  %v8822_v23 = vrot.slane %v8300_v20, %v13869_v62  ;;  %v8826_v25 = vrot.slane %v8302_v3, %v13869_v62  ;;  %v6433_v20 = vpop.permute.xlu1 %6432 }
 0x431   : > { %v9109_v5 = vsel %vm4598_vm1, %v19613_v59, %v8778_v61  ;;  %v10283_v2 = vrot.slane %v10275_v28, %v14066_v60  ;;  %v10300_v27 = vrot.slane %v10292_v12, %v14066_v60  ;;  %v8830_v30 = vrot.slane %v8285_v49, %v13869_v62  ;;  %v19618_v61 = vld [vmem:[#allocation168_spill] sm:$0xff] }
 0x432   : > { %v10290_v6 = vrot.slane %v10276_v10, %v14066_v60  ;;  %v10293_v0 = vcombine.low %v9109_v5, %v17652_v43  ;;  %v8834_v11 = vrot.slane %v8299_v57, %v13869_v62  ;;  %v8838_v7 = vrot.slane %v8301_v21, %v13869_v62  ;;  %v19615_v43 = vld [vmem:[#allocation109_spill] sm:$0xff] }
 0x433   : > { %v8842_v32 = vrot.slane %v8303_v46, %v13869_v62  ;;  %v9119_v45 = vsel %vm4598_vm1, %v19614_v18, %v8818_v39  ;;  %v9120_v63 = vsel %vm4598_vm1, %v19615_v43, %v8822_v23  ;;  %v19616_v49 = vcombine.high %v19614_v18, %v19614_v18  ;;  %v19620_v23 = vld [vmem:[#allocation5_spill] sm:$0xff] }
 0x434   : > { %v10291_v36 = vcombine.low %v10283_v2, %v10290_v6  ;;  %v10307_v4 = vrot.slane %v10293_v0, %v14066_v60  ;;  %v19617_v21 = vcombine.high %v19615_v43, %v19615_v43  ;;  %v9123_v24 = vsel %vm4598_vm1, %v19618_v61, %v8834_v11  ;;  %v19626_v43 = vld [vmem:[#allocation158_spill] sm:$0xff] }
 0x435   : > { %v9121_v57 = vsel %vm4598_vm1, %v19616_v49, %v8826_v25  ;;  %v9124_v22 = vsel %vm4598_vm1, %v19506_v34, %v8838_v7  ;;  %v19619_v35 = vcombine.high %v19618_v61, %v19618_v61  ;;  %v10411_v28 = vcombine.low %v9119_v45, %v9120_v63  ;;  %v19621_v25 = vld [vmem:[#allocation96_spill] sm:$0xff] }
 0x436   : > { %v9122_v3 = vsel %vm4598_vm1, %v19617_v21, %v8830_v30  ;;  %v10308_v50 = vcombine.low %v10300_v27, %v10307_v4  ;;  %10596 = vst.msk [vmem:[%s14466_s28 + $0x1a0] sm:$0xff] %vm10543_vm2, %v10291_v36  ;;  %v10428_v12 = vcombine.low %v9123_v24, %v9124_v22  ;;  %v8430_v59 = vrot.slane %v17687_v15, %v13869_v62  ;;  %v6457_v30 = vpop.permute.xlu1 %6456 }
 0x437   : > { %v9125_v38 = vsel %vm4598_vm1, %v19619_v35, %v8842_v32  ;;  %v10412_v10 = vcombine.low %v9121_v57, %v9122_v3  ;;  %v7806_v5 = vrot.slane %v7799_v56, %v19003_v33  ;;  %v10419_v34 = vrot.slane %v10411_v28, %v14066_v60 }
 0x438   : > { %v10429_v46 = vcombine.low %v9125_v38, %v17056_v47  ;;  %10597 = vst.msk [vmem:[%s14466_s28 + $0x1a8] sm:$0xff] %vm10543_vm2, %v10308_v50  ;;  %v6365_v2 = vadd.f32 %v19621_v25, %v19620_v23  ;;  %v6485_v6 = vmul.f32 %v17161_v41, %v6433_v20  ;;  %v10436_v0 = vrot.slane %v10428_v12, %v14066_v60 }
 0x439   : > { %v10426_v39 = vrot.slane %v10412_v10, %v14066_v60  ;;  %v19622_v15 = vcombine.high %v19562_v48, %v19562_v48  ;;  %v8558_v27 = vrot.slane %v7806_v5, %v13869_v62  ;;  %v19623_v20 = vcombine.high %v19533_v31, %v19533_v31 }
 0x43a   : > { %v10443_v47 = vrot.slane %v10429_v46, %v14066_v60  ;;  %v6509_v32 = vadd.f32 %v6485_v6, %v6365_v2  ;;  %v9518_v48 = vrot.slane %v9510_v19, %v14066_v60  ;;  %v19624_v18 = vcombine.high %v16580_v14, %v16580_v14 }
 0x43b   : > { %v9022_v56 = vsel %vm4598_vm1, %v19622_v15, %v8430_v59  ;;  %v10427_v11 = vcombine.low %v10419_v34, %v10426_v39  ;;  %v9085_v36 = vsel %vm4598_vm1, %v19623_v20, %v17261_v40  ;;  %v6491_v54 = vmul.f32 %v17161_v41, %v6457_v30 }
 0x43c   : > { %v9511_v7 = vcombine.low %v17639_v55, %v9022_v56  ;;  %v10444_v4 = vcombine.low %v10436_v0, %v10443_v47  ;;  %v9054_v45 = vsel %vm4598_vm1, %v19624_v18, %v8558_v27  ;;  %v19625_v55 = vld [vmem:[#allocation36_spill] sm:$0xff]  ;;  %v8023_v49 = vrot.slane %v6509_v32, %v19003_v33 }
 0x43d   : > { %v6371_v63 = vadd.f32 %v19626_v43, %v19625_v55  ;;  %10604 = vst.msk [vmem:[%s14466_s28 + $0x1e0] sm:$0xff] %vm10543_vm2, %v10427_v11  ;;  %v9783_v40 = vcombine.low %v17680_v26, %v9054_v45  ;;  %v9790_v14 = vrot.slane %v9782_v44, %v14066_v60  ;;  %v9117_v19 = vsel %vm4598_vm1, %v19627_v53, %v17666_v52 }
 0x43e   : > { %v9525_v31 = vrot.slane %v9511_v7, %v14066_v60  ;;  %10605 = vst.msk [vmem:[%s14466_s28 + $0x1e8] sm:$0xff] %vm10543_vm2, %v10444_v4  ;;  %v8030_v21 = vrot.slane %v8023_v49, %v19003_v33  ;;  %v7024_v41 = vcombine.high %v19534_v8, %v19534_v8  ;;  %v7220_v24 = vcombine.high %v19542_v9, %v19542_v9 }
 0x43f   : > { %v9797_v26 = vrot.slane %v9783_v40, %v14066_v60  ;;  %v6515_v3 = vadd.f32 %v6491_v54, %v6371_v63  ;;  %v10062_v22 = vrot.slane %v10054_v17, %v14066_v60 }
 0x440   : > { %v9526_v57 = vcombine.low %v9518_v48, %v9525_v31  ;;  %v8686_v13 = vrot.slane %v8030_v21, %v13869_v62 }
 0x441   : > { %v9798_v42 = vcombine.low %v9790_v14, %v9797_v26  ;;  %v8247_v44 = vrot.slane %v6515_v3, %v19003_v33 }
 0x442   : > { %10551 = vst.msk [vmem:[%s14466_s28 + $0x38] sm:$0xff] %vm10543_vm2, %v9526_v57  ;;  %v9086_v29 = vsel %vm4598_vm1, %v7024_v41, %v8686_v13 }
 0x443   : > { %10567 = vst.msk [vmem:[%s14466_s28 + $0xb8] sm:$0xff] %vm10543_vm2, %v9798_v42  ;;  %v8254_v52 = vrot.slane %v8247_v44, %v19003_v33  ;;  %v10055_v61 = vcombine.low %v9085_v36, %v9086_v29  ;;  %v10334_v33 = vrot.slane %v10326_v1, %v14066_v60 }
 0x445   : > { %v8814_v8 = vrot.slane %v8254_v52, %v13869_v62  ;;  %v10069_v50 = vrot.slane %v10055_v61, %v14066_v60 }
 0x447   : > { %v9118_v35 = vsel %vm4598_vm1, %v7220_v24, %v8814_v8  ;;  %v10070_v38 = vcombine.low %v10062_v22, %v10069_v50 }
 0x448   : > { %v10327_v28 = vcombine.low %v9117_v19, %v9118_v35 }
 0x449   : > { %10583 = vst.msk [vmem:[%s14466_s28 + $0x138] sm:$0xff] %vm10543_vm2, %v10070_v38 }
 0x44a   : > { %v10341_v62 = vrot.slane %v10327_v28, %v14066_v60 }
 0x44c   : > { %v10342_v9 = vcombine.low %v10334_v33, %v10341_v62 }
 0x44e   : > { %10599 = vst.msk [vmem:[%s14466_s28 + $0x1b8] sm:$0xff] %vm10543_vm2, %v10342_v9 }
 0x44f PF: > { %s15_s22 = sadd.s32 1, %s10916_s22   ;;  %s19628_s18 = smov %s10908_s20 }
 0x450   : > { %p12_p7 = scmp.ge.s32.totalorder %s15_s22, 6   ;;  %s19629_s19 = smov %s10912_s21 }
 0x451   : > { %s19630_s20 = smov %s19633_s23  ;;  %s19631_s21 = smov %s19637_s24 }
 0x452   :  { %14 = sbr.rel (!%p12_p7) target bundleno = 3 (0x3), region = 71 }

</bundles_post_ra>
